<compile_context>
chip_gen: v7x
topology: tpu7x:2x2x1
jax: 0.10.0
libtpu: 0.0.40
codegen_flags: <defaults>
</compile_context>

<pallas_src>
import functools

import jax
import jax.numpy as jnp
import numpy as np
from jax import lax
from jax.experimental import pallas as pl
from jax.experimental.pallas import tpu as pltpu


# ----------------------------------------------------------------------------
# Fused C2 kernel (one image per grid step).
# ----------------------------------------------------------------------------
def _c2_kernel(*refs, H, W, c_in, c_hid, c_out, n, shortcut):
    """refs layout:
      inputs : x(1,c_in,H*W) f32 | cv1: w(c_in,2c) bf16, s(1,2c), b(1,2c) f32
               per bottleneck conv (2n of them): w(9c,c) bf16, s(1,c), b(1,c)
               cv2 split: wa(c,c_out) bf16, wb(c,c_out) bf16, s(1,c_out), b(1,c_out)
      outputs: o(1,c_out,H*W) f32
      scratch: pad(H+2,W+2,c) f32, col(H*W,9c) f32
    """
    it = iter(refs)
    x_ref = next(it)
    w1_ref, s1_ref, b1_ref = next(it), next(it), next(it)
    m_refs = [[(next(it), next(it), next(it)) for _ in range(2)]
              for _ in range(n)]
    wa_ref, wb_ref, s2_ref, b2_ref = next(it), next(it), next(it), next(it)
    o_ref = next(it)
    pad_ref = next(it)
    col_ref = next(it)

    def silu(y):
        # y * sigmoid(y); reciprocal runs on the EUP slot.
        return y * pl.reciprocal(1.0 + jnp.exp(-y), approx=True)

    def conv1x1(v, w_r, s_r, b_r):
        # v: (H*W, Cin) f32 -> (H*W, Cout) f32 ; bf16 MXU, f32 accumulate.
        y = jnp.dot(v.astype(jnp.bfloat16), w_r[...],
                    preferred_element_type=jnp.float32)
        return silu(y * s_r[...] + b_r[...])

    def conv3x3(v, w_r, s_r, b_r):
        # v: (H*W, c_hid) f32 -> (H*W, c_hid) f32, "same" pad, stride 1.
        # Overwrite only the interior of pad_ref: the border stays zero (halo).
        pad_ref[1:H + 1, 1:W + 1, :] = v.reshape(H, W, c_hid)
        xp = pad_ref[...]                                  # (H+2, W+2, c_hid)
        k = 0
        for dy in range(3):                                # im2col: 9 taps
            for dx in range(3):
                col_ref[:, k * c_hid:(k + 1) * c_hid] = (
                    xp[dy:dy + H, dx:dx + W, :].reshape(H * W, c_hid))
                k += 1
        y = jnp.dot(col_ref[...].astype(jnp.bfloat16), w_r[...],
                    preferred_element_type=jnp.float32)    # single K=9c matmul
        return silu(y * s_r[...] + b_r[...])

    # Zero the padded scratch once per image; only the interior is rewritten.
    pad_ref[...] = jnp.zeros_like(pad_ref)

    # cv1 (1x1): NCHW tile -> rows-by-channels.
    x_t = x_ref[0].T                                       # (H*W, c_in)
    y = conv1x1(x_t, w1_ref, s1_ref, b1_ref)               # (H*W, 2*c_hid)
    a = y[:, :c_hid]                                       # chunk(2, channels)
    b = y[:, c_hid:]

    for conv_a, conv_b in m_refs:                          # Bottleneck chain
        h = conv3x3(a, *conv_a)
        a2 = conv3x3(h, *conv_b)
        a = a + a2 if shortcut else a2

    # cv2 (1x1) over concat((m(a), b)) without materializing the concat.
    out = jnp.dot(a.astype(jnp.bfloat16), wa_ref[...],
                  preferred_element_type=jnp.float32)
    out = out + jnp.dot(b.astype(jnp.bfloat16), wb_ref[...],
                        preferred_element_type=jnp.float32)
    out = silu(out * s2_ref[...] + b2_ref[...])            # (H*W, c_out)

    o_ref[0] = out.T.astype(o_ref.dtype)                   # lane-dense store


def c2_forward(x_nchw, p, shortcut=True):
    """x_nchw: (N, C1, H, W) f32 -> (N, C2, H, W) f32."""
    N, c_in, H, W = x_nchw.shape
    c = p["c"]
    c_out = p["cv2"]["w"].shape[-1]
    n = len(p["m"])

    # Flattened-NCHW HBM layout so both DMAs are lane-dense (last dim = H*W).
    x_flat = x_nchw.reshape(N, c_in, H * W)

    def bf16(w):
        return w.astype(jnp.bfloat16)

    args = [x_flat,
            bf16(p["cv1"]["w"].reshape(c_in, 2 * c)),
            p["cv1"]["scale"].reshape(1, 2 * c),
            p["cv1"]["bias"].reshape(1, 2 * c)]
    for conv_a, conv_b in p["m"]:
        for cc in (conv_a, conv_b):
            args += [bf16(cc["w"].reshape(9 * c, c)),
                     cc["scale"].reshape(1, c),
                     cc["bias"].reshape(1, c)]
    w2 = bf16(p["cv2"]["w"].reshape(2 * c, c_out))
    args += [w2[:c], w2[c:],                               # split cv2 weight
             p["cv2"]["scale"].reshape(1, c_out),
             p["cv2"]["bias"].reshape(1, c_out)]

    def full_spec(a):
        zeros = (0,) * a.ndim
        return pl.BlockSpec(a.shape, lambda nb: zeros)     # replicated weights

    in_specs = [pl.BlockSpec((1, c_in, H * W), lambda nb: (nb, 0, 0))]
    in_specs += [full_spec(a) for a in args[1:]]

    kernel = functools.partial(_c2_kernel, H=H, W=W, c_in=c_in, c_hid=c,
                               c_out=c_out, n=n, shortcut=shortcut)

    out_flat = pl.pallas_call(
        kernel,
        out_shape=jax.ShapeDtypeStruct((N, c_out, H * W), x_nchw.dtype),
        grid=(N,),
        in_specs=in_specs,
        out_specs=pl.BlockSpec((1, c_out, H * W), lambda nb: (nb, 0, 0)),
        scratch_shapes=[pltpu.VMEM((H + 2, W + 2, c), jnp.float32),   # halo pad
                        pltpu.VMEM((H * W, 9 * c), jnp.float32)],     # im2col
        compiler_params=pltpu.CompilerParams(
            dimension_semantics=("parallel",),
            vmem_limit_bytes=32 * 1024 * 1024),
    )(*args)
    # TODO(synk): for feature maps too large for one image's activations to fit
    # in VMEM, add an H-row grid axis carrying 2*n halo rows per tile.
    return out_flat.reshape(N, c_out, H, W)


# ----------------------------------------------------------------------------
# Deterministic parameter construction (Conv weight + folded BatchNorm).
# ----------------------------------------------------------------------------
def _fold_bn(gamma, beta, mean, var, eps=1e-3):
    scale = gamma / jnp.sqrt(var + eps)
    bias = beta - mean * scale
    return scale, bias


def _init_conv_params(key, kh, kw, cin, cout):
    kw_, kg, kb, km, kv = jax.random.split(key, 5)
    fan_in = cin * kh * kw
    bound = 1.0 / np.sqrt(fan_in)
    w = jax.random.uniform(kw_, (kh, kw, cin, cout), jnp.float32, -bound, bound)
    gamma = jax.random.uniform(kg, (cout,), jnp.float32, 0.5, 1.5)
    beta = jax.random.uniform(kb, (cout,), jnp.float32, -0.5, 0.5)
    mean = jax.random.uniform(km, (cout,), jnp.float32, -0.5, 0.5)
    var = jax.random.uniform(kv, (cout,), jnp.float32, 0.5, 1.5)
    scale, bias = _fold_bn(gamma, beta, mean, var)
    return dict(w=w, scale=scale, bias=bias)


def init_c2_params(key, c1, c2, n=1, e=0.5):
    c = int(c2 * e)
    keys = jax.random.split(key, 2 + 2 * n)
    return {
        "c": c,
        "cv1": _init_conv_params(keys[0], 1, 1, c1, 2 * c),
        "cv2": _init_conv_params(keys[1], 1, 1, 2 * c, c2),
        "m": [(_init_conv_params(keys[2 + 2 * i], 3, 3, c, c),
               _init_conv_params(keys[3 + 2 * i], 3, 3, c, c))
              for i in range(n)],
    }


# ----------------------------------------------------------------------------
# Pure-JAX references (lax.conv) for verification.
# ----------------------------------------------------------------------------
def _ref_conv(x, w, scale, bias, residual=None, matmul_dtype=None):
    pad = (w.shape[0] - 1) // 2
    xin, win = x, w
    precision = lax.Precision.HIGHEST
    if matmul_dtype is not None:
        xin, win = x.astype(matmul_dtype), w.astype(matmul_dtype)
        precision = None
    y = lax.conv_general_dilated(
        xin, win, (1, 1), ((pad, pad), (pad, pad)),
        dimension_numbers=("NHWC", "HWIO", "NHWC"),
        preferred_element_type=jnp.float32, precision=precision)
    y = y * scale.reshape(1, 1, 1, -1) + bias.reshape(1, 1, 1, -1)
    y = y * jax.nn.sigmoid(y)
    if residual is not None:
        y = y + residual
    return y


def c2_forward_ref(x_nchw, p, shortcut=True, matmul_dtype=None):
    x = jnp.transpose(x_nchw, (0, 2, 3, 1))
    c = p["c"]
    conv = functools.partial(_ref_conv, matmul_dtype=matmul_dtype)
    y = conv(x, p["cv1"]["w"], p["cv1"]["scale"], p["cv1"]["bias"])
    a, b = y[..., :c], y[..., c:]
    for conv_a, conv_b in p["m"]:
        h = conv(a, conv_a["w"], conv_a["scale"], conv_a["bias"])
        a = conv(h, conv_b["w"], conv_b["scale"], conv_b["bias"],
                 residual=a if shortcut else None)
    cat = jnp.concatenate([a, b], axis=-1)
    out = conv(cat, p["cv2"]["w"], p["cv2"]["scale"], p["cv2"]["bias"])
    return jnp.transpose(out, (0, 3, 1, 2))


if __name__ == "__main__":
    key = jax.random.PRNGKey(0)

    def damped_rel_err(a, b):
        return float(jnp.max(jnp.abs(a - b) / (jnp.abs(b) + 1.0)))

    configs = [
        (8, 8, 1),        # toy config matching the module's small usage
        (128, 128, 2),    # lane/MXU-friendly config (channels multiple of 128)
    ]
    for (c1, c2, n) in configs:
        key, kx, kp = jax.random.split(key, 3)
        x = jax.random.normal(kx, (2, c1, 16, 16), jnp.float32)   # NCHW input
        params = init_c2_params(kp, c1, c2, n=n, e=0.5)

        out = jax.block_until_ready(c2_forward(x, params, shortcut=True))
        assert out.shape == (2, c2, 16, 16)

        # Structural check: reference with the same bf16-matmul numerics.
        ref_bf16 = c2_forward_ref(x, params, shortcut=True,
                                  matmul_dtype=jnp.bfloat16)
        # Precision sanity check: full-f32 reference.
        ref_f32 = c2_forward_ref(x, params, shortcut=True)

        err_m = damped_rel_err(out, ref_bf16)
        err_f = damped_rel_err(out, ref_f32)
        assert err_m < 3e-2, f"c1={c1}: mismatch vs bf16-matched ref: {err_m}"
        assert err_f < 8e-2, f"c1={c1}: mismatch vs f32 ref: {err_f}"

    print("KERNEL_OK")
</pallas_src>

<mosaic_0001>
module attributes {stable_mosaic.version = 11 : i64} {
  func.func @_c2_kernel(%arg0: i32, %arg1: memref<1x8x256xf32, #tpu.memory_space<vmem>>, %arg2: memref<8x8xbf16, #tpu.memory_space<vmem>>, %arg3: memref<1x8xf32, #tpu.memory_space<vmem>>, %arg4: memref<1x8xf32, #tpu.memory_space<vmem>>, %arg5: memref<36x4xbf16, #tpu.memory_space<vmem>>, %arg6: memref<1x4xf32, #tpu.memory_space<vmem>>, %arg7: memref<1x4xf32, #tpu.memory_space<vmem>>, %arg8: memref<36x4xbf16, #tpu.memory_space<vmem>>, %arg9: memref<1x4xf32, #tpu.memory_space<vmem>>, %arg10: memref<1x4xf32, #tpu.memory_space<vmem>>, %arg11: memref<4x8xbf16, #tpu.memory_space<vmem>>, %arg12: memref<4x8xbf16, #tpu.memory_space<vmem>>, %arg13: memref<1x8xf32, #tpu.memory_space<vmem>>, %arg14: memref<1x8xf32, #tpu.memory_space<vmem>>, %arg15: memref<1x8x256xf32, #tpu.memory_space<vmem>>, %arg16: memref<18x18x4xf32, #tpu.memory_space<vmem>>, %arg17: memref<256x36xf32, #tpu.memory_space<vmem>>) attributes {dimension_semantics = [#tpu.dimension_semantics<parallel>], iteration_bounds = array<i64: 2>, scalar_prefetch = 0 : i64, scratch_operands = 2 : i64, tpu.core_type = #tpu.core_type<tc>, window_params = [{transform_indices = @transform_0, window_bounds = array<i64: 1, 8, 256>}, {pipeline_mode = #tpu.pipeline_mode<synchronous>, transform_indices = @transform_1, window_bounds = array<i64: 8, 8>}, {pipeline_mode = #tpu.pipeline_mode<synchronous>, transform_indices = @transform_2, window_bounds = array<i64: 1, 8>}, {pipeline_mode = #tpu.pipeline_mode<synchronous>, transform_indices = @transform_3, window_bounds = array<i64: 1, 8>}, {pipeline_mode = #tpu.pipeline_mode<synchronous>, transform_indices = @transform_4, window_bounds = array<i64: 36, 4>}, {pipeline_mode = #tpu.pipeline_mode<synchronous>, transform_indices = @transform_5, window_bounds = array<i64: 1, 4>}, {pipeline_mode = #tpu.pipeline_mode<synchronous>, transform_indices = @transform_6, window_bounds = array<i64: 1, 4>}, {pipeline_mode = #tpu.pipeline_mode<synchronous>, transform_indices = @transform_7, window_bounds = array<i64: 36, 4>}, {pipeline_mode = #tpu.pipeline_mode<synchronous>, transform_indices = @transform_8, window_bounds = array<i64: 1, 4>}, {pipeline_mode = #tpu.pipeline_mode<synchronous>, transform_indices = @transform_9, window_bounds = array<i64: 1, 4>}, {pipeline_mode = #tpu.pipeline_mode<synchronous>, transform_indices = @transform_10, window_bounds = array<i64: 4, 8>}, {pipeline_mode = #tpu.pipeline_mode<synchronous>, transform_indices = @transform_11, window_bounds = array<i64: 4, 8>}, {pipeline_mode = #tpu.pipeline_mode<synchronous>, transform_indices = @transform_12, window_bounds = array<i64: 1, 8>}, {pipeline_mode = #tpu.pipeline_mode<synchronous>, transform_indices = @transform_13, window_bounds = array<i64: 1, 8>}, {transform_indices = @transform_14, window_bounds = array<i64: 1, 8, 256>}]} {
    %cst = arith.constant 0.000000e+00 : f32
    %0 = vector.broadcast %cst : f32 to vector<18x18x4xf32>
    %c0 = arith.constant 0 : index
    %c0_0 = arith.constant 0 : index
    %c0_1 = arith.constant 0 : index
    %1 = vector.load %arg16[%c0, %c0_0, %c0_1] : memref<18x18x4xf32, #tpu.memory_space<vmem>>, vector<18x18x4xf32>
    tpu.vector_store %arg16[%c0, %c0_0, %c0_1], %0 {strides = array<i32>} : memref<18x18x4xf32, #tpu.memory_space<vmem>>, vector<18x18x4xf32>,
    %c0_2 = arith.constant 0 : index
    %c0_3 = arith.constant 0 : index
    %c0_4 = arith.constant 0 : index
    %2 = vector.load %arg1[%c0_2, %c0_3, %c0_4] : memref<1x8x256xf32, #tpu.memory_space<vmem>>, vector<1x8x256xf32>
    %3 = vector.shape_cast %2 : vector<1x8x256xf32> to vector<8x256xf32>
    %4 = tpu.transpose %3, [1, 0] : vector<8x256xf32> -> vector<256x8xf32>
    %5 = arith.truncf %4 : vector<256x8xf32> to vector<256x8xbf16>
    %c0_5 = arith.constant 0 : index
    %c0_6 = arith.constant 0 : index
    %6 = vector.load %arg2[%c0_5, %c0_6] : memref<8x8xbf16, #tpu.memory_space<vmem>>, vector<8x8xbf16>
    %cst_7 = arith.constant dense<0.000000e+00> : vector<256x8xf32>
    %7 = tpu.matmul %5, %6, %cst_7 {dimension_numbers = #tpu.dot_dimension_numbers<[1], [0], [0], [1], [0, 0, 1, 1], [], []>} : vector<256x8xbf16>, vector<8x8xbf16>, vector<256x8xf32> -> vector<256x8xf32>
    %c0_8 = arith.constant 0 : index
    %c0_9 = arith.constant 0 : index
    %8 = vector.load %arg3[%c0_8, %c0_9] : memref<1x8xf32, #tpu.memory_space<vmem>>, vector<1x8xf32>
    %9 = vector.broadcast %8 : vector<1x8xf32> to vector<256x8xf32>
    %10 = arith.mulf %7, %9 : vector<256x8xf32>
    %c0_10 = arith.constant 0 : index
    %c0_11 = arith.constant 0 : index
    %11 = vector.load %arg4[%c0_10, %c0_11] : memref<1x8xf32, #tpu.memory_space<vmem>>, vector<1x8xf32>
    %12 = vector.broadcast %11 : vector<1x8xf32> to vector<256x8xf32>
    %13 = arith.addf %10, %12 : vector<256x8xf32>
    %cst_12 = arith.constant 0.000000e+00 : f32
    %14 = vector.broadcast %cst_12 : f32 to vector<256x8xf32>
    %15 = arith.subf %14, %13 : vector<256x8xf32>
    %16 = math.exp %15 : vector<256x8xf32>
    %cst_13 = arith.constant 1.000000e+00 : f32
    %17 = vector.broadcast %cst_13 : f32 to vector<256x8xf32>
    %18 = arith.addf %17, %16 : vector<256x8xf32>
    %19 = tpu.reciprocal %18 {approx = true} : vector<256x8xf32> -> vector<256x8xf32>
    %20 = arith.mulf %13, %19 : vector<256x8xf32>
    %21 = vector.extract_strided_slice %20 {offsets = [0, 0], sizes = [256, 4], strides = [1, 1]} : vector<256x8xf32> to vector<256x4xf32>
    %22 = vector.extract_strided_slice %20 {offsets = [0, 4], sizes = [256, 4], strides = [1, 1]} : vector<256x8xf32> to vector<256x4xf32>
    %23 = vector.shape_cast %21 : vector<256x4xf32> to vector<16x16x4xf32>
    %c1 = arith.constant 1 : index
    %c1_14 = arith.constant 1 : index
    %c0_15 = arith.constant 0 : index
    %24 = vector.load %arg16[%c1, %c1_14, %c0_15] : memref<18x18x4xf32, #tpu.memory_space<vmem>>, vector<16x16x4xf32>
    tpu.vector_store %arg16[%c1, %c1_14, %c0_15], %23 {strides = array<i32>} : memref<18x18x4xf32, #tpu.memory_space<vmem>>, vector<16x16x4xf32>,
    %c0_16 = arith.constant 0 : index
    %c0_17 = arith.constant 0 : index
    %c0_18 = arith.constant 0 : index
    %25 = vector.load %arg16[%c0_16, %c0_17, %c0_18] : memref<18x18x4xf32, #tpu.memory_space<vmem>>, vector<18x18x4xf32>
    %26 = vector.extract_strided_slice %25 {offsets = [0, 0, 0], sizes = [16, 16, 4], strides = [1, 1, 1]} : vector<18x18x4xf32> to vector<16x16x4xf32>
    %27 = vector.shape_cast %26 : vector<16x16x4xf32> to vector<256x4xf32>
    %c0_19 = arith.constant 0 : index
    %c0_20 = arith.constant 0 : index
    %28 = vector.load %arg17[%c0_19, %c0_20] : memref<256x36xf32, #tpu.memory_space<vmem>>, vector<256x4xf32>
    tpu.vector_store %arg17[%c0_19, %c0_20], %27 {strides = array<i32>} : memref<256x36xf32, #tpu.memory_space<vmem>>, vector<256x4xf32>,
    %29 = vector.extract_strided_slice %25 {offsets = [0, 1, 0], sizes = [16, 16, 4], strides = [1, 1, 1]} : vector<18x18x4xf32> to vector<16x16x4xf32>
    %30 = vector.shape_cast %29 : vector<16x16x4xf32> to vector<256x4xf32>
    %c0_21 = arith.constant 0 : index
    %c4 = arith.constant 4 : index
    %31 = vector.load %arg17[%c0_21, %c4] : memref<256x36xf32, #tpu.memory_space<vmem>>, vector<256x4xf32>
    tpu.vector_store %arg17[%c0_21, %c4], %30 {strides = array<i32>} : memref<256x36xf32, #tpu.memory_space<vmem>>, vector<256x4xf32>,
    %32 = vector.extract_strided_slice %25 {offsets = [0, 2, 0], sizes = [16, 16, 4], strides = [1, 1, 1]} : vector<18x18x4xf32> to vector<16x16x4xf32>
    %33 = vector.shape_cast %32 : vector<16x16x4xf32> to vector<256x4xf32>
    %c0_22 = arith.constant 0 : index
    %c8 = arith.constant 8 : index
    %34 = vector.load %arg17[%c0_22, %c8] : memref<256x36xf32, #tpu.memory_space<vmem>>, vector<256x4xf32>
    tpu.vector_store %arg17[%c0_22, %c8], %33 {strides = array<i32>} : memref<256x36xf32, #tpu.memory_space<vmem>>, vector<256x4xf32>,
    %35 = vector.extract_strided_slice %25 {offsets = [1, 0, 0], sizes = [16, 16, 4], strides = [1, 1, 1]} : vector<18x18x4xf32> to vector<16x16x4xf32>
    %36 = vector.shape_cast %35 : vector<16x16x4xf32> to vector<256x4xf32>
    %c0_23 = arith.constant 0 : index
    %c12 = arith.constant 12 : index
    %37 = vector.load %arg17[%c0_23, %c12] : memref<256x36xf32, #tpu.memory_space<vmem>>, vector<256x4xf32>
    tpu.vector_store %arg17[%c0_23, %c12], %36 {strides = array<i32>} : memref<256x36xf32, #tpu.memory_space<vmem>>, vector<256x4xf32>,
    %38 = vector.extract_strided_slice %25 {offsets = [1, 1, 0], sizes = [16, 16, 4], strides = [1, 1, 1]} : vector<18x18x4xf32> to vector<16x16x4xf32>
    %39 = vector.shape_cast %38 : vector<16x16x4xf32> to vector<256x4xf32>
    %c0_24 = arith.constant 0 : index
    %c16 = arith.constant 16 : index
    %40 = vector.load %arg17[%c0_24, %c16] : memref<256x36xf32, #tpu.memory_space<vmem>>, vector<256x4xf32>
    tpu.vector_store %arg17[%c0_24, %c16], %39 {strides = array<i32>} : memref<256x36xf32, #tpu.memory_space<vmem>>, vector<256x4xf32>,
    %41 = vector.extract_strided_slice %25 {offsets = [1, 2, 0], sizes = [16, 16, 4], strides = [1, 1, 1]} : vector<18x18x4xf32> to vector<16x16x4xf32>
    %42 = vector.shape_cast %41 : vector<16x16x4xf32> to vector<256x4xf32>
    %c0_25 = arith.constant 0 : index
    %c20 = arith.constant 20 : index
    %43 = vector.load %arg17[%c0_25, %c20] : memref<256x36xf32, #tpu.memory_space<vmem>>, vector<256x4xf32>
    tpu.vector_store %arg17[%c0_25, %c20], %42 {strides = array<i32>} : memref<256x36xf32, #tpu.memory_space<vmem>>, vector<256x4xf32>,
    %44 = vector.extract_strided_slice %25 {offsets = [2, 0, 0], sizes = [16, 16, 4], strides = [1, 1, 1]} : vector<18x18x4xf32> to vector<16x16x4xf32>
    %45 = vector.shape_cast %44 : vector<16x16x4xf32> to vector<256x4xf32>
    %c0_26 = arith.constant 0 : index
    %c24 = arith.constant 24 : index
    %46 = vector.load %arg17[%c0_26, %c24] : memref<256x36xf32, #tpu.memory_space<vmem>>, vector<256x4xf32>
    tpu.vector_store %arg17[%c0_26, %c24], %45 {strides = array<i32>} : memref<256x36xf32, #tpu.memory_space<vmem>>, vector<256x4xf32>,
    %47 = vector.extract_strided_slice %25 {offsets = [2, 1, 0], sizes = [16, 16, 4], strides = [1, 1, 1]} : vector<18x18x4xf32> to vector<16x16x4xf32>
    %48 = vector.shape_cast %47 : vector<16x16x4xf32> to vector<256x4xf32>
    %c0_27 = arith.constant 0 : index
    %c28 = arith.constant 28 : index
    %49 = vector.load %arg17[%c0_27, %c28] : memref<256x36xf32, #tpu.memory_space<vmem>>, vector<256x4xf32>
    tpu.vector_store %arg17[%c0_27, %c28], %48 {strides = array<i32>} : memref<256x36xf32, #tpu.memory_space<vmem>>, vector<256x4xf32>,
    %50 = vector.extract_strided_slice %25 {offsets = [2, 2, 0], sizes = [16, 16, 4], strides = [1, 1, 1]} : vector<18x18x4xf32> to vector<16x16x4xf32>
    %51 = vector.shape_cast %50 : vector<16x16x4xf32> to vector<256x4xf32>
    %c0_28 = arith.constant 0 : index
    %c32 = arith.constant 32 : index
    %52 = vector.load %arg17[%c0_28, %c32] : memref<256x36xf32, #tpu.memory_space<vmem>>, vector<256x4xf32>
    tpu.vector_store %arg17[%c0_28, %c32], %51 {strides = array<i32>} : memref<256x36xf32, #tpu.memory_space<vmem>>, vector<256x4xf32>,
    %c0_29 = arith.constant 0 : index
    %c0_30 = arith.constant 0 : index
    %53 = vector.load %arg17[%c0_29, %c0_30] : memref<256x36xf32, #tpu.memory_space<vmem>>, vector<256x36xf32>
    %54 = arith.truncf %53 : vector<256x36xf32> to vector<256x36xbf16>
    %c0_31 = arith.constant 0 : index
    %c0_32 = arith.constant 0 : index
    %55 = vector.load %arg5[%c0_31, %c0_32] : memref<36x4xbf16, #tpu.memory_space<vmem>>, vector<36x4xbf16>
    %cst_33 = arith.constant dense<0.000000e+00> : vector<256x4xf32>
    %56 = tpu.matmul %54, %55, %cst_33 {dimension_numbers = #tpu.dot_dimension_numbers<[1], [0], [0], [1], [0, 0, 1, 1], [], []>} : vector<256x36xbf16>, vector<36x4xbf16>, vector<256x4xf32> -> vector<256x4xf32>
    %c0_34 = arith.constant 0 : index
    %c0_35 = arith.constant 0 : index
    %57 = vector.load %arg6[%c0_34, %c0_35] : memref<1x4xf32, #tpu.memory_space<vmem>>, vector<1x4xf32>
    %58 = vector.broadcast %57 : vector<1x4xf32> to vector<256x4xf32>
    %59 = arith.mulf %56, %58 : vector<256x4xf32>
    %c0_36 = arith.constant 0 : index
    %c0_37 = arith.constant 0 : index
    %60 = vector.load %arg7[%c0_36, %c0_37] : memref<1x4xf32, #tpu.memory_space<vmem>>, vector<1x4xf32>
    %61 = vector.broadcast %60 : vector<1x4xf32> to vector<256x4xf32>
    %62 = arith.addf %59, %61 : vector<256x4xf32>
    %cst_38 = arith.constant 0.000000e+00 : f32
    %63 = vector.broadcast %cst_38 : f32 to vector<256x4xf32>
    %64 = arith.subf %63, %62 : vector<256x4xf32>
    %65 = math.exp %64 : vector<256x4xf32>
    %cst_39 = arith.constant 1.000000e+00 : f32
    %66 = vector.broadcast %cst_39 : f32 to vector<256x4xf32>
    %67 = arith.addf %66, %65 : vector<256x4xf32>
    %68 = tpu.reciprocal %67 {approx = true} : vector<256x4xf32> -> vector<256x4xf32>
    %69 = arith.mulf %62, %68 : vector<256x4xf32>
    %70 = vector.shape_cast %69 : vector<256x4xf32> to vector<16x16x4xf32>
    %c1_40 = arith.constant 1 : index
    %c1_41 = arith.constant 1 : index
    %c0_42 = arith.constant 0 : index
    %71 = vector.load %arg16[%c1_40, %c1_41, %c0_42] : memref<18x18x4xf32, #tpu.memory_space<vmem>>, vector<16x16x4xf32>
    tpu.vector_store %arg16[%c1_40, %c1_41, %c0_42], %70 {strides = array<i32>} : memref<18x18x4xf32, #tpu.memory_space<vmem>>, vector<16x16x4xf32>,
    %c0_43 = arith.constant 0 : index
    %c0_44 = arith.constant 0 : index
    %c0_45 = arith.constant 0 : index
    %72 = vector.load %arg16[%c0_43, %c0_44, %c0_45] : memref<18x18x4xf32, #tpu.memory_space<vmem>>, vector<18x18x4xf32>
    %73 = vector.extract_strided_slice %72 {offsets = [0, 0, 0], sizes = [16, 16, 4], strides = [1, 1, 1]} : vector<18x18x4xf32> to vector<16x16x4xf32>
    %74 = vector.shape_cast %73 : vector<16x16x4xf32> to vector<256x4xf32>
    %c0_46 = arith.constant 0 : index
    %c0_47 = arith.constant 0 : index
    %75 = vector.load %arg17[%c0_46, %c0_47] : memref<256x36xf32, #tpu.memory_space<vmem>>, vector<256x4xf32>
    tpu.vector_store %arg17[%c0_46, %c0_47], %74 {strides = array<i32>} : memref<256x36xf32, #tpu.memory_space<vmem>>, vector<256x4xf32>,
    %76 = vector.extract_strided_slice %72 {offsets = [0, 1, 0], sizes = [16, 16, 4], strides = [1, 1, 1]} : vector<18x18x4xf32> to vector<16x16x4xf32>
    %77 = vector.shape_cast %76 : vector<16x16x4xf32> to vector<256x4xf32>
    %c0_48 = arith.constant 0 : index
    %c4_49 = arith.constant 4 : index
    %78 = vector.load %arg17[%c0_48, %c4_49] : memref<256x36xf32, #tpu.memory_space<vmem>>, vector<256x4xf32>
    tpu.vector_store %arg17[%c0_48, %c4_49], %77 {strides = array<i32>} : memref<256x36xf32, #tpu.memory_space<vmem>>, vector<256x4xf32>,
    %79 = vector.extract_strided_slice %72 {offsets = [0, 2, 0], sizes = [16, 16, 4], strides = [1, 1, 1]} : vector<18x18x4xf32> to vector<16x16x4xf32>
    %80 = vector.shape_cast %79 : vector<16x16x4xf32> to vector<256x4xf32>
    %c0_50 = arith.constant 0 : index
    %c8_51 = arith.constant 8 : index
    %81 = vector.load %arg17[%c0_50, %c8_51] : memref<256x36xf32, #tpu.memory_space<vmem>>, vector<256x4xf32>
    tpu.vector_store %arg17[%c0_50, %c8_51], %80 {strides = array<i32>} : memref<256x36xf32, #tpu.memory_space<vmem>>, vector<256x4xf32>,
    %82 = vector.extract_strided_slice %72 {offsets = [1, 0, 0], sizes = [16, 16, 4], strides = [1, 1, 1]} : vector<18x18x4xf32> to vector<16x16x4xf32>
    %83 = vector.shape_cast %82 : vector<16x16x4xf32> to vector<256x4xf32>
    %c0_52 = arith.constant 0 : index
    %c12_53 = arith.constant 12 : index
    %84 = vector.load %arg17[%c0_52, %c12_53] : memref<256x36xf32, #tpu.memory_space<vmem>>, vector<256x4xf32>
    tpu.vector_store %arg17[%c0_52, %c12_53], %83 {strides = array<i32>} : memref<256x36xf32, #tpu.memory_space<vmem>>, vector<256x4xf32>,
    %85 = vector.extract_strided_slice %72 {offsets = [1, 1, 0], sizes = [16, 16, 4], strides = [1, 1, 1]} : vector<18x18x4xf32> to vector<16x16x4xf32>
    %86 = vector.shape_cast %85 : vector<16x16x4xf32> to vector<256x4xf32>
    %c0_54 = arith.constant 0 : index
    %c16_55 = arith.constant 16 : index
    %87 = vector.load %arg17[%c0_54, %c16_55] : memref<256x36xf32, #tpu.memory_space<vmem>>, vector<256x4xf32>
    tpu.vector_store %arg17[%c0_54, %c16_55], %86 {strides = array<i32>} : memref<256x36xf32, #tpu.memory_space<vmem>>, vector<256x4xf32>,
    %88 = vector.extract_strided_slice %72 {offsets = [1, 2, 0], sizes = [16, 16, 4], strides = [1, 1, 1]} : vector<18x18x4xf32> to vector<16x16x4xf32>
    %89 = vector.shape_cast %88 : vector<16x16x4xf32> to vector<256x4xf32>
    %c0_56 = arith.constant 0 : index
    %c20_57 = arith.constant 20 : index
    %90 = vector.load %arg17[%c0_56, %c20_57] : memref<256x36xf32, #tpu.memory_space<vmem>>, vector<256x4xf32>
    tpu.vector_store %arg17[%c0_56, %c20_57], %89 {strides = array<i32>} : memref<256x36xf32, #tpu.memory_space<vmem>>, vector<256x4xf32>,
    %91 = vector.extract_strided_slice %72 {offsets = [2, 0, 0], sizes = [16, 16, 4], strides = [1, 1, 1]} : vector<18x18x4xf32> to vector<16x16x4xf32>
    %92 = vector.shape_cast %91 : vector<16x16x4xf32> to vector<256x4xf32>
    %c0_58 = arith.constant 0 : index
    %c24_59 = arith.constant 24 : index
    %93 = vector.load %arg17[%c0_58, %c24_59] : memref<256x36xf32, #tpu.memory_space<vmem>>, vector<256x4xf32>
    tpu.vector_store %arg17[%c0_58, %c24_59], %92 {strides = array<i32>} : memref<256x36xf32, #tpu.memory_space<vmem>>, vector<256x4xf32>,
    %94 = vector.extract_strided_slice %72 {offsets = [2, 1, 0], sizes = [16, 16, 4], strides = [1, 1, 1]} : vector<18x18x4xf32> to vector<16x16x4xf32>
    %95 = vector.shape_cast %94 : vector<16x16x4xf32> to vector<256x4xf32>
    %c0_60 = arith.constant 0 : index
    %c28_61 = arith.constant 28 : index
    %96 = vector.load %arg17[%c0_60, %c28_61] : memref<256x36xf32, #tpu.memory_space<vmem>>, vector<256x4xf32>
    tpu.vector_store %arg17[%c0_60, %c28_61], %95 {strides = array<i32>} : memref<256x36xf32, #tpu.memory_space<vmem>>, vector<256x4xf32>,
    %97 = vector.extract_strided_slice %72 {offsets = [2, 2, 0], sizes = [16, 16, 4], strides = [1, 1, 1]} : vector<18x18x4xf32> to vector<16x16x4xf32>
    %98 = vector.shape_cast %97 : vector<16x16x4xf32> to vector<256x4xf32>
    %c0_62 = arith.constant 0 : index
    %c32_63 = arith.constant 32 : index
    %99 = vector.load %arg17[%c0_62, %c32_63] : memref<256x36xf32, #tpu.memory_space<vmem>>, vector<256x4xf32>
    tpu.vector_store %arg17[%c0_62, %c32_63], %98 {strides = array<i32>} : memref<256x36xf32, #tpu.memory_space<vmem>>, vector<256x4xf32>,
    %c0_64 = arith.constant 0 : index
    %c0_65 = arith.constant 0 : index
    %100 = vector.load %arg17[%c0_64, %c0_65] : memref<256x36xf32, #tpu.memory_space<vmem>>, vector<256x36xf32>
    %101 = arith.truncf %100 : vector<256x36xf32> to vector<256x36xbf16>
    %c0_66 = arith.constant 0 : index
    %c0_67 = arith.constant 0 : index
    %102 = vector.load %arg8[%c0_66, %c0_67] : memref<36x4xbf16, #tpu.memory_space<vmem>>, vector<36x4xbf16>
    %cst_68 = arith.constant dense<0.000000e+00> : vector<256x4xf32>
    %103 = tpu.matmul %101, %102, %cst_68 {dimension_numbers = #tpu.dot_dimension_numbers<[1], [0], [0], [1], [0, 0, 1, 1], [], []>} : vector<256x36xbf16>, vector<36x4xbf16>, vector<256x4xf32> -> vector<256x4xf32>
    %c0_69 = arith.constant 0 : index
    %c0_70 = arith.constant 0 : index
    %104 = vector.load %arg9[%c0_69, %c0_70] : memref<1x4xf32, #tpu.memory_space<vmem>>, vector<1x4xf32>
    %105 = vector.broadcast %104 : vector<1x4xf32> to vector<256x4xf32>
    %106 = arith.mulf %103, %105 : vector<256x4xf32>
    %c0_71 = arith.constant 0 : index
    %c0_72 = arith.constant 0 : index
    %107 = vector.load %arg10[%c0_71, %c0_72] : memref<1x4xf32, #tpu.memory_space<vmem>>, vector<1x4xf32>
    %108 = vector.broadcast %107 : vector<1x4xf32> to vector<256x4xf32>
    %109 = arith.addf %106, %108 : vector<256x4xf32>
    %cst_73 = arith.constant 0.000000e+00 : f32
    %110 = vector.broadcast %cst_73 : f32 to vector<256x4xf32>
    %111 = arith.subf %110, %109 : vector<256x4xf32>
    %112 = math.exp %111 : vector<256x4xf32>
    %cst_74 = arith.constant 1.000000e+00 : f32
    %113 = vector.broadcast %cst_74 : f32 to vector<256x4xf32>
    %114 = arith.addf %113, %112 : vector<256x4xf32>
    %115 = tpu.reciprocal %114 {approx = true} : vector<256x4xf32> -> vector<256x4xf32>
    %116 = arith.mulf %109, %115 : vector<256x4xf32>
    %117 = arith.addf %21, %116 : vector<256x4xf32>
    %118 = arith.truncf %117 : vector<256x4xf32> to vector<256x4xbf16>
    %c0_75 = arith.constant 0 : index
    %c0_76 = arith.constant 0 : index
    %119 = vector.load %arg11[%c0_75, %c0_76] : memref<4x8xbf16, #tpu.memory_space<vmem>>, vector<4x8xbf16>
    %cst_77 = arith.constant dense<0.000000e+00> : vector<256x8xf32>
    %120 = tpu.matmul %118, %119, %cst_77 {dimension_numbers = #tpu.dot_dimension_numbers<[1], [0], [0], [1], [0, 0, 1, 1], [], []>} : vector<256x4xbf16>, vector<4x8xbf16>, vector<256x8xf32> -> vector<256x8xf32>
    %121 = arith.truncf %22 : vector<256x4xf32> to vector<256x4xbf16>
    %c0_78 = arith.constant 0 : index
    %c0_79 = arith.constant 0 : index
    %122 = vector.load %arg12[%c0_78, %c0_79] : memref<4x8xbf16, #tpu.memory_space<vmem>>, vector<4x8xbf16>
    %cst_80 = arith.constant dense<0.000000e+00> : vector<256x8xf32>
    %123 = tpu.matmul %121, %122, %cst_80 {dimension_numbers = #tpu.dot_dimension_numbers<[1], [0], [0], [1], [0, 0, 1, 1], [], []>} : vector<256x4xbf16>, vector<4x8xbf16>, vector<256x8xf32> -> vector<256x8xf32>
    %124 = arith.addf %120, %123 : vector<256x8xf32>
    %c0_81 = arith.constant 0 : index
    %c0_82 = arith.constant 0 : index
    %125 = vector.load %arg13[%c0_81, %c0_82] : memref<1x8xf32, #tpu.memory_space<vmem>>, vector<1x8xf32>
    %126 = vector.broadcast %125 : vector<1x8xf32> to vector<256x8xf32>
    %127 = arith.mulf %124, %126 : vector<256x8xf32>
    %c0_83 = arith.constant 0 : index
    %c0_84 = arith.constant 0 : index
    %128 = vector.load %arg14[%c0_83, %c0_84] : memref<1x8xf32, #tpu.memory_space<vmem>>, vector<1x8xf32>
    %129 = vector.broadcast %128 : vector<1x8xf32> to vector<256x8xf32>
    %130 = arith.addf %127, %129 : vector<256x8xf32>
    %cst_85 = arith.constant 0.000000e+00 : f32
    %131 = vector.broadcast %cst_85 : f32 to vector<256x8xf32>
    %132 = arith.subf %131, %130 : vector<256x8xf32>
    %133 = math.exp %132 : vector<256x8xf32>
    %cst_86 = arith.constant 1.000000e+00 : f32
    %134 = vector.broadcast %cst_86 : f32 to vector<256x8xf32>
    %135 = arith.addf %134, %133 : vector<256x8xf32>
    %136 = tpu.reciprocal %135 {approx = true} : vector<256x8xf32> -> vector<256x8xf32>
    %137 = arith.mulf %130, %136 : vector<256x8xf32>
    %138 = tpu.transpose %137, [1, 0] : vector<256x8xf32> -> vector<8x256xf32>
    %c0_87 = arith.constant 0 : index
    %c0_88 = arith.constant 0 : index
    %c0_89 = arith.constant 0 : index
    %139 = vector.load %arg15[%c0_87, %c0_88, %c0_89] : memref<1x8x256xf32, #tpu.memory_space<vmem>>, vector<1x8x256xf32>
    %140 = vector.shape_cast %139 : vector<1x8x256xf32> to vector<8x256xf32>
    %141 = vector.shape_cast %138 : vector<8x256xf32> to vector<1x8x256xf32>
    tpu.vector_store %arg15[%c0_87, %c0_88, %c0_89], %141 {strides = array<i32>} : memref<1x8x256xf32, #tpu.memory_space<vmem>>, vector<1x8x256xf32>,
    return
  }
  func.func @transform_0(%arg0: i32) -> (i32, i32, i32) {
    %c0_i32 = arith.constant 0 : i32
    %c0_i32_0 = arith.constant 0 : i32
    %c0_i32_1 = arith.constant 0 : i32
    return %arg0, %c0_i32, %c0_i32_0 : i32, i32, i32
  }
  func.func @transform_1(%arg0: i32) -> (i32, i32) {
    %c0_i32 = arith.constant 0 : i32
    %c0_i32_0 = arith.constant 0 : i32
    %c0_i32_1 = arith.constant 0 : i32
    return %c0_i32, %c0_i32_0 : i32, i32
  }
  func.func @transform_2(%arg0: i32) -> (i32, i32) {
    %c0_i32 = arith.constant 0 : i32
    %c0_i32_0 = arith.constant 0 : i32
    %c0_i32_1 = arith.constant 0 : i32
    return %c0_i32, %c0_i32_0 : i32, i32
  }
  func.func @transform_3(%arg0: i32) -> (i32, i32) {
    %c0_i32 = arith.constant 0 : i32
    %c0_i32_0 = arith.constant 0 : i32
    %c0_i32_1 = arith.constant 0 : i32
    return %c0_i32, %c0_i32_0 : i32, i32
  }
  func.func @transform_4(%arg0: i32) -> (i32, i32) {
    %c0_i32 = arith.constant 0 : i32
    %c0_i32_0 = arith.constant 0 : i32
    %c0_i32_1 = arith.constant 0 : i32
    return %c0_i32, %c0_i32_0 : i32, i32
  }
  func.func @transform_5(%arg0: i32) -> (i32, i32) {
    %c0_i32 = arith.constant 0 : i32
    %c0_i32_0 = arith.constant 0 : i32
    %c0_i32_1 = arith.constant 0 : i32
    return %c0_i32, %c0_i32_0 : i32, i32
  }
  func.func @transform_6(%arg0: i32) -> (i32, i32) {
    %c0_i32 = arith.constant 0 : i32
    %c0_i32_0 = arith.constant 0 : i32
    %c0_i32_1 = arith.constant 0 : i32
    return %c0_i32, %c0_i32_0 : i32, i32
  }
  func.func @transform_7(%arg0: i32) -> (i32, i32) {
    %c0_i32 = arith.constant 0 : i32
    %c0_i32_0 = arith.constant 0 : i32
    %c0_i32_1 = arith.constant 0 : i32
    return %c0_i32, %c0_i32_0 : i32, i32
  }
  func.func @transform_8(%arg0: i32) -> (i32, i32) {
    %c0_i32 = arith.constant 0 : i32
    %c0_i32_0 = arith.constant 0 : i32
    %c0_i32_1 = arith.constant 0 : i32
    return %c0_i32, %c0_i32_0 : i32, i32
  }
  func.func @transform_9(%arg0: i32) -> (i32, i32) {
    %c0_i32 = arith.constant 0 : i32
    %c0_i32_0 = arith.constant 0 : i32
    %c0_i32_1 = arith.constant 0 : i32
    return %c0_i32, %c0_i32_0 : i32, i32
  }
  func.func @transform_10(%arg0: i32) -> (i32, i32) {
    %c0_i32 = arith.constant 0 : i32
    %c0_i32_0 = arith.constant 0 : i32
    %c0_i32_1 = arith.constant 0 : i32
    return %c0_i32, %c0_i32_0 : i32, i32
  }
  func.func @transform_11(%arg0: i32) -> (i32, i32) {
    %c0_i32 = arith.constant 0 : i32
    %c0_i32_0 = arith.constant 0 : i32
    %c0_i32_1 = arith.constant 0 : i32
    return %c0_i32, %c0_i32_0 : i32, i32
  }
  func.func @transform_12(%arg0: i32) -> (i32, i32) {
    %c0_i32 = arith.constant 0 : i32
    %c0_i32_0 = arith.constant 0 : i32
    %c0_i32_1 = arith.constant 0 : i32
    return %c0_i32, %c0_i32_0 : i32, i32
  }
  func.func @transform_13(%arg0: i32) -> (i32, i32) {
    %c0_i32 = arith.constant 0 : i32
    %c0_i32_0 = arith.constant 0 : i32
    %c0_i32_1 = arith.constant 0 : i32
    return %c0_i32, %c0_i32_0 : i32, i32
  }
  func.func @transform_14(%arg0: i32) -> (i32, i32, i32) {
    %c0_i32 = arith.constant 0 : i32
    %c0_i32_0 = arith.constant 0 : i32
    %c0_i32_1 = arith.constant 0 : i32
    return %arg0, %c0_i32, %c0_i32_0 : i32, i32, i32
  }
}

</mosaic_0001>

<bundles_post_ra>
// kernel: tpu_custom_call.1
= control target key start
LH: loop header
LB: loop body
LE: loop exit
PB: predicated region body
PF: predicated region fallthrough
CT: control target
= control target key end

     0   :  { %s11034_s0 = inlined_call_operand.vmem [shape: f32[2,8,256], index: 0, kind: input, shape index: {}]   ;;  %s11035_s1 = inlined_call_operand.vmem [shape: bf16[8,8], index: 1, kind: input, shape index: {}]   ;;  %s11036_s2 = inlined_call_operand.vmem [shape: f32[1,8], index: 2, kind: input, shape index: {}]   ;;  %s11037_s3 = inlined_call_operand.vmem [shape: f32[1,8], index: 3, kind: input, shape index: {}]   ;;  %s11038_s4 = inlined_call_operand.vmem [shape: bf16[36,4], index: 4, kind: input, shape index: {}]   ;;  %s11039_s5 = inlined_call_operand.vmem [shape: f32[1,4], index: 5, kind: input, shape index: {}]   ;;  %s11040_s6 = inlined_call_operand.vmem [shape: f32[1,4], index: 6, kind: input, shape index: {}]   ;;  %s11041_s7 = inlined_call_operand.vmem [shape: bf16[36,4], index: 7, kind: input, shape index: {}]   ;;  %s11042_s8 = inlined_call_operand.vmem [shape: f32[1,4], index: 8, kind: input, shape index: {}]   ;;  %s11043_s9 = inlined_call_operand.vmem [shape: f32[1,4], index: 9, kind: input, shape index: {}]   ;;  %s11044_s10 = inlined_call_operand.vmem [shape: bf16[4,8], index: 10, kind: input, shape index: {}]   ;;  %s11045_s11 = inlined_call_operand.vmem [shape: bf16[4,8], index: 11, kind: input, shape index: {}]   ;;  %s11046_s12 = inlined_call_operand.vmem [shape: f32[1,8], index: 12, kind: input, shape index: {}]   ;;  %s11047_s13 = inlined_call_operand.vmem [shape: f32[1,8], index: 13, kind: input, shape index: {}]   ;;  %s11048_s14 = inlined_call_operand.hbm [shape: f32[2,8,256], index: 14, kind: output, shape index: {}]  }
   0x1   :  { %11102 = sst [smem:[#allocation18_spill]] %s11034_s0 }
   0x2   :  { %11103 = sst [smem:[#allocation19_spill]] %s11035_s1 }
   0x3   :  { %11104 = sst [smem:[#allocation20_spill]] %s11036_s2 }
   0x4   :  { %11105 = sst [smem:[#allocation21_spill]] %s11037_s3 }
   0x5   :  { %11106 = sst [smem:[#allocation22_spill]] %s11038_s4 }
   0x6   :  { %19 = vsyncpa [#allocation5], 0 }
   0x7   :  { %21 = vsyncpa [#allocation5 + $0x1], 0  ;;  %s7127_s29 = smov 0   ;;  %s7129_s30 = smov 0  }
   0x8   :  { %s7131_s15 = smov 0   ;;  %s7133_s16 = smov 0  }
   0x9 LB: > { %s7148_s17 = sadd.s32 4294967295, %s7039_s16   ;;  %s5903_s18 = sadd.s32 4294967294, %s7039_s16   ;;  %s7039_s16 = sphi %s7133_s16, %s11162_s16   ;;  %s7035_s15 = sphi %s7131_s15, %s11161_s15   ;;  %s7031_s30 = sphi %s7129_s30, %s11160_s30   ;;  %s7027_s29 = sphi %s7127_s29, %s11159_s29  }
   0xa   : > { %s7152_s19 = sadd.s32 1, %s7039_s16   ;;  %s333_s20 = sadd.s32 1, %s7035_s15 }
   0xb   : > { %s330_s21 = ssub.s32 %s7039_s16, %s7152_s19  ;;  %p343_p0 = scmp.ne.s32.totalorder %s7035_s15, %s7031_s30 }
   0xc   : > { %p331_p1 = scmp.eq.s32.totalorder %s330_s21, 0  ;;  %p344_p2 = scmp.eq.s32.totalorder %s7148_s17, 1 }
   0xd   : > { %p349_p3 = scmp.ne.s32.totalorder %s7031_s30, %s7027_s29  ;;  %p350_p4 = scmp.eq.s32.totalorder %s5903_s18, 1 }
   0xe   : > { %s7163_s22 = scalar_select %p331_p1, %s7035_s15, %s333_s20  }
   0xf   : > { %p7165_p5 = por %p344_p2, %p343_p0  ;;  %p7169_p6 = por %p350_p4, %p349_p3 }
  0x10   : > { %p5906_p7 = scmp.ge.s32.totalorder %s7039_s16, 1  ;;  %p415_p8 = scmp.lt.s32.totalorder %s7039_s16, 3 }
  0x12   : > { %p416_p9 = pnand %p5906_p7, %p415_p8 }
  0x14   : > { %419 = sbr.rel (%p416_p9) target bundleno = 2224 (0x8b0), region = 76 }
  0x1b   : > { %p461_p10 = scmp.lt.s32.totalorder %s7148_s17, 1  ;;  %s11109_s0 = sld [smem:[#allocation18_spill]]  ;;  %vm655_vm0 = vcmask 1043456   ;;  %vm467_vm1 = vcmask 31744   ;;  %v7041_v5 = vmov 0.0   ;;  %vm606_vm2 = vcmask 64512  }
  0x1c   : > { %s11110_s1 = sld [smem:[#allocation19_spill]]  ;;  %475 = vst.msk [vmem:[#allocation2 + $0x30] sm:$0xff] %vm467_vm1, %v7041_v5  ;;  %476 = vst.msk [vmem:[#allocation2 + $0x38] sm:$0xff] %vm467_vm1, %v7041_v5  ;;  %vm470_vm3 = vcmask 25600   ;;  %vm1257_vm4 = vcmask 1046528   ;;  %vm1467_vm5 = vcmask 1045504  }
  0x1d   : > { %s462_s25 = scalar_select %p461_p10, %s7148_s17, 1  ;;  %468 = vst.msk [vmem:[#allocation2] sm:$0xff] %vm467_vm1, %v7041_v5  ;;  %469 = vst.msk [vmem:[#allocation2 + $0x8] sm:$0xff] %vm467_vm1, %v7041_v5  ;;  %vm1434_vm6 = vcmask 64544   ;;  %vm1644_vm7 = vcmask 97344   ;;  %vm2594_vm8 = vcmask 1041408  }
  0x1e   : > { %472 = vst.msk [vmem:[#allocation2 + $0x18] sm:$0xff] %vm467_vm1, %v7041_v5  ;;  %473 = vst.msk [vmem:[#allocation2 + $0x20] sm:$0xff] %vm467_vm1, %v7041_v5  ;;  %s11111_s2 = sld [smem:[#allocation20_spill]]  ;;  %s11112_s3 = sld [smem:[#allocation21_spill]]  ;;  %vm1775_vm9 = vcmask 130144   ;;  %vm1910_vm10 = vcmask 162944  }
  0x1f   : > { %s6009_s26 = sshll.u32 %s462_s25, 4  ;;  %478 = vst.msk [vmem:[#allocation2 + $0x48] sm:$0xff] %vm467_vm1, %v7041_v5  ;;  %479 = vst.msk [vmem:[#allocation2 + $0x50] sm:$0xff] %vm467_vm1, %v7041_v5  ;;  %s11051_s25 = smov 4   ;;  %vm2044_vm11 = vcmask 195744   ;;  %vm2175_vm12 = vcmask 228544  }
  0x20   : > { %481 = vst.msk [vmem:[#allocation2 + $0x60] sm:$0xff] %vm467_vm1, %v7041_v5  ;;  %482 = vst.msk [vmem:[#allocation2 + $0x68] sm:$0xff] %vm467_vm1, %v7041_v5  ;;  %s11053_s21 = smov 12   ;;  %s11049_s27 = smov 24   ;;  %vm2310_vm13 = vcmask 261344   ;;  %vm2444_vm14 = vcmask 294144  }
  0x21   : > { %s465_s18 = scalar_lea.vmem %s11109_s0, %s6009_s26  ;;  %484 = vst.msk [vmem:[#allocation2 + $0x78] sm:$0xff] %vm467_vm1, %v7041_v5  ;;  %485 = vst.msk [vmem:[#allocation2 + $0x80] sm:$0xff] %vm467_vm1, %v7041_v5  ;;  %s11067_s26 = smov 8   ;;  %vm2545_vm15 = vcmask 293888  }
  0x22   : > { %v523_v0 = vld [vmem:[%s465_s18] sm:$0xff]  ;;  %v524_v1 = vld [vmem:[%s465_s18 + $0x8] sm:$0xff]  ;;  %487 = vst.msk [vmem:[#allocation2 + $0x90] sm:$0xff] %vm467_vm1, %v7041_v5  ;;  %488 = vst.msk [vmem:[#allocation2 + $0x98] sm:$0xff] %vm467_vm1, %v7041_v5  ;;  %s11069_s28 = smov 16   ;;  %s11071_s18 = smov 20  }
  0x23   : > { %v6371_v2 = vpack.i.bf16 %v524_v1, %v523_v0  ;;  %v605_v3 = vld [vmem:[%s11110_s1] sm:$0xf]  ;;  %490 = vst.msk [vmem:[#allocation2 + $0xa8] sm:$0xff] %vm467_vm1, %v7041_v5  ;;  %491 = vst.msk [vmem:[#allocation2 + $0xb0] sm:$0xff] %vm467_vm1, %v7041_v5  ;;  %s11099_s20 = smov 28   ;;  %s11128_s4 = sld [smem:[#allocation22_spill]] }
  0x24   : > { %6316 = vmatprep.subr.msk.bf16.mxu0 %vm655_vm0, %v605_v3  ;;  %v657_v4 = vsel %vm655_vm0, %v605_v3, 0  ;;  %493 = vst.msk [vmem:[#allocation2 + $0xc0] sm:$0xff] %vm467_vm1, %v7041_v5  ;;  %494 = vst.msk [vmem:[#allocation2 + $0xc8] sm:$0xff] %vm467_vm1, %v7041_v5  ;;  %s11130_s0 = smov 8   ;;  %s11143_s1 = smov 28  }
  0x25   : > { %6372 = vxpose.xlu0.b32.start.end [1/1] (short) %v6371_v2, 128  ;;  %6101 = vmatpush3.bf16.msra.mxu0 %v657_v4  ;;  %496 = vst.msk [vmem:[#allocation2 + $0xd8] sm:$0xff] %vm467_vm1, %v7041_v5  ;;  %497 = vst.msk [vmem:[#allocation2 + $0xe0] sm:$0xff] %vm467_vm1, %v7041_v5 }
  0x26   : > { %499 = vst.msk [vmem:[#allocation2 + $0xf0] sm:$0xff] %vm467_vm1, %v7041_v5  ;;  %500 = vst.msk [vmem:[#allocation2 + $0xf8] sm:$0xff] %vm467_vm1, %v7041_v5 }
  0x27   : > { %502 = vst.msk [vmem:[#allocation2 + $0x108] sm:$0xff] %vm467_vm1, %v7041_v5  ;;  %503 = vst.msk [vmem:[#allocation2 + $0x110] sm:$0xff] %vm467_vm1, %v7041_v5 }
  0x28   : > { %505 = vst.msk [vmem:[#allocation2 + $0x120] sm:$0xff] %vm467_vm1, %v7041_v5  ;;  %506 = vst.msk [vmem:[#allocation2 + $0x128] sm:$0xff] %vm467_vm1, %v7041_v5 }
  0x29   : > { %508 = vst.msk [vmem:[#allocation2 + $0x138] sm:$0xff] %vm467_vm1, %v7041_v5  ;;  %509 = vst.msk [vmem:[#allocation2 + $0x140] sm:$0xff] %vm467_vm1, %v7041_v5 }
  0x2a   : > { %511 = vst.msk [vmem:[#allocation2 + $0x150] sm:$0xff] %vm467_vm1, %v7041_v5  ;;  %512 = vst.msk [vmem:[#allocation2 + $0x158] sm:$0xff] %vm467_vm1, %v7041_v5 }
  0x2b   : > { %514 = vst.msk [vmem:[#allocation2 + $0x168] sm:$0xff] %vm467_vm1, %v7041_v5  ;;  %515 = vst.msk [vmem:[#allocation2 + $0x170] sm:$0xff] %vm467_vm1, %v7041_v5 }
  0x2c   : > { %517 = vst.msk [vmem:[#allocation2 + $0x180] sm:$0xff] %vm467_vm1, %v7041_v5  ;;  %518 = vst.msk [vmem:[#allocation2 + $0x188] sm:$0xff] %vm467_vm1, %v7041_v5 }
  0x2d   : > { %520 = vst.msk [vmem:[#allocation2 + $0x198] sm:$0xff] %vm467_vm1, %v7041_v5  ;;  %521 = vst.msk [vmem:[#allocation2 + $0x1a0] sm:$0xff] %vm467_vm1, %v7041_v5 }
  0x2e   : > { %477 = vst.msk [vmem:[#allocation2 + $0x40] sm:$0x3] %vm470_vm3, %v7041_v5  ;;  %471 = vst.msk [vmem:[#allocation2 + $0x10] sm:$0x3] %vm470_vm3, %v7041_v5 }
  0x2f   : > { %474 = vst.msk [vmem:[#allocation2 + $0x28] sm:$0x3] %vm470_vm3, %v7041_v5  ;;  %480 = vst.msk [vmem:[#allocation2 + $0x58] sm:$0x3] %vm470_vm3, %v7041_v5 }
  0x30   : > { %483 = vst.msk [vmem:[#allocation2 + $0x70] sm:$0x3] %vm470_vm3, %v7041_v5  ;;  %486 = vst.msk [vmem:[#allocation2 + $0x88] sm:$0x3] %vm470_vm3, %v7041_v5 }
  0x31   : > { %489 = vst.msk [vmem:[#allocation2 + $0xa0] sm:$0x3] %vm470_vm3, %v7041_v5  ;;  %492 = vst.msk [vmem:[#allocation2 + $0xb8] sm:$0x3] %vm470_vm3, %v7041_v5 }
  0x32   : > { %495 = vst.msk [vmem:[#allocation2 + $0xd0] sm:$0x3] %vm470_vm3, %v7041_v5  ;;  %498 = vst.msk [vmem:[#allocation2 + $0xe8] sm:$0x3] %vm470_vm3, %v7041_v5 }
  0x33   : > { %501 = vst.msk [vmem:[#allocation2 + $0x100] sm:$0x3] %vm470_vm3, %v7041_v5  ;;  %504 = vst.msk [vmem:[#allocation2 + $0x118] sm:$0x3] %vm470_vm3, %v7041_v5 }
  0x34   : > { %507 = vst.msk [vmem:[#allocation2 + $0x130] sm:$0x3] %vm470_vm3, %v7041_v5  ;;  %510 = vst.msk [vmem:[#allocation2 + $0x148] sm:$0x3] %vm470_vm3, %v7041_v5 }
  0x35   : > { %513 = vst.msk [vmem:[#allocation2 + $0x160] sm:$0x3] %vm470_vm3, %v7041_v5  ;;  %516 = vst.msk [vmem:[#allocation2 + $0x178] sm:$0x3] %vm470_vm3, %v7041_v5 }
  0x36   : > { %519 = vst.msk [vmem:[#allocation2 + $0x190] sm:$0x3] %vm470_vm3, %v7041_v5  ;;  %522 = vst.msk [vmem:[#allocation2 + $0x1a8] sm:$0x3] %vm470_vm3, %v7041_v5 }
  0xa5   : > { %v6373_v6 = vpop.trf.xlu0 }
  0xa6   : > { %v6374_v9 = vunpack.i.l.bf16 %v6373_v6  ;;  %v6377_v46 = vunpack.i.h.bf16 %v6373_v6 }
  0xa9   : > { %v6378_v7 = vpop.trf.xlu0 }
  0xaa   : > { %v6379_v8 = vunpack.i.l.bf16 %v6378_v7  ;;  %v6382_v43 = vunpack.i.h.bf16 %v6378_v7  ;;  %v1123_v7 = vld [vmem:[#allocation2] sm:$0xff] }
  0xab   : > { %1177 = vst.msk [vmem:[#allocation3] sm:$0xff] %vm467_vm1, %v1123_v7 }
  0xac   : > { %v589_v10 = vpack.c.bf16 %v6379_v8, %v6374_v9  ;;  %v597_v48 = vpack.c.bf16 %v6382_v43, %v6377_v46  ;;  %v1124_v8 = vld [vmem:[#allocation2 + $0x8] sm:$0xff]  ;;  %v1258_v9 = vrot.slane %v1123_v7, 1 }
  0xad   : > { %v6383_v11 = vpop.trf.xlu0  ;;  %1178 = vst.msk [vmem:[#allocation3 + $0x8] sm:$0xff] %vm467_vm1, %v1124_v8  ;;  %v1469_v5 = vrot.slane %v1124_v8, 2 }
  0xae   : > { %6102 = vmatprep.mubr.msk.bf16.mxu0 %vm606_vm2, %v589_v10  ;;  %v6384_v13 = vunpack.i.l.bf16 %v6383_v11  ;;  %v6387_v52 = vunpack.i.h.bf16 %v6383_v11  ;;  %v1259_v10 = vrot.slane %v1124_v8, 1  ;;  %v1125_v11 = vld [vmem:[#allocation2 + $0x10] sm:$0x3] }
  0xb1   : > { %v6388_v12 = vpop.trf.xlu0 }
  0xb2   : > { %v6389_v14 = vunpack.i.l.bf16 %v6388_v12  ;;  %v6392_v49 = vunpack.i.h.bf16 %v6388_v12  ;;  %v1260_v12 = vsel %vm1257_vm4, %v1258_v9, %v1259_v10 }
  0xb3   : > { %1338 = vrot.lane.b32.xlu0 %v1260_v12, %s11051_s25 }
  0xb4   : > { %v590_v15 = vpack.c.bf16 %v6389_v14, %v6384_v13  ;;  %v598_v53 = vpack.c.bf16 %v6392_v49, %v6387_v52  ;;  %v1261_v13 = vrot.slane %v1125_v11, 1 }
  0xb5   : > { %v6393_v16 = vpop.trf.xlu0 }
  0xb6   : > { %6103 = vmatmul.mubr.msk.bf16.vlgmr.msra.gmra.mrb[0].mxu0 %vm606_vm2, %v590_v15  ;;  %v6394_v17 = vunpack.i.l.bf16 %v6393_v16  ;;  %v6397_v50 = vunpack.i.h.bf16 %v6393_v16  ;;  %v1262_v14 = vsel %vm1257_vm4, %v1259_v10, %v1261_v13  ;;  %v1468_v15 = vrot.slane %v1123_v7, 2 }
  0xb7   : > { %1340 = vrot.lane.b32.xlu1 %v1262_v14, %s11051_s25 }
  0xb8   : > { %v1470_v16 = vsel %vm1467_vm5, %v1468_v15, %v1469_v5 }
  0xb9   : > { %v6398_v18 = vpop.trf.xlu0  ;;  %1548 = vrot.lane.b32.xlu0 %v1470_v16, %s11067_s26 }
  0xba   : > { %v6399_v19 = vunpack.i.l.bf16 %v6398_v18  ;;  %v6402_v51 = vunpack.i.h.bf16 %v6398_v18 }
  0xbc   : > { %v591_v20 = vpack.c.bf16 %v6399_v19, %v6394_v17  ;;  %v599_v54 = vpack.c.bf16 %v6402_v51, %v6397_v50  ;;  %v1471_v17 = vrot.slane %v1125_v11, 2  ;;  %v7320_v19 = vld [vmem:[%s11111_s2] ss:$0 sm:$0xff] }
  0xbd   : > { %v6403_v21 = vpop.trf.xlu0 }
  0xbe   : > { %6106 = vmatprep.mubr.msk.bf16.mxu0 %vm606_vm2, %v591_v20  ;;  %v6404_v22 = vunpack.i.l.bf16 %v6403_v21  ;;  %v6407_v57 = vunpack.i.h.bf16 %v6403_v21  ;;  %v1472_v18 = vsel %vm1467_vm5, %v1469_v5, %v1471_v17  ;;  %v7325_v21 = vld [vmem:[%s11112_s3] ss:$0 sm:$0xff] }
  0xbf   : > { %1550 = vrot.lane.b32.xlu1 %v1472_v18, %s11067_s26 }
  0xc1   : > { %v6408_v23 = vpop.trf.xlu0 }
  0xc2   : > { %v6409_v24 = vunpack.i.l.bf16 %v6408_v23  ;;  %v6412_v58 = vunpack.i.h.bf16 %v6408_v23 }
  0xc4   : > { %v592_v25 = vpack.c.bf16 %v6409_v24, %v6404_v22  ;;  %v600_v60 = vpack.c.bf16 %v6412_v58, %v6407_v57 }
  0xc5   : > { %v6413_v26 = vpop.trf.xlu0 }
  0xc6   : > { %6107 = vmatmul.mubr.msk.bf16.gmra.mrb[4].mxu0 %vm606_vm2, %v592_v25  ;;  %v6414_v27 = vunpack.i.l.bf16 %v6413_v26  ;;  %v6417_v55 = vunpack.i.h.bf16 %v6413_v26 }
  0xc9   : > { %v6418_v28 = vpop.trf.xlu0 }
  0xca   : > { %v6419_v29 = vunpack.i.l.bf16 %v6418_v28  ;;  %v6422_v56 = vunpack.i.h.bf16 %v6418_v28 }
  0xcc   : > { %v593_v30 = vpack.c.bf16 %v6419_v29, %v6414_v27  ;;  %v601_v59 = vpack.c.bf16 %v6422_v56, %v6417_v55 }
  0xcd   : > { %v6423_v31 = vpop.trf.xlu0 }
  0xce   : > { %6110 = vmatprep.mubr.msk.bf16.mxu0 %vm606_vm2, %v593_v30  ;;  %v6424_v32 = vunpack.i.l.bf16 %v6423_v31  ;;  %v6427_v61 = vunpack.i.h.bf16 %v6423_v31 }
  0xd1   : > { %v6428_v33 = vpop.trf.xlu0 }
  0xd2   : > { %v6429_v34 = vunpack.i.l.bf16 %v6428_v33  ;;  %v6432_v62 = vunpack.i.h.bf16 %v6428_v33 }
  0xd4   : > { %v594_v35 = vpack.c.bf16 %v6429_v34, %v6424_v32  ;;  %v602_v1 = vpack.c.bf16 %v6432_v62, %v6427_v61 }
  0xd5   : > { %v6433_v36 = vpop.trf.xlu0 }
  0xd6   : > { %6111 = vmatmul.mubr.msk.bf16.gmra.mrb[8].mxu0 %vm606_vm2, %v594_v35  ;;  %v6434_v37 = vunpack.i.l.bf16 %v6433_v36  ;;  %v6437_v63 = vunpack.i.h.bf16 %v6433_v36 }
  0xd9   : > { %v6438_v38 = vpop.trf.xlu0 }
  0xda   : > { %v6439_v39 = vunpack.i.l.bf16 %v6438_v38  ;;  %v6442_v0 = vunpack.i.h.bf16 %v6438_v38 }
  0xdc   : > { %v595_v40 = vpack.c.bf16 %v6439_v39, %v6434_v37  ;;  %v603_v2 = vpack.c.bf16 %v6442_v0, %v6437_v63 }
  0xdd   : > { %v6443_v41 = vpop.trf.xlu0 }
  0xde   : > { %6114 = vmatprep.mubr.msk.bf16.mxu0 %vm606_vm2, %v595_v40  ;;  %v6444_v42 = vunpack.i.l.bf16 %v6443_v41  ;;  %v6447_v3 = vunpack.i.h.bf16 %v6443_v41 }
  0xe1   : > { %v6448_v44 = vpop.trf.xlu0 }
  0xe2   : > { %v6449_v45 = vunpack.i.l.bf16 %v6448_v44  ;;  %v6452_v4 = vunpack.i.h.bf16 %v6448_v44 }
  0xe4   : > { %v596_v47 = vpack.c.bf16 %v6449_v45, %v6444_v42  ;;  %v604_v6 = vpack.c.bf16 %v6452_v4, %v6447_v3 }
  0xe6   : > { %6115 = vmatmul.mubr.msk.bf16.gmra.mrb[12].mxu0 %vm606_vm2, %v596_v47 }
  0xe7   : > { %6118 = vmatprep.mubr.msk.bf16.mxu0 %vm606_vm2, %v597_v48 }
  0xee   : > { %6119 = vmatmul.mubr.msk.bf16.gmra.mrb[16].mxu0 %vm606_vm2, %v598_v53 }
  0xef   : > { %6122 = vmatprep.mubr.msk.bf16.mxu0 %vm606_vm2, %v599_v54 }
  0xf6   : > { %6123 = vmatmul.mubr.msk.bf16.gmra.mrb[20].mxu0 %vm606_vm2, %v600_v60 }
  0xf7   : > { %6126 = vmatprep.mubr.msk.bf16.mxu0 %vm606_vm2, %v601_v59 }
  0xfe   : > { %6127 = vmatmul.mubr.msk.bf16.gmra.mrb[24].mxu0 %vm606_vm2, %v602_v1 }
  0xff   : > { %6130 = vmatprep.mubr.msk.bf16.mxu0 %vm606_vm2, %v603_v2 }
 0x106   : > { %6131 = vmatmul.mubr.msk.bf16.gmra.mrb[28].mxu0 %vm606_vm2, %v604_v6 }
 0x125   : > { %v1339_v58 = vpop.permute.xlu0 %1338 }
 0x126   : > { %1435 = vst.msk [vmem:[#allocation3] sm:$0xff] %vm1434_vm6, %v1339_v58 }
 0x129   : > { %v1341_v2 = vpop.permute.xlu1 %1340 }
 0x12a   : > { %1436 = vst.msk [vmem:[#allocation3 + $0x8] sm:$0xff] %vm1434_vm6, %v1341_v2 }
 0x12b   : > { %v1549_v7 = vpop.permute.xlu0 %1548 }
 0x12c   : > { %1645 = vst.msk [vmem:[#allocation3] sm:$0xff] %vm1644_vm7, %v1549_v7 }
 0x131   : > { %v1551_v9 = vpop.permute.xlu1 %1550 }
 0x132   : > { %1646 = vst.msk [vmem:[#allocation3 + $0x8] sm:$0xff] %vm1644_vm7, %v1551_v9 }
 0x189   : > { %v6104_v20 = vpop.f32.mrb[0].mxu0 }
 0x18a   : > { %v829_v22 = vmul.f32 %v6104_v20, %v7320_v19  ;;  %v693_v23 = vpop.f32.mrb[1].mxu0 }
 0x18b   : > { %v827_v24 = vmul.f32 %v7320_v19, %v693_v23  ;;  %v6105_v25 = vpop.f32.mrb[2].mxu0 }
 0x18c   : > { %v7330_v26 = vadd.f32 %v7325_v21, %v829_v22  ;;  %v830_v27 = vmul.f32 %v6105_v25, %v7320_v19  ;;  %v696_v28 = vpop.f32.mrb[3].mxu0 }
 0x18d   : > { %v7334_v29 = vadd.f32 %v7325_v21, %v827_v24  ;;  %v828_v30 = vmul.f32 %v7320_v19, %v696_v28 }
 0x18e   : > { %v900_v31 = vsub.f32 0.0, %v7330_v26  ;;  %v7339_v32 = vadd.f32 %v7325_v21, %v830_v27 }
 0x18f   : > { %v898_v33 = vsub.f32 0.0, %v7334_v29  ;;  %v7343_v34 = vadd.f32 %v7325_v21, %v828_v30 }
 0x190   : > { %v934_v35 = vmul.f32 1.442695, %v900_v31  ;;  %v901_v36 = vsub.f32 0.0, %v7339_v32 }
 0x191   : > { %v930_v37 = vmul.f32 1.442695, %v898_v33  ;;  %v899_v38 = vsub.f32 0.0, %v7343_v34 }
 0x192   : > { %6459 = vpow2.f32 %v934_v35  ;;  %v936_v39 = vmul.f32 1.442695, %v901_v36 }
 0x193   : > { %6461 = vpow2.f32 %v930_v37  ;;  %v932_v40 = vmul.f32 1.442695, %v899_v38 }
 0x194   : > { %6463 = vpow2.f32 %v936_v39 }
 0x195   : > { %6465 = vpow2.f32 %v932_v40 }
 0x199   : > { %v6108_v41 = vpop.f32.mrb[4].mxu0 }
 0x19a   : > { %v833_v42 = vmul.f32 %v6108_v41, %v7320_v19  ;;  %v709_v43 = vpop.f32.mrb[5].mxu0 }
 0x19b   : > { %v831_v44 = vmul.f32 %v7320_v19, %v709_v43  ;;  %v6109_v45 = vpop.f32.mrb[6].mxu0 }
 0x19c   : > { %v6460_v46 = vpop.eup %6459  ;;  %v7350_v47 = vadd.f32 %v7325_v21, %v833_v42  ;;  %v834_v48 = vmul.f32 %v6109_v45, %v7320_v19  ;;  %v712_v49 = vpop.f32.mrb[7].mxu0 }
 0x19d   : > { %v6462_v50 = vpop.eup %6461  ;;  %v996_v51 = vadd.f32 1.0, %v6460_v46  ;;  %v7354_v52 = vadd.f32 %v7325_v21, %v831_v44  ;;  %v832_v53 = vmul.f32 %v7320_v19, %v712_v49 }
 0x19e   : > { %v6464_v54 = vpop.eup %6463  ;;  %v994_v55 = vadd.f32 1.0, %v6462_v50  ;;  %v904_v56 = vsub.f32 0.0, %v7350_v47  ;;  %v7359_v57 = vadd.f32 %v7325_v21, %v834_v48 }
 0x19f   : > { %v6466_v59 = vpop.eup %6465  ;;  %6467 = vrcp.f32 %v996_v51  ;;  %v997_v60 = vadd.f32 1.0, %v6464_v54  ;;  %v902_v61 = vsub.f32 0.0, %v7354_v52  ;;  %v7363_v62 = vadd.f32 %v7325_v21, %v832_v53 }
 0x1a0   : > { %6469 = vrcp.f32 %v994_v55  ;;  %v995_v63 = vadd.f32 1.0, %v6466_v59  ;;  %v942_v0 = vmul.f32 1.442695, %v904_v56  ;;  %v905_v1 = vsub.f32 0.0, %v7359_v57 }
 0x1a1   : > { %6471 = vrcp.f32 %v997_v60  ;;  %v938_v3 = vmul.f32 1.442695, %v902_v61  ;;  %v903_v4 = vsub.f32 0.0, %v7363_v62 }
 0x1a2   : > { %6473 = vrcp.f32 %v995_v63  ;;  %v944_v6 = vmul.f32 1.442695, %v905_v1 }
 0x1a3   : > { %6475 = vpow2.f32 %v942_v0  ;;  %v940_v8 = vmul.f32 1.442695, %v903_v4 }
 0x1a4   : > { %6477 = vpow2.f32 %v938_v3 }
 0x1a5   : > { %6479 = vpow2.f32 %v944_v6 }
 0x1a6   : > { %6481 = vpow2.f32 %v940_v8 }
 0x1a9   : > { %v6468_v10 = vpop.eup %6467  ;;  %v6112_v11 = vpop.f32.mrb[8].mxu0 }
 0x1aa   : > { %v6470_v12 = vpop.eup %6469  ;;  %v7372_v13 = vmul.f32 %v6468_v10, %v7330_v26  ;;  %v837_v14 = vmul.f32 %v6112_v11, %v7320_v19  ;;  %v725_v15 = vpop.f32.mrb[9].mxu0 }
 0x1ab   : > { %v6472_v5 = vpop.eup %6471  ;;  %v7376_v16 = vmul.f32 %v6470_v12, %v7334_v29  ;;  %v835_v17 = vmul.f32 %v7320_v19, %v725_v15  ;;  %v6113_v18 = vpop.f32.mrb[10].mxu0 }
 0x1ac   : > { %v6474_v20 = vpop.eup %6473  ;;  %1093 = vst.msk [vmem:[#allocation2 + $0x31] sm:$0xff] %vm467_vm1, %v7372_v13  ;;  %v7382_v22 = vmul.f32 %v6472_v5, %v7339_v32  ;;  %v7385_v23 = vadd.f32 %v7325_v21, %v837_v14  ;;  %v838_v24 = vmul.f32 %v6113_v18, %v7320_v19  ;;  %v728_v25 = vpop.f32.mrb[11].mxu0 }
 0x1ad   : > { %v6476_v26 = vpop.eup %6475  ;;  %1091 = vst.msk [vmem:[#allocation2 + $0x19] sm:$0xff] %vm467_vm1, %v7376_v16  ;;  %v7391_v27 = vmul.f32 %v6474_v20, %v7343_v34  ;;  %v7394_v28 = vadd.f32 %v7325_v21, %v835_v17  ;;  %v836_v29 = vmul.f32 %v7320_v19, %v728_v25 }
 0x1ae   : > { %v6478_v30 = vpop.eup %6477  ;;  %1094 = vst.msk [vmem:[#allocation2 + $0x39] sm:$0xff] %vm467_vm1, %v7382_v22  ;;  %v1000_v31 = vadd.f32 1.0, %v6476_v26  ;;  %v908_v32 = vsub.f32 0.0, %v7385_v23  ;;  %v7401_v33 = vadd.f32 %v7325_v21, %v838_v24 }
 0x1af   : > { %v6480_v35 = vpop.eup %6479  ;;  %1092 = vst.msk [vmem:[#allocation2 + $0x21] sm:$0xff] %vm467_vm1, %v7391_v27  ;;  %v998_v34 = vadd.f32 1.0, %v6478_v30  ;;  %v906_v36 = vsub.f32 0.0, %v7394_v28  ;;  %v7407_v37 = vadd.f32 %v7325_v21, %v836_v29 }
 0x1b0   : > { %v6482_v38 = vpop.eup %6481  ;;  %6483 = vrcp.f32 %v1000_v31  ;;  %v1001_v39 = vadd.f32 1.0, %v6480_v35  ;;  %v950_v40 = vmul.f32 1.442695, %v908_v32  ;;  %v909_v41 = vsub.f32 0.0, %v7401_v33 }
 0x1b1   : > { %6485 = vrcp.f32 %v998_v34  ;;  %v999_v42 = vadd.f32 1.0, %v6482_v38  ;;  %v946_v43 = vmul.f32 1.442695, %v906_v36  ;;  %v907_v44 = vsub.f32 0.0, %v7407_v37 }
 0x1b2   : > { %6487 = vrcp.f32 %v1001_v39  ;;  %v952_v45 = vmul.f32 1.442695, %v909_v41 }
 0x1b3   : > { %6489 = vrcp.f32 %v999_v42  ;;  %v1129_v46 = vld [vmem:[#allocation2 + $0x30] sm:$0xff]  ;;  %v948_v48 = vmul.f32 1.442695, %v907_v44 }
 0x1b4   : > { %1683 = vrot.lane.b32.xlu0 %v1129_v46, %s11053_s21  ;;  %1181 = vst.msk [vmem:[#allocation3 + $0x20] sm:$0xff] %vm467_vm1, %v1129_v46  ;;  %6491 = vpow2.f32 %v950_v40  ;;  %v7413_v49 = vld [vmem:[#allocation2 + $0x18] sm:$0xff]  ;;  %v1478_v8 = vrot.slane %v1129_v46, 2  ;;  %v1268_v15 = vrot.slane %v1129_v46, 1 }
 0x1b5   : > { %v7415_v50 = vld [vmem:[#allocation2 + $0x38] sm:$0xff]  ;;  %6493 = vpow2.f32 %v946_v43  ;;  %1179 = vst.msk [vmem:[#allocation3 + $0x10] sm:$0xff] %vm467_vm1, %v7413_v49  ;;  %v7455_v10 = vld [vmem:[#allocation2 + $0x40] sm:$0x3] }
 0x1b6   : > { %1685 = vrot.lane.b32.xlu1 %v7415_v50, %s11053_s21  ;;  %1182 = vst.msk [vmem:[#allocation3 + $0x28] sm:$0xff] %vm467_vm1, %v7415_v50  ;;  %6495 = vpow2.f32 %v952_v45  ;;  %v7423_v51 = vld [vmem:[#allocation2 + $0x20] sm:$0xff]  ;;  %v1479_v63 = vrot.slane %v7415_v50, 2  ;;  %v1271_v30 = vrot.slane %v7455_v10, 1  ;;  %v1481_v45 = vrot.slane %v7455_v10, 2 }
 0x1b7   : > { %6497 = vpow2.f32 %v948_v48  ;;  %1180 = vst.msk [vmem:[#allocation3 + $0x18] sm:$0xff] %vm467_vm1, %v7423_v51 }
 0x1b8   : > { %2079 = vrot.lane.b32.xlu0 %v1129_v46, %s11049_s27 }
 0x1b9   : > { %v6116_v53 = vpop.f32.mrb[12].mxu0 }
 0x1ba   : > { %v6484_v54 = vpop.eup %6483  ;;  %2081 = vrot.lane.b32.xlu1 %v7415_v50, %s11049_s27  ;;  %v841_v55 = vmul.f32 %v6116_v53, %v7320_v19  ;;  %v741_v56 = vpop.f32.mrb[13].mxu0  ;;  %s11073_s27 = smov 32  }
 0x1bb   : > { %v6486_v58 = vpop.eup %6485  ;;  %v7432_v59 = vmul.f32 %v6484_v54, %v7350_v47  ;;  %v839_v60 = vmul.f32 %v7320_v19, %v741_v56  ;;  %v6117_v61 = vpop.f32.mrb[14].mxu0  ;;  %v1269_v47 = vrot.slane %v7415_v50, 1  ;;  %v1264_v50 = vrot.slane %v7423_v51, 1 }
 0x1bc   : > { %v6488_v0 = vpop.eup %6487  ;;  %v7437_v1 = vmul.f32 %v6486_v58, %v7354_v52  ;;  %1679 = vrot.lane.b32.xlu0 %v7413_v49, %s11053_s21  ;;  %v7442_v2 = vadd.f32 %v7325_v21, %v841_v55  ;;  %v842_v3 = vmul.f32 %v6117_v61, %v7320_v19  ;;  %v744_v4 = vpop.f32.mrb[15].mxu0 }
 0x1bd   : > { %v6490_v6 = vpop.eup %6489  ;;  %1097 = vst.msk [vmem:[#allocation2 + $0x61] sm:$0xff] %vm467_vm1, %v7432_v59  ;;  %v7449_v7 = vmul.f32 %v6488_v0, %v7359_v57  ;;  %v7452_v52 = vadd.f32 %v7325_v21, %v839_v60  ;;  %v840_v9 = vmul.f32 %v7320_v19, %v744_v4  ;;  %v7485_v29 = vsel %vm1257_vm4, %v1268_v15, %v1269_v47 }
 0x1be   : > { %v6492_v11 = vpop.eup %6491  ;;  %1095 = vst.msk [vmem:[#allocation2 + $0x49] sm:$0xff] %vm467_vm1, %v7437_v1  ;;  %v7460_v12 = vmul.f32 %v6490_v6, %v7363_v62  ;;  %v912_v14 = vsub.f32 0.0, %v7442_v2  ;;  %1681 = vrot.lane.b32.xlu1 %v7423_v51, %s11053_s21  ;;  %v7466_v57 = vadd.f32 %v7325_v21, %v842_v3  ;;  %v7474_v62 = vsel %vm1467_vm5, %v1478_v8, %v1479_v63 }
 0x1bf   : > { %v6494_v5 = vpop.eup %6493  ;;  %1098 = vst.msk [vmem:[#allocation2 + $0x69] sm:$0xff] %vm467_vm1, %v7449_v7  ;;  %v1004_v17 = vadd.f32 1.0, %v6492_v11  ;;  %v910_v18 = vsub.f32 0.0, %v7452_v52  ;;  %v7477_v20 = vadd.f32 %v7325_v21, %v840_v9  ;;  %v7507_v60 = vsel %vm1257_vm4, %v1269_v47, %v1271_v30 }
 0x1c0   : > { %v6496_v24 = vpop.eup %6495  ;;  %1096 = vst.msk [vmem:[#allocation2 + $0x51] sm:$0xff] %vm467_vm1, %v7460_v12  ;;  %v1002_v25 = vadd.f32 1.0, %v6494_v5  ;;  %v913_v26 = vsub.f32 0.0, %v7466_v57  ;;  %1556 = vrot.lane.b32.xlu0 %v7474_v62, %s11067_s26  ;;  %v958_v35 = vmul.f32 1.442695, %v912_v14  ;;  %v7540_v5 = vsel %vm1467_vm5, %v1479_v63, %v1481_v45 }
 0x1c1   : > { %v6498_v31 = vpop.eup %6497  ;;  %6499 = vrcp.f32 %v1004_v17  ;;  %v1005_v32 = vadd.f32 1.0, %v6496_v24  ;;  %v911_v34 = vsub.f32 0.0, %v7477_v20  ;;  %v6120_v36 = vpop.f32.mrb[16].mxu0  ;;  %v954_v39 = vmul.f32 1.442695, %v910_v18 }
 0x1c2   : > { %6501 = vrcp.f32 %v1002_v25  ;;  %v1003_v38 = vadd.f32 1.0, %v6498_v31  ;;  %v845_v40 = vmul.f32 %v6120_v36, %v7320_v19  ;;  %1346 = vrot.lane.b32.xlu1 %v7485_v29, %s11051_s25  ;;  %v757_v41 = vpop.f32.mrb[17].mxu0  ;;  %v960_v42 = vmul.f32 1.442695, %v913_v26 }
 0x1c3   : > { %6503 = vrcp.f32 %v1005_v32  ;;  %v843_v43 = vmul.f32 %v7320_v19, %v757_v41  ;;  %v6121_v44 = vpop.f32.mrb[18].mxu0  ;;  %v956_v46 = vmul.f32 1.442695, %v911_v34  ;;  %v1474_v25 = vrot.slane %v7423_v51, 2 }
 0x1c4   : > { %6505 = vrcp.f32 %v1003_v38  ;;  %v7495_v48 = vadd.f32 %v7325_v21, %v845_v40  ;;  %v846_v53 = vmul.f32 %v6121_v44, %v7320_v19  ;;  %1818 = vrot.lane.b32.xlu0 %v7485_v29, %s11069_s28  ;;  %v760_v54 = vpop.f32.mrb[19].mxu0  ;;  %v7500_v55 = vld [vmem:[#allocation2 + $0x60] sm:$0xff] }
 0x1c5   : > { %6507 = vpow2.f32 %v958_v35  ;;  %v7503_v56 = vadd.f32 %v7325_v21, %v843_v43  ;;  %v844_v58 = vmul.f32 %v7320_v19, %v760_v54  ;;  %1185 = vst.msk [vmem:[#allocation3 + $0x40] sm:$0xff] %vm467_vm1, %v7500_v55  ;;  %v7511_v61 = vld [vmem:[#allocation2 + $0x48] sm:$0xff] }
 0x1c6   : > { %6509 = vpow2.f32 %v954_v39  ;;  %v916_v0 = vsub.f32 0.0, %v7495_v48  ;;  %v7515_v3 = vadd.f32 %v7325_v21, %v846_v53  ;;  %1348 = vrot.lane.b32.xlu1 %v7507_v60, %s11051_s25  ;;  %1183 = vst.msk [vmem:[#allocation3 + $0x30] sm:$0xff] %vm467_vm1, %v7511_v61  ;;  %v7521_v4 = vld [vmem:[#allocation2 + $0x68] sm:$0xff]  ;;  %v1263_v53 = vrot.slane %v7413_v49, 1 }
 0x1c7   : > { %6511 = vpow2.f32 %v960_v42  ;;  %v914_v47 = vsub.f32 0.0, %v7503_v56  ;;  %v7525_v6 = vadd.f32 %v7325_v21, %v844_v58  ;;  %1186 = vst.msk [vmem:[#allocation3 + $0x48] sm:$0xff] %vm467_vm1, %v7521_v4  ;;  %v7529_v8 = vld [vmem:[#allocation2 + $0x50] sm:$0xff] }
 0x1c8   : > { %6513 = vpow2.f32 %v956_v46  ;;  %v966_v9 = vmul.f32 1.442695, %v916_v0  ;;  %v917_v10 = vsub.f32 0.0, %v7515_v3  ;;  %1952 = vrot.lane.b32.xlu0 %v7474_v62, %s11071_s18  ;;  %1184 = vst.msk [vmem:[#allocation3 + $0x38] sm:$0xff] %vm467_vm1, %v7529_v8 }
 0x1c9   : > { %v962_v11 = vmul.f32 1.442695, %v914_v47  ;;  %v915_v14 = vsub.f32 0.0, %v7525_v6  ;;  %v6124_v15 = vpop.f32.mrb[20].mxu0 }
 0x1ca   : > { %6515 = vpow2.f32 %v966_v9  ;;  %v968_v17 = vmul.f32 1.442695, %v917_v10  ;;  %v849_v18 = vmul.f32 %v6124_v15, %v7320_v19  ;;  %1558 = vrot.lane.b32.xlu1 %v7540_v5, %s11067_s26  ;;  %v773_v24 = vpop.f32.mrb[21].mxu0  ;;  %v7600_v10 = vsel %vm1257_vm4, %v1263_v53, %v1264_v50 }
 0x1cb   : > { %v6500_v26 = vpop.eup %6499  ;;  %6517 = vpow2.f32 %v962_v11  ;;  %v964_v30 = vmul.f32 1.442695, %v915_v14  ;;  %v847_v31 = vmul.f32 %v7320_v19, %v773_v24  ;;  %v6125_v32 = vpop.f32.mrb[22].mxu0 }
 0x1cc   : > { %v6502_v63 = vpop.eup %6501  ;;  %v7549_v35 = vmul.f32 %v6500_v26, %v7385_v23  ;;  %6519 = vpow2.f32 %v968_v17  ;;  %v7552_v34 = vadd.f32 %v7325_v21, %v849_v18  ;;  %v850_v36 = vmul.f32 %v6125_v32, %v7320_v19  ;;  %2214 = vrot.lane.b32.xlu0 %v7485_v29, %s11099_s20  ;;  %v776_v38 = vpop.f32.mrb[23].mxu0 }
 0x1cd   : > { %v6504_v39 = vpop.eup %6503  ;;  %v7558_v40 = vmul.f32 %v6502_v63, %v7394_v28  ;;  %6521 = vpow2.f32 %v964_v30  ;;  %v7561_v41 = vadd.f32 %v7325_v21, %v847_v31  ;;  %v848_v23 = vmul.f32 %v7320_v19, %v776_v38 }
 0x1ce   : > { %v6506_v42 = vpop.eup %6505  ;;  %1101 = vst.msk [vmem:[#allocation2 + $0x91] sm:$0xff] %vm467_vm1, %v7549_v35  ;;  %v7567_v43 = vmul.f32 %v6504_v39, %v7401_v33  ;;  %v920_v29 = vsub.f32 0.0, %v7552_v34  ;;  %v7571_v44 = vadd.f32 %v7325_v21, %v850_v36  ;;  %1820 = vrot.lane.b32.xlu1 %v7507_v60, %s11069_s28  ;;  %v1473_v33 = vrot.slane %v7413_v49, 2 }
 0x1cf   : > { %v6508_v28 = vpop.eup %6507  ;;  %1099 = vst.msk [vmem:[#allocation2 + $0x79] sm:$0xff] %vm467_vm1, %v7558_v40  ;;  %v7578_v45 = vmul.f32 %v6506_v42, %v7407_v37  ;;  %v918_v46 = vsub.f32 0.0, %v7561_v41  ;;  %v7586_v0 = vadd.f32 %v7325_v21, %v848_v23 }
 0x1d0   : > { %11113 = vst [vmem:[#allocation7_spill] sm:$0xff] %v7567_v43  ;;  %v6510_v54 = vpop.eup %6509  ;;  %1102 = vst.msk [vmem:[#allocation2 + $0x99] sm:$0xff] %vm467_vm1, %v7567_v43  ;;  %v1008_v58 = vadd.f32 1.0, %v6508_v28  ;;  %2348 = vrot.lane.b32.xlu0 %v7474_v62, %s11073_s27  ;;  %v974_v9 = vmul.f32 1.442695, %v920_v29  ;;  %v7595_v49 = vsel %vm1467_vm5, %v1473_v33, %v1474_v25  ;;  %v921_v15 = vsub.f32 0.0, %v7571_v44 }
 0x1d1   : > { %v6512_v37 = vpop.eup %6511  ;;  %1100 = vst.msk [vmem:[#allocation2 + $0x81] sm:$0xff] %vm467_vm1, %v7578_v45  ;;  %v1006_v47 = vadd.f32 1.0, %v6510_v54  ;;  %v6128_v11 = vpop.f32.mrb[24].mxu0  ;;  %v970_v26 = vmul.f32 1.442695, %v918_v46  ;;  %v919_v63 = vsub.f32 0.0, %v7586_v0 }
 0x1d2   : > { %v6514_v14 = vpop.eup %6513  ;;  %6523 = vrcp.f32 %v1008_v58  ;;  %v1009_v62 = vadd.f32 1.0, %v6512_v37  ;;  %1954 = vrot.lane.b32.xlu1 %v7540_v5, %s11071_s18  ;;  %v853_v17 = vmul.f32 %v6128_v11, %v7320_v19  ;;  %v789_v18 = vpop.f32.mrb[25].mxu0 }
 0x1d3   : > { %6525 = vrcp.f32 %v1006_v47  ;;  %v1007_v24 = vadd.f32 1.0, %v6514_v14  ;;  %v851_v30 = vmul.f32 %v7320_v19, %v789_v18  ;;  %v6129_v31 = vpop.f32.mrb[26].mxu0 }
 0x1d4   : > { %v6516_v32 = vpop.eup %6515  ;;  %6527 = vrcp.f32 %v1009_v62  ;;  %1552 = vrot.lane.b32.xlu0 %v7595_v49, %s11067_s26  ;;  %v7611_v36 = vadd.f32 %v7325_v21, %v853_v17  ;;  %v854_v38 = vmul.f32 %v6129_v31, %v7320_v19  ;;  %v792_v39 = vpop.f32.mrb[27].mxu0  ;;  %v976_v17 = vmul.f32 1.442695, %v921_v15  ;;  %v1128_v15 = vld [vmem:[#allocation2 + $0x28] sm:$0x3] }
 0x1d5   : > { %v6518_v23 = vpop.eup %6517  ;;  %6529 = vrcp.f32 %v1007_v24  ;;  %v1012_v42 = vadd.f32 1.0, %v6516_v32  ;;  %v7615_v29 = vadd.f32 %v7325_v21, %v851_v30  ;;  %v852_v28 = vmul.f32 %v7320_v19, %v792_v39  ;;  %v7618_v46 = vld [vmem:[#allocation2 + $0x90] sm:$0xff] }
 0x1d6   : > { %v6520_v33 = vpop.eup %6519  ;;  %v1010_v53 = vadd.f32 1.0, %v6518_v23  ;;  %6531 = vpow2.f32 %v974_v9  ;;  %2216 = vrot.lane.b32.xlu1 %v7507_v60, %s11099_s20  ;;  %v924_v54 = vsub.f32 0.0, %v7611_v36  ;;  %v7624_v58 = vadd.f32 %v7325_v21, %v854_v38  ;;  %1189 = vst.msk [vmem:[#allocation3 + $0x60] sm:$0xff] %vm467_vm1, %v7618_v46  ;;  %v7628_v37 = vld [vmem:[#allocation2 + $0x78] sm:$0xff] }
 0x1d7   : > { %v6522_v47 = vpop.eup %6521  ;;  %6533 = vrcp.f32 %v1012_v42  ;;  %v1013_v11 = vadd.f32 1.0, %v6520_v33  ;;  %v922_v14 = vsub.f32 0.0, %v7615_v29  ;;  %v7632_v9 = vadd.f32 %v7325_v21, %v852_v28  ;;  %1187 = vst.msk [vmem:[#allocation3 + $0x50] sm:$0xff] %vm467_vm1, %v7628_v37  ;;  %v7636_v60 = vld [vmem:[#allocation2 + $0x98] sm:$0xff] }
 0x1d8   : > { %6535 = vrcp.f32 %v1010_v53  ;;  %v1011_v62 = vadd.f32 1.0, %v6522_v47  ;;  %1814 = vrot.lane.b32.xlu0 %v7600_v10, %s11069_s28  ;;  %v925_v18 = vsub.f32 0.0, %v7624_v58  ;;  %1190 = vst.msk [vmem:[#allocation3 + $0x68] sm:$0xff] %vm467_vm1, %v7636_v60  ;;  %v7643_v24 = vld [vmem:[#allocation2 + $0x80] sm:$0xff]  ;;  %v972_v30 = vmul.f32 1.442695, %v919_v63 }
 0x1d9   : > { %6537 = vrcp.f32 %v1013_v11  ;;  %v923_v31 = vsub.f32 0.0, %v7632_v9  ;;  %v6132_v32 = vpop.f32.mrb[28].mxu0  ;;  %1188 = vst.msk [vmem:[#allocation3 + $0x58] sm:$0xff] %vm467_vm1, %v7643_v24  ;;  %v982_v38 = vmul.f32 1.442695, %v924_v54  ;;  %v1266_v11 = vrot.slane %v1128_v15, 1 }
 0x1da   : > { %6539 = vrcp.f32 %v1011_v62  ;;  %2350 = vrot.lane.b32.xlu1 %v7540_v5, %s11073_s27  ;;  %v805_v39 = vpop.f32.mrb[29].mxu0  ;;  %v978_v23 = vmul.f32 1.442695, %v922_v14  ;;  %v984_v63 = vmul.f32 1.442695, %v925_v18 }
 0x1db   : > { %6541 = vpow2.f32 %v970_v26  ;;  %v6133_v42 = vpop.f32.mrb[30].mxu0  ;;  %v980_v5 = vmul.f32 1.442695, %v923_v31  ;;  %v855_v14 = vmul.f32 %v7320_v19, %v805_v39  ;;  %v1267_v31 = vsel %vm1257_vm4, %v1264_v50, %v1266_v11 }
 0x1dc   : > { %v6524_v28 = vpop.eup %6523  ;;  %6543 = vpow2.f32 %v976_v17  ;;  %1948 = vrot.lane.b32.xlu0 %v7595_v49, %s11071_s18  ;;  %v808_v33 = vpop.f32.mrb[31].mxu0 }
 0x1dd   : > { %v6526_v53 = vpop.eup %6525  ;;  %v7653_v47 = vmul.f32 %v6524_v28, %v7442_v2  ;;  %6545 = vpow2.f32 %v972_v30  ;;  %v857_v2 = vmul.f32 %v6132_v32, %v7320_v19 }
 0x1de   : > { %v6528_v62 = vpop.eup %6527  ;;  %v7656_v54 = vmul.f32 %v6526_v53, %v7452_v52  ;;  %1342 = vrot.lane.b32.xlu1 %v7600_v10, %s11051_s25  ;;  %6547 = vpow2.f32 %v982_v38  ;;  %v1476_v10 = vrot.slane %v1128_v15, 2  ;;  %v856_v38 = vmul.f32 %v7320_v19, %v808_v33 }
 0x1df   : > { %11114 = vst [vmem:[#allocation8_spill] sm:$0xff] %v7653_v47  ;;  %v6530_v26 = vpop.eup %6529  ;;  %1105 = vst.msk [vmem:[#allocation2 + $0xc1] sm:$0xff] %vm467_vm1, %v7653_v47  ;;  %v7663_v49 = vmul.f32 %v6528_v62, %v7466_v57  ;;  %6549 = vpow2.f32 %v978_v23  ;;  %v858_v57 = vmul.f32 %v6133_v42, %v7320_v19  ;;  %v7695_v42 = vadd.f32 %v7325_v21, %v855_v14 }
 0x1e0   : > { %v6532_v17 = vpop.eup %6531  ;;  %1103 = vst.msk [vmem:[#allocation2 + $0xa9] sm:$0xff] %vm467_vm1, %v7656_v54  ;;  %v7670_v52 = vmul.f32 %v6530_v26, %v7477_v20  ;;  %1691 = vrot.lane.b32.xlu0 %v7500_v55, %s11053_s21  ;;  %6551 = vpow2.f32 %v984_v63  ;;  %v7681_v20 = vadd.f32 %v7325_v21, %v857_v2  ;;  %v1477_v33 = vsel %vm1467_vm5, %v1474_v25, %v1476_v10 }
 0x1e1   : > { %11115 = vst [vmem:[#allocation9_spill] sm:$0xff] %v7663_v49  ;;  %v6534_v18 = vpop.eup %6533  ;;  %1106 = vst.msk [vmem:[#allocation2 + $0xc9] sm:$0xff] %vm467_vm1, %v7663_v49  ;;  %v1016_v30 = vadd.f32 1.0, %v6532_v17  ;;  %6553 = vpow2.f32 %v980_v5  ;;  %v7705_v19 = vadd.f32 %v7325_v21, %v858_v57 }
 0x1e2   : > { %v6536_v32 = vpop.eup %6535  ;;  %1104 = vst.msk [vmem:[#allocation2 + $0xb1] sm:$0xff] %vm467_vm1, %v7670_v52  ;;  %v7686_v15 = vmul.f32 %v6534_v18, %v7495_v48  ;;  %1344 = vrot.lane.b32.xlu1 %v1267_v31, %s11051_s25  ;;  %v928_v50 = vsub.f32 0.0, %v7681_v20  ;;  %s11118_s25 = smov 24  }
 0x1e3   : > { %v6538_v39 = vpop.eup %6537  ;;  %v7691_v23 = vmul.f32 %v6536_v32, %v7503_v56  ;;  %6555 = vrcp.f32 %v1016_v30  ;;  %v929_v14 = vsub.f32 0.0, %v7705_v19 }
 0x1e4   : > { %11116 = vst [vmem:[#allocation10_spill] sm:$0xff] %v7686_v15  ;;  %v6540_v28 = vpop.eup %6539  ;;  %1109 = vst.msk [vmem:[#allocation2 + $0xf1] sm:$0xff] %vm467_vm1, %v7686_v15  ;;  %v7700_v48 = vmul.f32 %v6538_v39, %v7515_v3  ;;  %2087 = vrot.lane.b32.xlu0 %v7500_v55, %s11118_s25  ;;  %v990_v53 = vmul.f32 1.442695, %v928_v50  ;;  %v7716_v3 = vadd.f32 %v7325_v21, %v856_v38  ;;  %v1488_v38 = vrot.slane %v7500_v55, 2 }
 0x1e5   : > { %v6542_v56 = vpop.eup %6541  ;;  %1107 = vst.msk [vmem:[#allocation2 + $0xd9] sm:$0xff] %vm467_vm1, %v7691_v23  ;;  %v7710_v63 = vmul.f32 %v6540_v28, %v7525_v6  ;;  %v926_v6 = vsub.f32 0.0, %v7695_v42  ;;  %v11134_v15 = vrot.slane %v7636_v60, 1 }
 0x1e6   : > { %11117 = vst [vmem:[#allocation11_spill] sm:$0xff] %v7700_v48  ;;  %v6544_v11 = vpop.eup %6543  ;;  %1110 = vst.msk [vmem:[#allocation2 + $0xf9] sm:$0xff] %vm467_vm1, %v7700_v48  ;;  %v1014_v5 = vadd.f32 1.0, %v6542_v56  ;;  %1554 = vrot.lane.b32.xlu1 %v1477_v33, %s11067_s26  ;;  %v7721_v62 = vld [vmem:[#allocation2 + $0xc0] sm:$0xff]  ;;  %6557 = vpow2.f32 %v990_v53  ;;  %v927_v18 = vsub.f32 0.0, %v7716_v3  ;;  %v11055_v56 = vrot.slane %v7521_v4, 2 }
 0x1e7   : > { %v6546_v26 = vpop.eup %6545  ;;  %1108 = vst.msk [vmem:[#allocation2 + $0xe1] sm:$0xff] %vm467_vm1, %v7710_v63  ;;  %v1017_v51 = vadd.f32 1.0, %v6544_v11  ;;  %1193 = vst.msk [vmem:[#allocation3 + $0x80] sm:$0xff] %vm467_vm1, %v7721_v62  ;;  %v7728_v21 = vld [vmem:[#allocation2 + $0xa8] sm:$0xff]  ;;  %v986_v53 = vmul.f32 1.442695, %v926_v6 }
 0x1e8   : > { %v6548_v25 = vpop.eup %6547  ;;  %6559 = vrcp.f32 %v1014_v5  ;;  %v1015_v2 = vadd.f32 1.0, %v6546_v26  ;;  %2083 = vrot.lane.b32.xlu0 %v7511_v61, %s11118_s25  ;;  %1191 = vst.msk [vmem:[#allocation3 + $0x70] sm:$0xff] %vm467_vm1, %v7728_v21  ;;  %v7735_v17 = vld [vmem:[#allocation2 + $0xc8] sm:$0xff]  ;;  %v992_v5 = vmul.f32 1.442695, %v929_v14 }
 0x1e9   : > { %v6550_v10 = vpop.eup %6549  ;;  %6561 = vrcp.f32 %v1017_v51  ;;  %v1020_v57 = vadd.f32 1.0, %v6548_v25  ;;  %1194 = vst.msk [vmem:[#allocation3 + $0x88] sm:$0xff] %vm467_vm1, %v7735_v17  ;;  %v7742_v39 = vld [vmem:[#allocation2 + $0xb0] sm:$0xff]  ;;  %v988_v25 = vmul.f32 1.442695, %v927_v18  ;;  %v1279_v18 = vrot.slane %v7521_v4, 1 }
 0x1ea   : > { %v6552_v30 = vpop.eup %6551  ;;  %6563 = vrcp.f32 %v1015_v2  ;;  %1816 = vrot.lane.b32.xlu1 %v1267_v31, %s11069_s28  ;;  %v1018_v32 = vadd.f32 1.0, %v6550_v10  ;;  %1192 = vst.msk [vmem:[#allocation3 + $0x78] sm:$0xff] %vm467_vm1, %v7742_v39  ;;  %v7770_v10 = vsel %vm1467_vm5, %v1488_v38, %v11055_v56  ;;  %v1274_v56 = vrot.slane %v7529_v8, 1 }
 0x1eb   : > { %v6554_v50 = vpop.eup %6553  ;;  %6565 = vrcp.f32 %v1020_v57  ;;  %v1021_v28 = vadd.f32 1.0, %v6552_v30  ;;  %v7747_v11 = vld [vmem:[#allocation2 + $0xf0] sm:$0xff]  ;;  %v1278_v57 = vrot.slane %v7500_v55, 1 }
 0x1ec   : > { %6567 = vrcp.f32 %v1018_v32  ;;  %1687 = vrot.lane.b32.xlu0 %v7511_v61, %s11053_s21  ;;  %v1019_v31 = vadd.f32 1.0, %v6554_v50  ;;  %1197 = vst.msk [vmem:[#allocation3 + $0xa0] sm:$0xff] %vm467_vm1, %v7747_v11  ;;  %v7753_v26 = vld [vmem:[#allocation2 + $0xd8] sm:$0xff] }
 0x1ed   : > { %v6556_v51 = vpop.eup %6555  ;;  %6569 = vrcp.f32 %v1021_v28  ;;  %1195 = vst.msk [vmem:[#allocation3 + $0x90] sm:$0xff] %vm467_vm1, %v7753_v26  ;;  %v7757_v6 = vld [vmem:[#allocation2 + $0xf8] sm:$0xff]  ;;  %v1280_v38 = vsel %vm1257_vm4, %v1278_v57, %v1279_v18 }
 0x1ee   : > { %v7760_v2 = vmul.f32 %v6556_v51, %v7552_v34  ;;  %6571 = vrcp.f32 %v1019_v31  ;;  %1950 = vrot.lane.b32.xlu1 %v1477_v33, %s11071_s18  ;;  %1198 = vst.msk [vmem:[#allocation3 + $0xa8] sm:$0xff] %vm467_vm1, %v7757_v6  ;;  %v7765_v14 = vld [vmem:[#allocation2 + $0xe0] sm:$0xff] }
 0x1ef   : > { %6573 = vpow2.f32 %v986_v53  ;;  %1196 = vst.msk [vmem:[#allocation3 + $0x98] sm:$0xff] %vm467_vm1, %v7765_v14 }
 0x1f0   : > { %11119 = vst [vmem:[#allocation12_spill] sm:$0xff] %v7760_v2  ;;  %1113 = vst.msk [vmem:[#allocation2 + $0x121] sm:$0xff] %vm467_vm1, %v7760_v2  ;;  %1564 = vrot.lane.b32.xlu0 %v7770_v10, %s11067_s26  ;;  %6575 = vpow2.f32 %v992_v5  ;;  %v6558_v34 = vpop.eup %6557  ;;  %v11126_v2 = vrot.slane %v7521_v4, 2 }
 0x1f1   : > { %6577 = vpow2.f32 %v988_v25  ;;  %v1024_v55 = vadd.f32 1.0, %v6558_v34 }
 0x1f2   : > { %v6560_v33 = vpop.eup %6559  ;;  %1693 = vrot.lane.b32.xlu1 %v7521_v4, %s11053_s21 }
 0x1f3   : > { %v6562_v30 = vpop.eup %6561  ;;  %v7783_v32 = vmul.f32 %v6560_v33, %v7561_v41  ;;  %6579 = vrcp.f32 %v1024_v55 }
 0x1f4   : > { %v6564_v50 = vpop.eup %6563  ;;  %v7789_v28 = vmul.f32 %v6562_v30, %v7571_v44  ;;  %1826 = vrot.lane.b32.xlu0 %v1280_v38, %s11069_s28 }
 0x1f5   : > { %v6566_v53 = vpop.eup %6565  ;;  %1111 = vst.msk [vmem:[#allocation2 + $0x109] sm:$0xff] %vm467_vm1, %v7783_v32  ;;  %v7795_v31 = vmul.f32 %v6564_v50, %v7586_v0 }
 0x1f6   : > { %11120 = vst [vmem:[#allocation13_spill] sm:$0xff] %v7789_v28  ;;  %v6568_v41 = vpop.eup %6567  ;;  %1114 = vst.msk [vmem:[#allocation2 + $0x129] sm:$0xff] %vm467_vm1, %v7789_v28  ;;  %v7800_v5 = vmul.f32 %v6566_v53, %v7611_v36  ;;  %2089 = vrot.lane.b32.xlu1 %v7521_v4, %s11118_s25 }
 0x1f7   : > { %v6570_v44 = vpop.eup %6569  ;;  %1112 = vst.msk [vmem:[#allocation2 + $0x111] sm:$0xff] %vm467_vm1, %v7795_v31  ;;  %v7807_v51 = vmul.f32 %v6568_v41, %v7615_v29  ;;  %v7809_v25 = vld [vmem:[#allocation2 + $0x120] sm:$0xff]  ;;  %v1137_v41 = vld [vmem:[#allocation2 + $0x70] sm:$0x3] }
 0x1f8   : > { %11121 = vst [vmem:[#allocation14_spill] sm:$0xff] %v7800_v5  ;;  %v6572_v0 = vpop.eup %6571  ;;  %1117 = vst.msk [vmem:[#allocation2 + $0x151] sm:$0xff] %vm467_vm1, %v7800_v5  ;;  %v7814_v57 = vmul.f32 %v6570_v44, %v7624_v58  ;;  %1960 = vrot.lane.b32.xlu0 %v7770_v10, %s11071_s18 }
 0x1f9   : > { %1201 = vst.msk [vmem:[#allocation3 + $0xc0] sm:$0xff] %vm467_vm1, %v7809_v25  ;;  %v6574_v36 = vpop.eup %6573  ;;  %1115 = vst.msk [vmem:[#allocation2 + $0x139] sm:$0xff] %vm467_vm1, %v7807_v51  ;;  %v7823_v29 = vmul.f32 %v6572_v0, %v7632_v9  ;;  %v1483_v0 = vrot.slane %v7511_v61, 2 }
 0x1fa   : > { %11122 = vst [vmem:[#allocation15_spill] sm:$0xff] %v7814_v57  ;;  %v6576_v34 = vpop.eup %6575  ;;  %1118 = vst.msk [vmem:[#allocation2 + $0x159] sm:$0xff] %vm467_vm1, %v7814_v57  ;;  %2085 = vrot.lane.b32.xlu1 %v7529_v8, %s11118_s25  ;;  %v1022_v58 = vadd.f32 1.0, %v6574_v36  ;;  %v11062_v36 = vrot.slane %v7529_v8, 2 }
 0x1fb   : > { %v6578_v33 = vpop.eup %6577  ;;  %1116 = vst.msk [vmem:[#allocation2 + $0x141] sm:$0xff] %vm467_vm1, %v7823_v29  ;;  %v1025_v55 = vadd.f32 1.0, %v6576_v34 }
 0x1fc   : > { %2222 = vrot.lane.b32.xlu0 %v1280_v38, %s11099_s20  ;;  %6581 = vrcp.f32 %v1022_v58  ;;  %v1023_v30 = vadd.f32 1.0, %v6578_v33  ;;  %v7832_v50 = vld [vmem:[#allocation2 + $0x108] sm:$0xff] }
 0x1fd   : > { %6583 = vrcp.f32 %v1025_v55  ;;  %1199 = vst.msk [vmem:[#allocation3 + $0xb0] sm:$0xff] %vm467_vm1, %v7832_v50  ;;  %v7836_v9 = vld [vmem:[#allocation2 + $0x128] sm:$0xff]  ;;  %v6580_v53 = vpop.eup %6579  ;;  %v1281_v55 = vrot.slane %v1137_v41, 1 }
 0x1fe   : > { %1689 = vrot.lane.b32.xlu1 %v7529_v8, %s11053_s21  ;;  %6585 = vrcp.f32 %v1023_v30  ;;  %1202 = vst.msk [vmem:[#allocation3 + $0xc8] sm:$0xff] %vm467_vm1, %v7836_v9  ;;  %v7842_v44 = vld [vmem:[#allocation2 + $0x110] sm:$0xff]  ;;  %v7847_v34 = vmul.f32 %v6580_v53, %v7681_v20  ;;  %s11124_s21 = smov 4   ;;  %v1273_v53 = vrot.slane %v7511_v61, 1 }
 0x1ff   : > { %1200 = vst.msk [vmem:[#allocation3 + $0xb8] sm:$0xff] %vm467_vm1, %v7842_v44  ;;  %v7851_v58 = vld [vmem:[#allocation2 + $0x150] sm:$0xff] }
 0x200   : > { %11123 = vst [vmem:[#allocation16_spill] sm:$0xff] %v7847_v34  ;;  %2356 = vrot.lane.b32.xlu0 %v7770_v10, %s11073_s27  ;;  %1205 = vst.msk [vmem:[#allocation3 + $0xe0] sm:$0xff] %vm467_vm1, %v7851_v58  ;;  %v7857_v33 = vld [vmem:[#allocation2 + $0x138] sm:$0xff]  ;;  %v1485_v10 = vsel %vm1467_vm5, %v1483_v0, %v11062_v36  ;;  %v1275_v0 = vsel %vm1257_vm4, %v1273_v53, %v1274_v56 }
 0x201   : > { %1121 = vst.msk [vmem:[#allocation2 + $0x181] sm:$0xff] %vm467_vm1, %v7847_v34  ;;  %v7861_v30 = vld [vmem:[#allocation2 + $0x158] sm:$0xff]  ;;  %1203 = vst.msk [vmem:[#allocation3 + $0xd0] sm:$0xff] %vm467_vm1, %v7857_v33  ;;  %v1491_v34 = vrot.slane %v1137_v41, 2 }
 0x202   : > { %1354 = vrot.lane.b32.xlu1 %v1280_v38, %s11124_s21  ;;  %1206 = vst.msk [vmem:[#allocation3 + $0xe8] sm:$0xff] %vm467_vm1, %v7861_v30  ;;  %v7868_v20 = vld [vmem:[#allocation2 + $0x140] sm:$0xff]  ;;  %v1282_v38 = vsel %vm1257_vm4, %v1279_v18, %v1281_v55  ;;  %v11075_v55 = vrot.slane %v7636_v60, 2 }
 0x203   : > { %1204 = vst.msk [vmem:[#allocation3 + $0xd8] sm:$0xff] %vm467_vm1, %v7868_v20  ;;  %v1492_v18 = vsel %vm1467_vm5, %v11126_v2, %v1491_v34  ;;  %v6453_v2 = vld [vmem:[%s11128_s4] sm:$0xff]   ;;  %v1498_v34 = vrot.slane %v7618_v46, 2 }
 0x204   : > { %1560 = vrot.lane.b32.xlu0 %v1485_v10, %s11067_s26  ;;  %6134 = vmatprep.subr.bf16.mxu0 %v6453_v2 }
 0x205   : > { %6135 = vmatpush3.bf16.msra.mxu0 %v6453_v2  ;;  %6278 = vmatprep.subr.bf16.mxu1 %v6453_v2 }
 0x206   : > { %v6582_v57 = vpop.eup %6581  ;;  %1356 = vrot.lane.b32.xlu1 %v1282_v38, %s11124_s21  ;;  %6281 = vmatpush3.bf16.msra.mxu1 %v6453_v2 }
 0x207   : > { %v6584_v5 = vpop.eup %6583  ;;  %v7884_v61 = vmul.f32 %v6582_v57, %v7695_v42 }
 0x208   : > { %v6586_v36 = vpop.eup %6585  ;;  %2218 = vrot.lane.b32.xlu0 %v1275_v0, %s11099_s20  ;;  %v7888_v28 = vmul.f32 %v6584_v5, %v7705_v19  ;;  %v1134_v19 = vld [vmem:[#allocation2 + $0x58] sm:$0x3] }
 0x209   : > { %1119 = vst.msk [vmem:[#allocation2 + $0x169] sm:$0xff] %vm467_vm1, %v7884_v61  ;;  %v7896_v41 = vmul.f32 %v6586_v36, %v7716_v3  ;;  %v1276_v3 = vrot.slane %v1134_v19, 1  ;;  %v1486_v57 = vrot.slane %v1134_v19, 2  ;;  %v6454_v36 = vld [vmem:[%s11128_s4 + $0x8] sm:$0xff]  }
 0x20a   : > { %11125 = vst [vmem:[#allocation17_spill] sm:$0xff] %v7888_v28  ;;  %1566 = vrot.lane.b32.xlu1 %v1492_v18, %s11067_s26  ;;  %1122 = vst.msk [vmem:[#allocation2 + $0x189] sm:$0xff] %vm467_vm1, %v7888_v28  ;;  %s11127_s26 = smov 12   ;;  %6136 = vmatprep.subr.bf16.mxu0 %v6454_v36 }
 0x20b   : > { %1120 = vst.msk [vmem:[#allocation2 + $0x171] sm:$0xff] %vm467_vm1, %v7896_v41  ;;  %v1277_v5 = vsel %vm1257_vm4, %v1274_v56, %v1276_v3  ;;  %v11129_v56 = vrot.slane %v7529_v8, 2  ;;  %6137 = vmatpush3.bf16.msra.mxu0 %v6454_v36  ;;  %6279 = vmatprep.subr.bf16.mxu1 %v6454_v36  ;;  %v1288_v8 = vrot.slane %v7618_v46, 1 }
 0x20c   : > { %2352 = vrot.lane.b32.xlu0 %v1485_v10, %s11073_s27  ;;  %6282 = vmatpush3.bf16.msra.mxu1 %v6454_v36 }
 0x20e   : > { %1828 = vrot.lane.b32.xlu1 %v1282_v38, %s11069_s28 }
 0x210   : > { %1822 = vrot.lane.b32.xlu0 %v1275_v0, %s11069_s28  ;;  %v7906_v4 = vld [vmem:[#allocation2 + $0x168] sm:$0xff]  ;;  %s11133_s28 = smov 20  }
 0x211   : > { %1207 = vst.msk [vmem:[#allocation3 + $0xf0] sm:$0xff] %vm467_vm1, %v7906_v4 }
 0x212   : > { %1962 = vrot.lane.b32.xlu1 %v1492_v18, %s11071_s18  ;;  %v7911_v42 = vld [vmem:[#allocation2 + $0x170] sm:$0xff] }
 0x213   : > { %1208 = vst.msk [vmem:[#allocation3 + $0xf8] sm:$0xff] %vm467_vm1, %v7911_v42 }
 0x214   : > { %1956 = vrot.lane.b32.xlu0 %v1485_v10, %s11071_s18  ;;  %v1487_v10 = vsel %vm1467_vm5, %v11129_v56, %v1486_v57  ;;  %s11131_s18 = smov 16  }
 0x216   : > { %2224 = vrot.lane.b32.xlu1 %v1282_v38, %s11099_s20  ;;  %v6455_v38 = vld [vmem:[%s11128_s4 + $0x10] ss:$0 sps:$4 sm:$0x33]  }
 0x217   : > { %6317 = vmatprep.subr.msk.bf16.mxu0 %vm2594_vm8, %v6455_v38  ;;  %v2596_v3 = vsel %vm2594_vm8, %v6455_v38, 0  ;;  %6318 = vmatprep.subr.msk.bf16.mxu1 %vm2594_vm8, %v6455_v38 }
 0x218   : > { %1699 = vrot.lane.b32.xlu0 %v7618_v46, %s11127_s26  ;;  %6139 = vmatpush3.bf16.msra.mxu0 %v2596_v3 }
 0x219   : > { %6283 = vmatpush3.bf16.msra.mxu1 %v2596_v3  ;;  %v1493_v3 = vrot.slane %v7628_v37, 2 }
 0x21a   : > { %2358 = vrot.lane.b32.xlu1 %v1492_v18, %s11073_s27  ;;  %v11076_v18 = vrot.slane %v7636_v60, 1  ;;  %s11132_s27 = smov 32  }
 0x21c   : > { %2095 = vrot.lane.b32.xlu0 %v7618_v46, %s11118_s25  ;;  %v1290_v46 = vsel %vm1257_vm4, %v1288_v8, %v11076_v18 }
 0x21e   : > { %1350 = vrot.lane.b32.xlu1 %v1275_v0, %s11124_s21  ;;  %v1500_v0 = vsel %vm1467_vm5, %v1498_v34, %v11075_v55 }
 0x220   : > { %2091 = vrot.lane.b32.xlu0 %v7628_v37, %s11118_s25 }
 0x222   : > { %1352 = vrot.lane.b32.xlu1 %v1277_v5, %s11124_s21 }
 0x224   : > { %1695 = vrot.lane.b32.xlu0 %v7628_v37, %s11127_s26 }
 0x226   : > { %v7940_v53 = vpop.permute.xlu0 %1683  ;;  %1562 = vrot.lane.b32.xlu1 %v1487_v10, %s11130_s0 }
 0x228   : > { %v7951_v19 = vpop.permute.xlu1 %1685  ;;  %1572 = vrot.lane.b32.xlu0 %v1500_v0, %s11130_s0 }
 0x22a   : > { %v7957_v2 = vpop.permute.xlu0 %2079  ;;  %2220 = vrot.lane.b32.xlu1 %v1277_v5, %s11099_s20 }
 0x22c   : > { %v7963_v57 = vpop.permute.xlu1 %2081  ;;  %1834 = vrot.lane.b32.xlu0 %v1290_v46, %s11131_s18 }
 0x22e   : > { %v1680_v36 = vpop.permute.xlu0 %1679  ;;  %2354 = vrot.lane.b32.xlu1 %v1487_v10, %s11132_s27 }
 0x22f   : > { %1776 = vst.msk [vmem:[#allocation3] sm:$0xff] %vm1775_vm9, %v1680_v36  ;;  %v11077_v36 = vrot.slane %v7643_v24, 2 }
 0x230   : > { %v1682_v34 = vpop.permute.xlu1 %1681  ;;  %1968 = vrot.lane.b32.xlu0 %v1500_v0, %s11133_s28 }
 0x231   : > { %1777 = vst.msk [vmem:[#allocation3 + $0x8] sm:$0xff] %vm1775_vm9, %v1682_v34  ;;  %v1495_v34 = vsel %vm1467_vm5, %v1493_v3, %v11077_v36  ;;  %v1143_v36 = vld [vmem:[#allocation2 + $0xa0] sm:$0x3] }
 0x232   : > { %v1557_v56 = vpop.permute.xlu0 %1556  ;;  %1824 = vrot.lane.b32.xlu1 %v1277_v5, %s11131_s18  ;;  %v1501_v47 = vrot.slane %v1143_v36, 2 }
 0x234   : > { %v1347_v38 = vpop.permute.xlu1 %1346  ;;  %2230 = vrot.lane.b32.xlu0 %v1290_v46, %s11099_s20 }
 0x235   : > { %1439 = vst.msk [vmem:[#allocation3 + $0x20] sm:$0xff] %vm1434_vm6, %v1347_v38 }
 0x236   : > { %1649 = vst.msk [vmem:[#allocation3 + $0x20] sm:$0xff] %vm1644_vm7, %v1557_v56  ;;  %v1819_v8 = vpop.permute.xlu0 %1818  ;;  %1958 = vrot.lane.b32.xlu1 %v1487_v10, %s11133_s28  ;;  %v1283_v56 = vrot.slane %v7628_v37, 1  ;;  %v11080_v10 = vrot.slane %v7643_v24, 1 }
 0x238   : > { %v1349_v55 = vpop.permute.xlu1 %1348  ;;  %2364 = vrot.lane.b32.xlu0 %v1500_v0, %s11132_s27 }
 0x239   : > { %1440 = vst.msk [vmem:[#allocation3 + $0x28] sm:$0xff] %vm1434_vm6, %v1349_v55  ;;  %v7993_v55 = vsel %vm1257_vm4, %v1283_v56, %v11080_v10  ;;  %v1291_v56 = vrot.slane %v1143_v36, 1 }
 0x23a   : > { %v1953_v5 = vpop.permute.xlu0 %1952  ;;  %1701 = vrot.lane.b32.xlu1 %v7636_v60, %s11127_s26 }
 0x23b   : > { %v1292_v49 = vsel %vm1257_vm4, %v11134_v15, %v1291_v56  ;;  %v11135_v15 = vrot.slane %v7636_v60, 2 }
 0x23c   : > { %v1559_v38 = vpop.permute.xlu1 %1558  ;;  %1568 = vrot.lane.b32.xlu0 %v1495_v34, %s11130_s0 }
 0x23d   : > { %1650 = vst.msk [vmem:[#allocation3 + $0x28] sm:$0xff] %vm1644_vm7, %v1559_v38  ;;  %v1502_v36 = vsel %vm1467_vm5, %v11135_v15, %v1501_v47  ;;  %v11136_v15 = vrot.slane %v7643_v24, 1 }
 0x23e   : > { %v2215_v0 = vpop.permute.xlu0 %2214  ;;  %2097 = vrot.lane.b32.xlu1 %v7636_v60, %s11118_s25 }
 0x240   : > { %v1821_v18 = vpop.permute.xlu1 %1820  ;;  %2226 = vrot.lane.b32.xlu0 %v7993_v55, %s11099_s20 }
 0x242   : > { %v2349_v37 = vpop.permute.xlu0 %2348  ;;  %2093 = vrot.lane.b32.xlu1 %v7643_v24, %s11118_s25 }
 0x244   : > { %v1955_v3 = vpop.permute.xlu1 %1954  ;;  %2360 = vrot.lane.b32.xlu0 %v1495_v34, %s11132_s27 }
 0x246   : > { %v1553_v38 = vpop.permute.xlu0 %1552  ;;  %1697 = vrot.lane.b32.xlu1 %v7643_v24, %s11127_s26 }
 0x248   : > { %v8002_v28 = vpop.permute.xlu1 %2216  ;;  %1830 = vrot.lane.b32.xlu0 %v7993_v55, %s11131_s18 }
 0x24a   : > { %v1815_v10 = vpop.permute.xlu0 %1814  ;;  %1362 = vrot.lane.b32.xlu1 %v1290_v46, %s11124_s21 }
 0x24b   : > { %1911 = vst.msk [vmem:[#allocation3] sm:$0xff] %vm1910_vm10, %v1815_v10 }
 0x24c   : > { %v2351_v48 = vpop.permute.xlu1 %2350  ;;  %1964 = vrot.lane.b32.xlu0 %v1495_v34, %s11133_s28 }
 0x24e   : > { %v1949_v43 = vpop.permute.xlu0 %1948  ;;  %1364 = vrot.lane.b32.xlu1 %v1292_v49, %s11124_s21 }
 0x24f   : > { %2045 = vst.msk [vmem:[#allocation3] sm:$0xff] %vm2044_vm11, %v1949_v43 }
 0x250   : > { %2176 = vst.msk [vmem:[#allocation3] sm:$0xff] %vm2175_vm12, %v7957_v2  ;;  %v1343_v46 = vpop.permute.xlu1 %1342  ;;  %1707 = vrot.lane.b32.xlu0 %v7721_v62, %s11127_s26 }
 0x251   : > { %2311 = vst.msk [vmem:[#allocation3] sm:$0xff] %vm2310_vm13, %v2215_v0  ;;  %v1299_v0 = vrot.slane %v7735_v17, 1 }
 0x252   : > { %1437 = vst.msk [vmem:[#allocation3 + $0x10] sm:$0xff] %vm1434_vm6, %v1343_v46  ;;  %v8025_v43 = vpop.permute.xlu0 %1691  ;;  %1574 = vrot.lane.b32.xlu1 %v1502_v36, %s11130_s0 }
 0x253   : > { %2445 = vst.msk [vmem:[#allocation3] sm:$0xff] %vm2444_vm14, %v2349_v37 }
 0x254   : > { %1647 = vst.msk [vmem:[#allocation3 + $0x10] sm:$0xff] %vm1644_vm7, %v1553_v38  ;;  %v1345_v2 = vpop.permute.xlu1 %1344  ;;  %2103 = vrot.lane.b32.xlu0 %v7721_v62, %s11118_s25  ;;  %v1140_v38 = vld [vmem:[#allocation2 + $0x88] sm:$0x3] }
 0x255   : > { %1778 = vst.msk [vmem:[#allocation3 + $0x10] sm:$0xff] %vm1775_vm9, %v7940_v53  ;;  %v1508_v53 = vrot.slane %v7721_v62, 2  ;;  %v1286_v56 = vrot.slane %v1140_v38, 1 }
 0x256   : > { %1913 = vst.msk [vmem:[#allocation3 + $0x10] sm:$0xff] %vm1910_vm10, %v1819_v8  ;;  %v8035_v60 = vpop.permute.xlu0 %2087  ;;  %1836 = vrot.lane.b32.xlu1 %v1292_v49, %s11131_s18  ;;  %v1509_v8 = vrot.slane %v7735_v17, 2 }
 0x257   : > { %2047 = vst.msk [vmem:[#allocation3 + $0x10] sm:$0xff] %vm2044_vm11, %v1953_v5 }
 0x258   : > { %1438 = vst.msk [vmem:[#allocation3 + $0x18] sm:$0xff] %vm1434_vm6, %v1345_v2  ;;  %v1555_v47 = vpop.permute.xlu1 %1554  ;;  %2099 = vrot.lane.b32.xlu0 %v7728_v21, %s11118_s25  ;;  %v1510_v10 = vsel %vm1467_vm5, %v1508_v53, %v1509_v8 }
 0x259   : > { %1648 = vst.msk [vmem:[#allocation3 + $0x18] sm:$0xff] %vm1644_vm7, %v1555_v47 }
 0x25a   : > { %1779 = vst.msk [vmem:[#allocation3 + $0x18] sm:$0xff] %vm1775_vm9, %v7951_v19  ;;  %v2084_v5 = vpop.permute.xlu0 %2083  ;;  %1970 = vrot.lane.b32.xlu1 %v1502_v36, %s11133_s28  ;;  %v1298_v19 = vrot.slane %v7721_v62, 1  ;;  %v2477_v2 = vld [vmem:[#allocation3] sm:$0xff] }
 0x25b   : > { %1914 = vst.msk [vmem:[#allocation3 + $0x18] sm:$0xff] %vm1910_vm10, %v1821_v18 }
 0x25c   : > { %2178 = vst.msk [vmem:[#allocation3 + $0x10] sm:$0xff] %vm2175_vm12, %v2084_v5  ;;  %v1817_v34 = vpop.permute.xlu1 %1816  ;;  %1703 = vrot.lane.b32.xlu0 %v7728_v21, %s11127_s26  ;;  %v11137_v5 = vrot.slane %v7643_v24, 2 }
 0x25d   : > { %2048 = vst.msk [vmem:[#allocation3 + $0x18] sm:$0xff] %vm2044_vm11, %v1955_v3  ;;  %v8064_v3 = vsel %vm1257_vm4, %v1298_v19, %v1299_v0 }
 0x25e   : > { %1912 = vst.msk [vmem:[#allocation3 + $0x8] sm:$0xff] %vm1910_vm10, %v1817_v34  ;;  %v1688_v37 = vpop.permute.xlu0 %1687  ;;  %2232 = vrot.lane.b32.xlu1 %v1292_v49, %s11099_s20 }
 0x25f   : > { %1780 = vst.msk [vmem:[#allocation3 + $0x20] sm:$0xff] %vm1775_vm9, %v1688_v37  ;;  %v1503_v37 = vrot.slane %v7728_v21, 2 }
 0x260   : > { %v1951_v18 = vpop.permute.xlu1 %1950  ;;  %1580 = vrot.lane.b32.xlu0 %v1510_v10, %s11130_s0 }
 0x261   : > { %2046 = vst.msk [vmem:[#allocation3 + $0x8] sm:$0xff] %vm2044_vm11, %v1951_v18  ;;  %v1504_v18 = vrot.slane %v7742_v39, 2 }
 0x262   : > { %2177 = vst.msk [vmem:[#allocation3 + $0x8] sm:$0xff] %vm2175_vm12, %v7963_v57  ;;  %v1565_v62 = vpop.permute.xlu0 %1564  ;;  %2366 = vrot.lane.b32.xlu1 %v1502_v36, %s11132_s27 }
 0x263   : > { %2312 = vst.msk [vmem:[#allocation3 + $0x8] sm:$0xff] %vm2310_vm13, %v8002_v28  ;;  %v1287_v28 = vsel %vm1257_vm4, %v11136_v15, %v1286_v56  ;;  %v1505_v24 = vsel %vm1467_vm5, %v1503_v37, %v1504_v18  ;;  %v1293_v15 = vrot.slane %v7728_v21, 1 }
 0x264   : > { %2446 = vst.msk [vmem:[#allocation3 + $0x8] sm:$0xff] %vm2444_vm14, %v2351_v48  ;;  %v8072_v49 = vpop.permute.xlu1 %1693  ;;  %1842 = vrot.lane.b32.xlu0 %v8064_v3, %s11131_s18  ;;  %v1496_v48 = vrot.slane %v1140_v38, 2 }
 0x266   : > { %v8076_v46 = vpop.permute.xlu0 %1826  ;;  %1358 = vrot.lane.b32.xlu1 %v7993_v55, %s11124_s21  ;;  %v1497_v34 = vsel %vm1467_vm5, %v11137_v5, %v1496_v48  ;;  %v1294_v48 = vrot.slane %v7742_v39, 1 }
 0x268   : > { %v8080_v57 = vpop.permute.xlu1 %2089  ;;  %1976 = vrot.lane.b32.xlu0 %v1510_v10, %s11133_s28 }
 0x26a   : > { %v8086_v36 = vpop.permute.xlu0 %1960  ;;  %1360 = vrot.lane.b32.xlu1 %v1287_v28, %s11124_s21 }
 0x26b   : > { %v2478_v47 = vld [vmem:[#allocation3 + $0x8] sm:$0xff] }
 0x26c   : > { %v2086_v53 = vpop.permute.xlu1 %2085  ;;  %2238 = vrot.lane.b32.xlu0 %v8064_v3, %s11099_s20  ;;  %v2509_v55 = vpack.c.bf16 %v2478_v47, %v2477_v2  ;;  %v8114_v47 = vsel %vm1257_vm4, %v1293_v15, %v1294_v48 }
 0x26d   : > { %2179 = vst.msk [vmem:[#allocation3 + $0x18] sm:$0xff] %vm2175_vm12, %v2086_v53 }
 0x26e   : > { %6140 = vmatprep.mubr.msk.bf16.mxu0 %vm2545_vm15, %v2509_v55  ;;  %v2223_v19 = vpop.permute.xlu0 %2222  ;;  %1570 = vrot.lane.b32.xlu1 %v1497_v34, %s11130_s0 }
 0x270   : > { %v1690_v38 = vpop.permute.xlu1 %1689  ;;  %2372 = vrot.lane.b32.xlu0 %v1510_v10, %s11132_s27 }
 0x271   : > { %1781 = vst.msk [vmem:[#allocation3 + $0x28] sm:$0xff] %vm1775_vm9, %v1690_v38 }
 0x272   : > { %v2357_v56 = vpop.permute.xlu0 %2356  ;;  %2228 = vrot.lane.b32.xlu1 %v1287_v28, %s11099_s20 }
 0x274   : > { %v1355_v2 = vpop.permute.xlu1 %1354  ;;  %1576 = vrot.lane.b32.xlu0 %v1505_v24, %s11130_s0 }
 0x275   : > { %1443 = vst.msk [vmem:[#allocation3 + $0x40] sm:$0xff] %vm1434_vm6, %v1355_v2  ;;  %v1149_v2 = vld [vmem:[#allocation2 + $0xd0] sm:$0x3] }
 0x276   : > { %1653 = vst.msk [vmem:[#allocation3 + $0x40] sm:$0xff] %vm1644_vm7, %v1565_v62  ;;  %v1561_v10 = vpop.permute.xlu0 %1560  ;;  %2362 = vrot.lane.b32.xlu1 %v1497_v34, %s11132_s27 }
 0x278   : > { %v1357_v53 = vpop.permute.xlu1 %1356  ;;  %2234 = vrot.lane.b32.xlu0 %v8114_v47, %s11099_s20 }
 0x279   : > { %1444 = vst.msk [vmem:[#allocation3 + $0x48] sm:$0xff] %vm1434_vm6, %v1357_v53 }
 0x27a   : > { %v2219_v21 = vpop.permute.xlu0 %2218  ;;  %1832 = vrot.lane.b32.xlu1 %v1287_v28, %s11131_s18 }
 0x27b   : > { %2313 = vst.msk [vmem:[#allocation3 + $0x10] sm:$0xff] %vm2310_vm13, %v2219_v21  ;;  %v1519_v21 = vrot.slane %v7757_v6, 2 }
 0x27c   : > { %v1567_v62 = vpop.permute.xlu1 %1566  ;;  %2368 = vrot.lane.b32.xlu0 %v1505_v24, %s11132_s27 }
 0x27d   : > { %1654 = vst.msk [vmem:[#allocation3 + $0x48] sm:$0xff] %vm1644_vm7, %v1567_v62 }
 0x27e   : > { %v2353_v55 = vpop.permute.xlu0 %2352  ;;  %1966 = vrot.lane.b32.xlu1 %v1497_v34, %s11133_s28 }
 0x27f   : > { %2447 = vst.msk [vmem:[#allocation3 + $0x10] sm:$0xff] %vm2444_vm14, %v2353_v55 }
 0x280   : > { %v1829_v5 = vpop.permute.xlu1 %1828  ;;  %1838 = vrot.lane.b32.xlu0 %v8114_v47, %s11131_s18 }
 0x282   : > { %v1823_v37 = vpop.permute.xlu0 %1822  ;;  %1709 = vrot.lane.b32.xlu1 %v7735_v17, %s11127_s26 }
 0x283   : > { %1915 = vst.msk [vmem:[#allocation3 + $0x20] sm:$0xff] %vm1910_vm10, %v1823_v37 }
 0x284   : > { %v1963_v28 = vpop.permute.xlu1 %1962  ;;  %1972 = vrot.lane.b32.xlu0 %v1505_v24, %s11133_s28 }
 0x286   : > { %v1957_v38 = vpop.permute.xlu0 %1956  ;;  %2105 = vrot.lane.b32.xlu1 %v7735_v17, %s11118_s25 }
 0x287   : > { %2049 = vst.msk [vmem:[#allocation3 + $0x20] sm:$0xff] %vm2044_vm11, %v1957_v38  ;;  %v1308_v38 = vrot.slane %v7747_v11, 1 }
 0x288   : > { %2180 = vst.msk [vmem:[#allocation3 + $0x20] sm:$0xff] %vm2175_vm12, %v8035_v60  ;;  %v8136_v34 = vpop.permute.xlu1 %2224  ;;  %1715 = vrot.lane.b32.xlu0 %v7747_v11, %s11127_s26 }
 0x289   : > { %2315 = vst.msk [vmem:[#allocation3 + $0x20] sm:$0xff] %vm2310_vm13, %v2223_v19  ;;  %v1301_v19 = vrot.slane %v1149_v2, 1 }
 0x28a   : > { %2449 = vst.msk [vmem:[#allocation3 + $0x20] sm:$0xff] %vm2444_vm14, %v2357_v56  ;;  %v8142_v15 = vpop.permute.xlu0 %1699  ;;  %2101 = vrot.lane.b32.xlu1 %v7742_v39, %s11118_s25 }
 0x28c   : > { %v8146_v24 = vpop.permute.xlu1 %2358  ;;  %2111 = vrot.lane.b32.xlu0 %v7747_v11, %s11118_s25 }
 0x28e   : > { %v8150_v60 = vpop.permute.xlu0 %2095  ;;  %1705 = vrot.lane.b32.xlu1 %v7742_v39, %s11127_s26 }
 0x290   : > { %v1351_v53 = vpop.permute.xlu1 %1350  ;;  %2107 = vrot.lane.b32.xlu0 %v7753_v26, %s11118_s25 }
 0x291   : > { %1441 = vst.msk [vmem:[#allocation3 + $0x30] sm:$0xff] %vm1434_vm6, %v1351_v53 }
 0x292   : > { %1651 = vst.msk [vmem:[#allocation3 + $0x30] sm:$0xff] %vm1644_vm7, %v1561_v10  ;;  %v2092_v56 = vpop.permute.xlu0 %2091  ;;  %1370 = vrot.lane.b32.xlu1 %v8064_v3, %s11124_s21  ;;  %v1302_v3 = vsel %vm1257_vm4, %v1299_v0, %v1301_v19  ;;  %v1511_v10 = vrot.slane %v1149_v2, 2  ;;  %v1514_v19 = vrot.slane %v7765_v14, 2 }
 0x293   : > { %1782 = vst.msk [vmem:[#allocation3 + $0x30] sm:$0xff] %vm1775_vm9, %v8025_v43  ;;  %v1518_v43 = vrot.slane %v7747_v11, 2 }
 0x294   : > { %1917 = vst.msk [vmem:[#allocation3 + $0x30] sm:$0xff] %vm1910_vm10, %v8076_v46  ;;  %v1353_v62 = vpop.permute.xlu1 %1352  ;;  %1711 = vrot.lane.b32.xlu0 %v7753_v26, %s11127_s26  ;;  %v1512_v0 = vsel %vm1467_vm5, %v1509_v8, %v1511_v10 }
 0x295   : > { %2051 = vst.msk [vmem:[#allocation3 + $0x30] sm:$0xff] %vm2044_vm11, %v8086_v36  ;;  %v1520_v46 = vsel %vm1467_vm5, %v1518_v43, %v1519_v21  ;;  %v1309_v36 = vrot.slane %v7757_v6, 1 }
 0x296   : > { %1442 = vst.msk [vmem:[#allocation3 + $0x38] sm:$0xff] %vm1434_vm6, %v1353_v62  ;;  %v1696_v55 = vpop.permute.xlu0 %1695  ;;  %1372 = vrot.lane.b32.xlu1 %v1302_v3, %s11124_s21  ;;  %v2479_v62 = vld [vmem:[#allocation3 + $0x10] sm:$0xff] }
 0x297   : > { %2182 = vst.msk [vmem:[#allocation3 + $0x30] sm:$0xff] %vm2175_vm12, %v2092_v56  ;;  %v8196_v53 = vsel %vm1257_vm4, %v1308_v38, %v1309_v36  ;;  %v1146_v38 = vld [vmem:[#allocation2 + $0xb8] sm:$0x3] }
 0x298   : > { %1784 = vst.msk [vmem:[#allocation3 + $0x40] sm:$0xff] %vm1775_vm9, %v1696_v55  ;;  %v1563_v37 = vpop.permute.xlu1 %1562  ;;  %1588 = vrot.lane.b32.xlu0 %v1520_v46, %s11130_s0  ;;  %v1513_v55 = vrot.slane %v7753_v26, 2 }
 0x299   : > { %1652 = vst.msk [vmem:[#allocation3 + $0x38] sm:$0xff] %vm1644_vm7, %v1563_v37 }
 0x29a   : > { %1783 = vst.msk [vmem:[#allocation3 + $0x38] sm:$0xff] %vm1775_vm9, %v8072_v49  ;;  %v8189_v2 = vpop.permute.xlu0 %1572  ;;  %1582 = vrot.lane.b32.xlu1 %v1512_v0, %s11130_s0 }
 0x29b   : > { %1918 = vst.msk [vmem:[#allocation3 + $0x38] sm:$0xff] %vm1910_vm10, %v1829_v5 }
 0x29c   : > { %2052 = vst.msk [vmem:[#allocation3 + $0x38] sm:$0xff] %vm2044_vm11, %v1963_v28  ;;  %v2221_v17 = vpop.permute.xlu1 %2220  ;;  %1850 = vrot.lane.b32.xlu0 %v8196_v53, %s11131_s18 }
 0x29d   : > { %2314 = vst.msk [vmem:[#allocation3 + $0x18] sm:$0xff] %vm2310_vm13, %v2221_v17 }
 0x29e   : > { %v8202_v11 = vpop.permute.xlu0 %1834  ;;  %1844 = vrot.lane.b32.xlu1 %v1302_v3, %s11131_s18 }
 0x2a0   : > { %v2355_v8 = vpop.permute.xlu1 %2354  ;;  %1984 = vrot.lane.b32.xlu0 %v1520_v46, %s11133_s28 }
 0x2a1   : > { %2448 = vst.msk [vmem:[#allocation3 + $0x18] sm:$0xff] %vm2444_vm14, %v2355_v8 }
 0x2a2   : > { %v8207_v49 = vpop.permute.xlu0 %1968  ;;  %1978 = vrot.lane.b32.xlu1 %v1512_v0, %s11133_s28 }
 0x2a4   : > { %v1825_v5 = vpop.permute.xlu1 %1824  ;;  %2246 = vrot.lane.b32.xlu0 %v8196_v53, %s11099_s20 }
 0x2a5   : > { %1916 = vst.msk [vmem:[#allocation3 + $0x28] sm:$0xff] %vm1910_vm10, %v1825_v5 }
 0x2a6   : > { %v2231_v28 = vpop.permute.xlu0 %2230  ;;  %2240 = vrot.lane.b32.xlu1 %v1302_v3, %s11099_s20  ;;  %v1515_v3 = vsel %vm1467_vm5, %v1513_v55, %v1514_v19 }
 0x2a8   : > { %v1959_v56 = vpop.permute.xlu1 %1958  ;;  %2380 = vrot.lane.b32.xlu0 %v1520_v46, %s11132_s27  ;;  %v2480_v43 = vld [vmem:[#allocation3 + $0x18] sm:$0xff]  ;;  %v1304_v46 = vrot.slane %v7765_v14, 1 }
 0x2a9   : > { %2050 = vst.msk [vmem:[#allocation3 + $0x28] sm:$0xff] %vm2044_vm11, %v1959_v56  ;;  %v2510_v10 = vpack.c.bf16 %v2480_v43, %v2479_v62 }
 0x2aa   : > { %2181 = vst.msk [vmem:[#allocation3 + $0x28] sm:$0xff] %vm2175_vm12, %v8080_v57  ;;  %v2365_v37 = vpop.permute.xlu0 %2364  ;;  %2374 = vrot.lane.b32.xlu1 %v1512_v0, %s11132_s27  ;;  %v1303_v57 = vrot.slane %v7753_v26, 1  ;;  %v1296_v0 = vrot.slane %v1146_v38, 1 }
 0x2ab   : > { %2316 = vst.msk [vmem:[#allocation3 + $0x28] sm:$0xff] %vm2310_vm13, %v8136_v34  ;;  %6141 = vmatmul.mubr.msk.bf16.vlgmr.msra.gmra.mrb[32].mxu0 %vm2545_vm15, %v2510_v10 }
 0x2ac   : > { %2450 = vst.msk [vmem:[#allocation3 + $0x28] sm:$0xff] %vm2444_vm14, %v8146_v24  ;;  %v8230_v17 = vpop.permute.xlu1 %1701  ;;  %1584 = vrot.lane.b32.xlu0 %v1515_v3, %s11130_s0  ;;  %v8241_v34 = vsel %vm1257_vm4, %v1303_v57, %v1304_v46  ;;  %v1297_v26 = vsel %vm1257_vm4, %v1294_v48, %v1296_v0  ;;  %v1506_v24 = vrot.slane %v1146_v38, 2 }
 0x2ae   : > { %v8234_v8 = vpop.permute.xlu0 %1568  ;;  %1366 = vrot.lane.b32.xlu1 %v8114_v47, %s11124_s21  ;;  %v2481_v47 = vld [vmem:[#allocation3 + $0x20] sm:$0xff]  ;;  %v1507_v55 = vsel %vm1467_vm5, %v1504_v18, %v1506_v24 }
 0x2b0   : > { %v8243_v5 = vpop.permute.xlu1 %2097  ;;  %2242 = vrot.lane.b32.xlu0 %v8241_v34, %s11099_s20 }
 0x2b2   : > { %v2227_v56 = vpop.permute.xlu0 %2226  ;;  %1368 = vrot.lane.b32.xlu1 %v1297_v26, %s11124_s21 }
 0x2b3   : > { %2317 = vst.msk [vmem:[#allocation3 + $0x30] sm:$0xff] %vm2310_vm13, %v2227_v56  ;;  %v2482_v62 = vld [vmem:[#allocation3 + $0x28] sm:$0xff] }
 0x2b4   : > { %v2094_v43 = vpop.permute.xlu1 %2093  ;;  %2376 = vrot.lane.b32.xlu0 %v1515_v3, %s11132_s27  ;;  %v2511_v10 = vpack.c.bf16 %v2482_v62, %v2481_v47  ;;  %v1319_v47 = vrot.slane %v7836_v9, 1 }
 0x2b5   : > { %2183 = vst.msk [vmem:[#allocation3 + $0x38] sm:$0xff] %vm2175_vm12, %v2094_v43  ;;  %v1318_v43 = vrot.slane %v7809_v25, 1 }
 0x2b6   : > { %6144 = vmatprep.mubr.msk.bf16.mxu0 %vm2545_vm15, %v2511_v10  ;;  %v2361_v48 = vpop.permute.xlu0 %2360  ;;  %1578 = vrot.lane.b32.xlu1 %v1507_v55, %s11130_s0 }
 0x2b7   : > { %2451 = vst.msk [vmem:[#allocation3 + $0x30] sm:$0xff] %vm2444_vm14, %v2361_v48  ;;  %v11091_v48 = vrot.slane %v7842_v44, 2 }
 0x2b8   : > { %v1698_v38 = vpop.permute.xlu1 %1697  ;;  %1846 = vrot.lane.b32.xlu0 %v8241_v34, %s11131_s18 }
 0x2b9   : > { %1785 = vst.msk [vmem:[#allocation3 + $0x48] sm:$0xff] %vm1775_vm9, %v1698_v38 }
 0x2ba   : > { %v1831_v57 = vpop.permute.xlu0 %1830  ;;  %2236 = vrot.lane.b32.xlu1 %v1297_v26, %s11099_s20 }
 0x2bb   : > { %1919 = vst.msk [vmem:[#allocation3 + $0x40] sm:$0xff] %vm1910_vm10, %v1831_v57  ;;  %v1523_v57 = vrot.slane %v7832_v50, 2 }
 0x2bc   : > { %v1363_v39 = vpop.permute.xlu1 %1362  ;;  %1980 = vrot.lane.b32.xlu0 %v1515_v3, %s11133_s28 }
 0x2bd   : > { %1447 = vst.msk [vmem:[#allocation3 + $0x60] sm:$0xff] %vm1434_vm6, %v1363_v39 }
 0x2be   : > { %1657 = vst.msk [vmem:[#allocation3 + $0x60] sm:$0xff] %vm1644_vm7, %v8189_v2  ;;  %v1965_v18 = vpop.permute.xlu0 %1964  ;;  %2370 = vrot.lane.b32.xlu1 %v1507_v55, %s11132_s27 }
 0x2bf   : > { %2053 = vst.msk [vmem:[#allocation3 + $0x40] sm:$0xff] %vm2044_vm11, %v1965_v18  ;;  %v8323_v18 = vsel %vm1467_vm5, %v1523_v57, %v11091_v48 }
 0x2c0   : > { %2184 = vst.msk [vmem:[#allocation3 + $0x40] sm:$0xff] %vm2175_vm12, %v8150_v60  ;;  %v1365_v0 = vpop.permute.xlu1 %1364  ;;  %1723 = vrot.lane.b32.xlu0 %v7809_v25, %s11127_s26 }
 0x2c1   : > { %2319 = vst.msk [vmem:[#allocation3 + $0x40] sm:$0xff] %vm2310_vm13, %v2231_v28  ;;  %v11092_v28 = vrot.slane %v7836_v9, 2 }
 0x2c2   : > { %1448 = vst.msk [vmem:[#allocation3 + $0x68] sm:$0xff] %vm1434_vm6, %v1365_v0  ;;  %v8278_v3 = vpop.permute.xlu0 %1707  ;;  %1840 = vrot.lane.b32.xlu1 %v1297_v26, %s11131_s18  ;;  %v11093_v0 = vrot.slane %v7842_v44, 1 }
 0x2c3   : > { %2453 = vst.msk [vmem:[#allocation3 + $0x40] sm:$0xff] %vm2444_vm14, %v2365_v37  ;;  %v1528_v37 = vrot.slane %v7809_v25, 2 }
 0x2c4   : > { %v1575_v2 = vpop.permute.xlu1 %1574  ;;  %2115 = vrot.lane.b32.xlu0 %v7832_v50, %s11118_s25 }
 0x2c5   : > { %1658 = vst.msk [vmem:[#allocation3 + $0x68] sm:$0xff] %vm1644_vm7, %v1575_v2  ;;  %v8296_v26 = vsel %vm1467_vm5, %v1528_v37, %v11092_v28  ;;  %v1313_v37 = vrot.slane %v7832_v50, 1 }
 0x2c6   : > { %v8284_v60 = vpop.permute.xlu0 %2103  ;;  %1974 = vrot.lane.b32.xlu1 %v1507_v55, %s11133_s28  ;;  %v8308_v55 = vsel %vm1257_vm4, %v1318_v43, %v1319_v47 }
 0x2c7   : > { %v8338_v57 = vsel %vm1257_vm4, %v1313_v37, %v11093_v0 }
 0x2c8   : > { %v1837_v24 = vpop.permute.xlu1 %1836  ;;  %1719 = vrot.lane.b32.xlu0 %v7832_v50, %s11127_s26 }
 0x2ca   : > { %v2100_v56 = vpop.permute.xlu0 %2099  ;;  %1717 = vrot.lane.b32.xlu1 %v7757_v6, %s11127_s26 }
 0x2cc   : > { %v1971_v62 = vpop.permute.xlu1 %1970  ;;  %1596 = vrot.lane.b32.xlu0 %v8296_v26, %s11130_s0 }
 0x2ce   : > { %v1704_v10 = vpop.permute.xlu0 %1703  ;;  %2113 = vrot.lane.b32.xlu1 %v7757_v6, %s11118_s25 }
 0x2cf   : > { %1788 = vst.msk [vmem:[#allocation3 + $0x60] sm:$0xff] %vm1775_vm9, %v1704_v10  ;;  %v1155_v10 = vld [vmem:[#allocation2 + $0x100] sm:$0x3] }
 0x2d0   : > { %v8311_v38 = vpop.permute.xlu1 %2232  ;;  %1858 = vrot.lane.b32.xlu0 %v8308_v55, %s11131_s18  ;;  %v1311_v28 = vrot.slane %v1155_v10, 1 }
 0x2d2   : > { %v8316_v39 = vpop.permute.xlu0 %1580  ;;  %2109 = vrot.lane.b32.xlu1 %v7765_v14, %s11118_s25 }
 0x2d4   : > { %v8326_v2 = vpop.permute.xlu1 %2366  ;;  %1592 = vrot.lane.b32.xlu0 %v8323_v18, %s11130_s0 }
 0x2d6   : > { %v8331_v43 = vpop.permute.xlu0 %1842  ;;  %1713 = vrot.lane.b32.xlu1 %v7765_v14, %s11127_s26  ;;  %v1324_v14 = vrot.slane %v7868_v20, 1 }
 0x2d8   : > { %v1359_v48 = vpop.permute.xlu1 %1358  ;;  %2250 = vrot.lane.b32.xlu0 %v8338_v57, %s11099_s20 }
 0x2d9   : > { %1445 = vst.msk [vmem:[#allocation3 + $0x50] sm:$0xff] %vm1434_vm6, %v1359_v48  ;;  %v1329_v48 = vrot.slane %v7861_v30, 1 }
 0x2da   : > { %1655 = vst.msk [vmem:[#allocation3 + $0x50] sm:$0xff] %vm1644_vm7, %v8234_v8  ;;  %v8345_v50 = vpop.permute.xlu0 %1976  ;;  %1378 = vrot.lane.b32.xlu1 %v8196_v53, %s11124_s21  ;;  %v1312_v8 = vsel %vm1257_vm4, %v1309_v36, %v1311_v28  ;;  %v1521_v53 = vrot.slane %v1155_v10, 2  ;;  %v11094_v10 = vrot.slane %v7868_v20, 2 }
 0x2db   : > { %1786 = vst.msk [vmem:[#allocation3 + $0x50] sm:$0xff] %vm1775_vm9, %v8142_v15 }
 0x2dc   : > { %1921 = vst.msk [vmem:[#allocation3 + $0x50] sm:$0xff] %vm1910_vm10, %v8202_v11  ;;  %v1361_v37 = vpop.permute.xlu1 %1360  ;;  %2384 = vrot.lane.b32.xlu0 %v8323_v18, %s11132_s27  ;;  %v1328_v11 = vrot.slane %v7851_v58, 1  ;;  %v1522_v36 = vsel %vm1467_vm5, %v1519_v21, %v1521_v53 }
 0x2dd   : > { %2055 = vst.msk [vmem:[#allocation3 + $0x50] sm:$0xff] %vm2044_vm11, %v8207_v49 }
 0x2de   : > { %1446 = vst.msk [vmem:[#allocation3 + $0x58] sm:$0xff] %vm1434_vm6, %v1361_v37  ;;  %v8362_v15 = vpop.permute.xlu0 %2238  ;;  %1380 = vrot.lane.b32.xlu1 %v1312_v8, %s11124_s21  ;;  %v8380_v28 = vsel %vm1257_vm4, %v1328_v11, %v1329_v48 }
 0x2df   : > { %2186 = vst.msk [vmem:[#allocation3 + $0x50] sm:$0xff] %vm2175_vm12, %v2100_v56  ;;  %v1538_v56 = vrot.slane %v7851_v58, 2 }
 0x2e0   : > { %v1571_v0 = vpop.permute.xlu1 %1570  ;;  %1854 = vrot.lane.b32.xlu0 %v8338_v57, %s11131_s18 }
 0x2e1   : > { %1656 = vst.msk [vmem:[#allocation3 + $0x58] sm:$0xff] %vm1644_vm7, %v1571_v0  ;;  %v11095_v0 = vrot.slane %v7861_v30, 2 }
 0x2e2   : > { %1787 = vst.msk [vmem:[#allocation3 + $0x58] sm:$0xff] %vm1775_vm9, %v8230_v17  ;;  %v2373_v49 = vpop.permute.xlu0 %2372  ;;  %1590 = vrot.lane.b32.xlu1 %v1522_v36, %s11130_s0 }
 0x2e3   : > { %1922 = vst.msk [vmem:[#allocation3 + $0x58] sm:$0xff] %vm1910_vm10, %v1837_v24  ;;  %v8394_v17 = vsel %vm1467_vm5, %v1538_v56, %v11095_v0  ;;  %v1533_v24 = vrot.slane %v7857_v33, 2 }
 0x2e4   : > { %2056 = vst.msk [vmem:[#allocation3 + $0x58] sm:$0xff] %vm2044_vm11, %v1971_v62  ;;  %v2229_v6 = vpop.permute.xlu1 %2228  ;;  %1394 = vrot.lane.b32.xlu0 %v8380_v28, %s11124_s21 }
 0x2e5   : > { %2318 = vst.msk [vmem:[#allocation3 + $0x38] sm:$0xff] %vm2310_vm13, %v2229_v6  ;;  %v8406_v53 = vsel %vm1467_vm5, %v1533_v24, %v11094_v10  ;;  %v1333_v6 = vrot.slane %v7906_v4, 1  ;;  %v2483_v24 = vld [vmem:[#allocation3 + $0x30] sm:$0xff] }
 0x2e6   : > { %v8388_v21 = vpop.permute.xlu0 %1576  ;;  %1852 = vrot.lane.b32.xlu1 %v1312_v8, %s11131_s18 }
 0x2e8   : > { %v2363_v62 = vpop.permute.xlu1 %2362  ;;  %1604 = vrot.lane.b32.xlu0 %v8394_v17, %s11130_s0 }
 0x2e9   : > { %2452 = vst.msk [vmem:[#allocation3 + $0x38] sm:$0xff] %vm2444_vm14, %v2363_v62  ;;  %v1334_v62 = vrot.slane %v7911_v42, 1 }
 0x2ea   : > { %v2235_v37 = vpop.permute.xlu0 %2234  ;;  %1986 = vrot.lane.b32.xlu1 %v1522_v36, %s11133_s28 }
 0x2eb   : > { %2321 = vst.msk [vmem:[#allocation3 + $0x50] sm:$0xff] %vm2310_vm13, %v2235_v37 }
 0x2ec   : > { %v1833_v11 = vpop.permute.xlu1 %1832  ;;  %1600 = vrot.lane.b32.xlu0 %v8406_v53, %s11130_s0 }
 0x2ed   : > { %1920 = vst.msk [vmem:[#allocation3 + $0x48] sm:$0xff] %vm1910_vm10, %v1833_v11 }
 0x2ee   : > { %v2369_v56 = vpop.permute.xlu0 %2368  ;;  %2248 = vrot.lane.b32.xlu1 %v1312_v8, %s11099_s20  ;;  %v1152_v8 = vld [vmem:[#allocation2 + $0xe8] sm:$0x3] }
 0x2ef   : > { %2455 = vst.msk [vmem:[#allocation3 + $0x50] sm:$0xff] %vm2444_vm14, %v2369_v56 }
 0x2f0   : > { %v1967_v37 = vpop.permute.xlu1 %1966  ;;  %1988 = vrot.lane.b32.xlu0 %v8323_v18, %s11133_s28  ;;  %v2484_v10 = vld [vmem:[#allocation3 + $0x38] sm:$0xff]  ;;  %v8428_v18 = vsel %vm1257_vm4, %v1333_v6, %v1334_v62 }
 0x2f1   : > { %2054 = vst.msk [vmem:[#allocation3 + $0x48] sm:$0xff] %vm2044_vm11, %v1967_v37  ;;  %v2512_v0 = vpack.c.bf16 %v2484_v10, %v2483_v24  ;;  %v1323_v24 = vrot.slane %v7857_v33, 1 }
 0x2f2   : > { %2185 = vst.msk [vmem:[#allocation3 + $0x48] sm:$0xff] %vm2175_vm12, %v8243_v5  ;;  %v1839_v11 = vpop.permute.xlu0 %1838  ;;  %2382 = vrot.lane.b32.xlu1 %v1522_v36, %s11132_s27  ;;  %v1306_v36 = vrot.slane %v1152_v8, 1 }
 0x2f3   : > { %2320 = vst.msk [vmem:[#allocation3 + $0x48] sm:$0xff] %vm2310_vm13, %v8311_v38  ;;  %6145 = vmatmul.mubr.msk.bf16.gmra.mrb[36].mxu0 %vm2545_vm15, %v2512_v0  ;;  %v1516_v0 = vrot.slane %v1152_v8, 2  ;;  %v8480_v8 = vsel %vm1257_vm4, %v1323_v24, %v1324_v14 }
 0x2f4   : > { %1923 = vst.msk [vmem:[#allocation3 + $0x60] sm:$0xff] %vm1910_vm10, %v1839_v11  ;;  %v8432_v5 = vpop.permute.xlu1 %1709  ;;  %1398 = vrot.lane.b32.xlu0 %v8428_v18, %s11124_s21 }
 0x2f5   : > { %2454 = vst.msk [vmem:[#allocation3 + $0x48] sm:$0xff] %vm2444_vm14, %v8326_v2  ;;  %v1307_v2 = vsel %vm1257_vm4, %v1304_v46, %v1306_v36  ;;  %v1517_v46 = vsel %vm1467_vm5, %v1514_v19, %v1516_v0 }
 0x2f6   : > { %v1973_v10 = vpop.permute.xlu0 %1972  ;;  %1374 = vrot.lane.b32.xlu1 %v8241_v34, %s11124_s21 }
 0x2f7   : > { %2057 = vst.msk [vmem:[#allocation3 + $0x60] sm:$0xff] %vm2044_vm11, %v1973_v10 }
 0x2f8   : > { %2188 = vst.msk [vmem:[#allocation3 + $0x60] sm:$0xff] %vm2175_vm12, %v8284_v60  ;;  %v8441_v38 = vpop.permute.xlu1 %2105  ;;  %1992 = vrot.lane.b32.xlu0 %v8296_v26, %s11133_s28  ;;  %v2485_v60 = vld [vmem:[#allocation3 + $0x40] sm:$0xff] }
 0x2f9   : > { %2323 = vst.msk [vmem:[#allocation3 + $0x60] sm:$0xff] %vm2310_vm13, %v8362_v15 }
 0x2fa   : > { %2457 = vst.msk [vmem:[#allocation3 + $0x60] sm:$0xff] %vm2444_vm14, %v2373_v49  ;;  %v8451_v34 = vpop.permute.xlu0 %1715  ;;  %1376 = vrot.lane.b32.xlu1 %v1307_v2, %s11124_s21 }
 0x2fc   : > { %v2486_v56 = vld [vmem:[#allocation3 + $0x48] sm:$0xff]  ;;  %v2102_v6 = vpop.permute.xlu1 %2101  ;;  %2119 = vrot.lane.b32.xlu0 %v7809_v25, %s11118_s25 }
 0x2fd   : > { %v2513_v37 = vpack.c.bf16 %v2486_v56, %v2485_v60  ;;  %2187 = vst.msk [vmem:[#allocation3 + $0x58] sm:$0xff] %vm2175_vm12, %v2102_v6 }
 0x2fe   : > { %v8461_v15 = vpop.permute.xlu0 %2111  ;;  %1586 = vrot.lane.b32.xlu1 %v1517_v46, %s11130_s0 }
 0x2ff   : > { %6148 = vmatprep.mubr.msk.bf16.mxu0 %vm2545_vm15, %v2513_v37 }
 0x300   : > { %v1706_v49 = vpop.permute.xlu1 %1705  ;;  %2123 = vrot.lane.b32.xlu0 %v7857_v33, %s11118_s25 }
 0x301   : > { %1789 = vst.msk [vmem:[#allocation3 + $0x68] sm:$0xff] %vm1775_vm9, %v1706_v49 }
 0x302   : > { %v2108_v25 = vpop.permute.xlu0 %2107  ;;  %2244 = vrot.lane.b32.xlu1 %v1307_v2, %s11099_s20 }
 0x304   : > { %v1371_v19 = vpop.permute.xlu1 %1370  ;;  %2254 = vrot.lane.b32.xlu0 %v8308_v55, %s11099_s20 }
 0x305   : > { %1451 = vst.msk [vmem:[#allocation3 + $0x80] sm:$0xff] %vm1434_vm6, %v1371_v19 }
 0x306   : > { %1661 = vst.msk [vmem:[#allocation3 + $0x80] sm:$0xff] %vm1644_vm7, %v8316_v39  ;;  %v1712_v11 = vpop.permute.xlu0 %1711  ;;  %2378 = vrot.lane.b32.xlu1 %v1517_v46, %s11132_s27 }
 0x307   : > { %1792 = vst.msk [vmem:[#allocation3 + $0x80] sm:$0xff] %vm1775_vm9, %v1712_v11 }
 0x308   : > { %v1373_v36 = vpop.permute.xlu1 %1372  ;;  %2258 = vrot.lane.b32.xlu0 %v8480_v8, %s11099_s20 }
 0x309   : > { %1452 = vst.msk [vmem:[#allocation3 + $0x88] sm:$0xff] %vm1434_vm6, %v1373_v36 }
 0x30a   : > { %v8485_v10 = vpop.permute.xlu0 %1588  ;;  %1848 = vrot.lane.b32.xlu1 %v1307_v2, %s11131_s18 }
 0x30c   : > { %v1583_v39 = vpop.permute.xlu1 %1582  ;;  %2388 = vrot.lane.b32.xlu0 %v8296_v26, %s11132_s27 }
 0x30d   : > { %1662 = vst.msk [vmem:[#allocation3 + $0x88] sm:$0xff] %vm1644_vm7, %v1583_v39 }
 0x30e   : > { %v8491_v0 = vpop.permute.xlu0 %1850  ;;  %1982 = vrot.lane.b32.xlu1 %v1517_v46, %s11133_s28  ;;  %v1161_v46 = vld [vmem:[#allocation2 + $0x130] sm:$0x3] }
 0x30f   : > { %v1531_v36 = vrot.slane %v1161_v46, 2 }
 0x310   : > { %v1845_v60 = vpop.permute.xlu1 %1844  ;;  %2392 = vrot.lane.b32.xlu0 %v8406_v53, %s11132_s27 }
 0x312   : > { %v8496_v56 = vpop.permute.xlu0 %1984  ;;  %1725 = vrot.lane.b32.xlu1 %v7836_v9, %s11127_s26 }
 0x314   : > { %v1979_v2 = vpop.permute.xlu1 %1978  ;;  %1727 = vrot.lane.b32.xlu0 %v7857_v33, %s11127_s26  ;;  %v1321_v33 = vrot.slane %v1161_v46, 1  ;;  %v8538_v46 = vld [vmem:[#allocation2 + $0x8] sm:$0xff] }
 0x315   : > { %3116 = vst.msk [vmem:[#allocation3 + $0x8] sm:$0xff] %vm467_vm1, %v8538_v46 }
 0x316   : > { %v2247_v26 = vpop.permute.xlu0 %2246  ;;  %2117 = vrot.lane.b32.xlu1 %v7842_v44, %s11118_s25  ;;  %v8524_v11 = vsel %vm1257_vm4, %v1319_v47, %v1321_v33  ;;  %v8536_v47 = vld [vmem:[#allocation2] sm:$0xff] }
 0x317   : > { %3115 = vst.msk [vmem:[#allocation3] sm:$0xff] %vm467_vm1, %v8536_v47 }
 0x318   : > { %v8504_v6 = vpop.permute.xlu1 %2240  ;;  %1731 = vrot.lane.b32.xlu0 %v7851_v58, %s11127_s26 }
 0x31a   : > { %v2381_v37 = vpop.permute.xlu0 %2380  ;;  %1721 = vrot.lane.b32.xlu1 %v7842_v44, %s11127_s26 }
 0x31c   : > { %v8510_v49 = vpop.permute.xlu1 %2374  ;;  %1862 = vrot.lane.b32.xlu0 %v8480_v8, %s11131_s18 }
 0x31e   : > { %v8514_v24 = vpop.permute.xlu0 %1584  ;;  %1386 = vrot.lane.b32.xlu1 %v8308_v55, %s11124_s21 }
 0x320   : > { %v1367_v19 = vpop.permute.xlu1 %1366  ;;  %1866 = vrot.lane.b32.xlu0 %v8380_v28, %s11131_s18 }
 0x321   : > { %1449 = vst.msk [vmem:[#allocation3 + $0x70] sm:$0xff] %vm1434_vm6, %v1367_v19 }
 0x322   : > { %1659 = vst.msk [vmem:[#allocation3 + $0x70] sm:$0xff] %vm1644_vm7, %v8388_v21  ;;  %v2243_v39 = vpop.permute.xlu0 %2242  ;;  %1388 = vrot.lane.b32.xlu1 %v8524_v11, %s11124_s21  ;;  %v11138_v21 = vrot.slane %v7836_v9, 2 }
 0x323   : > { %1790 = vst.msk [vmem:[#allocation3 + $0x70] sm:$0xff] %vm1775_vm9, %v8278_v3 }
 0x324   : > { %1925 = vst.msk [vmem:[#allocation3 + $0x70] sm:$0xff] %vm1910_vm10, %v8331_v43  ;;  %v1369_v55 = vpop.permute.xlu1 %1368  ;;  %1996 = vrot.lane.b32.xlu0 %v8406_v53, %s11133_s28  ;;  %v8546_v3 = vsel %vm1467_vm5, %v11138_v21, %v1531_v36  ;;  %v11139_v36 = vrot.slane %v7842_v44, 1 }
 0x325   : > { %2059 = vst.msk [vmem:[#allocation3 + $0x70] sm:$0xff] %vm2044_vm11, %v8345_v50  ;;  %v1158_v50 = vld [vmem:[#allocation2 + $0x118] sm:$0x3] }
 0x326   : > { %1450 = vst.msk [vmem:[#allocation3 + $0x78] sm:$0xff] %vm1434_vm6, %v1369_v55  ;;  %v2377_v43 = vpop.permute.xlu0 %2376  ;;  %1598 = vrot.lane.b32.xlu1 %v8546_v3, %s11130_s0  ;;  %v1316_v33 = vrot.slane %v1158_v50, 1 }
 0x327   : > { %2190 = vst.msk [vmem:[#allocation3 + $0x70] sm:$0xff] %vm2175_vm12, %v2108_v25 }
 0x328   : > { %2325 = vst.msk [vmem:[#allocation3 + $0x70] sm:$0xff] %vm2310_vm13, %v2243_v39  ;;  %v1579_v53 = vpop.permute.xlu1 %1578  ;;  %2000 = vrot.lane.b32.xlu0 %v8394_v17, %s11133_s28  ;;  %v1526_v39 = vrot.slane %v1158_v50, 2 }
 0x329   : > { %2459 = vst.msk [vmem:[#allocation3 + $0x70] sm:$0xff] %vm2444_vm14, %v2377_v43 }
 0x32a   : > { %1660 = vst.msk [vmem:[#allocation3 + $0x78] sm:$0xff] %vm1644_vm7, %v1579_v53  ;;  %v1847_v25 = vpop.permute.xlu0 %1846  ;;  %1382 = vrot.lane.b32.xlu1 %v8338_v57, %s11124_s21  ;;  %v1543_v53 = vrot.slane %v7906_v4, 2 }
 0x32b   : > { %1791 = vst.msk [vmem:[#allocation3 + $0x78] sm:$0xff] %vm1775_vm9, %v8432_v5  ;;  %v1317_v5 = vsel %vm1257_vm4, %v11139_v36, %v1316_v33  ;;  %v11098_v33 = vrot.slane %v7911_v42, 2 }
 0x32c   : > { %1926 = vst.msk [vmem:[#allocation3 + $0x78] sm:$0xff] %vm1910_vm10, %v1845_v60  ;;  %1927 = vst.msk [vmem:[#allocation3 + $0x80] sm:$0xff] %vm1910_vm10, %v1847_v25  ;;  %v2237_v19 = vpop.permute.xlu1 %2236  ;;  %2127 = vrot.lane.b32.xlu0 %v7851_v58, %s11118_s25  ;;  %v11140_v58 = vrot.slane %v7842_v44, 2 }
 0x32d   : > { %2060 = vst.msk [vmem:[#allocation3 + $0x78] sm:$0xff] %vm2044_vm11, %v1979_v2 }
 0x32e   : > { %2322 = vst.msk [vmem:[#allocation3 + $0x58] sm:$0xff] %vm2310_vm13, %v2237_v19  ;;  %v1981_v55 = vpop.permute.xlu0 %1980  ;;  %1384 = vrot.lane.b32.xlu1 %v1317_v5, %s11124_s21  ;;  %v8584_v60 = vsel %vm1467_vm5, %v11140_v58, %v1526_v39 }
 0x32f   : > { %2061 = vst.msk [vmem:[#allocation3 + $0x80] sm:$0xff] %vm2044_vm11, %v1981_v55 }
 0x330   : > { %2192 = vst.msk [vmem:[#allocation3 + $0x80] sm:$0xff] %vm2175_vm12, %v8461_v15  ;;  %v2371_v57 = vpop.permute.xlu1 %2370  ;;  %2131 = vrot.lane.b32.xlu0 %v7906_v4, %s11118_s25 }
 0x331   : > { %2327 = vst.msk [vmem:[#allocation3 + $0x80] sm:$0xff] %vm2310_vm13, %v2247_v26 }
 0x332   : > { %2456 = vst.msk [vmem:[#allocation3 + $0x58] sm:$0xff] %vm2444_vm14, %v2371_v57  ;;  %2461 = vst.msk [vmem:[#allocation3 + $0x80] sm:$0xff] %vm2444_vm14, %v2381_v37  ;;  %v8587_v2 = vpop.permute.xlu0 %1723  ;;  %1594 = vrot.lane.b32.xlu1 %v8584_v60, %s11130_s0  ;;  %v2487_v37 = vld [vmem:[#allocation3 + $0x50] sm:$0xff] }
 0x334   : > { %v1841_v15 = vpop.permute.xlu1 %1840  ;;  %2262 = vrot.lane.b32.xlu0 %v8380_v28, %s11099_s20  ;;  %v1167_v28 = vld [vmem:[#allocation2 + $0x160] sm:$0x3] }
 0x335   : > { %1924 = vst.msk [vmem:[#allocation3 + $0x68] sm:$0xff] %vm1910_vm10, %v1841_v15  ;;  %v1541_v39 = vrot.slane %v1167_v28, 2  ;;  %v11141_v15 = vrot.slane %v7861_v30, 2 }
 0x336   : > { %v8594_v26 = vpop.permute.xlu0 %2115  ;;  %2252 = vrot.lane.b32.xlu1 %v1317_v5, %s11099_s20 }
 0x338   : > { %v1975_v44 = vpop.permute.xlu1 %1974  ;;  %2266 = vrot.lane.b32.xlu0 %v8428_v18, %s11099_s20 }
 0x339   : > { %v2488_v21 = vld [vmem:[#allocation3 + $0x58] sm:$0xff]  ;;  %2058 = vst.msk [vmem:[#allocation3 + $0x68] sm:$0xff] %vm2044_vm11, %v1975_v44  ;;  %v8638_v44 = vsel %vm1467_vm5, %v11141_v15, %v1541_v39 }
 0x33a   : > { %v2514_v43 = vpack.c.bf16 %v2488_v21, %v2487_v37  ;;  %2189 = vst.msk [vmem:[#allocation3 + $0x68] sm:$0xff] %vm2175_vm12, %v8441_v38  ;;  %v1720_v50 = vpop.permute.xlu0 %1719  ;;  %2386 = vrot.lane.b32.xlu1 %v8584_v60, %s11132_s27  ;;  %v1331_v38 = vrot.slane %v1167_v28, 1  ;;  %v1164_v37 = vld [vmem:[#allocation2 + $0x148] sm:$0x3] }
 0x33b   : > { %2324 = vst.msk [vmem:[#allocation3 + $0x68] sm:$0xff] %vm2310_vm13, %v8504_v6  ;;  %v1545_v6 = vsel %vm1467_vm5, %v1543_v53, %v11098_v33  ;;  %v1171_v53 = vld [vmem:[#allocation2 + $0x180] sm:$0xff]  ;;  %v8653_v39 = vld [vmem:[#allocation2 + $0x188] sm:$0xff] }
 0x33c   : > { %6149 = vmatmul.mubr.msk.bf16.gmra.mrb[40].mxu0 %vm2545_vm15, %v2514_v43  ;;  %2458 = vst.msk [vmem:[#allocation3 + $0x68] sm:$0xff] %vm2444_vm14, %v8510_v49  ;;  %v8611_v25 = vpop.permute.xlu1 %1717  ;;  %2396 = vrot.lane.b32.xlu0 %v8394_v17, %s11132_s27  ;;  %v8627_v49 = vsel %vm1257_vm4, %v1329_v48, %v1331_v38  ;;  %v1326_v43 = vrot.slane %v1164_v37, 1 }
 0x33e   : > { %v8615_v19 = vpop.permute.xlu0 %1596  ;;  %1856 = vrot.lane.b32.xlu1 %v1317_v5, %s11131_s18  ;;  %v2489_v5 = vld [vmem:[#allocation3 + $0x60] sm:$0xff] }
 0x340   : > { %v8621_v36 = vpop.permute.xlu1 %2113  ;;  %2400 = vrot.lane.b32.xlu0 %v1545_v6, %s11132_s27 }
 0x342   : > { %v8629_v17 = vpop.permute.xlu0 %1858  ;;  %1396 = vrot.lane.b32.xlu1 %v8627_v49, %s11124_s21 }
 0x343   : > { %v2490_v55 = vld [vmem:[#allocation3 + $0x68] sm:$0xff] }
 0x344   : > { %v2110_v57 = vpop.permute.xlu1 %2109  ;;  %1608 = vrot.lane.b32.xlu0 %v1545_v6, %s11130_s0  ;;  %v2515_v58 = vpack.c.bf16 %v2490_v55, %v2489_v5  ;;  %v1536_v5 = vrot.slane %v1164_v37, 2  ;;  %v8679_v37 = vld [vmem:[#allocation2 + $0x178] sm:$0x3] }
 0x345   : > { %2191 = vst.msk [vmem:[#allocation3 + $0x78] sm:$0xff] %vm2175_vm12, %v2110_v57  ;;  %v11097_v57 = vrot.slane %v8653_v39, 1 }
 0x346   : > { %6152 = vmatprep.mubr.msk.bf16.mxu0 %vm2545_vm15, %v2515_v58  ;;  %v8641_v48 = vpop.permute.xlu0 %1592  ;;  %1606 = vrot.lane.b32.xlu1 %v8638_v44, %s11130_s0 }
 0x348   : > { %v1714_v21 = vpop.permute.xlu1 %1713  ;;  %1735 = vrot.lane.b32.xlu0 %v7906_v4, %s11127_s26  ;;  %v8659_v4 = vsel %vm1257_vm4, %v1324_v14, %v1326_v43  ;;  %v11142_v14 = vrot.slane %v7868_v20, 2 }
 0x349   : > { %1793 = vst.msk [vmem:[#allocation3 + $0x88] sm:$0xff] %vm1775_vm9, %v1714_v21  ;;  %v1336_v21 = vrot.slane %v8679_v37, 1 }
 0x34a   : > { %v8648_v28 = vpop.permute.xlu0 %2250  ;;  %1390 = vrot.lane.b32.xlu1 %v8480_v8, %s11124_s21  ;;  %v1809_v8 = vrot.slane %v1171_v53, 1 }
 0x34c   : > { %v1379_v38 = vpop.permute.xlu1 %1378  ;;  %1739 = vrot.lane.b32.xlu0 %v1171_v53, %s11127_s26 }
 0x34d   : > { %1455 = vst.msk [vmem:[#allocation3 + $0xa0] sm:$0xff] %vm1434_vm6, %v1379_v38  ;;  %v1943_v38 = vrot.slane %v1171_v53, 2 }
 0x34e   : > { %1665 = vst.msk [vmem:[#allocation3 + $0xa0] sm:$0xff] %vm1644_vm7, %v8485_v10  ;;  %v8663_v55 = vpop.permute.xlu0 %2384  ;;  %1392 = vrot.lane.b32.xlu1 %v8659_v4, %s11124_s21  ;;  %v8675_v10 = vsel %vm1467_vm5, %v11142_v14, %v1536_v5  ;;  %v11096_v5 = vrot.slane %v8653_v39, 2 }
 0x34f   : > { %1796 = vst.msk [vmem:[#allocation3 + $0xa0] sm:$0xff] %vm1775_vm9, %v1720_v50  ;;  %v1811_v50 = vsel %vm1257_vm4, %v1809_v8, %v11097_v57  ;;  %v8696_v8 = vsel %vm1257_vm4, %v1334_v62, %v1336_v21 }
 0x350   : > { %v1381_v58 = vpop.permute.xlu1 %1380  ;;  %1870 = vrot.lane.b32.xlu0 %v8428_v18, %s11131_s18 }
 0x351   : > { %1456 = vst.msk [vmem:[#allocation3 + $0xa8] sm:$0xff] %vm1434_vm6, %v1381_v58 }
 0x352   : > { %v1855_v15 = vpop.permute.xlu0 %1854  ;;  %1602 = vrot.lane.b32.xlu1 %v8675_v10, %s11130_s0 }
 0x353   : > { %1931 = vst.msk [vmem:[#allocation3 + $0xa0] sm:$0xff] %vm1910_vm10, %v1855_v15  ;;  %v1945_v15 = vsel %vm1467_vm5, %v1943_v38, %v11096_v5 }
 0x354   : > { %v1591_v18 = vpop.permute.xlu1 %1590  ;;  %1874 = vrot.lane.b32.xlu0 %v1811_v50, %s11131_s18 }
 0x355   : > { %1666 = vst.msk [vmem:[#allocation3 + $0xa8] sm:$0xff] %vm1644_vm7, %v1591_v18 }
 0x356   : > { %v1395_v43 = vpop.permute.xlu0 %1394  ;;  %1860 = vrot.lane.b32.xlu1 %v8524_v11, %s11131_s18 }
 0x357   : > { %1463 = vst.msk [vmem:[#allocation3 + $0xe0] sm:$0xff] %vm1434_vm6, %v1395_v43 }
 0x358   : > { %v1853_v58 = vpop.permute.xlu1 %1852  ;;  %2004 = vrot.lane.b32.xlu0 %v1545_v6, %s11133_s28  ;;  %v1174_v6 = vld [vmem:[#allocation2 + $0x198] sm:$0xff] }
 0x359   : > { %v2209_v5 = vrot.slane %v1174_v6, 1 }
 0x35a   : > { %v1605_v14 = vpop.permute.xlu0 %1604  ;;  %1400 = vrot.lane.b32.xlu1 %v8696_v8, %s11124_s21 }
 0x35b   : > { %1673 = vst.msk [vmem:[#allocation3 + $0xe0] sm:$0xff] %vm1644_vm7, %v1605_v14  ;;  %v8714_v14 = vld [vmem:[#allocation2 + $0x1a0] sm:$0xff] }
 0x35c   : > { %v1987_v18 = vpop.permute.xlu1 %1986  ;;  %2008 = vrot.lane.b32.xlu0 %v1945_v15, %s11133_s28 }
 0x35e   : > { %v8705_v43 = vpop.permute.xlu0 %1600  ;;  %1990 = vrot.lane.b32.xlu1 %v8584_v60, %s11133_s28  ;;  %v2210_v60 = vrot.slane %v8714_v14, 1 }
 0x360   : > { %v8709_v62 = vpop.permute.xlu1 %2248  ;;  %2135 = vrot.lane.b32.xlu0 %v1171_v53, %s11118_s25 }
 0x362   : > { %v1989_v21 = vpop.permute.xlu0 %1988  ;;  %1994 = vrot.lane.b32.xlu1 %v8546_v3, %s11133_s28 }
 0x363   : > { %2065 = vst.msk [vmem:[#allocation3 + $0xa0] sm:$0xff] %vm2044_vm11, %v1989_v21  ;;  %v2211_v21 = vsel %vm1257_vm4, %v2209_v5, %v2210_v60  ;;  %v11101_v5 = vrot.slane %v8538_v46, 2 }
 0x364   : > { %v8717_v38 = vpop.permute.xlu1 %2382  ;;  %2139 = vrot.lane.b32.xlu0 %v1174_v6, %s11118_s25 }
 0x366   : > { %2121 = vrot.lane.b32.xlu1 %v7836_v9, %s11118_s25  ;;  %v1399_v53 = vpop.permute.xlu0 %1398 }
 0x367   : > { %1465 = vst.msk [vmem:[#allocation3 + $0xf0] sm:$0xff] %vm1434_vm6, %v1399_v53 }
 0x368   : > { %v1375_v57 = vpop.permute.xlu1 %1374  ;;  %2270 = vrot.lane.b32.xlu0 %v1811_v50, %s11099_s20 }
 0x369   : > { %1453 = vst.msk [vmem:[#allocation3 + $0x90] sm:$0xff] %vm1434_vm6, %v1375_v57  ;;  %v2343_v57 = vrot.slane %v1174_v6, 2 }
 0x36a   : > { %1663 = vst.msk [vmem:[#allocation3 + $0x90] sm:$0xff] %vm1644_vm7, %v8514_v24  ;;  %2125 = vrot.lane.b32.xlu1 %v7868_v20, %s11118_s25  ;;  %v8733_v33 = vpop.permute.xlu0 %1992  ;;  %v2344_v24 = vrot.slane %v8714_v14, 2 }
 0x36b   : > { %1794 = vst.msk [vmem:[#allocation3 + $0x90] sm:$0xff] %vm1775_vm9, %v8451_v34 }
 0x36c   : > { %1929 = vst.msk [vmem:[#allocation3 + $0x90] sm:$0xff] %vm1910_vm10, %v8491_v0  ;;  %v1377_v9 = vpop.permute.xlu1 %1376  ;;  %2274 = vrot.lane.b32.xlu0 %v2211_v21, %s11099_s20  ;;  %v8797_v21 = vld [vmem:[%s11040_s6] ss:$0 sm:$0xff] }
 0x36d   : > { %2063 = vst.msk [vmem:[#allocation3 + $0x90] sm:$0xff] %vm2044_vm11, %v8496_v56  ;;  %v2345_v56 = vsel %vm1467_vm5, %v2343_v57, %v2344_v24 }
 0x36e   : > { %1454 = vst.msk [vmem:[#allocation3 + $0x98] sm:$0xff] %vm1434_vm6, %v1377_v9  ;;  %2256 = vrot.lane.b32.xlu1 %v8524_v11, %s11099_s20  ;;  %v2120_v34 = vpop.permute.xlu0 %2119  ;;  %v3195_v11 = vrot.slane %v8536_v47, 1 }
 0x36f   : > { %2194 = vst.msk [vmem:[#allocation3 + $0x90] sm:$0xff] %vm2175_vm12, %v8594_v26  ;;  %2196 = vst.msk [vmem:[#allocation3 + $0xa0] sm:$0xff] %vm2175_vm12, %v2120_v34  ;;  %v3196_v26 = vrot.slane %v8538_v46, 1 }
 0x370   : > { %2329 = vst.msk [vmem:[#allocation3 + $0x90] sm:$0xff] %vm2310_vm13, %v8648_v28  ;;  %v1587_v0 = vpop.permute.xlu1 %1586  ;;  %2404 = vrot.lane.b32.xlu0 %v1945_v15, %s11132_s27 }
 0x371   : > { %2463 = vst.msk [vmem:[#allocation3 + $0x90] sm:$0xff] %vm2444_vm14, %v8663_v55  ;;  %v3197_v50 = vsel %vm1257_vm4, %v3195_v11, %v3196_v26 }
 0x372   : > { %1664 = vst.msk [vmem:[#allocation3 + $0x98] sm:$0xff] %vm1644_vm7, %v1587_v0  ;;  %2260 = vrot.lane.b32.xlu1 %v8659_v4, %s11099_s20  ;;  %v8764_v28 = vpop.permute.xlu0 %2123 }
 0x373   : > { %1795 = vst.msk [vmem:[#allocation3 + $0x98] sm:$0xff] %vm1775_vm9, %v8611_v25  ;;  %v3403_v25 = vrot.slane %v8536_v47, 2 }
 0x374   : > { %1930 = vst.msk [vmem:[#allocation3 + $0x98] sm:$0xff] %vm1910_vm10, %v1853_v58  ;;  %v2245_v55 = vpop.permute.xlu1 %2244  ;;  %2408 = vrot.lane.b32.xlu0 %v2345_v56, %s11132_s27 }
 0x375   : > { %2064 = vst.msk [vmem:[#allocation3 + $0x98] sm:$0xff] %vm2044_vm11, %v1987_v18  ;;  %v3405_v18 = vsel %vm1467_vm5, %v3403_v25, %v11101_v5 }
 0x376   : > { %2326 = vst.msk [vmem:[#allocation3 + $0x78] sm:$0xff] %vm2310_vm13, %v2245_v55  ;;  %2390 = vrot.lane.b32.xlu1 %v8546_v3, %s11132_s27  ;;  %v2255_v15 = vpop.permute.xlu0 %2254  ;;  %v8790_v3 = vld [vmem:[%s11039_s5] ss:$0 sm:$0xff] }
 0x377   : > { %2331 = vst.msk [vmem:[#allocation3 + $0xa0] sm:$0xff] %vm2310_vm13, %v2255_v15  ;;  %v2491_v55 = vld [vmem:[#allocation3 + $0x70] sm:$0xff] }
 0x378   : > { %v2379_v58 = vpop.permute.xlu1 %2378  ;;  %3275 = vrot.lane.b32.xlu0 %v3197_v50, %s11124_s21 }
 0x379   : > { %2460 = vst.msk [vmem:[#allocation3 + $0x78] sm:$0xff] %vm2444_vm14, %v2379_v58 }
 0x37a   : > { %2394 = vrot.lane.b32.xlu1 %v8675_v10, %s11132_s27  ;;  %v8785_v47 = vpop.permute.xlu0 %2258 }
 0x37c   : > { %v1849_v6 = vpop.permute.xlu1 %1848  ;;  %3483 = vrot.lane.b32.xlu0 %v3405_v18, %s11130_s0 }
 0x37d   : > { %1928 = vst.msk [vmem:[#allocation3 + $0x88] sm:$0xff] %vm1910_vm10, %v1849_v6 }
 0x37e   : > { %v6142_v53 = vpop.f32.mrb[32].mxu0  ;;  %1729 = vrot.lane.b32.xlu1 %v7868_v20, %s11127_s26  ;;  %v2389_v9 = vpop.permute.xlu0 %2388 }
 0x37f   : > { %v2768_v57 = vmul.f32 %v6142_v53, %v8790_v3  ;;  %2465 = vst.msk [vmem:[#allocation3 + $0xa0] sm:$0xff] %vm2444_vm14, %v2389_v9  ;;  %v2632_v34 = vpop.f32.mrb[33].mxu0 }
 0x380   : > { %v2766_v0 = vmul.f32 %v8790_v3, %v2632_v34  ;;  %v1983_v56 = vpop.permute.xlu1 %1982  ;;  %v6143_v11 = vpop.f32.mrb[34].mxu0  ;;  %v2492_v50 = vld [vmem:[#allocation3 + $0x78] sm:$0xff] }
 0x381   : > { %v8805_v25 = vadd.f32 %v8797_v21, %v2768_v57  ;;  %2062 = vst.msk [vmem:[#allocation3 + $0x88] sm:$0xff] %vm2044_vm11, %v1983_v56  ;;  %v2769_v15 = vmul.f32 %v6143_v11, %v8790_v3  ;;  %v2635_v20 = vpop.f32.mrb[35].mxu0  ;;  %v2516_v58 = vpack.c.bf16 %v2492_v50, %v2491_v55 }
 0x382   : > { %v8810_v18 = vadd.f32 %v8797_v21, %v2766_v0  ;;  %2193 = vst.msk [vmem:[#allocation3 + $0x88] sm:$0xff] %vm2175_vm12, %v8621_v36  ;;  %v2767_v6 = vmul.f32 %v8790_v3, %v2635_v20  ;;  %1733 = vrot.lane.b32.xlu1 %v7861_v30, %s11127_s26  ;;  %v8817_v53 = vpop.permute.xlu0 %2392 }
 0x383   : > { %v2839_v9 = vsub.f32 0.0, %v8805_v25  ;;  %2328 = vst.msk [vmem:[#allocation3 + $0x88] sm:$0xff] %vm2310_vm13, %v8709_v62  ;;  %v8823_v57 = vadd.f32 %v8797_v21, %v2769_v15  ;;  %6153 = vmatmul.mubr.msk.bf16.gmra.mrb[44].mxu0 %vm2545_vm15, %v2516_v58 }
 0x384   : > { %v2837_v34 = vsub.f32 0.0, %v8810_v18  ;;  %2462 = vst.msk [vmem:[#allocation3 + $0x88] sm:$0xff] %vm2444_vm14, %v8717_v38  ;;  %v8830_v36 = vadd.f32 %v8797_v21, %v2767_v6  ;;  %v8832_v0 = vpop.permute.xlu1 %1725  ;;  %v2493_v6 = vld [vmem:[#allocation3 + $0x80] sm:$0xff] }
 0x385   : > { %v2873_v56 = vmul.f32 1.442695, %v2839_v9  ;;  %v2840_v11 = vsub.f32 0.0, %v8823_v57 }
 0x386   : > { %v2869_v55 = vmul.f32 1.442695, %v2837_v34  ;;  %v2838_v62 = vsub.f32 0.0, %v8830_v36  ;;  %1864 = vrot.lane.b32.xlu1 %v8659_v4, %s11131_s18  ;;  %v1728_v50 = vpop.permute.xlu0 %1727 }
 0x387   : > { %6587 = vpow2.f32 %v2873_v56  ;;  %v2875_v15 = vmul.f32 1.442695, %v2840_v11 }
 0x388   : > { %6589 = vpow2.f32 %v2869_v55  ;;  %v2871_v20 = vmul.f32 1.442695, %v2838_v62  ;;  %v2118_v38 = vpop.permute.xlu1 %2117 }
 0x389   : > { %6591 = vpow2.f32 %v2875_v15  ;;  %2195 = vst.msk [vmem:[#allocation3 + $0x98] sm:$0xff] %vm2175_vm12, %v2118_v38 }
 0x38a   : > { %6593 = vpow2.f32 %v2871_v20  ;;  %1868 = vrot.lane.b32.xlu1 %v8627_v49, %s11131_s18  ;;  %v8841_v58 = vpop.permute.xlu0 %1731 }
 0x38b   : > { %v2494_v9 = vld [vmem:[#allocation3 + $0x88] sm:$0xff] }
 0x38c   : > { %v1722_v34 = vpop.permute.xlu1 %1721  ;;  %v2517_v5 = vpack.c.bf16 %v2494_v9, %v2493_v6 }
 0x38d   : > { %1797 = vst.msk [vmem:[#allocation3 + $0xa8] sm:$0xff] %vm1775_vm9, %v1722_v34 }
 0x38e   : > { %6156 = vmatprep.mubr.msk.bf16.mxu1 %vm2545_vm15, %v2517_v5  ;;  %1998 = vrot.lane.b32.xlu1 %v8675_v10, %s11133_s28  ;;  %v1863_v4 = vpop.permute.xlu0 %1862 }
 0x390   : > { %v1387_v56 = vpop.permute.xlu1 %1386 }
 0x391   : > { %v6588_v11 = vpop.eup %6587  ;;  %1459 = vst.msk [vmem:[#allocation3 + $0xc0] sm:$0xff] %vm1434_vm6, %v1387_v56 }
 0x392   : > { %v6590_v55 = vpop.eup %6589  ;;  %v2935_v62 = vadd.f32 1.0, %v6588_v11  ;;  %1669 = vst.msk [vmem:[#allocation3 + $0xc0] sm:$0xff] %vm1644_vm7, %v8615_v19  ;;  %2002 = vrot.lane.b32.xlu1 %v8638_v44, %s11133_s28  ;;  %v8852_v15 = vpop.permute.xlu0 %1866 }
 0x393   : > { %v6592_v20 = vpop.eup %6591  ;;  %v2933_v5 = vadd.f32 1.0, %v6590_v55  ;;  %1800 = vst.msk [vmem:[#allocation3 + $0xc0] sm:$0xff] %vm1775_vm9, %v1728_v50 }
 0x394   : > { %v6594_v10 = vpop.eup %6593  ;;  %6595 = vrcp.f32 %v2935_v62  ;;  %v2936_v38 = vadd.f32 1.0, %v6592_v20  ;;  %1935 = vst.msk [vmem:[#allocation3 + $0xc0] sm:$0xff] %vm1910_vm10, %v1863_v4  ;;  %v1389_v6 = vpop.permute.xlu1 %1388 }
 0x395   : > { %6597 = vrcp.f32 %v2933_v5  ;;  %v2934_v9 = vadd.f32 1.0, %v6594_v10  ;;  %1460 = vst.msk [vmem:[#allocation3 + $0xc8] sm:$0xff] %vm1434_vm6, %v1389_v6 }
 0x396   : > { %6599 = vrcp.f32 %v2936_v38  ;;  %2129 = vrot.lane.b32.xlu1 %v7861_v30, %s11118_s25  ;;  %v1997_v19 = vpop.permute.xlu0 %1996 }
 0x397   : > { %6601 = vrcp.f32 %v2934_v9  ;;  %2069 = vst.msk [vmem:[#allocation3 + $0xc0] sm:$0xff] %vm2044_vm11, %v1997_v19 }
 0x398   : > { %v1599_v34 = vpop.permute.xlu1 %1598 }
 0x399   : > { %1670 = vst.msk [vmem:[#allocation3 + $0xc8] sm:$0xff] %vm1644_vm7, %v1599_v34 }
 0x39a   : > { %2133 = vrot.lane.b32.xlu1 %v7911_v42, %s11118_s25  ;;  %v8863_v50 = vpop.permute.xlu0 %2000 }
 0x39c   : > { %v1383_v4 = vpop.permute.xlu1 %1382 }
 0x39d   : > { %1457 = vst.msk [vmem:[#allocation3 + $0xb0] sm:$0xff] %vm1434_vm6, %v1383_v4 }
 0x39e   : > { %v6596_v56 = vpop.eup %6595  ;;  %1667 = vst.msk [vmem:[#allocation3 + $0xb0] sm:$0xff] %vm1644_vm7, %v8641_v48  ;;  %2264 = vrot.lane.b32.xlu1 %v8627_v49, %s11143_s1  ;;  %v2128_v30 = vpop.permute.xlu0 %2127 }
 0x39f   : > { %v6598_v11 = vpop.eup %6597  ;;  %v2999_v55 = vmul.f32 %v6596_v56, %v8805_v25  ;;  %1798 = vst.msk [vmem:[#allocation3 + $0xb0] sm:$0xff] %vm1775_vm9, %v8587_v2 }
 0x3a0   : > { %2200 = vst.msk [vmem:[#allocation3 + $0xc0] sm:$0xff] %vm2175_vm12, %v2128_v30  ;;  %v6600_v62 = vpop.eup %6599  ;;  %v2997_v20 = vmul.f32 %v6598_v11, %v8810_v18  ;;  %v1385_v5 = vpop.permute.xlu1 %1384  ;;  %v2495_v30 = vld [vmem:[#allocation3 + $0x90] sm:$0xff] }
 0x3a1   : > { %1933 = vst.msk [vmem:[#allocation3 + $0xb0] sm:$0xff] %vm1910_vm10, %v8629_v17  ;;  %v6602_v48 = vpop.eup %6601  ;;  %v3000_v49 = vmul.f32 %v6600_v62, %v8823_v57 }
 0x3a2   : > { %3031 = vst.msk [vmem:[#allocation2 + $0x31] sm:$0xff] %vm467_vm1, %v2999_v55  ;;  %3029 = vst.msk [vmem:[#allocation2 + $0x19] sm:$0xff] %vm467_vm1, %v2997_v20  ;;  %v2998_v2 = vmul.f32 %v6602_v48, %v8830_v36  ;;  %2268 = vrot.lane.b32.xlu1 %v8696_v8, %s11143_s1  ;;  %v8888_v17 = vpop.permute.xlu0 %2131 }
 0x3a3   : > { %2067 = vst.msk [vmem:[#allocation3 + $0xb0] sm:$0xff] %vm2044_vm11, %v8733_v33 }
 0x3a4   : > { %1458 = vst.msk [vmem:[#allocation3 + $0xb8] sm:$0xff] %vm1434_vm6, %v1385_v5  ;;  %v1595_v33 = vpop.permute.xlu1 %1594  ;;  %v1173_v5 = vld [vmem:[#allocation2 + $0x190] sm:$0x3] }
 0x3a5   : > { %2198 = vst.msk [vmem:[#allocation3 + $0xb0] sm:$0xff] %vm2175_vm12, %v8764_v28  ;;  %v1546_v28 = vrot.slane %v8679_v37, 2 }
 0x3a6   : > { %3032 = vst.msk [vmem:[#allocation2 + $0x39] sm:$0xff] %vm467_vm1, %v3000_v49  ;;  %3030 = vst.msk [vmem:[#allocation2 + $0x21] sm:$0xff] %vm467_vm1, %v2998_v2  ;;  %2398 = vrot.lane.b32.xlu1 %v8638_v44, %s11132_s27  ;;  %v2263_v25 = vpop.permute.xlu0 %2262  ;;  %v1812_v2 = vrot.slane %v1173_v5, 1 }
 0x3a7   : > { %2333 = vst.msk [vmem:[#allocation3 + $0xb0] sm:$0xff] %vm2310_vm13, %v8785_v47  ;;  %2335 = vst.msk [vmem:[#allocation3 + $0xc0] sm:$0xff] %vm2310_vm13, %v2263_v25  ;;  %v11145_v25 = vrot.slane %v8653_v39, 1 }
 0x3a8   : > { %2467 = vst.msk [vmem:[#allocation3 + $0xb0] sm:$0xff] %vm2444_vm14, %v8817_v53  ;;  %v2253_v47 = vpop.permute.xlu1 %2252  ;;  %v11144_v53 = vrot.slane %v7911_v42, 2 }
 0x3a9   : > { %1668 = vst.msk [vmem:[#allocation3 + $0xb8] sm:$0xff] %vm1644_vm7, %v1595_v33  ;;  %v3067_v18 = vld [vmem:[#allocation2 + $0x30] sm:$0xff]  ;;  %v8909_v57 = vld [vmem:[#allocation2 + $0x18] sm:$0xff] }
 0x3aa   : > { %1799 = vst.msk [vmem:[#allocation3 + $0xb8] sm:$0xff] %vm1775_vm9, %v8832_v0  ;;  %3617 = vrot.lane.b32.xlu0 %v3067_v18, %s11127_s26  ;;  %v1547_v37 = vsel %vm1467_vm5, %v11144_v53, %v1546_v28  ;;  %v2267_v44 = vpop.permute.xlu0 %2266  ;;  %v3205_v34 = vrot.slane %v3067_v18, 1  ;;  %v3413_v20 = vrot.slane %v3067_v18, 2 }
 0x3ab   : > { %2330 = vst.msk [vmem:[#allocation3 + $0x98] sm:$0xff] %vm2310_vm13, %v2253_v47  ;;  %2402 = vrot.lane.b32.xlu1 %v1547_v37, %s11132_s27  ;;  %v8955_v47 = vsel %vm1257_vm4, %v11145_v25, %v1812_v2  ;;  %v1176_v25 = vld [vmem:[#allocation2 + $0x1a8] sm:$0x3] }
 0x3ac   : > { %3119 = vst.msk [vmem:[#allocation3 + $0x20] sm:$0xff] %vm467_vm1, %v3067_v18  ;;  %3117 = vst.msk [vmem:[#allocation3 + $0x10] sm:$0xff] %vm467_vm1, %v8909_v57  ;;  %v2387_v10 = vpop.permute.xlu1 %2386 }
 0x3ad   : > { %v8914_v36 = vld [vmem:[#allocation2 + $0x38] sm:$0xff]  ;;  %v8918_v0 = vld [vmem:[#allocation2 + $0x20] sm:$0xff]  ;;  %2464 = vst.msk [vmem:[#allocation3 + $0x98] sm:$0xff] %vm2444_vm14, %v2387_v10 }
 0x3ae   : > { %3120 = vst.msk [vmem:[#allocation3 + $0x28] sm:$0xff] %vm467_vm1, %v8914_v36  ;;  %3118 = vst.msk [vmem:[#allocation3 + $0x18] sm:$0xff] %vm467_vm1, %v8918_v0  ;;  %4010 = vrot.lane.b32.xlu0 %v3067_v18, %s11118_s25  ;;  %v2397_v38 = vpop.permute.xlu0 %2396  ;;  %v3206_v9 = vrot.slane %v8914_v36, 1  ;;  %v3414_v55 = vrot.slane %v8914_v36, 2 }
 0x3af   : > { %1610 = vrot.lane.b32.xlu1 %v1547_v37, %s11130_s0  ;;  %2469 = vst.msk [vmem:[#allocation3 + $0xc0] sm:$0xff] %vm2444_vm14, %v2397_v38 }
 0x3b0   : > { %v1857_v6 = vpop.permute.xlu1 %1856  ;;  %v3207_v56 = vsel %vm1257_vm4, %v3205_v34, %v3206_v9  ;;  %v3415_v49 = vsel %vm1467_vm5, %v3413_v20, %v3414_v55  ;;  %v3201_v34 = vrot.slane %v8918_v0, 1 }
 0x3b1   : > { %1932 = vst.msk [vmem:[#allocation3 + $0xa8] sm:$0xff] %vm1910_vm10, %v1857_v6 }
 0x3b2   : > { %3613 = vrot.lane.b32.xlu0 %v8909_v57, %s11127_s26  ;;  %v2401_v19 = vpop.permute.xlu0 %2400 }
 0x3b3   : > { %1737 = vrot.lane.b32.xlu1 %v7911_v42, %s11127_s26 }
 0x3b4   : > { %v1397_v4 = vpop.permute.xlu1 %1396  ;;  %v2496_v11 = vld [vmem:[#allocation3 + $0x98] sm:$0xff] }
 0x3b5   : > { %1464 = vst.msk [vmem:[#allocation3 + $0xe8] sm:$0xff] %vm1434_vm6, %v1397_v4  ;;  %v2518_v62 = vpack.c.bf16 %v2496_v11, %v2495_v30  ;;  %v3200_v11 = vrot.slane %v8909_v57, 1 }
 0x3b6   : > { %3751 = vrot.lane.b32.xlu0 %v3207_v56, %s11131_s18  ;;  %v1609_v42 = vpop.permute.xlu0 %1608 }
 0x3b7   : > { %1741 = vrot.lane.b32.xlu1 %v8653_v39, %s11127_s26  ;;  %1675 = vst.msk [vmem:[#allocation3 + $0xf0] sm:$0xff] %vm1644_vm7, %v1609_v42  ;;  %6157 = vmatmul.mubr.msk.bf16.vlgmr.msra.gmra.mrb[0].mxu1 %vm2545_vm15, %v2518_v62 }
 0x3b8   : > { %v1607_v48 = vpop.permute.xlu1 %1606 }
 0x3b9   : > { %1674 = vst.msk [vmem:[#allocation3 + $0xe8] sm:$0xff] %vm1644_vm7, %v1607_v48 }
 0x3ba   : > { %3884 = vrot.lane.b32.xlu0 %v3415_v49, %s11133_s28  ;;  %v1736_v33 = vpop.permute.xlu0 %1735 }
 0x3bb   : > { %1872 = vrot.lane.b32.xlu1 %v8696_v8, %s11131_s18  ;;  %1804 = vst.msk [vmem:[#allocation3 + $0xe0] sm:$0xff] %vm1775_vm9, %v1736_v33 }
 0x3bc   : > { %v1391_v28 = vpop.permute.xlu1 %1390 }
 0x3bd   : > { %1461 = vst.msk [vmem:[#allocation3 + $0xd0] sm:$0xff] %vm1434_vm6, %v1391_v28  ;;  %v3202_v28 = vsel %vm1257_vm4, %v3200_v11, %v3201_v34 }
 0x3be   : > { %4144 = vrot.lane.b32.xlu0 %v3207_v56, %s11143_s1  ;;  %1671 = vst.msk [vmem:[#allocation3 + $0xd0] sm:$0xff] %vm1644_vm7, %v8705_v43  ;;  %v1740_v8 = vpop.permute.xlu0 %1739  ;;  %v1946_v43 = vrot.slane %v1173_v5, 2 }
 0x3bf   : > { %1876 = vrot.lane.b32.xlu1 %v8955_v47, %s11131_s18  ;;  %1802 = vst.msk [vmem:[#allocation3 + $0xd0] sm:$0xff] %vm1775_vm9, %v8841_v58  ;;  %1806 = vst.msk [vmem:[#allocation3 + $0xf0] sm:$0xff] %vm1775_vm9, %v1740_v8 }
 0x3c0   : > { %1937 = vst.msk [vmem:[#allocation3 + $0xd0] sm:$0xff] %vm1910_vm10, %v8852_v15  ;;  %v1393_v18 = vpop.permute.xlu1 %1392 }
 0x3c1   : > { %2071 = vst.msk [vmem:[#allocation3 + $0xd0] sm:$0xff] %vm2044_vm11, %v8863_v50  ;;  %v11146_v50 = vrot.slane %v8653_v39, 2 }
 0x3c2   : > { %1462 = vst.msk [vmem:[#allocation3 + $0xd8] sm:$0xff] %vm1434_vm6, %v1393_v18  ;;  %4277 = vrot.lane.b32.xlu0 %v3415_v49, %s11132_s27  ;;  %v1871_v58 = vpop.permute.xlu0 %1870 }
 0x3c3   : > { %2202 = vst.msk [vmem:[#allocation3 + $0xd0] sm:$0xff] %vm2175_vm12, %v8888_v17  ;;  %2006 = vrot.lane.b32.xlu1 %v1547_v37, %s11133_s28  ;;  %v8981_v53 = vsel %vm1467_vm5, %v11146_v50, %v1946_v43  ;;  %v3408_v43 = vrot.slane %v8909_v57, 2 }
 0x3c4   : > { %2337 = vst.msk [vmem:[#allocation3 + $0xd0] sm:$0xff] %vm2310_vm13, %v2267_v44  ;;  %v1603_v15 = vpop.permute.xlu1 %1602 }
 0x3c5   : > { %1939 = vst.msk [vmem:[#allocation3 + $0xe0] sm:$0xff] %vm1910_vm10, %v1871_v58 }
 0x3c6   : > { %2471 = vst.msk [vmem:[#allocation3 + $0xd0] sm:$0xff] %vm2444_vm14, %v2401_v19  ;;  %3283 = vrot.lane.b32.xlu0 %v3207_v56, %s11124_s21  ;;  %v6146_v17 = vpop.f32.mrb[36].mxu0  ;;  %v1875_v37 = vpop.permute.xlu0 %1874 }
 0x3c7   : > { %1672 = vst.msk [vmem:[#allocation3 + $0xd8] sm:$0xff] %vm1644_vm7, %v1603_v15  ;;  %2010 = vrot.lane.b32.xlu1 %v8981_v53, %s11133_s28  ;;  %v2772_v44 = vmul.f32 %v6146_v17, %v8790_v3  ;;  %v2648_v10 = vpop.f32.mrb[37].mxu0 }
 0x3c8   : > { %1941 = vst.msk [vmem:[#allocation3 + $0xf0] sm:$0xff] %vm1910_vm10, %v1875_v37  ;;  %v2770_v38 = vmul.f32 %v8790_v3, %v2648_v10  ;;  %v1861_v6 = vpop.permute.xlu1 %1860  ;;  %v6147_v19 = vpop.f32.mrb[38].mxu0  ;;  %v2212_v37 = vrot.slane %v1176_v25, 1 }
 0x3c9   : > { %v8990_v4 = vadd.f32 %v8797_v21, %v2772_v44  ;;  %1934 = vst.msk [vmem:[#allocation3 + $0xb8] sm:$0xff] %vm1910_vm10, %v1861_v6  ;;  %v2773_v56 = vmul.f32 %v6147_v19, %v8790_v3  ;;  %v2651_v30 = vpop.f32.mrb[39].mxu0 }
 0x3ca   : > { %3491 = vrot.lane.b32.xlu0 %v3415_v49, %s11130_s0  ;;  %v8997_v62 = vadd.f32 %v8797_v21, %v2770_v38  ;;  %v2771_v42 = vmul.f32 %v8790_v3, %v2651_v30  ;;  %v2005_v20 = vpop.permute.xlu0 %2004  ;;  %v2213_v6 = vsel %vm1257_vm4, %v2210_v60, %v2212_v37  ;;  %v2346_v30 = vrot.slane %v1176_v25, 2 }
 0x3cb   : > { %2137 = vrot.lane.b32.xlu1 %v8653_v39, %s11118_s25  ;;  %v2843_v5 = vsub.f32 0.0, %v8990_v4  ;;  %v9004_v48 = vadd.f32 %v8797_v21, %v2773_v56  ;;  %2073 = vst.msk [vmem:[#allocation3 + $0xe0] sm:$0xff] %vm2044_vm11, %v2005_v20  ;;  %v3409_v39 = vrot.slane %v8918_v0, 2 }
 0x3cc   : > { %v2841_v49 = vsub.f32 0.0, %v8997_v62  ;;  %v9009_v2 = vadd.f32 %v8797_v21, %v2771_v42  ;;  %v1401_v33 = vpop.permute.xlu1 %1400 }
 0x3cd   : > { %v2881_v8 = vmul.f32 1.442695, %v2843_v5  ;;  %v2844_v18 = vsub.f32 0.0, %v9004_v48  ;;  %1466 = vst.msk [vmem:[#allocation3 + $0xf8] sm:$0xff] %vm1434_vm6, %v1401_v33  ;;  %v3410_v38 = vsel %vm1467_vm5, %v3408_v43, %v3409_v39 }
 0x3ce   : > { %3279 = vrot.lane.b32.xlu0 %v3202_v28, %s11124_s21  ;;  %v2877_v58 = vmul.f32 1.442695, %v2841_v49  ;;  %v2842_v15 = vsub.f32 0.0, %v9009_v2  ;;  %v2009_v50 = vpop.permute.xlu0 %2008 }
 0x3cf   : > { %2141 = vrot.lane.b32.xlu1 %v8714_v14, %s11118_s25  ;;  %6603 = vpow2.f32 %v2881_v8  ;;  %v2883_v17 = vmul.f32 1.442695, %v2844_v18  ;;  %2075 = vst.msk [vmem:[#allocation3 + $0xf0] sm:$0xff] %vm2044_vm11, %v2009_v50 }
 0x3d0   : > { %6605 = vpow2.f32 %v2877_v58  ;;  %v2879_v44 = vmul.f32 1.442695, %v2842_v15  ;;  %v1991_v10 = vpop.permute.xlu1 %1990 }
 0x3d1   : > { %6607 = vpow2.f32 %v2883_v17  ;;  %2066 = vst.msk [vmem:[#allocation3 + $0xa8] sm:$0xff] %vm2044_vm11, %v1991_v10  ;;  %v11147_v17 = vrot.slane %v8538_v46, 2 }
 0x3d2   : > { %3487 = vrot.lane.b32.xlu0 %v3410_v38, %s11130_s0  ;;  %6609 = vpow2.f32 %v2879_v44  ;;  %v2136_v57 = vpop.permute.xlu0 %2135 }
 0x3d3   : > { %2272 = vrot.lane.b32.xlu1 %v8955_v47, %s11143_s1  ;;  %2204 = vst.msk [vmem:[#allocation3 + $0xe0] sm:$0xff] %vm2175_vm12, %v2136_v57  ;;  %v3063_v47 = vld [vmem:[#allocation2 + $0x10] sm:$0x3] }
 0x3d4   : > { %v1995_v19 = vpop.permute.xlu1 %1994  ;;  %v3198_v25 = vrot.slane %v3063_v47, 1 }
 0x3d5   : > { %2068 = vst.msk [vmem:[#allocation3 + $0xb8] sm:$0xff] %vm2044_vm11, %v1995_v19 }
 0x3d6   : > { %3747 = vrot.lane.b32.xlu0 %v3202_v28, %s11131_s18  ;;  %v2140_v56 = vpop.permute.xlu0 %2139  ;;  %v2347_v28 = vsel %vm1467_vm5, %v2344_v24, %v2346_v30  ;;  %v3199_v14 = vsel %vm1257_vm4, %v3196_v26, %v3198_v25  ;;  %v3406_v24 = vrot.slane %v3063_v47, 2 }
 0x3d7   : > { %2276 = vrot.lane.b32.xlu1 %v2213_v6, %s11143_s1  ;;  %2206 = vst.msk [vmem:[#allocation3 + $0xf0] sm:$0xff] %vm2175_vm12, %v2140_v56 }
 0x3d8   : > { %v2122_v11 = vpop.permute.xlu1 %2121  ;;  %v3407_v37 = vsel %vm1467_vm5, %v11147_v17, %v3406_v24 }
 0x3d9   : > { %v6604_v42 = vpop.eup %6603  ;;  %2197 = vst.msk [vmem:[#allocation3 + $0xa8] sm:$0xff] %vm2175_vm12, %v2122_v11 }
 0x3da   : > { %3880 = vrot.lane.b32.xlu0 %v3410_v38, %s11133_s28  ;;  %v6606_v20 = vpop.eup %6605  ;;  %v2939_v60 = vadd.f32 1.0, %v6604_v42  ;;  %v2271_v5 = vpop.permute.xlu0 %2270 }
 0x3db   : > { %2406 = vrot.lane.b32.xlu1 %v8981_v53, %s11132_s27  ;;  %v6608_v49 = vpop.eup %6607  ;;  %v2937_v33 = vadd.f32 1.0, %v6606_v20  ;;  %2339 = vst.msk [vmem:[#allocation3 + $0xe0] sm:$0xff] %vm2310_vm13, %v2271_v5  ;;  %v2497_v20 = vld [vmem:[#allocation3 + $0xa0] sm:$0xff] }
 0x3dc   : > { %v6610_v8 = vpop.eup %6609  ;;  %6611 = vrcp.f32 %v2939_v60  ;;  %v2940_v18 = vadd.f32 1.0, %v6608_v49  ;;  %v2126_v43 = vpop.permute.xlu1 %2125 }
 0x3dd   : > { %6613 = vrcp.f32 %v2937_v33  ;;  %v2938_v58 = vadd.f32 1.0, %v6610_v8  ;;  %2199 = vst.msk [vmem:[#allocation3 + $0xb8] sm:$0xff] %vm2175_vm12, %v2126_v43 }
 0x3de   : > { %6615 = vrcp.f32 %v2940_v18  ;;  %v2275_v53 = vpop.permute.xlu0 %2274  ;;  %v2499_v18 = vld [vmem:[#allocation3 + $0xb0] sm:$0xff] }
 0x3df   : > { %2410 = vrot.lane.b32.xlu1 %v2347_v28, %s11132_s27  ;;  %6617 = vrcp.f32 %v2938_v58  ;;  %2341 = vst.msk [vmem:[#allocation3 + $0xf0] sm:$0xff] %vm2310_vm13, %v2275_v53 }
 0x3e0   : > { %v2257_v15 = vpop.permute.xlu1 %2256 }
 0x3e1   : > { %2332 = vst.msk [vmem:[#allocation3 + $0xa8] sm:$0xff] %vm2310_vm13, %v2257_v15 }
 0x3e2   : > { %v2405_v50 = vpop.permute.xlu0 %2404 }
 0x3e3   : > { %3277 = vrot.lane.b32.xlu1 %v3199_v14, %s11124_s21  ;;  %2473 = vst.msk [vmem:[#allocation3 + $0xe0] sm:$0xff] %vm2444_vm14, %v2405_v50 }
 0x3e4   : > { %v2261_v44 = vpop.permute.xlu1 %2260 }
 0x3e5   : > { %2334 = vst.msk [vmem:[#allocation3 + $0xb8] sm:$0xff] %vm2310_vm13, %v2261_v44 }
 0x3e6   : > { %v6612_v10 = vpop.eup %6611  ;;  %v2409_v26 = vpop.permute.xlu0 %2408 }
 0x3e7   : > { %3485 = vrot.lane.b32.xlu1 %v3407_v37, %s11130_s0  ;;  %v6614_v38 = vpop.eup %6613  ;;  %v3003_v57 = vmul.f32 %v6612_v10, %v8990_v4  ;;  %2475 = vst.msk [vmem:[#allocation3 + $0xf0] sm:$0xff] %vm2444_vm14, %v2409_v26 }
 0x3e8   : > { %v6616_v6 = vpop.eup %6615  ;;  %v3001_v19 = vmul.f32 %v6614_v38, %v8997_v62  ;;  %v2391_v56 = vpop.permute.xlu1 %2390  ;;  %v3066_v38 = vld [vmem:[#allocation2 + $0x28] sm:$0x3] }
 0x3e9   : > { %v6618_v30 = vpop.eup %6617  ;;  %3035 = vst.msk [vmem:[#allocation2 + $0x61] sm:$0xff] %vm467_vm1, %v3003_v57  ;;  %v3004_v46 = vmul.f32 %v6616_v6, %v9004_v48  ;;  %v3069_v48 = vld [vmem:[#allocation2 + $0x40] sm:$0x3]  ;;  %v3203_v6 = vrot.slane %v3066_v38, 1 }
 0x3ea   : > { %2466 = vst.msk [vmem:[#allocation3 + $0xa8] sm:$0xff] %vm2444_vm14, %v2391_v56  ;;  %v3002_v11 = vmul.f32 %v6618_v30, %v9009_v2  ;;  %v3276_v4 = vpop.permute.xlu0 %3275  ;;  %v3208_v49 = vrot.slane %v3069_v48, 1  ;;  %v3416_v14 = vrot.slane %v3069_v48, 2  ;;  %v3411_v30 = vrot.slane %v3066_v38, 2 }
 0x3eb   : > { %3033 = vst.msk [vmem:[#allocation2 + $0x49] sm:$0xff] %vm467_vm1, %v3001_v19  ;;  %3619 = vrot.lane.b32.xlu1 %v8914_v36, %s11127_s26  ;;  %3036 = vst.msk [vmem:[#allocation2 + $0x69] sm:$0xff] %vm467_vm1, %v3004_v46  ;;  %v3204_v56 = vsel %vm1257_vm4, %v3201_v34, %v3203_v6  ;;  %v2501_v6 = vld [vmem:[#allocation3 + $0xc0] sm:$0xff] }
 0x3ec   : > { %3371 = vst.msk [vmem:[#allocation3] sm:$0xff] %vm1434_vm6, %v3276_v4  ;;  %v2395_v62 = vpop.permute.xlu1 %2394  ;;  %v3209_v58 = vsel %vm1257_vm4, %v3206_v9, %v3208_v49  ;;  %v3417_v15 = vsel %vm1467_vm5, %v3414_v55, %v3416_v14  ;;  %v3412_v34 = vsel %vm1467_vm5, %v3409_v39, %v3411_v30 }
 0x3ed   : > { %3034 = vst.msk [vmem:[#allocation2 + $0x51] sm:$0xff] %vm467_vm1, %v3002_v11 }
 0x3ee   : > { %2468 = vst.msk [vmem:[#allocation3 + $0xb8] sm:$0xff] %vm2444_vm14, %v2395_v62  ;;  %v3484_v47 = vpop.permute.xlu0 %3483 }
 0x3ef   : > { %4012 = vrot.lane.b32.xlu1 %v8914_v36, %s11118_s25  ;;  %3579 = vst.msk [vmem:[#allocation3] sm:$0xff] %vm1644_vm7, %v3484_v47 }
 0x3f0   : > { %v1730_v2 = vpop.permute.xlu1 %1729  ;;  %v3073_v42 = vld [vmem:[#allocation2 + $0x60] sm:$0xff] }
 0x3f1   : > { %v2498_v60 = vld [vmem:[#allocation3 + $0xa8] sm:$0xff]  ;;  %1801 = vst.msk [vmem:[#allocation3 + $0xc8] sm:$0xff] %vm1775_vm9, %v1730_v2  ;;  %3625 = vrot.lane.b32.xlu0 %v3073_v42, %s11127_s26  ;;  %v3215_v17 = vrot.slane %v3073_v42, 1  ;;  %v3423_v44 = vrot.slane %v3073_v42, 2 }
 0x3f2   : > { %3123 = vst.msk [vmem:[#allocation3 + $0x40] sm:$0xff] %vm467_vm1, %v3073_v42  ;;  %v2519_v5 = vpack.c.bf16 %v2498_v60, %v2497_v20  ;;  %v9080_v33 = vld [vmem:[#allocation2 + $0x48] sm:$0xff] }
 0x3f3   : > { %3615 = vrot.lane.b32.xlu1 %v8918_v0, %s11127_s26  ;;  %3121 = vst.msk [vmem:[#allocation3 + $0x30] sm:$0xff] %vm467_vm1, %v9080_v33  ;;  %v9086_v28 = vld [vmem:[#allocation2 + $0x68] sm:$0xff] }
 0x3f4   : > { %6160 = vmatprep.mubr.msk.bf16.mxu1 %vm2545_vm15, %v2519_v5  ;;  %3124 = vst.msk [vmem:[#allocation3 + $0x48] sm:$0xff] %vm467_vm1, %v9086_v28  ;;  %v9091_v25 = vld [vmem:[#allocation2 + $0x50] sm:$0xff]  ;;  %v1734_v8 = vpop.permute.xlu1 %1733  ;;  %v3216_v9 = vrot.slane %v9086_v28, 1  ;;  %v3424_v55 = vrot.slane %v9086_v28, 2 }
 0x3f5   : > { %v2500_v43 = vld [vmem:[#allocation3 + $0xb8] sm:$0xff]  ;;  %3122 = vst.msk [vmem:[#allocation3 + $0x38] sm:$0xff] %vm467_vm1, %v9091_v25  ;;  %4018 = vrot.lane.b32.xlu0 %v3073_v42, %s11118_s25  ;;  %v3211_v39 = vrot.slane %v9091_v25, 1 }
 0x3f6   : > { %1803 = vst.msk [vmem:[#allocation3 + $0xd8] sm:$0xff] %vm1775_vm9, %v1734_v8  ;;  %v2520_v53 = vpack.c.bf16 %v2500_v43, %v2499_v18  ;;  %v3217_v36 = vsel %vm1257_vm4, %v3215_v17, %v3216_v9  ;;  %v3425_v26 = vsel %vm1467_vm5, %v3423_v44, %v3424_v55 }
 0x3f7   : > { %3753 = vrot.lane.b32.xlu1 %v3209_v58, %s11131_s18 }
 0x3f8   : > { %6161 = vmatmul.mubr.msk.bf16.gmra.mrb[4].mxu1 %vm2545_vm15, %v2520_v53  ;;  %v1865_v24 = vpop.permute.xlu1 %1864 }
 0x3f9   : > { %1936 = vst.msk [vmem:[#allocation3 + $0xc8] sm:$0xff] %vm1910_vm10, %v1865_v24  ;;  %4014 = vrot.lane.b32.xlu0 %v9080_v33, %s11118_s25  ;;  %v3210_v24 = vrot.slane %v9080_v33, 1 }
 0x3fb   : > { %3886 = vrot.lane.b32.xlu1 %v3417_v15, %s11133_s28  ;;  %v3212_v17 = vsel %vm1257_vm4, %v3210_v24, %v3211_v39 }
 0x3fc   : > { %v1869_v50 = vpop.permute.xlu1 %1868 }
 0x3fd   : > { %1938 = vst.msk [vmem:[#allocation3 + $0xd8] sm:$0xff] %vm1910_vm10, %v1869_v50  ;;  %3621 = vrot.lane.b32.xlu0 %v9080_v33, %s11127_s26 }
 0x3ff   : > { %4146 = vrot.lane.b32.xlu1 %v3209_v58, %s11143_s1 }
 0x400   : > { %v1999_v37 = vpop.permute.xlu1 %1998 }
 0x401   : > { %2070 = vst.msk [vmem:[#allocation3 + $0xc8] sm:$0xff] %vm2044_vm11, %v1999_v37  ;;  %3759 = vrot.lane.b32.xlu0 %v3217_v36, %s11131_s18  ;;  %v3419_v37 = vrot.slane %v9091_v25, 2 }
 0x403   : > { %4279 = vrot.lane.b32.xlu1 %v3417_v15, %s11132_s27 }
 0x404   : > { %v2003_v10 = vpop.permute.xlu1 %2002 }
 0x405   : > { %2072 = vst.msk [vmem:[#allocation3 + $0xd8] sm:$0xff] %vm2044_vm11, %v2003_v10  ;;  %3892 = vrot.lane.b32.xlu0 %v3425_v26, %s11133_s28 }
 0x407   : > { %3285 = vrot.lane.b32.xlu1 %v3209_v58, %s11124_s21 }
 0x408   : > { %v2130_v57 = vpop.permute.xlu1 %2129 }
 0x409   : > { %2201 = vst.msk [vmem:[#allocation3 + $0xc8] sm:$0xff] %vm2175_vm12, %v2130_v57  ;;  %4152 = vrot.lane.b32.xlu0 %v3217_v36, %s11143_s1 }
 0x40b   : > { %3493 = vrot.lane.b32.xlu1 %v3417_v15, %s11130_s0 }
 0x40c   : > { %v2134_v19 = vpop.permute.xlu1 %2133 }
 0x40d   : > { %2203 = vst.msk [vmem:[#allocation3 + $0xd8] sm:$0xff] %vm2175_vm12, %v2134_v19  ;;  %4285 = vrot.lane.b32.xlu0 %v3425_v26, %s11132_s27 }
 0x40f   : > { %v6150_v46 = vpop.f32.mrb[40].mxu0  ;;  %3281 = vrot.lane.b32.xlu1 %v3204_v56, %s11124_s21 }
 0x410   : > { %v2776_v11 = vmul.f32 %v6150_v46, %v8790_v3  ;;  %v2664_v4 = vpop.f32.mrb[41].mxu0  ;;  %v2265_v47 = vpop.permute.xlu1 %2264 }
 0x411   : > { %v2774_v62 = vmul.f32 %v8790_v3, %v2664_v4  ;;  %v6151_v48 = vpop.f32.mrb[42].mxu0  ;;  %2336 = vst.msk [vmem:[#allocation3 + $0xc8] sm:$0xff] %vm2310_vm13, %v2265_v47  ;;  %3291 = vrot.lane.b32.xlu0 %v3217_v36, %s11124_s21  ;;  %v3418_v36 = vrot.slane %v9080_v33, 2 }
 0x412   : > { %v9139_v2 = vadd.f32 %v8797_v21, %v2776_v11  ;;  %v2777_v42 = vmul.f32 %v6151_v48, %v8790_v3  ;;  %v2667_v20 = vpop.f32.mrb[43].mxu0 }
 0x413   : > { %v9148_v60 = vadd.f32 %v8797_v21, %v2774_v62  ;;  %v2775_v5 = vmul.f32 %v8790_v3, %v2667_v20  ;;  %3489 = vrot.lane.b32.xlu1 %v3412_v34, %s11130_s0  ;;  %v2503_v20 = vld [vmem:[#allocation3 + $0xd0] sm:$0xff] }
 0x414   : > { %v2847_v49 = vsub.f32 0.0, %v9139_v2  ;;  %v9154_v8 = vadd.f32 %v8797_v21, %v2777_v42  ;;  %v2269_v0 = vpop.permute.xlu1 %2268 }
 0x415   : > { %v2845_v18 = vsub.f32 0.0, %v9148_v60  ;;  %v9158_v43 = vadd.f32 %v8797_v21, %v2775_v5  ;;  %2338 = vst.msk [vmem:[#allocation3 + $0xd8] sm:$0xff] %vm2310_vm13, %v2269_v0  ;;  %3499 = vrot.lane.b32.xlu0 %v3425_v26, %s11130_s0  ;;  %v3420_v26 = vsel %vm1467_vm5, %v3418_v36, %v3419_v37 }
 0x416   : > { %v2889_v58 = vmul.f32 1.442695, %v2847_v49  ;;  %v2848_v53 = vsub.f32 0.0, %v9154_v8 }
 0x417   : > { %v2885_v3 = vmul.f32 1.442695, %v2845_v18  ;;  %v2846_v14 = vsub.f32 0.0, %v9158_v43  ;;  %3749 = vrot.lane.b32.xlu1 %v3204_v56, %s11131_s18  ;;  %v3075_v18 = vld [vmem:[#allocation2 + $0x70] sm:$0x3] }
 0x418   : > { %6619 = vpow2.f32 %v2889_v58  ;;  %v2891_v21 = vmul.f32 1.442695, %v2848_v53  ;;  %v2399_v50 = vpop.permute.xlu1 %2398  ;;  %v3218_v53 = vrot.slane %v3075_v18, 1 }
 0x419   : > { %6621 = vpow2.f32 %v2885_v3  ;;  %v2887_v15 = vmul.f32 1.442695, %v2846_v14  ;;  %2470 = vst.msk [vmem:[#allocation3 + $0xc8] sm:$0xff] %vm2444_vm14, %v2399_v50  ;;  %4148 = vrot.lane.b32.xlu0 %v3212_v17, %s11143_s1 }
 0x41a   : > { %6623 = vpow2.f32 %v2891_v21  ;;  %v3219_v24 = vsel %vm1257_vm4, %v3216_v9, %v3218_v53  ;;  %v3426_v21 = vrot.slane %v3075_v18, 2 }
 0x41b   : > { %6625 = vpow2.f32 %v2887_v15  ;;  %3882 = vrot.lane.b32.xlu1 %v3412_v34, %s11133_s28 }
 0x41c   : > { %v9175_v44 = vpop.permute.xlu0 %3617  ;;  %v3427_v9 = vsel %vm1467_vm5, %v3424_v55, %v3426_v21 }
 0x41d   : > { %v2403_v10 = vpop.permute.xlu1 %2402  ;;  %4281 = vrot.lane.b32.xlu0 %v3420_v26, %s11132_s27 }
 0x41e   : > { %2472 = vst.msk [vmem:[#allocation3 + $0xd8] sm:$0xff] %vm2444_vm14, %v2403_v10 }
 0x41f   : > { %3627 = vrot.lane.b32.xlu1 %v9086_v28, %s11127_s26 }
 0x420   : > { %v9184_v38 = vpop.permute.xlu0 %4010  ;;  %v2502_v19 = vld [vmem:[#allocation3 + $0xc8] sm:$0xff] }
 0x421   : > { %v1611_v57 = vpop.permute.xlu1 %1610  ;;  %3287 = vrot.lane.b32.xlu0 %v3212_v17, %s11124_s21  ;;  %v2521_v56 = vpack.c.bf16 %v2502_v19, %v2501_v6 }
 0x422   : > { %v6620_v33 = vpop.eup %6619  ;;  %1676 = vst.msk [vmem:[#allocation3 + $0xf8] sm:$0xff] %vm1644_vm7, %v1611_v57 }
 0x423   : > { %v6622_v30 = vpop.eup %6621  ;;  %v2943_v46 = vadd.f32 1.0, %v6620_v33  ;;  %4020 = vrot.lane.b32.xlu1 %v9086_v28, %s11118_s25  ;;  %6164 = vmatprep.mubr.msk.bf16.mxu1 %vm2545_vm15, %v2521_v56 }
 0x424   : > { %v6624_v11 = vpop.eup %6623  ;;  %v2941_v4 = vadd.f32 1.0, %v6622_v30  ;;  %v3614_v62 = vpop.permute.xlu0 %3613  ;;  %v6456_v30 = vld [vmem:[%s11041_s7] sm:$0xff]  }
 0x425   : > { %v6626_v48 = vpop.eup %6625  ;;  %6627 = vrcp.f32 %v2943_v46  ;;  %v2944_v47 = vadd.f32 1.0, %v6624_v11  ;;  %3709 = vst.msk [vmem:[#allocation3] sm:$0xff] %vm1775_vm9, %v3614_v62  ;;  %v1738_v42 = vpop.permute.xlu1 %1737  ;;  %v2504_v34 = vld [vmem:[#allocation3 + $0xd8] sm:$0xff]  ;;  %3495 = vrot.lane.b32.xlu0 %v3420_v26, %s11130_s0  ;;  %6172 = vmatprep.subr.bf16.mxu0 %v6456_v30  ;;  %v3072_v62 = vld [vmem:[#allocation2 + $0x58] sm:$0x3] }
 0x426   : > { %6629 = vrcp.f32 %v2941_v4  ;;  %v2942_v5 = vadd.f32 1.0, %v6626_v48  ;;  %1805 = vst.msk [vmem:[#allocation3 + $0xe8] sm:$0xff] %vm1775_vm9, %v1738_v42  ;;  %v2522_v49 = vpack.c.bf16 %v2504_v34, %v2503_v20  ;;  %6173 = vmatpush3.bf16.msra.mxu0 %v6456_v30  ;;  %v6457_v48 = vld [vmem:[%s11041_s7 + $0x8] sm:$0xff]   ;;  %v3213_v20 = vrot.slane %v3072_v62, 1 }
 0x427   : > { %6631 = vrcp.f32 %v2944_v47  ;;  %4016 = vrot.lane.b32.xlu1 %v9091_v25, %s11118_s25  ;;  %6174 = vmatprep.subr.bf16.mxu0 %v6457_v48  ;;  %v6458_v34 = vld [vmem:[%s11041_s7 + $0x10] ss:$0 sps:$4 sm:$0x33]  }
 0x428   : > { %6633 = vrcp.f32 %v2942_v5  ;;  %6165 = vmatmul.mubr.msk.bf16.gmra.mrb[8].mxu1 %vm2545_vm15, %v2522_v49  ;;  %v9197_v0 = vpop.permute.xlu0 %3751  ;;  %v3214_v53 = vsel %vm1257_vm4, %v3211_v39, %v3213_v20 }
 0x429   : > { %v1742_v58 = vpop.permute.xlu1 %1741  ;;  %3755 = vrot.lane.b32.xlu0 %v3212_v17, %s11131_s18 }
 0x42a   : > { %1807 = vst.msk [vmem:[#allocation3 + $0xf8] sm:$0xff] %vm1775_vm9, %v1742_v58  ;;  %6175 = vmatpush3.bf16.msra.mxu0 %v6457_v48  ;;  %v4522_v58 = vsel %vm2594_vm8, %v6458_v34, 0 }
 0x42b   : > { %3623 = vrot.lane.b32.xlu1 %v9091_v25, %s11127_s26  ;;  %6319 = vmatprep.subr.msk.bf16.mxu0 %vm2594_vm8, %v6458_v34 }
 0x42c   : > { %v9203_v3 = vpop.permute.xlu0 %3884 }
 0x42d   : > { %v1873_v14 = vpop.permute.xlu1 %1872  ;;  %3888 = vrot.lane.b32.xlu0 %v3420_v26, %s11133_s28 }
 0x42e   : > { %1940 = vst.msk [vmem:[#allocation3 + $0xe8] sm:$0xff] %vm1910_vm10, %v1873_v14  ;;  %v3421_v14 = vrot.slane %v3072_v62, 2  ;;  %6177 = vmatpush3.bf16.msra.mxu0 %v4522_v58 }
 0x42f   : > { %v6628_v15 = vpop.eup %6627  ;;  %3761 = vrot.lane.b32.xlu1 %v3219_v24, %s11131_s18 }
 0x430   : > { %v6630_v50 = vpop.eup %6629  ;;  %v3007_v17 = vmul.f32 %v6628_v15, %v9139_v2  ;;  %v9212_v36 = vpop.permute.xlu0 %4144 }
 0x431   : > { %v6632_v10 = vpop.eup %6631  ;;  %v3005_v57 = vmul.f32 %v6630_v50, %v9148_v60  ;;  %v1877_v6 = vpop.permute.xlu1 %1876 }
 0x432   : > { %v6634_v19 = vpop.eup %6633  ;;  %3039 = vst.msk [vmem:[#allocation2 + $0x91] sm:$0xff] %vm467_vm1, %v3007_v17  ;;  %v3008_v26 = vmul.f32 %v6632_v10, %v9154_v8 }
 0x433   : > { %1942 = vst.msk [vmem:[#allocation3 + $0xf8] sm:$0xff] %vm1910_vm10, %v1877_v6  ;;  %v3006_v2 = vmul.f32 %v6634_v19, %v9158_v43  ;;  %3894 = vrot.lane.b32.xlu1 %v3427_v9, %s11133_s28  ;;  %v2507_v19 = vld [vmem:[#allocation3 + $0xf0] sm:$0xff] }
 0x434   : > { %3037 = vst.msk [vmem:[#allocation2 + $0x79] sm:$0xff] %vm467_vm1, %v3005_v57  ;;  %3040 = vst.msk [vmem:[#allocation2 + $0x99] sm:$0xff] %vm467_vm1, %v3008_v26  ;;  %v9225_v60 = vpop.permute.xlu0 %4277  ;;  %v9322_v26 = vld [vmem:[%s11039_s5] ss:$0 sm:$0xff] }
 0x435   : > { %3038 = vst.msk [vmem:[#allocation2 + $0x81] sm:$0xff] %vm467_vm1, %v3006_v2  ;;  %v2007_v33 = vpop.permute.xlu1 %2006 }
 0x436   : > { %2074 = vst.msk [vmem:[#allocation3 + $0xe8] sm:$0xff] %vm2044_vm11, %v2007_v33 }
 0x437   : > { %4154 = vrot.lane.b32.xlu1 %v3219_v24, %s11143_s1 }
 0x438   : > { %v3284_v28 = vpop.permute.xlu0 %3283 }
 0x439   : > { %3375 = vst.msk [vmem:[#allocation3 + $0x20] sm:$0xff] %vm1434_vm6, %v3284_v28  ;;  %v2011_v55 = vpop.permute.xlu1 %2010  ;;  %v9231_v8 = vld [vmem:[#allocation2 + $0x90] sm:$0xff] }
 0x43a   : > { %2076 = vst.msk [vmem:[#allocation3 + $0xf8] sm:$0xff] %vm2044_vm11, %v2011_v55  ;;  %3633 = vrot.lane.b32.xlu0 %v9231_v8, %s11127_s26 }
 0x43b   : > { %3127 = vst.msk [vmem:[#allocation3 + $0x60] sm:$0xff] %vm467_vm1, %v9231_v8  ;;  %v9238_v43 = vld [vmem:[#allocation2 + $0x78] sm:$0xff]  ;;  %4287 = vrot.lane.b32.xlu1 %v3427_v9, %s11132_s27 }
 0x43c   : > { %3125 = vst.msk [vmem:[#allocation3 + $0x50] sm:$0xff] %vm467_vm1, %v9238_v43  ;;  %v9243_v56 = vld [vmem:[#allocation2 + $0x98] sm:$0xff]  ;;  %v3492_v46 = vpop.permute.xlu0 %3491  ;;  %v9250_v11 = vld [vmem:[#allocation2 + $0x80] sm:$0xff] }
 0x43d   : > { %3128 = vst.msk [vmem:[#allocation3 + $0x68] sm:$0xff] %vm467_vm1, %v9243_v56  ;;  %v2138_v4 = vpop.permute.xlu1 %2137  ;;  %3126 = vst.msk [vmem:[#allocation3 + $0x58] sm:$0xff] %vm467_vm1, %v9250_v11  ;;  %v3226_v18 = vrot.slane %v9243_v56, 1  ;;  %v3434_v15 = vrot.slane %v9243_v56, 2  ;;  %v3221_v58 = vrot.slane %v9250_v11, 1 }
 0x43e   : > { %3583 = vst.msk [vmem:[#allocation3 + $0x20] sm:$0xff] %vm1644_vm7, %v3492_v46  ;;  %4026 = vrot.lane.b32.xlu0 %v9231_v8, %s11118_s25 }
 0x43f   : > { %2205 = vst.msk [vmem:[#allocation3 + $0xe8] sm:$0xff] %vm2175_vm12, %v2138_v4  ;;  %3293 = vrot.lane.b32.xlu1 %v3219_v24, %s11124_s21  ;;  %v3225_v24 = vrot.slane %v9231_v8, 1 }
 0x440   : > { %v3280_v47 = vpop.permute.xlu0 %3279 }
 0x441   : > { %3373 = vst.msk [vmem:[#allocation3 + $0x10] sm:$0xff] %vm1434_vm6, %v3280_v47  ;;  %v2142_v42 = vpop.permute.xlu1 %2141  ;;  %v3227_v39 = vsel %vm1257_vm4, %v3225_v24, %v3226_v18 }
 0x442   : > { %2207 = vst.msk [vmem:[#allocation3 + $0xf8] sm:$0xff] %vm2175_vm12, %v2142_v42  ;;  %4022 = vrot.lane.b32.xlu0 %v9238_v43, %s11118_s25 }
 0x443   : > { %3501 = vrot.lane.b32.xlu1 %v3427_v9, %s11130_s0 }
 0x444   : > { %v3488_v5 = vpop.permute.xlu0 %3487 }
 0x445   : > { %3581 = vst.msk [vmem:[#allocation3 + $0x10] sm:$0xff] %vm1644_vm7, %v3488_v5  ;;  %v2273_v49 = vpop.permute.xlu1 %2272 }
 0x446   : > { %3711 = vst.msk [vmem:[#allocation3 + $0x10] sm:$0xff] %vm1775_vm9, %v9175_v44  ;;  %3629 = vrot.lane.b32.xlu0 %v9238_v43, %s11127_s26 }
 0x447   : > { %2340 = vst.msk [vmem:[#allocation3 + $0xe8] sm:$0xff] %vm2310_vm13, %v2273_v49  ;;  %4150 = vrot.lane.b32.xlu1 %v3214_v53, %s11143_s1 }
 0x448   : > { %3845 = vst.msk [vmem:[#allocation3 + $0x10] sm:$0xff] %vm1910_vm10, %v9197_v0  ;;  %v3748_v44 = vpop.permute.xlu0 %3747  ;;  %v3422_v0 = vsel %vm1467_vm5, %v3419_v37, %v3421_v14 }
 0x449   : > { %3978 = vst.msk [vmem:[#allocation3 + $0x10] sm:$0xff] %vm2044_vm11, %v9203_v3  ;;  %v2277_v21 = vpop.permute.xlu1 %2276  ;;  %v3433_v3 = vrot.slane %v9231_v8, 2  ;;  %v9330_v8 = vld [vmem:[%s11040_s6] ss:$0 sm:$0xff] }
 0x44a   : > { %3843 = vst.msk [vmem:[#allocation3] sm:$0xff] %vm1910_vm10, %v3748_v44  ;;  %3767 = vrot.lane.b32.xlu0 %v3227_v39, %s11131_s18 }
 0x44b   : > { %2342 = vst.msk [vmem:[#allocation3 + $0xf8] sm:$0xff] %vm2310_vm13, %v2277_v21  ;;  %4283 = vrot.lane.b32.xlu1 %v3422_v0, %s11132_s27  ;;  %v3435_v10 = vsel %vm1467_vm5, %v3433_v3, %v3434_v15  ;;  %v3220_v21 = vrot.slane %v9238_v43, 1 }
 0x44c   : > { %v3881_v50 = vpop.permute.xlu0 %3880 }
 0x44d   : > { %3976 = vst.msk [vmem:[#allocation3] sm:$0xff] %vm2044_vm11, %v3881_v50  ;;  %v2407_v17 = vpop.permute.xlu1 %2406  ;;  %v3222_v50 = vsel %vm1257_vm4, %v3220_v21, %v3221_v58 }
 0x44e   : > { %4106 = vst.msk [vmem:[#allocation3] sm:$0xff] %vm2175_vm12, %v9184_v38  ;;  %3900 = vrot.lane.b32.xlu0 %v3435_v10, %s11133_s28  ;;  %v2505_v38 = vld [vmem:[#allocation3 + $0xe0] sm:$0xff] }
 0x44f   : > { %2474 = vst.msk [vmem:[#allocation3 + $0xe8] sm:$0xff] %vm2444_vm14, %v2407_v17  ;;  %3289 = vrot.lane.b32.xlu1 %v3214_v53, %s11124_s21  ;;  %v3429_v17 = vrot.slane %v9250_v11, 2 }
 0x450   : > { %4240 = vst.msk [vmem:[#allocation3] sm:$0xff] %vm2310_vm13, %v9212_v36 }
 0x451   : > { %4373 = vst.msk [vmem:[#allocation3] sm:$0xff] %vm2444_vm14, %v9225_v60  ;;  %v2411_v25 = vpop.permute.xlu1 %2410 }
 0x452   : > { %2476 = vst.msk [vmem:[#allocation3 + $0xf8] sm:$0xff] %vm2444_vm14, %v2411_v25  ;;  %4160 = vrot.lane.b32.xlu0 %v3227_v39, %s11143_s1 }
 0x453   : > { %3497 = vrot.lane.b32.xlu1 %v3422_v0, %s11130_s0 }
 0x455   : > { %v3278_v37 = vpop.permute.xlu1 %3277 }
 0x456   : > { %v2506_v57 = vld [vmem:[#allocation3 + $0xe8] sm:$0xff]  ;;  %3372 = vst.msk [vmem:[#allocation3 + $0x8] sm:$0xff] %vm1434_vm6, %v3278_v37  ;;  %4293 = vrot.lane.b32.xlu0 %v3435_v10, %s11132_s27  ;;  %v6154_v6 = vpop.f32.mrb[44].mxu0 }
 0x457   : > { %v2523_v36 = vpack.c.bf16 %v2506_v57, %v2505_v38  ;;  %3757 = vrot.lane.b32.xlu1 %v3214_v53, %s11131_s18  ;;  %v2780_v9 = vmul.f32 %v9322_v26, %v6154_v6  ;;  %v2680_v2 = vpop.f32.mrb[45].mxu0  ;;  %v3081_v57 = vld [vmem:[#allocation2 + $0xa0] sm:$0x3] }
 0x458   : > { %v2778_v60 = vmul.f32 %v9322_v26, %v2680_v2  ;;  %v6155_v33 = vpop.f32.mrb[46].mxu0 }
 0x459   : > { %6168 = vmatprep.mubr.msk.bf16.mxu1 %vm2545_vm15, %v2523_v36  ;;  %v3486_v28 = vpop.permute.xlu1 %3485  ;;  %v2508_v55 = vld [vmem:[#allocation3 + $0xf8] sm:$0xff]  ;;  %v9333_v30 = vadd.f32 %v9330_v8, %v2780_v9  ;;  %v2781_v46 = vmul.f32 %v9322_v26, %v6155_v33  ;;  %v2683_v4 = vpop.f32.mrb[47].mxu0 }
 0x45a   : > { %3580 = vst.msk [vmem:[#allocation3 + $0x8] sm:$0xff] %vm1644_vm7, %v3486_v28  ;;  %3299 = vrot.lane.b32.xlu0 %v3227_v39, %s11124_s21  ;;  %v2524_v62 = vpack.c.bf16 %v2508_v55, %v2507_v19  ;;  %v9339_v48 = vadd.f32 %v9330_v8, %v2778_v60  ;;  %v2779_v47 = vmul.f32 %v9322_v26, %v2683_v4  ;;  %v3228_v19 = vrot.slane %v3081_v57, 1 }
 0x45b   : > { %3890 = vrot.lane.b32.xlu1 %v3422_v0, %s11133_s28  ;;  %v2851_v42 = vsub.f32 0.0, %v9333_v30  ;;  %v9345_v20 = vadd.f32 %v9330_v8, %v2781_v46 }
 0x45c   : > { %6169 = vmatmul.mubr.msk.bf16.gmra.mrb[12].mxu1 %vm2545_vm15, %v2524_v62  ;;  %v2849_v34 = vsub.f32 0.0, %v9339_v48  ;;  %v9350_v5 = vadd.f32 %v9330_v8, %v2779_v47  ;;  %v3229_v47 = vsel %vm1257_vm4, %v3226_v18, %v3228_v19 }
 0x45d   : > { %v9352_v49 = vpop.permute.xlu1 %3619  ;;  %v2897_v53 = vmul.f32 1.442695, %v2851_v42  ;;  %v2852_v14 = vsub.f32 0.0, %v9345_v20  ;;  %v3436_v42 = vrot.slane %v3081_v57, 2 }
 0x45e   : > { %3507 = vrot.lane.b32.xlu0 %v3435_v10, %s11130_s0  ;;  %v2893_v24 = vmul.f32 1.442695, %v2849_v34  ;;  %v2850_v44 = vsub.f32 0.0, %v9350_v5  ;;  %v3428_v10 = vrot.slane %v9238_v43, 2 }
 0x45f   : > { %3635 = vrot.lane.b32.xlu1 %v9243_v56, %s11127_s26  ;;  %6635 = vpow2.f32 %v2897_v53  ;;  %v2899_v39 = vmul.f32 1.442695, %v2852_v14  ;;  %v3437_v14 = vsel %vm1467_vm5, %v3434_v15, %v3436_v42 }
 0x460   : > { %6637 = vpow2.f32 %v2893_v24  ;;  %v2895_v0 = vmul.f32 1.442695, %v2850_v44  ;;  %v3430_v38 = vsel %vm1467_vm5, %v3428_v10, %v3429_v17 }
 0x461   : > { %v9361_v3 = vpop.permute.xlu1 %4012  ;;  %6639 = vpow2.f32 %v2899_v39 }
 0x462   : > { %4156 = vrot.lane.b32.xlu0 %v3222_v50, %s11143_s1  ;;  %6641 = vpow2.f32 %v2895_v0 }
 0x463   : > { %4028 = vrot.lane.b32.xlu1 %v9243_v56, %s11118_s25  ;;  %v9371_v25 = vpop.permute.xlu0 %3625 }
 0x465   : > { %v3616_v37 = vpop.permute.xlu1 %3615 }
 0x466   : > { %3710 = vst.msk [vmem:[#allocation3 + $0x8] sm:$0xff] %vm1775_vm9, %v3616_v37  ;;  %4289 = vrot.lane.b32.xlu0 %v3430_v38, %s11132_s27 }
 0x467   : > { %4024 = vrot.lane.b32.xlu1 %v9250_v11, %s11118_s25  ;;  %v9380_v36 = vpop.permute.xlu0 %4018 }
 0x469   : > { %v9382_v6 = vpop.permute.xlu1 %3753  ;;  %v6636_v43 = vpop.eup %6635 }
 0x46a   : > { %3295 = vrot.lane.b32.xlu0 %v3222_v50, %s11124_s21  ;;  %v6638_v9 = vpop.eup %6637  ;;  %v2947_v2 = vadd.f32 1.0, %v6636_v43 }
 0x46b   : > { %3631 = vrot.lane.b32.xlu1 %v9250_v11, %s11127_s26  ;;  %v6640_v60 = vpop.eup %6639  ;;  %v2945_v33 = vadd.f32 1.0, %v6638_v9  ;;  %v4015_v28 = vpop.permute.xlu0 %4014 }
 0x46c   : > { %v6642_v55 = vpop.eup %6641  ;;  %6643 = vrcp.f32 %v2947_v2  ;;  %v2948_v46 = vadd.f32 1.0, %v6640_v60  ;;  %4108 = vst.msk [vmem:[#allocation3 + $0x10] sm:$0xff] %vm2175_vm12, %v4015_v28 }
 0x46d   : > { %v9388_v4 = vpop.permute.xlu1 %3886  ;;  %6645 = vrcp.f32 %v2945_v33  ;;  %v2946_v62 = vadd.f32 1.0, %v6642_v55 }
 0x46e   : > { %3503 = vrot.lane.b32.xlu0 %v3430_v38, %s11130_s0  ;;  %6647 = vrcp.f32 %v2948_v46 }
 0x46f   : > { %3769 = vrot.lane.b32.xlu1 %v3229_v47, %s11131_s18  ;;  %6649 = vrcp.f32 %v2946_v62  ;;  %v3622_v34 = vpop.permute.xlu0 %3621 }
 0x470   : > { %3713 = vst.msk [vmem:[#allocation3 + $0x20] sm:$0xff] %vm1775_vm9, %v3622_v34 }
 0x471   : > { %v9396_v53 = vpop.permute.xlu1 %4146 }
 0x472   : > { %3763 = vrot.lane.b32.xlu0 %v3222_v50, %s11131_s18 }
 0x473   : > { %3902 = vrot.lane.b32.xlu1 %v3437_v14, %s11133_s28  ;;  %v9403_v24 = vpop.permute.xlu0 %3759 }
 0x475   : > { %v9405_v18 = vpop.permute.xlu1 %4279 }
 0x476   : > { %3896 = vrot.lane.b32.xlu0 %v3430_v38, %s11133_s28  ;;  %v6644_v44 = vpop.eup %6643 }
 0x477   : > { %4162 = vrot.lane.b32.xlu1 %v3229_v47, %s11143_s1  ;;  %v6646_v21 = vpop.eup %6645  ;;  %v3011_v39 = vmul.f32 %v6644_v44, %v9333_v30  ;;  %v9410_v0 = vpop.permute.xlu0 %3892 }
 0x478   : > { %v6648_v50 = vpop.eup %6647  ;;  %v3009_v56 = vmul.f32 %v6646_v21, %v9339_v48 }
 0x479   : > { %v3286_v15 = vpop.permute.xlu1 %3285  ;;  %v6650_v10 = vpop.eup %6649  ;;  %3043 = vst.msk [vmem:[#allocation2 + $0xc1] sm:$0xff] %vm467_vm1, %v3011_v39  ;;  %v3012_v37 = vmul.f32 %v6648_v50, %v9345_v20  ;;  %v3078_v20 = vld [vmem:[#allocation2 + $0x88] sm:$0x3] }
 0x47a   : > { %3376 = vst.msk [vmem:[#allocation3 + $0x28] sm:$0xff] %vm1434_vm6, %v3286_v15  ;;  %v3010_v38 = vmul.f32 %v6650_v10, %v9350_v5  ;;  %v3223_v9 = vrot.slane %v3078_v20, 1  ;;  %v3431_v46 = vrot.slane %v3078_v20, 2 }
 0x47b   : > { %3041 = vst.msk [vmem:[#allocation2 + $0xa9] sm:$0xff] %vm467_vm1, %v3009_v56  ;;  %4295 = vrot.lane.b32.xlu1 %v3437_v14, %s11132_s27  ;;  %3044 = vst.msk [vmem:[#allocation2 + $0xc9] sm:$0xff] %vm467_vm1, %v3012_v37  ;;  %v9420_v30 = vpop.permute.xlu0 %4152 }
 0x47c   : > { %3042 = vst.msk [vmem:[#allocation2 + $0xb1] sm:$0xff] %vm467_vm1, %v3010_v38  ;;  %v9454_v55 = vsel %vm1257_vm4, %v3221_v58, %v3223_v9 }
 0x47d   : > { %v3494_v48 = vpop.permute.xlu1 %3493 }
 0x47e   : > { %3584 = vst.msk [vmem:[#allocation3 + $0x28] sm:$0xff] %vm1644_vm7, %v3494_v48 }
 0x47f   : > { %3301 = vrot.lane.b32.xlu1 %v3229_v47, %s11124_s21  ;;  %v9425_v57 = vpop.permute.xlu0 %4285 }
 0x480   : > { %v9427_v19 = vld [vmem:[#allocation2 + $0xc0] sm:$0xff] }
 0x481   : > { %v3282_v43 = vpop.permute.xlu1 %3281  ;;  %3641 = vrot.lane.b32.xlu0 %v9427_v19, %s11127_s26  ;;  %3131 = vst.msk [vmem:[#allocation3 + $0x80] sm:$0xff] %vm467_vm1, %v9427_v19  ;;  %v3443_v38 = vrot.slane %v9427_v19, 2 }
 0x482   : > { %3374 = vst.msk [vmem:[#allocation3 + $0x18] sm:$0xff] %vm1434_vm6, %v3282_v43  ;;  %v9434_v5 = vld [vmem:[#allocation2 + $0xa8] sm:$0xff] }
 0x483   : > { %3509 = vrot.lane.b32.xlu1 %v3437_v14, %s11130_s0  ;;  %3129 = vst.msk [vmem:[#allocation3 + $0x70] sm:$0xff] %vm467_vm1, %v9434_v5  ;;  %v9439_v2 = vld [vmem:[#allocation2 + $0xc8] sm:$0xff]  ;;  %v3292_v60 = vpop.permute.xlu0 %3291  ;;  %v9443_v33 = vld [vmem:[#allocation2 + $0xb0] sm:$0xff] }
 0x484   : > { %3132 = vst.msk [vmem:[#allocation3 + $0x88] sm:$0xff] %vm467_vm1, %v9439_v2  ;;  %3130 = vst.msk [vmem:[#allocation3 + $0x78] sm:$0xff] %vm467_vm1, %v9443_v33  ;;  %v3236_v58 = vrot.slane %v9439_v2, 1 }
 0x485   : > { %3379 = vst.msk [vmem:[#allocation3 + $0x40] sm:$0xff] %vm1434_vm6, %v3292_v60  ;;  %v3490_v28 = vpop.permute.xlu1 %3489  ;;  %4030 = vrot.lane.b32.xlu0 %v9434_v5, %s11118_s25 }
 0x486   : > { %3582 = vst.msk [vmem:[#allocation3 + $0x18] sm:$0xff] %vm1644_vm7, %v3490_v28 }
 0x487   : > { %3712 = vst.msk [vmem:[#allocation3 + $0x18] sm:$0xff] %vm1775_vm9, %v9352_v49  ;;  %4158 = vrot.lane.b32.xlu1 %v9454_v55, %s11143_s1  ;;  %v3500_v62 = vpop.permute.xlu0 %3499  ;;  %v9472_v49 = vsel %vm1467_vm5, %v3429_v17, %v3431_v46  ;;  %v3444_v17 = vrot.slane %v9439_v2, 2 }
 0x488   : > { %3846 = vst.msk [vmem:[#allocation3 + $0x18] sm:$0xff] %vm1910_vm10, %v9382_v6 }
 0x489   : > { %3979 = vst.msk [vmem:[#allocation3 + $0x18] sm:$0xff] %vm2044_vm11, %v9388_v4  ;;  %v3750_v47 = vpop.permute.xlu1 %3749  ;;  %3637 = vrot.lane.b32.xlu0 %v9434_v5, %s11127_s26  ;;  %v3235_v4 = vrot.slane %v9427_v19, 1  ;;  %v9520_v28 = vsel %vm1467_vm5, %v3443_v38, %v3444_v17 }
 0x48a   : > { %3587 = vst.msk [vmem:[#allocation3 + $0x40] sm:$0xff] %vm1644_vm7, %v3500_v62  ;;  %v6158_v6 = vpop.f32.mrb[0].mxu1 }
 0x48b   : > { %3844 = vst.msk [vmem:[#allocation3 + $0x8] sm:$0xff] %vm1910_vm10, %v3750_v47  ;;  %4291 = vrot.lane.b32.xlu1 %v9472_v49, %s11132_s27  ;;  %v2784_v42 = vmul.f32 %v9322_v26, %v6158_v6  ;;  %v2696_v34 = vpop.f32.mrb[1].mxu1  ;;  %v4149_v14 = vpop.permute.xlu0 %4148  ;;  %v9483_v11 = vsel %vm1257_vm4, %v3235_v4, %v3236_v58  ;;  %v3230_v6 = vrot.slane %v9434_v5, 1 }
 0x48c   : > { %v2782_v44 = vmul.f32 %v9322_v26, %v2696_v34  ;;  %4242 = vst.msk [vmem:[#allocation3 + $0x10] sm:$0xff] %vm2310_vm13, %v4149_v14  ;;  %v6159_v21 = vpop.f32.mrb[2].mxu1 }
 0x48d   : > { %v3883_v39 = vpop.permute.xlu1 %3882  ;;  %v9487_v50 = vadd.f32 %v9330_v8, %v2784_v42  ;;  %v2785_v56 = vmul.f32 %v9322_v26, %v6159_v21  ;;  %v2699_v15 = vpop.f32.mrb[3].mxu1  ;;  %3775 = vrot.lane.b32.xlu0 %v9483_v11, %s11131_s18  ;;  %v3439_v21 = vrot.slane %v9443_v33, 2 }
 0x48e   : > { %3977 = vst.msk [vmem:[#allocation3 + $0x8] sm:$0xff] %vm2044_vm11, %v3883_v39  ;;  %v9494_v10 = vadd.f32 %v9330_v8, %v2782_v44  ;;  %v2783_v37 = vmul.f32 %v9322_v26, %v2699_v15  ;;  %v3438_v39 = vrot.slane %v9434_v5, 2  ;;  %v4405_v15 = vld [vmem:[#allocation3] sm:$0xff] }
 0x48f   : > { %4107 = vst.msk [vmem:[#allocation3 + $0x8] sm:$0xff] %vm2175_vm12, %v9361_v3  ;;  %3297 = vrot.lane.b32.xlu1 %v9454_v55, %s11124_s21  ;;  %v2855_v48 = vsub.f32 0.0, %v9487_v50  ;;  %v9504_v20 = vadd.f32 %v9330_v8, %v2785_v56  ;;  %v4282_v43 = vpop.permute.xlu0 %4281 }
 0x490   : > { %4241 = vst.msk [vmem:[#allocation3 + $0x8] sm:$0xff] %vm2310_vm13, %v9396_v53  ;;  %v2853_v9 = vsub.f32 0.0, %v9494_v10  ;;  %v9512_v3 = vadd.f32 %v9330_v8, %v2783_v37  ;;  %v3231_v53 = vrot.slane %v9443_v33, 1 }
 0x491   : > { %4374 = vst.msk [vmem:[#allocation3 + $0x8] sm:$0xff] %vm2444_vm14, %v9405_v18  ;;  %4375 = vst.msk [vmem:[#allocation3 + $0x10] sm:$0xff] %vm2444_vm14, %v4282_v43  ;;  %v9515_v60 = vpop.permute.xlu1 %3627  ;;  %v2905_v46 = vmul.f32 1.442695, %v2855_v48  ;;  %v2856_v62 = vsub.f32 0.0, %v9504_v20  ;;  %3908 = vrot.lane.b32.xlu0 %v9520_v28, %s11133_s28  ;;  %v3440_v48 = vsel %vm1467_vm5, %v3438_v39, %v3439_v21 }
 0x492   : > { %v2901_v18 = vmul.f32 1.442695, %v2853_v9  ;;  %v2854_v47 = vsub.f32 0.0, %v9512_v3  ;;  %v3232_v44 = vsel %vm1257_vm4, %v3230_v6, %v3231_v53 }
 0x493   : > { %3505 = vrot.lane.b32.xlu1 %v9472_v49, %s11130_s0  ;;  %6651 = vpow2.f32 %v2905_v46  ;;  %v2907_v4 = vmul.f32 1.442695, %v2856_v62  ;;  %v3288_v42 = vpop.permute.xlu0 %3287 }
 0x494   : > { %6653 = vpow2.f32 %v2901_v18  ;;  %v2903_v34 = vmul.f32 1.442695, %v2854_v47  ;;  %3377 = vst.msk [vmem:[#allocation3 + $0x30] sm:$0xff] %vm1434_vm6, %v3288_v42 }
 0x495   : > { %v9531_v14 = vpop.permute.xlu1 %4020  ;;  %6655 = vpow2.f32 %v2907_v4  ;;  %4164 = vrot.lane.b32.xlu0 %v3232_v44, %s11143_s1  ;;  %v3087_v4 = vld [vmem:[#allocation2 + $0xd0] sm:$0x3] }
 0x496   : > { %6657 = vpow2.f32 %v2903_v34  ;;  %v3238_v34 = vrot.slane %v3087_v4, 1  ;;  %v3446_v39 = vrot.slane %v3087_v4, 2 }
 0x497   : > { %3765 = vrot.lane.b32.xlu1 %v9454_v55, %s11131_s18  ;;  %v3496_v56 = vpop.permute.xlu0 %3495 }
 0x498   : > { %v4406_v37 = vld [vmem:[#allocation3 + $0x8] sm:$0xff]  ;;  %3585 = vst.msk [vmem:[#allocation3 + $0x30] sm:$0xff] %vm1644_vm7, %v3496_v56 }
 0x499   : > { %v4017_v38 = vpop.permute.xlu1 %4016  ;;  %v4437_v43 = vpack.c.bf16 %v4406_v37, %v4405_v15  ;;  %3715 = vst.msk [vmem:[#allocation3 + $0x30] sm:$0xff] %vm1775_vm9, %v9371_v25  ;;  %4297 = vrot.lane.b32.xlu0 %v3440_v48, %s11132_s27 }
 0x49a   : > { %4109 = vst.msk [vmem:[#allocation3 + $0x18] sm:$0xff] %vm2175_vm12, %v4017_v38 }
 0x49b   : > { %3849 = vst.msk [vmem:[#allocation3 + $0x30] sm:$0xff] %vm1910_vm10, %v9403_v24  ;;  %3898 = vrot.lane.b32.xlu1 %v9472_v49, %s11133_s28  ;;  %6178 = vmatprep.mubr.msk.bf16.mxu0 %vm2545_vm15, %v4437_v43  ;;  %v3756_v5 = vpop.permute.xlu0 %3755 }
 0x49c   : > { %3982 = vst.msk [vmem:[#allocation3 + $0x30] sm:$0xff] %vm2044_vm11, %v9410_v0 }
 0x49d   : > { %3847 = vst.msk [vmem:[#allocation3 + $0x20] sm:$0xff] %vm1910_vm10, %v3756_v5  ;;  %v3624_v55 = vpop.permute.xlu1 %3623  ;;  %v6652_v25 = vpop.eup %6651  ;;  %3303 = vrot.lane.b32.xlu0 %v3232_v44, %s11124_s21 }
 0x49e   : > { %3714 = vst.msk [vmem:[#allocation3 + $0x28] sm:$0xff] %vm1775_vm9, %v3624_v55  ;;  %v6654_v9 = vpop.eup %6653  ;;  %v2951_v46 = vadd.f32 1.0, %v6652_v25  ;;  %v9601_v55 = vsel %vm1467_vm5, %v3444_v17, %v3446_v39 }
 0x49f   : > { %3643 = vrot.lane.b32.xlu1 %v9439_v2, %s11127_s26  ;;  %v6656_v24 = vpop.eup %6655  ;;  %v2949_v49 = vadd.f32 1.0, %v6654_v9  ;;  %v3889_v62 = vpop.permute.xlu0 %3888 }
 0x4a0   : > { %v6658_v18 = vpop.eup %6657  ;;  %6659 = vrcp.f32 %v2951_v46  ;;  %v2952_v0 = vadd.f32 1.0, %v6656_v24  ;;  %3980 = vst.msk [vmem:[#allocation3 + $0x20] sm:$0xff] %vm2044_vm11, %v3889_v62 }
 0x4a1   : > { %v9562_v47 = vpop.permute.xlu1 %3761  ;;  %6661 = vrcp.f32 %v2949_v49  ;;  %v2950_v6 = vadd.f32 1.0, %v6658_v18  ;;  %4110 = vst.msk [vmem:[#allocation3 + $0x20] sm:$0xff] %vm2175_vm12, %v9380_v36  ;;  %3511 = vrot.lane.b32.xlu0 %v3440_v48, %s11130_s0 }
 0x4a2   : > { %6663 = vrcp.f32 %v2952_v0  ;;  %4244 = vst.msk [vmem:[#allocation3 + $0x20] sm:$0xff] %vm2310_vm13, %v9420_v30  ;;  %v9584_v30 = vsel %vm1257_vm4, %v3236_v58, %v3238_v34 }
 0x4a3   : > { %4032 = vrot.lane.b32.xlu1 %v9443_v33, %s11118_s25  ;;  %6665 = vrcp.f32 %v2950_v6  ;;  %4377 = vst.msk [vmem:[#allocation3 + $0x20] sm:$0xff] %vm2444_vm14, %v9425_v57  ;;  %v3084_v57 = vld [vmem:[#allocation2 + $0xb8] sm:$0x3] }
 0x4a5   : > { %v9573_v42 = vpop.permute.xlu1 %3894  ;;  %3771 = vrot.lane.b32.xlu0 %v3232_v44, %s11131_s18 }
 0x4a7   : > { %3639 = vrot.lane.b32.xlu1 %v9443_v33, %s11127_s26 }
 0x4a9   : > { %v9578_v36 = vpop.permute.xlu1 %4154  ;;  %3904 = vrot.lane.b32.xlu0 %v3440_v48, %s11133_s28 }
 0x4aa   : > { %v6660_v56 = vpop.eup %6659 }
 0x4ab   : > { %3777 = vrot.lane.b32.xlu1 %v9584_v30, %s11131_s18  ;;  %v6662_v44 = vpop.eup %6661  ;;  %v3015_v15 = vmul.f32 %v6660_v56, %v9487_v50  ;;  %v3233_v50 = vrot.slane %v3084_v57, 1 }
 0x4ac   : > { %v9589_v37 = vpop.permute.xlu0 %3633  ;;  %v6664_v38 = vpop.eup %6663  ;;  %v3013_v43 = vmul.f32 %v6662_v44, %v9494_v10 }
 0x4ad   : > { %v9592_v48 = vpop.permute.xlu1 %4287  ;;  %v6666_v5 = vpop.eup %6665  ;;  %3047 = vst.msk [vmem:[#allocation2 + $0xf1] sm:$0xff] %vm467_vm1, %v3015_v15  ;;  %v3016_v58 = vmul.f32 %v6664_v38, %v9504_v20  ;;  %4034 = vrot.lane.b32.xlu0 %v9427_v19, %s11118_s25  ;;  %v3234_v17 = vsel %vm1257_vm4, %v3231_v53, %v3233_v50  ;;  %v3441_v20 = vrot.slane %v3084_v57, 2  ;;  %v4407_v15 = vld [vmem:[#allocation3 + $0x10] sm:$0xff] }
 0x4ae   : > { %3045 = vst.msk [vmem:[#allocation2 + $0xd9] sm:$0xff] %vm467_vm1, %v3013_v43  ;;  %v3014_v10 = vmul.f32 %v6666_v5, %v9512_v3 }
 0x4af   : > { %3910 = vrot.lane.b32.xlu1 %v9601_v55, %s11133_s28  ;;  %3048 = vst.msk [vmem:[#allocation2 + $0xf9] sm:$0xff] %vm467_vm1, %v3016_v58  ;;  %v3442_v24 = vsel %vm1467_vm5, %v3439_v21, %v3441_v20 }
 0x4b0   : > { %v9608_v25 = vpop.permute.xlu0 %4026  ;;  %3046 = vst.msk [vmem:[#allocation2 + $0xe1] sm:$0xff] %vm467_vm1, %v3014_v10 }
 0x4b1   : > { %v3294_v19 = vpop.permute.xlu1 %3293 }
 0x4b2   : > { %3380 = vst.msk [vmem:[#allocation3 + $0x48] sm:$0xff] %vm1434_vm6, %v3294_v19 }
 0x4b3   : > { %4166 = vrot.lane.b32.xlu1 %v3234_v17, %s11143_s1 }
 0x4b4   : > { %v4023_v3 = vpop.permute.xlu0 %4022  ;;  %v9617_v46 = vld [vmem:[#allocation2 + $0xf0] sm:$0xff] }
 0x4b5   : > { %4112 = vst.msk [vmem:[#allocation3 + $0x30] sm:$0xff] %vm2175_vm12, %v4023_v3  ;;  %v3502_v9 = vpop.permute.xlu1 %3501  ;;  %v9623_v49 = vld [vmem:[#allocation2 + $0xd8] sm:$0xff] }
 0x4b6   : > { %3588 = vst.msk [vmem:[#allocation3 + $0x48] sm:$0xff] %vm1644_vm7, %v3502_v9  ;;  %4038 = vrot.lane.b32.xlu0 %v9623_v49, %s11118_s25  ;;  %v9632_v53 = vld [vmem:[#allocation2 + $0xf8] sm:$0xff]  ;;  %v3240_v6 = vrot.slane %v9623_v49, 1  ;;  %v3448_v50 = vrot.slane %v9623_v49, 2 }
 0x4b7   : > { %3135 = vst.msk [vmem:[#allocation3 + $0xa0] sm:$0xff] %vm467_vm1, %v9617_v46  ;;  %4299 = vrot.lane.b32.xlu1 %v3442_v24, %s11132_s27  ;;  %3133 = vst.msk [vmem:[#allocation3 + $0x90] sm:$0xff] %vm467_vm1, %v9623_v49  ;;  %v9634_v18 = vld [vmem:[#allocation2 + $0xe0] sm:$0xff] }
 0x4b8   : > { %v3630_v62 = vpop.permute.xlu0 %3629  ;;  %3136 = vst.msk [vmem:[#allocation3 + $0xa8] sm:$0xff] %vm467_vm1, %v9632_v53  ;;  %3134 = vst.msk [vmem:[#allocation3 + $0x98] sm:$0xff] %vm467_vm1, %v9634_v18  ;;  %v3241_v21 = vrot.slane %v9634_v18, 1  ;;  %v3449_v5 = vrot.slane %v9634_v18, 2 }
 0x4b9   : > { %3717 = vst.msk [vmem:[#allocation3 + $0x40] sm:$0xff] %vm1775_vm9, %v3630_v62  ;;  %v4151_v33 = vpop.permute.xlu1 %4150 }
 0x4ba   : > { %4243 = vst.msk [vmem:[#allocation3 + $0x18] sm:$0xff] %vm2310_vm13, %v4151_v33  ;;  %4168 = vrot.lane.b32.xlu0 %v9483_v11, %s11143_s1  ;;  %v9653_v34 = vsel %vm1257_vm4, %v3240_v6, %v3241_v21  ;;  %v3090_v6 = vld [vmem:[#allocation2 + $0xe8] sm:$0x3] }
 0x4bb   : > { %3305 = vrot.lane.b32.xlu1 %v3234_v17, %s11124_s21 }
 0x4bc   : > { %v9646_v0 = vpop.permute.xlu0 %3767 }
 0x4bd   : > { %v4284_v4 = vpop.permute.xlu1 %4283 }
 0x4be   : > { %4376 = vst.msk [vmem:[#allocation3 + $0x18] sm:$0xff] %vm2444_vm14, %v4284_v4  ;;  %4172 = vrot.lane.b32.xlu0 %v9653_v34, %s11143_s1 }
 0x4bf   : > { %3513 = vrot.lane.b32.xlu1 %v3442_v24, %s11130_s0 }
 0x4c0   : > { %v9658_v39 = vpop.permute.xlu0 %3900 }
 0x4c1   : > { %v3290_v56 = vpop.permute.xlu1 %3289 }
 0x4c2   : > { %3378 = vst.msk [vmem:[#allocation3 + $0x38] sm:$0xff] %vm1434_vm6, %v3290_v56  ;;  %4301 = vrot.lane.b32.xlu0 %v9520_v28, %s11132_s27 }
 0x4c3   : > { %3773 = vrot.lane.b32.xlu1 %v3234_v17, %s11131_s18 }
 0x4c4   : > { %v9664_v57 = vpop.permute.xlu0 %4160 }
 0x4c5   : > { %v3498_v44 = vpop.permute.xlu1 %3497  ;;  %v4408_v38 = vld [vmem:[#allocation3 + $0x18] sm:$0xff] }
 0x4c6   : > { %3586 = vst.msk [vmem:[#allocation3 + $0x38] sm:$0xff] %vm1644_vm7, %v3498_v44  ;;  %v4438_v43 = vpack.c.bf16 %v4408_v38, %v4407_v15  ;;  %3307 = vrot.lane.b32.xlu0 %v9483_v11, %s11124_s21 }
 0x4c7   : > { %3716 = vst.msk [vmem:[#allocation3 + $0x38] sm:$0xff] %vm1775_vm9, %v9515_v60  ;;  %3906 = vrot.lane.b32.xlu1 %v3442_v24, %s11133_s28  ;;  %v9685_v60 = vsel %vm1467_vm5, %v3448_v50, %v3449_v5 }
 0x4c8   : > { %3850 = vst.msk [vmem:[#allocation3 + $0x38] sm:$0xff] %vm1910_vm10, %v9562_v47  ;;  %6179 = vmatmul.mubr.msk.bf16.vlgmr.msra.gmra.mrb[48].mxu0 %vm2545_vm15, %v4438_v43  ;;  %v9676_v58 = vpop.permute.xlu0 %4293 }
 0x4c9   : > { %3983 = vst.msk [vmem:[#allocation3 + $0x38] sm:$0xff] %vm2044_vm11, %v9573_v42  ;;  %v3758_v10 = vpop.permute.xlu1 %3757 }
 0x4ca   : > { %3848 = vst.msk [vmem:[#allocation3 + $0x28] sm:$0xff] %vm1910_vm10, %v3758_v10  ;;  %4305 = vrot.lane.b32.xlu0 %v9685_v60, %s11132_s27 }
 0x4cb   : > { %4036 = vrot.lane.b32.xlu1 %v9439_v2, %s11118_s25  ;;  %v6162_v11 = vpop.f32.mrb[4].mxu1 }
 0x4cc   : > { %v2788_v47 = vmul.f32 %v9322_v26, %v6162_v11  ;;  %v2712_v19 = vpop.f32.mrb[5].mxu1  ;;  %v3300_v17 = vpop.permute.xlu0 %3299 }
 0x4cd   : > { %v2786_v42 = vmul.f32 %v9322_v26, %v2712_v19  ;;  %3383 = vst.msk [vmem:[#allocation3 + $0x60] sm:$0xff] %vm1434_vm6, %v3300_v17  ;;  %v3891_v20 = vpop.permute.xlu1 %3890  ;;  %v6163_v3 = vpop.f32.mrb[6].mxu1 }
 0x4ce   : > { %v9695_v9 = vadd.f32 %v9330_v8, %v2788_v47  ;;  %3981 = vst.msk [vmem:[#allocation3 + $0x28] sm:$0xff] %vm2044_vm11, %v3891_v20  ;;  %v2789_v2 = vmul.f32 %v9322_v26, %v6163_v3  ;;  %v2715_v24 = vpop.f32.mrb[7].mxu1  ;;  %3311 = vrot.lane.b32.xlu0 %v9653_v34, %s11124_s21  ;;  %v4409_v20 = vld [vmem:[#allocation3 + $0x20] sm:$0xff] }
 0x4cf   : > { %v9700_v62 = vadd.f32 %v9330_v8, %v2786_v42  ;;  %4111 = vst.msk [vmem:[#allocation3 + $0x28] sm:$0xff] %vm2175_vm12, %v9531_v14  ;;  %v2787_v33 = vmul.f32 %v9322_v26, %v2715_v24  ;;  %4040 = vrot.lane.b32.xlu1 %v9634_v18, %s11118_s25 }
 0x4d0   : > { %v2859_v4 = vsub.f32 0.0, %v9695_v9  ;;  %4245 = vst.msk [vmem:[#allocation3 + $0x28] sm:$0xff] %vm2310_vm13, %v9578_v36  ;;  %v9713_v56 = vadd.f32 %v9330_v8, %v2789_v2  ;;  %v3508_v44 = vpop.permute.xlu0 %3507  ;;  %v3243_v36 = vrot.slane %v3090_v6, 1 }
 0x4d1   : > { %v2857_v14 = vsub.f32 0.0, %v9700_v62  ;;  %4378 = vst.msk [vmem:[#allocation3 + $0x28] sm:$0xff] %vm2444_vm14, %v9592_v48  ;;  %v9719_v15 = vadd.f32 %v9330_v8, %v2787_v33  ;;  %v9722_v38 = vpop.permute.xlu1 %3635 }
 0x4d2   : > { %3591 = vst.msk [vmem:[#allocation3 + $0x60] sm:$0xff] %vm1644_vm7, %v3508_v44  ;;  %v2913_v43 = vmul.f32 1.442695, %v2859_v4  ;;  %v2860_v50 = vsub.f32 0.0, %v9713_v56  ;;  %3515 = vrot.lane.b32.xlu0 %v9520_v28, %s11130_s0  ;;  %v9736_v42 = vsel %vm1257_vm4, %v3241_v21, %v3243_v36  ;;  %v3451_v44 = vrot.slane %v3090_v6, 2 }
 0x4d3   : > { %v2909_v10 = vmul.f32 1.442695, %v2857_v14  ;;  %v2858_v11 = vsub.f32 0.0, %v9719_v15  ;;  %4170 = vrot.lane.b32.xlu1 %v9584_v30, %s11143_s1 }
 0x4d4   : > { %6667 = vpow2.f32 %v2913_v43  ;;  %v2915_v48 = vmul.f32 1.442695, %v2860_v50  ;;  %v4157_v47 = vpop.permute.xlu0 %4156 }
 0x4d5   : > { %6669 = vpow2.f32 %v2909_v10  ;;  %v2911_v19 = vmul.f32 1.442695, %v2858_v11  ;;  %4246 = vst.msk [vmem:[#allocation3 + $0x30] sm:$0xff] %vm2310_vm13, %v4157_v47  ;;  %v9731_v17 = vpop.permute.xlu1 %4028  ;;  %v3246_v47 = vrot.slane %v9632_v53, 1 }
 0x4d6   : > { %6671 = vpow2.f32 %v2915_v48  ;;  %3519 = vrot.lane.b32.xlu0 %v9685_v60, %s11130_s0 }
 0x4d7   : > { %6673 = vpow2.f32 %v2911_v19  ;;  %4174 = vrot.lane.b32.xlu1 %v9736_v42, %s11143_s1 }
 0x4d8   : > { %v4290_v28 = vpop.permute.xlu0 %4289  ;;  %v4410_v3 = vld [vmem:[#allocation3 + $0x28] sm:$0xff] }
 0x4d9   : > { %4379 = vst.msk [vmem:[#allocation3 + $0x30] sm:$0xff] %vm2444_vm14, %v4290_v28  ;;  %v4025_v2 = vpop.permute.xlu1 %4024  ;;  %v4439_v24 = vpack.c.bf16 %v4410_v3, %v4409_v20  ;;  %v3454_v28 = vrot.slane %v9632_v53, 2 }
 0x4da   : > { %4113 = vst.msk [vmem:[#allocation3 + $0x38] sm:$0xff] %vm2175_vm12, %v4025_v2  ;;  %3645 = vrot.lane.b32.xlu0 %v9623_v49, %s11127_s26 }
 0x4db   : > { %4303 = vrot.lane.b32.xlu1 %v9601_v55, %s11132_s27  ;;  %6182 = vmatprep.mubr.msk.bf16.mxu0 %vm2545_vm15, %v4439_v24 }
 0x4dc   : > { %v3296_v21 = vpop.permute.xlu0 %3295 }
 0x4dd   : > { %3381 = vst.msk [vmem:[#allocation3 + $0x50] sm:$0xff] %vm1434_vm6, %v3296_v21  ;;  %v3632_v33 = vpop.permute.xlu1 %3631 }
 0x4de   : > { %v6668_v4 = vpop.eup %6667  ;;  %3718 = vst.msk [vmem:[#allocation3 + $0x48] sm:$0xff] %vm1775_vm9, %v3632_v33  ;;  %3649 = vrot.lane.b32.xlu0 %v9617_v46, %s11127_s26 }
 0x4df   : > { %v6670_v14 = vpop.eup %6669  ;;  %v2955_v43 = vadd.f32 1.0, %v6668_v4  ;;  %3309 = vrot.lane.b32.xlu1 %v9584_v30, %s11124_s21  ;;  %v9763_v30 = vsel %vm1467_vm5, %v3449_v5, %v3451_v44  ;;  %v3245_v5 = vrot.slane %v9617_v46, 1 }
 0x4e0   : > { %v6672_v50 = vpop.eup %6671  ;;  %v2953_v49 = vadd.f32 1.0, %v6670_v14  ;;  %v3504_v36 = vpop.permute.xlu0 %3503 }
 0x4e1   : > { %v6674_v10 = vpop.eup %6673  ;;  %6675 = vrcp.f32 %v2955_v43  ;;  %v2956_v11 = vadd.f32 1.0, %v6672_v50  ;;  %3589 = vst.msk [vmem:[#allocation3 + $0x50] sm:$0xff] %vm1644_vm7, %v3504_v36  ;;  %v9756_v48 = vpop.permute.xlu1 %3769 }
 0x4e2   : > { %6677 = vrcp.f32 %v2953_v49  ;;  %v2954_v6 = vadd.f32 1.0, %v6674_v10  ;;  %3719 = vst.msk [vmem:[#allocation3 + $0x50] sm:$0xff] %vm1775_vm9, %v9589_v37  ;;  %3779 = vrot.lane.b32.xlu0 %v9653_v34, %s11131_s18 }
 0x4e3   : > { %6679 = vrcp.f32 %v2956_v11  ;;  %3853 = vst.msk [vmem:[#allocation3 + $0x50] sm:$0xff] %vm1910_vm10, %v9646_v0  ;;  %4307 = vrot.lane.b32.xlu1 %v9763_v30, %s11132_s27  ;;  %v9781_v0 = vsel %vm1257_vm4, %v3245_v5, %v3246_v47 }
 0x4e4   : > { %6681 = vrcp.f32 %v2954_v6  ;;  %3986 = vst.msk [vmem:[#allocation3 + $0x50] sm:$0xff] %vm2044_vm11, %v9658_v39  ;;  %v3764_v37 = vpop.permute.xlu0 %3763 }
 0x4e5   : > { %3851 = vst.msk [vmem:[#allocation3 + $0x40] sm:$0xff] %vm1910_vm10, %v3764_v37  ;;  %v9776_v19 = vpop.permute.xlu1 %3902 }
 0x4e6   : > { %3783 = vrot.lane.b32.xlu0 %v9781_v0, %s11131_s18 }
 0x4e7   : > { %3313 = vrot.lane.b32.xlu1 %v9736_v42, %s11124_s21 }
 0x4e8   : > { %v3897_v34 = vpop.permute.xlu0 %3896 }
 0x4e9   : > { %3984 = vst.msk [vmem:[#allocation3 + $0x40] sm:$0xff] %vm2044_vm11, %v3897_v34  ;;  %v9788_v39 = vpop.permute.xlu1 %4162 }
 0x4ea   : > { %4114 = vst.msk [vmem:[#allocation3 + $0x40] sm:$0xff] %vm2175_vm12, %v9608_v25  ;;  %3912 = vrot.lane.b32.xlu0 %v9685_v60, %s11133_s28  ;;  %v3453_v25 = vrot.slane %v9617_v46, 2 }
 0x4eb   : > { %v6676_v20 = vpop.eup %6675  ;;  %4248 = vst.msk [vmem:[#allocation3 + $0x40] sm:$0xff] %vm2310_vm13, %v9664_v57  ;;  %3517 = vrot.lane.b32.xlu1 %v9601_v55, %s11130_s0 }
 0x4ec   : > { %v6678_v3 = vpop.eup %6677  ;;  %v3019_v2 = vmul.f32 %v6676_v20, %v9695_v9  ;;  %4381 = vst.msk [vmem:[#allocation3 + $0x40] sm:$0xff] %vm2444_vm14, %v9676_v58  ;;  %v9811_v60 = vsel %vm1467_vm5, %v3453_v25, %v3454_v28 }
 0x4ed   : > { %v6680_v24 = vpop.eup %6679  ;;  %v3017_v21 = vmul.f32 %v6678_v3, %v9700_v62  ;;  %v9804_v33 = vpop.permute.xlu1 %4295 }
 0x4ee   : > { %v6682_v57 = vpop.eup %6681  ;;  %3051 = vst.msk [vmem:[#allocation2 + $0x121] sm:$0xff] %vm467_vm1, %v3019_v2  ;;  %v3020_v55 = vmul.f32 %v6680_v24, %v9713_v56  ;;  %3916 = vrot.lane.b32.xlu0 %v9811_v60, %s11133_s28 }
 0x4ef   : > { %3049 = vst.msk [vmem:[#allocation2 + $0x109] sm:$0xff] %vm467_vm1, %v3017_v21  ;;  %v3018_v58 = vmul.f32 %v6682_v57, %v9719_v15  ;;  %3521 = vrot.lane.b32.xlu1 %v9763_v30, %s11130_s0 }
 0x4f0   : > { %3052 = vst.msk [vmem:[#allocation2 + $0x129] sm:$0xff] %vm467_vm1, %v3020_v55 }
 0x4f1   : > { %3050 = vst.msk [vmem:[#allocation2 + $0x111] sm:$0xff] %vm467_vm1, %v3018_v58  ;;  %v3302_v9 = vpop.permute.xlu1 %3301 }
 0x4f2   : > { %3384 = vst.msk [vmem:[#allocation3 + $0x68] sm:$0xff] %vm1434_vm6, %v3302_v9  ;;  %4042 = vrot.lane.b32.xlu0 %v9617_v46, %s11118_s25  ;;  %v3093_v46 = vld [vmem:[#allocation2 + $0x100] sm:$0x3] }
 0x4f3   : > { %3647 = vrot.lane.b32.xlu1 %v9634_v18, %s11127_s26  ;;  %v9826_v62 = vpop.permute.xlu0 %3641  ;;  %v3248_v50 = vrot.slane %v3093_v46, 1 }
 0x4f5   : > { %v3510_v56 = vpop.permute.xlu1 %3509  ;;  %v9828_v15 = vld [vmem:[#allocation2 + $0x120] sm:$0xff]  ;;  %v9868_v25 = vsel %vm1257_vm4, %v3246_v47, %v3248_v50  ;;  %v3456_v50 = vrot.slane %v3093_v46, 2 }
 0x4f6   : > { %3592 = vst.msk [vmem:[#allocation3 + $0x68] sm:$0xff] %vm1644_vm7, %v3510_v56  ;;  %v9831_v4 = vld [vmem:[#allocation2 + $0x108] sm:$0xff] }
 0x4f7   : > { %3139 = vst.msk [vmem:[#allocation3 + $0xc0] sm:$0xff] %vm467_vm1, %v9828_v15  ;;  %3651 = vrot.lane.b32.xlu1 %v9632_v53, %s11127_s26  ;;  %4046 = vrot.lane.b32.xlu0 %v9831_v4, %s11118_s25  ;;  %3137 = vst.msk [vmem:[#allocation3 + $0xb0] sm:$0xff] %vm467_vm1, %v9831_v4  ;;  %v9841_v18 = vld [vmem:[#allocation2 + $0x128] sm:$0xff]  ;;  %v4031_v44 = vpop.permute.xlu0 %4030  ;;  %v3250_v37 = vrot.slane %v9831_v4, 1  ;;  %v9906_v46 = vsel %vm1467_vm5, %v3454_v28, %v3456_v50 }
 0x4f8   : > { %v9843_v14 = vld [vmem:[#allocation2 + $0x110] sm:$0xff]  ;;  %3140 = vst.msk [vmem:[#allocation3 + $0xc8] sm:$0xff] %vm467_vm1, %v9841_v18 }
 0x4f9   : > { %4116 = vst.msk [vmem:[#allocation3 + $0x50] sm:$0xff] %vm2175_vm12, %v4031_v44  ;;  %v4159_v43 = vpop.permute.xlu1 %4158  ;;  %v3251_v49 = vrot.slane %v9843_v14, 1 }
 0x4fa   : > { %3138 = vst.msk [vmem:[#allocation3 + $0xb8] sm:$0xff] %vm467_vm1, %v9843_v14 }
 0x4fb   : > { %4247 = vst.msk [vmem:[#allocation3 + $0x38] sm:$0xff] %vm2310_vm13, %v4159_v43  ;;  %3781 = vrot.lane.b32.xlu1 %v9736_v42, %s11131_s18  ;;  %v6166_v36 = vpop.f32.mrb[8].mxu1  ;;  %4176 = vrot.lane.b32.xlu0 %v9781_v0, %s11143_s1  ;;  %v3638_v6 = vpop.permute.xlu0 %3637  ;;  %v9873_v24 = vsel %vm1257_vm4, %v3250_v37, %v3251_v49 }
 0x4fc   : > { %v2792_v10 = vmul.f32 %v9322_v26, %v6166_v36  ;;  %v2728_v11 = vpop.f32.mrb[9].mxu1  ;;  %3721 = vst.msk [vmem:[#allocation3 + $0x60] sm:$0xff] %vm1775_vm9, %v3638_v6 }
 0x4fd   : > { %v2790_v5 = vmul.f32 %v9322_v26, %v2728_v11  ;;  %v4292_v34 = vpop.permute.xlu1 %4291  ;;  %v6167_v20 = vpop.f32.mrb[10].mxu1 }
 0x4fe   : > { %v9861_v3 = vadd.f32 %v9330_v8, %v2792_v10  ;;  %4380 = vst.msk [vmem:[#allocation3 + $0x38] sm:$0xff] %vm2444_vm14, %v4292_v34  ;;  %v2793_v42 = vmul.f32 %v9322_v26, %v6167_v20  ;;  %v2731_v2 = vpop.f32.mrb[11].mxu1  ;;  %v3459_v20 = vrot.slane %v9843_v14, 2 }
 0x4ff   : > { %v9876_v21 = vadd.f32 %v9330_v8, %v2790_v5  ;;  %v2791_v57 = vmul.f32 %v9322_v26, %v2731_v2  ;;  %3785 = vrot.lane.b32.xlu1 %v9868_v25, %s11131_s18  ;;  %4180 = vrot.lane.b32.xlu0 %v9873_v24, %s11143_s1  ;;  %v9887_v58 = vpop.permute.xlu0 %3775  ;;  %v4411_v5 = vld [vmem:[#allocation3 + $0x30] sm:$0xff] }
 0x500   : > { %v2863_v55 = vsub.f32 0.0, %v9861_v3  ;;  %v9885_v47 = vadd.f32 %v9330_v8, %v2793_v42  ;;  %v3458_v42 = vrot.slane %v9831_v4, 2 }
 0x501   : > { %v2861_v9 = vsub.f32 0.0, %v9876_v21  ;;  %v9891_v56 = vadd.f32 %v9330_v8, %v2791_v57  ;;  %v3298_v44 = vpop.permute.xlu1 %3297 }
 0x502   : > { %v2921_v26 = vmul.f32 1.442695, %v2863_v55  ;;  %v2864_v43 = vsub.f32 0.0, %v9885_v47  ;;  %3382 = vst.msk [vmem:[#allocation3 + $0x58] sm:$0xff] %vm1434_vm6, %v3298_v44 }
 0x503   : > { %v2917_v36 = vmul.f32 1.442695, %v2861_v9  ;;  %v2862_v10 = vsub.f32 0.0, %v9891_v56  ;;  %3914 = vrot.lane.b32.xlu1 %v9763_v30, %s11133_s28  ;;  %4309 = vrot.lane.b32.xlu0 %v9811_v60, %s11132_s27  ;;  %v9900_v8 = vpop.permute.xlu0 %3908 }
 0x504   : > { %6683 = vpow2.f32 %v2921_v26  ;;  %v2923_v11 = vmul.f32 1.442695, %v2864_v43 }
 0x505   : > { %6685 = vpow2.f32 %v2917_v36  ;;  %v2919_v6 = vmul.f32 1.442695, %v2862_v10  ;;  %v3506_v37 = vpop.permute.xlu1 %3505  ;;  %v4412_v34 = vld [vmem:[#allocation3 + $0x38] sm:$0xff] }
 0x506   : > { %6687 = vpow2.f32 %v2923_v11  ;;  %3590 = vst.msk [vmem:[#allocation3 + $0x58] sm:$0xff] %vm1644_vm7, %v3506_v37  ;;  %v4440_v30 = vpack.c.bf16 %v4412_v34, %v4411_v5 }
 0x507   : > { %6689 = vpow2.f32 %v2919_v6  ;;  %3720 = vst.msk [vmem:[#allocation3 + $0x58] sm:$0xff] %vm1775_vm9, %v9722_v38  ;;  %3918 = vrot.lane.b32.xlu1 %v9906_v46, %s11133_s28  ;;  %3315 = vrot.lane.b32.xlu0 %v9781_v0, %s11124_s21  ;;  %v4165_v28 = vpop.permute.xlu0 %4164  ;;  %v9926_v0 = vsel %vm1467_vm5, %v3458_v42, %v3459_v20 }
 0x508   : > { %3854 = vst.msk [vmem:[#allocation3 + $0x58] sm:$0xff] %vm1910_vm10, %v9756_v48  ;;  %6183 = vmatmul.mubr.msk.bf16.gmra.mrb[52].mxu0 %vm2545_vm15, %v4440_v30 }
 0x509   : > { %3987 = vst.msk [vmem:[#allocation3 + $0x58] sm:$0xff] %vm2044_vm11, %v9776_v19  ;;  %v3766_v38 = vpop.permute.xlu1 %3765 }
 0x50a   : > { %4250 = vst.msk [vmem:[#allocation3 + $0x50] sm:$0xff] %vm2310_vm13, %v4165_v28 }
 0x50b   : > { %3852 = vst.msk [vmem:[#allocation3 + $0x48] sm:$0xff] %vm1910_vm10, %v3766_v38  ;;  %4044 = vrot.lane.b32.xlu1 %v9632_v53, %s11118_s25  ;;  %4313 = vrot.lane.b32.xlu0 %v9926_v0, %s11132_s27  ;;  %v4298_v48 = vpop.permute.xlu0 %4297  ;;  %v3096_v53 = vld [vmem:[#allocation2 + $0x118] sm:$0x3] }
 0x50c   : > { %4383 = vst.msk [vmem:[#allocation3 + $0x50] sm:$0xff] %vm2444_vm14, %v4298_v48  ;;  %v3253_v10 = vrot.slane %v3096_v53, 1 }
 0x50d   : > { %v3899_v19 = vpop.permute.xlu1 %3898 }
 0x50e   : > { %v6684_v2 = vpop.eup %6683  ;;  %3985 = vst.msk [vmem:[#allocation3 + $0x48] sm:$0xff] %vm2044_vm11, %v3899_v19  ;;  %v3461_v19 = vrot.slane %v3096_v53, 2 }
 0x50f   : > { %v6686_v57 = vpop.eup %6685  ;;  %v2959_v55 = vadd.f32 1.0, %v6684_v2  ;;  %4115 = vst.msk [vmem:[#allocation3 + $0x48] sm:$0xff] %vm2175_vm12, %v9731_v17  ;;  %4048 = vrot.lane.b32.xlu1 %v9843_v14, %s11118_s25  ;;  %3319 = vrot.lane.b32.xlu0 %v9873_v24, %s11124_s21  ;;  %v3304_v26 = vpop.permute.xlu0 %3303 }
 0x510   : > { %v6688_v9 = vpop.eup %6687  ;;  %v2957_v44 = vadd.f32 1.0, %v6686_v57  ;;  %4249 = vst.msk [vmem:[#allocation3 + $0x48] sm:$0xff] %vm2310_vm13, %v9788_v39 }
 0x511   : > { %v6690_v43 = vpop.eup %6689  ;;  %6691 = vrcp.f32 %v2959_v55  ;;  %v2960_v50 = vadd.f32 1.0, %v6688_v9  ;;  %4382 = vst.msk [vmem:[#allocation3 + $0x48] sm:$0xff] %vm2444_vm14, %v9804_v33  ;;  %v9945_v17 = vpop.permute.xlu1 %3643  ;;  %v9958_v33 = vsel %vm1257_vm4, %v3251_v49, %v3253_v10 }
 0x512   : > { %3385 = vst.msk [vmem:[#allocation3 + $0x70] sm:$0xff] %vm1434_vm6, %v3304_v26  ;;  %6693 = vrcp.f32 %v2957_v44  ;;  %v2958_v36 = vadd.f32 1.0, %v6690_v43  ;;  %v3464_v26 = vrot.slane %v9841_v18, 2  ;;  %v3463_v43 = vrot.slane %v9828_v15, 2 }
 0x513   : > { %6695 = vrcp.f32 %v2960_v50  ;;  %4178 = vrot.lane.b32.xlu1 %v9868_v25, %s11143_s1  ;;  %3523 = vrot.lane.b32.xlu0 %v9811_v60, %s11130_s0  ;;  %v3512_v39 = vpop.permute.xlu0 %3511 }
 0x514   : > { %6697 = vrcp.f32 %v2958_v36  ;;  %3593 = vst.msk [vmem:[#allocation3 + $0x70] sm:$0xff] %vm1644_vm7, %v3512_v39  ;;  %v10041_v10 = vsel %vm1467_vm5, %v3463_v43, %v3464_v26 }
 0x515   : > { %v4033_v11 = vpop.permute.xlu1 %4032  ;;  %3723 = vst.msk [vmem:[#allocation3 + $0x70] sm:$0xff] %vm1775_vm9, %v9826_v62  ;;  %v4413_v62 = vld [vmem:[#allocation3 + $0x40] sm:$0xff] }
 0x516   : > { %4117 = vst.msk [vmem:[#allocation3 + $0x58] sm:$0xff] %vm2175_vm12, %v4033_v11 }
 0x517   : > { %3857 = vst.msk [vmem:[#allocation3 + $0x70] sm:$0xff] %vm1910_vm10, %v9887_v58  ;;  %4182 = vrot.lane.b32.xlu1 %v9958_v33, %s11143_s1  ;;  %3527 = vrot.lane.b32.xlu0 %v9926_v0, %s11130_s0  ;;  %v3772_v60 = vpop.permute.xlu0 %3771 }
 0x518   : > { %3990 = vst.msk [vmem:[#allocation3 + $0x70] sm:$0xff] %vm2044_vm11, %v9900_v8  ;;  %v4414_v6 = vld [vmem:[#allocation3 + $0x48] sm:$0xff] }
 0x519   : > { %3855 = vst.msk [vmem:[#allocation3 + $0x60] sm:$0xff] %vm1910_vm10, %v3772_v60  ;;  %v3640_v37 = vpop.permute.xlu1 %3639  ;;  %v4441_v49 = vpack.c.bf16 %v4414_v6, %v4413_v62 }
 0x51a   : > { %3722 = vst.msk [vmem:[#allocation3 + $0x68] sm:$0xff] %vm1775_vm9, %v3640_v37  ;;  %v4415_v37 = vld [vmem:[#allocation3 + $0x50] sm:$0xff] }
 0x51b   : > { %v6692_v5 = vpop.eup %6691  ;;  %4311 = vrot.lane.b32.xlu1 %v9906_v46, %s11132_s27  ;;  %3653 = vrot.lane.b32.xlu0 %v9831_v4, %s11127_s26  ;;  %v3905_v8 = vpop.permute.xlu0 %3904 }
 0x51c   : > { %v6694_v58 = vpop.eup %6693  ;;  %v3023_v34 = vmul.f32 %v6692_v5, %v9861_v3  ;;  %6186 = vmatprep.mubr.msk.bf16.mxu0 %vm2545_vm15, %v4441_v49  ;;  %3988 = vst.msk [vmem:[#allocation3 + $0x60] sm:$0xff] %vm2044_vm11, %v3905_v8  ;;  %v6974_v5 = vld [vmem:[%s11040_s6] ss:$0 sm:$0xff] }
 0x51d   : > { %v6696_v30 = vpop.eup %6695  ;;  %v3021_v28 = vmul.f32 %v6694_v58, %v9876_v21  ;;  %v9978_v42 = vpop.permute.xlu1 %3777 }
 0x51e   : > { %v6698_v38 = vpop.eup %6697  ;;  %3055 = vst.msk [vmem:[#allocation2 + $0x151] sm:$0xff] %vm467_vm1, %v3023_v34  ;;  %v3024_v48 = vmul.f32 %v6696_v30, %v9885_v47  ;;  %v9994_v47 = vsel %vm1467_vm5, %v3459_v20, %v3461_v19 }
 0x51f   : > { %3053 = vst.msk [vmem:[#allocation2 + $0x139] sm:$0xff] %vm467_vm1, %v3021_v28  ;;  %v3022_v4 = vmul.f32 %v6698_v38, %v9891_v56  ;;  %3317 = vrot.lane.b32.xlu1 %v9868_v25, %s11124_s21  ;;  %3657 = vrot.lane.b32.xlu0 %v9828_v15, %s11127_s26  ;;  %v4035_v3 = vpop.permute.xlu0 %4034  ;;  %v3256_v56 = vrot.slane %v9841_v18, 1  ;;  %v3255_v25 = vrot.slane %v9828_v15, 1 }
 0x520   : > { %3056 = vst.msk [vmem:[#allocation2 + $0x159] sm:$0xff] %vm467_vm1, %v3024_v48 }
 0x521   : > { %3054 = vst.msk [vmem:[#allocation2 + $0x141] sm:$0xff] %vm467_vm1, %v3022_v4  ;;  %v3911_v21 = vpop.permute.xlu1 %3910  ;;  %v10008_v20 = vsel %vm1257_vm4, %v3255_v25, %v3256_v56 }
 0x522   : > { %4118 = vst.msk [vmem:[#allocation3 + $0x60] sm:$0xff] %vm2175_vm12, %v4035_v3 }
 0x523   : > { %4315 = vrot.lane.b32.xlu1 %v9994_v47, %s11132_s27  ;;  %3787 = vrot.lane.b32.xlu0 %v9873_v24, %s11131_s18 }
 0x525   : > { %v4167_v2 = vpop.permute.xlu1 %4166  ;;  %v10002_v57 = vld [vmem:[#allocation2 + $0x150] sm:$0xff] }
 0x526   : > { %4251 = vst.msk [vmem:[#allocation3 + $0x58] sm:$0xff] %vm2310_vm13, %v4167_v2  ;;  %v10010_v55 = vld [vmem:[#allocation2 + $0x138] sm:$0xff] }
 0x527   : > { %3143 = vst.msk [vmem:[#allocation3 + $0xe0] sm:$0xff] %vm467_vm1, %v10002_v57  ;;  %3321 = vrot.lane.b32.xlu1 %v9958_v33, %s11124_s21  ;;  %3791 = vrot.lane.b32.xlu0 %v10008_v20, %s11131_s18  ;;  %3141 = vst.msk [vmem:[#allocation3 + $0xd0] sm:$0xff] %vm467_vm1, %v10010_v55  ;;  %v10020_v24 = vld [vmem:[#allocation2 + $0x158] sm:$0xff] }
 0x528   : > { %v10022_v53 = vld [vmem:[#allocation2 + $0x140] sm:$0xff]  ;;  %3144 = vst.msk [vmem:[#allocation3 + $0xe8] sm:$0xff] %vm467_vm1, %v10020_v24  ;;  %v4039_v44 = vpop.permute.xlu0 %4038 }
 0x529   : > { %v4300_v9 = vpop.permute.xlu1 %4299  ;;  %3142 = vst.msk [vmem:[#allocation3 + $0xd8] sm:$0xff] %vm467_vm1, %v10022_v53 }
 0x52a   : > { %4384 = vst.msk [vmem:[#allocation3 + $0x58] sm:$0xff] %vm2444_vm14, %v4300_v9 }
 0x52b   : > { %4120 = vst.msk [vmem:[#allocation3 + $0x70] sm:$0xff] %vm2175_vm12, %v4039_v44  ;;  %3525 = vrot.lane.b32.xlu1 %v9906_v46, %s11130_s0  ;;  %3920 = vrot.lane.b32.xlu0 %v9926_v0, %s11133_s28  ;;  %v6973_v0 = vld [vmem:[%s11039_s5] ss:$0 sm:$0xff] }
 0x52c   : > { %v4169_v36 = vpop.permute.xlu0 %4168 }
 0x52d   : > { %v3306_v50 = vpop.permute.xlu1 %3305  ;;  %4252 = vst.msk [vmem:[#allocation3 + $0x60] sm:$0xff] %vm2310_vm13, %v4169_v36 }
 0x52e   : > { %3386 = vst.msk [vmem:[#allocation3 + $0x78] sm:$0xff] %vm1434_vm6, %v3306_v50 }
 0x52f   : > { %3529 = vrot.lane.b32.xlu1 %v9994_v47, %s11130_s0  ;;  %3924 = vrot.lane.b32.xlu0 %v10041_v10, %s11133_s28  ;;  %v6170_v46 = vpop.f32.mrb[12].mxu1 }
 0x530   : > { %v2796_v39 = vmul.f32 %v6973_v0, %v6170_v46  ;;  %v2744_v11 = vpop.f32.mrb[13].mxu1  ;;  %v4173_v6 = vpop.permute.xlu0 %4172 }
 0x531   : > { %v2794_v60 = vmul.f32 %v6973_v0, %v2744_v11  ;;  %v3514_v62 = vpop.permute.xlu1 %3513  ;;  %v4416_v49 = vld [vmem:[#allocation3 + $0x58] sm:$0xff]  ;;  %4254 = vst.msk [vmem:[#allocation3 + $0x70] sm:$0xff] %vm2310_vm13, %v4173_v6  ;;  %v6171_v34 = vpop.f32.mrb[14].mxu1 }
 0x532   : > { %v10053_v58 = vadd.f32 %v6974_v5, %v2796_v39  ;;  %3594 = vst.msk [vmem:[#allocation3 + $0x78] sm:$0xff] %vm1644_vm7, %v3514_v62  ;;  %v4442_v8 = vpack.c.bf16 %v4416_v49, %v4415_v37  ;;  %v2797_v28 = vmul.f32 %v6973_v0, %v6171_v34  ;;  %v2747_v38 = vpop.f32.mrb[15].mxu1  ;;  %v3260_v39 = vrot.slane %v10010_v55, 1 }
 0x533   : > { %v10057_v30 = vadd.f32 %v6974_v5, %v2794_v60  ;;  %3724 = vst.msk [vmem:[#allocation3 + $0x78] sm:$0xff] %vm1775_vm9, %v9945_v17  ;;  %3655 = vrot.lane.b32.xlu1 %v9843_v14, %s11127_s26  ;;  %4050 = vrot.lane.b32.xlu0 %v9828_v15, %s11118_s25  ;;  %v2795_v19 = vmul.f32 %v6973_v0, %v2747_v38  ;;  %v3261_v0 = vrot.slane %v10022_v53, 1 }
 0x534   : > { %v2867_v48 = vsub.f32 0.0, %v10053_v58  ;;  %3858 = vst.msk [vmem:[#allocation3 + $0x78] sm:$0xff] %vm1910_vm10, %v9978_v42  ;;  %6187 = vmatmul.mubr.msk.bf16.gmra.mrb[56].mxu0 %vm2545_vm15, %v4442_v8  ;;  %v10071_v17 = vadd.f32 %v6974_v5, %v2797_v28  ;;  %v4302_v25 = vpop.permute.xlu0 %4301 }
 0x535   : > { %v2865_v4 = vsub.f32 0.0, %v10057_v30  ;;  %3991 = vst.msk [vmem:[#allocation3 + $0x78] sm:$0xff] %vm2044_vm11, %v3911_v21  ;;  %v3774_v3 = vpop.permute.xlu1 %3773  ;;  %v10073_v2 = vadd.f32 %v6974_v5, %v2795_v19  ;;  %v3099_v21 = vld [vmem:[#allocation2 + $0x130] sm:$0x3] }
 0x536   : > { %v2929_v14 = vmul.f32 1.442695, %v2867_v48  ;;  %3856 = vst.msk [vmem:[#allocation3 + $0x68] sm:$0xff] %vm1910_vm10, %v3774_v3  ;;  %v2868_v42 = vsub.f32 0.0, %v10071_v17  ;;  %v3258_v46 = vrot.slane %v3099_v21, 1 }
 0x537   : > { %4385 = vst.msk [vmem:[#allocation3 + $0x60] sm:$0xff] %vm2444_vm14, %v4302_v25  ;;  %v2925_v15 = vmul.f32 1.442695, %v2865_v4  ;;  %3659 = vrot.lane.b32.xlu1 %v9841_v18, %s11127_s26  ;;  %4054 = vrot.lane.b32.xlu0 %v10010_v55, %s11118_s25  ;;  %v2866_v9 = vsub.f32 0.0, %v10073_v2 }
 0x538   : > { %6699 = vpow2.f32 %v2929_v14  ;;  %v2931_v44 = vmul.f32 1.442695, %v2868_v42  ;;  %v3308_v50 = vpop.permute.xlu0 %3307  ;;  %v10096_v62 = vsel %vm1257_vm4, %v3256_v56, %v3258_v46  ;;  %v3466_v56 = vrot.slane %v3099_v21, 2 }
 0x539   : > { %6701 = vpow2.f32 %v2925_v15  ;;  %v3907_v43 = vpop.permute.xlu1 %3906  ;;  %v2927_v36 = vmul.f32 1.442695, %v2866_v9  ;;  %3387 = vst.msk [vmem:[#allocation3 + $0x80] sm:$0xff] %vm1434_vm6, %v3308_v50  ;;  %v3468_v14 = vrot.slane %v10010_v55, 2 }
 0x53a   : > { %3989 = vst.msk [vmem:[#allocation3 + $0x68] sm:$0xff] %vm2044_vm11, %v3907_v43  ;;  %6703 = vpow2.f32 %v2931_v44  ;;  %v10118_v3 = vsel %vm1467_vm5, %v3464_v26, %v3466_v56  ;;  %v3102_v44 = vld [vmem:[#allocation2 + $0x148] sm:$0x3] }
 0x53b   : > { %3789 = vrot.lane.b32.xlu1 %v9958_v33, %s11131_s18  ;;  %4184 = vrot.lane.b32.xlu0 %v10008_v20, %s11143_s1  ;;  %6705 = vpow2.f32 %v2927_v36  ;;  %v10101_v33 = vsel %vm1257_vm4, %v3260_v39, %v3261_v0 }
 0x53c   : > { %v4306_v60 = vpop.permute.xlu0 %4305 }
 0x53d   : > { %v4037_v11 = vpop.permute.xlu1 %4036  ;;  %4387 = vst.msk [vmem:[#allocation3 + $0x70] sm:$0xff] %vm2444_vm14, %v4306_v60 }
 0x53e   : > { %4119 = vst.msk [vmem:[#allocation3 + $0x68] sm:$0xff] %vm2175_vm12, %v4037_v11  ;;  %v3263_v11 = vrot.slane %v3102_v44, 1 }
 0x53f   : > { %3793 = vrot.lane.b32.xlu1 %v10096_v62, %s11131_s18  ;;  %4188 = vrot.lane.b32.xlu0 %v10101_v33, %s11143_s1 }
 0x540   : > { %v3312_v37 = vpop.permute.xlu0 %3311 }
 0x541   : > { %v4041_v6 = vpop.permute.xlu1 %4040  ;;  %3389 = vst.msk [vmem:[#allocation3 + $0x90] sm:$0xff] %vm1434_vm6, %v3312_v37 }
 0x542   : > { %v6700_v49 = vpop.eup %6699  ;;  %4121 = vst.msk [vmem:[#allocation3 + $0x78] sm:$0xff] %vm2175_vm12, %v4041_v6 }
 0x543   : > { %v6702_v5 = vpop.eup %6701  ;;  %v2963_v34 = vadd.f32 1.0, %v6700_v49  ;;  %3922 = vrot.lane.b32.xlu1 %v9994_v47, %s11133_s28  ;;  %4317 = vrot.lane.b32.xlu0 %v10041_v10, %s11132_s27  ;;  %v3469_v47 = vrot.slane %v10022_v53, 2  ;;  %v4417_v49 = vld [vmem:[#allocation3 + $0x60] sm:$0xff] }
 0x544   : > { %v2961_v8 = vadd.f32 1.0, %v6702_v5  ;;  %v6704_v28 = vpop.eup %6703  ;;  %v3516_v48 = vpop.permute.xlu0 %3515 }
 0x545   : > { %6707 = vrcp.f32 %v2963_v34  ;;  %v4171_v38 = vpop.permute.xlu1 %4170  ;;  %v6706_v19 = vpop.eup %6705  ;;  %v2964_v4 = vadd.f32 1.0, %v6704_v28  ;;  %3595 = vst.msk [vmem:[#allocation3 + $0x80] sm:$0xff] %vm1644_vm7, %v3516_v48  ;;  %v10131_v26 = vsel %vm1467_vm5, %v3468_v14, %v3469_v47  ;;  %v4419_v28 = vld [vmem:[#allocation3 + $0x70] sm:$0xff] }
 0x546   : > { %6709 = vrcp.f32 %v2961_v8  ;;  %4253 = vst.msk [vmem:[#allocation3 + $0x68] sm:$0xff] %vm2310_vm13, %v4171_v38  ;;  %v2962_v25 = vadd.f32 1.0, %v6706_v19 }
 0x547   : > { %3926 = vrot.lane.b32.xlu1 %v10118_v3, %s11133_s28  ;;  %3323 = vrot.lane.b32.xlu0 %v10008_v20, %s11124_s21  ;;  %6711 = vrcp.f32 %v2964_v4  ;;  %v3471_v4 = vrot.slane %v3102_v44, 2  ;;  %v3473_v44 = vrot.slane %v10002_v57, 2 }
 0x548   : > { %6713 = vrcp.f32 %v2962_v25  ;;  %v3520_v42 = vpop.permute.xlu0 %3519 }
 0x549   : > { %v4175_v15 = vpop.permute.xlu1 %4174  ;;  %3597 = vst.msk [vmem:[#allocation3 + $0x90] sm:$0xff] %vm1644_vm7, %v3520_v42  ;;  %v3472_v14 = vsel %vm1467_vm5, %v3469_v47, %v3471_v4 }
 0x54a   : > { %4255 = vst.msk [vmem:[#allocation3 + $0x78] sm:$0xff] %vm2310_vm13, %v4175_v15  ;;  %v3266_v15 = vrot.slane %v10020_v24, 1 }
 0x54b   : > { %4052 = vrot.lane.b32.xlu1 %v9841_v18, %s11118_s25  ;;  %4321 = vrot.lane.b32.xlu0 %v10131_v26, %s11132_s27 }
 0x54c   : > { %v3646_v21 = vpop.permute.xlu0 %3645 }
 0x54d   : > { %v4304_v20 = vpop.permute.xlu1 %4303  ;;  %3725 = vst.msk [vmem:[#allocation3 + $0x80] sm:$0xff] %vm1775_vm9, %v3646_v21 }
 0x54e   : > { %4386 = vst.msk [vmem:[#allocation3 + $0x68] sm:$0xff] %vm2444_vm14, %v4304_v20 }
 0x54f   : > { %v6708_v9 = vpop.eup %6707  ;;  %4056 = vrot.lane.b32.xlu1 %v10022_v53, %s11118_s25  ;;  %3327 = vrot.lane.b32.xlu0 %v10101_v33, %s11124_s21 }
 0x550   : > { %v6710_v43 = vpop.eup %6709  ;;  %v3027_v18 = vmul.f32 %v6708_v9, %v10053_v58  ;;  %v3650_v46 = vpop.permute.xlu0 %3649 }
 0x551   : > { %v3025_v50 = vmul.f32 %v6710_v43, %v10057_v30  ;;  %v3310_v36 = vpop.permute.xlu1 %3309  ;;  %v6712_v39 = vpop.eup %6711  ;;  %3727 = vst.msk [vmem:[#allocation3 + $0x90] sm:$0xff] %vm1775_vm9, %v3650_v46 }
 0x552   : > { %3059 = vst.msk [vmem:[#allocation2 + $0x181] sm:$0xff] %vm467_vm1, %v3027_v18  ;;  %v6714_v60 = vpop.eup %6713  ;;  %v3028_v6 = vmul.f32 %v6712_v39, %v10071_v17  ;;  %v10162_v17 = vsel %vm1257_vm4, %v3261_v0, %v3263_v11  ;;  %v3105_v39 = vld [vmem:[#allocation2 + $0x160] sm:$0x3] }
 0x553   : > { %3388 = vst.msk [vmem:[#allocation3 + $0x88] sm:$0xff] %vm1434_vm6, %v3310_v36  ;;  %4186 = vrot.lane.b32.xlu1 %v10096_v62, %s11143_s1  ;;  %3531 = vrot.lane.b32.xlu0 %v10041_v10, %s11130_s0  ;;  %v3026_v58 = vmul.f32 %v6714_v60, %v10073_v2 }
 0x554   : > { %3057 = vst.msk [vmem:[#allocation2 + $0x169] sm:$0xff] %vm467_vm1, %v3025_v50  ;;  %3060 = vst.msk [vmem:[#allocation2 + $0x189] sm:$0xff] %vm467_vm1, %v3028_v6  ;;  %v3780_v37 = vpop.permute.xlu0 %3779 }
 0x555   : > { %v4308_v30 = vpop.permute.xlu1 %4307  ;;  %v4418_v56 = vld [vmem:[#allocation3 + $0x68] sm:$0xff]  ;;  %3058 = vst.msk [vmem:[#allocation2 + $0x171] sm:$0xff] %vm467_vm1, %v3026_v58 }
 0x556   : > { %4388 = vst.msk [vmem:[#allocation3 + $0x78] sm:$0xff] %vm2444_vm14, %v4308_v30  ;;  %v4443_v10 = vpack.c.bf16 %v4418_v56, %v4417_v49 }
 0x557   : > { %3859 = vst.msk [vmem:[#allocation3 + $0x80] sm:$0xff] %vm1910_vm10, %v3780_v37  ;;  %4190 = vrot.lane.b32.xlu1 %v10162_v17, %s11143_s1  ;;  %3535 = vrot.lane.b32.xlu0 %v10131_v26, %s11130_s0 }
 0x558   : > { %6190 = vmatprep.mubr.msk.bf16.mxu0 %vm2545_vm15, %v4443_v10  ;;  %v3784_v5 = vpop.permute.xlu0 %3783  ;;  %v3476_v10 = vrot.slane %v3105_v39, 2 }
 0x559   : > { %v3314_v2 = vpop.permute.xlu1 %3313  ;;  %3861 = vst.msk [vmem:[#allocation3 + $0x90] sm:$0xff] %vm1910_vm10, %v3784_v5 }
 0x55a   : > { %3390 = vst.msk [vmem:[#allocation3 + $0x98] sm:$0xff] %vm1434_vm6, %v3314_v2 }
 0x55b   : > { %v10171_v34 = vld [vmem:[#allocation2 + $0x168] sm:$0xff]  ;;  %4319 = vrot.lane.b32.xlu1 %v10118_v3, %s11132_s27  ;;  %3661 = vrot.lane.b32.xlu0 %v10010_v55, %s11127_s26 }
 0x55c   : > { %3145 = vst.msk [vmem:[#allocation3 + $0xf0] sm:$0xff] %vm467_vm1, %v10171_v34  ;;  %v3913_v8 = vpop.permute.xlu0 %3912  ;;  %v10179_v48 = vld [vmem:[#allocation2 + $0x170] sm:$0xff]  ;;  %v3270_v6 = vrot.slane %v10171_v34, 1 }
 0x55d   : > { %v3518_v0 = vpop.permute.xlu1 %3517  ;;  %v4420_v38 = vld [vmem:[#allocation3 + $0x78] sm:$0xff]  ;;  %3992 = vst.msk [vmem:[#allocation3 + $0x80] sm:$0xff] %vm2044_vm11, %v3913_v8  ;;  %v3479_v8 = vrot.slane %v10179_v48, 2 }
 0x55e   : > { %3596 = vst.msk [vmem:[#allocation3 + $0x88] sm:$0xff] %vm1644_vm7, %v3518_v0  ;;  %v4444_v19 = vpack.c.bf16 %v4420_v38, %v4419_v28  ;;  %v3478_v28 = vrot.slane %v10171_v34, 2 }
 0x55f   : > { %3146 = vst.msk [vmem:[#allocation3 + $0xf8] sm:$0xff] %vm467_vm1, %v10179_v48  ;;  %3325 = vrot.lane.b32.xlu1 %v10096_v62, %s11124_s21  ;;  %3665 = vrot.lane.b32.xlu0 %v10002_v57, %s11127_s26  ;;  %v3265_v62 = vrot.slane %v10002_v57, 1 }
 0x560   : > { %6191 = vmatmul.mubr.msk.bf16.gmra.mrb[60].mxu0 %vm2545_vm15, %v4444_v19  ;;  %v3917_v25 = vpop.permute.xlu0 %3916  ;;  %v10273_v4 = vsel %vm1467_vm5, %v3478_v28, %v3479_v8 }
 0x561   : > { %v3522_v55 = vpop.permute.xlu1 %3521  ;;  %3994 = vst.msk [vmem:[#allocation3 + $0x90] sm:$0xff] %vm2044_vm11, %v3917_v25  ;;  %v3267_v21 = vsel %vm1257_vm4, %v3265_v62, %v3266_v15 }
 0x562   : > { %3598 = vst.msk [vmem:[#allocation3 + $0x98] sm:$0xff] %vm1644_vm7, %v3522_v55 }
 0x563   : > { %4323 = vrot.lane.b32.xlu1 %v3472_v14, %s11132_s27  ;;  %3795 = vrot.lane.b32.xlu0 %v10101_v33, %s11131_s18  ;;  %v3474_v33 = vrot.slane %v10020_v24, 2 }
 0x564   : > { %v4043_v20 = vpop.permute.xlu0 %4042 }
 0x565   : > { %v3648_v42 = vpop.permute.xlu1 %3647  ;;  %4122 = vst.msk [vmem:[#allocation3 + $0x80] sm:$0xff] %vm2175_vm12, %v4043_v20  ;;  %v10217_v50 = vsel %vm1467_vm5, %v3473_v44, %v3474_v33  ;;  %v10261_v0 = vsel %vm1467_vm5, %v3474_v33, %v3476_v10 }
 0x566   : > { %3726 = vst.msk [vmem:[#allocation3 + $0x88] sm:$0xff] %vm1775_vm9, %v3648_v42 }
 0x567   : > { %3329 = vrot.lane.b32.xlu1 %v10162_v17, %s11124_s21  ;;  %3799 = vrot.lane.b32.xlu0 %v3267_v21, %s11131_s18 }
 0x569   : > { %v3652_v47 = vpop.permute.xlu1 %3651  ;;  %v4047_v9 = vpop.permute.xlu0 %4046 }
 0x56a   : > { %3728 = vst.msk [vmem:[#allocation3 + $0x98] sm:$0xff] %vm1775_vm9, %v3652_v47 }
 0x56b   : > { %4124 = vst.msk [vmem:[#allocation3 + $0x90] sm:$0xff] %vm2175_vm12, %v4047_v9  ;;  %3533 = vrot.lane.b32.xlu1 %v10118_v3, %s11130_s0  ;;  %3928 = vrot.lane.b32.xlu0 %v10131_v26, %s11133_s28 }
 0x56d   : > { %v3782_v43 = vpop.permute.xlu1 %3781  ;;  %v4177_v18 = vpop.permute.xlu0 %4176 }
 0x56e   : > { %3860 = vst.msk [vmem:[#allocation3 + $0x88] sm:$0xff] %vm1910_vm10, %v3782_v43 }
 0x56f   : > { %4256 = vst.msk [vmem:[#allocation3 + $0x80] sm:$0xff] %vm2310_vm13, %v4177_v18  ;;  %3537 = vrot.lane.b32.xlu1 %v3472_v14, %s11130_s0  ;;  %3932 = vrot.lane.b32.xlu0 %v10217_v50, %s11133_s28  ;;  %v10304_v18 = vld [vmem:[%s11042_s8] ss:$0 sm:$0xff] }
 0x571   : > { %v3786_v3 = vpop.permute.xlu1 %3785  ;;  %v4181_v36 = vpop.permute.xlu0 %4180 }
 0x572   : > { %3862 = vst.msk [vmem:[#allocation3 + $0x98] sm:$0xff] %vm1910_vm10, %v3786_v3  ;;  %v10311_v3 = vld [vmem:[%s11043_s9] ss:$0 sm:$0xff] }
 0x573   : > { %4258 = vst.msk [vmem:[#allocation3 + $0x90] sm:$0xff] %vm2310_vm13, %v4181_v36  ;;  %3663 = vrot.lane.b32.xlu1 %v10022_v53, %s11127_s26  ;;  %4058 = vrot.lane.b32.xlu0 %v10002_v57, %s11118_s25  ;;  %v3268_v57 = vrot.slane %v3105_v39, 1  ;;  %v3271_v53 = vrot.slane %v10179_v48, 1 }
 0x575   : > { %v3915_v26 = vpop.permute.xlu1 %3914  ;;  %v4310_v46 = vpop.permute.xlu0 %4309  ;;  %v10244_v37 = vsel %vm1257_vm4, %v3266_v15, %v3268_v57  ;;  %v10247_v49 = vsel %vm1257_vm4, %v3270_v6, %v3271_v53 }
 0x576   : > { %3993 = vst.msk [vmem:[#allocation3 + $0x88] sm:$0xff] %vm2044_vm11, %v3915_v26 }
 0x577   : > { %4389 = vst.msk [vmem:[#allocation3 + $0x80] sm:$0xff] %vm2444_vm14, %v4310_v46  ;;  %3667 = vrot.lane.b32.xlu1 %v10020_v24, %s11127_s26  ;;  %4062 = vrot.lane.b32.xlu0 %v10171_v34, %s11118_s25 }
 0x579   : > { %v3919_v11 = vpop.permute.xlu1 %3918  ;;  %v3316_v60 = vpop.permute.xlu0 %3315 }
 0x57a   : > { %3995 = vst.msk [vmem:[#allocation3 + $0x98] sm:$0xff] %vm2044_vm11, %v3919_v11 }
 0x57b   : > { %3391 = vst.msk [vmem:[#allocation3 + $0xa0] sm:$0xff] %vm1434_vm6, %v3316_v60  ;;  %3797 = vrot.lane.b32.xlu1 %v10162_v17, %s11131_s18  ;;  %4192 = vrot.lane.b32.xlu0 %v3267_v21, %s11143_s1 }
 0x57d   : > { %v4045_v58 = vpop.permute.xlu1 %4044  ;;  %v4314_v30 = vpop.permute.xlu0 %4313 }
 0x57e   : > { %4123 = vst.msk [vmem:[#allocation3 + $0x88] sm:$0xff] %vm2175_vm12, %v4045_v58 }
 0x57f   : > { %4391 = vst.msk [vmem:[#allocation3 + $0x90] sm:$0xff] %vm2444_vm14, %v4314_v30  ;;  %3801 = vrot.lane.b32.xlu1 %v10244_v37, %s11131_s18  ;;  %4196 = vrot.lane.b32.xlu0 %v10247_v49, %s11143_s1 }
 0x581   : > { %v4049_v56 = vpop.permute.xlu1 %4048  ;;  %v3320_v17 = vpop.permute.xlu0 %3319 }
 0x582   : > { %4125 = vst.msk [vmem:[#allocation3 + $0x98] sm:$0xff] %vm2175_vm12, %v4049_v56  ;;  %v10324_v56 = vld [vmem:[#allocation2 + $0x180] sm:$0xff] }
 0x583   : > { %3393 = vst.msk [vmem:[#allocation3 + $0xb0] sm:$0xff] %vm1434_vm6, %v3320_v17  ;;  %3930 = vrot.lane.b32.xlu1 %v3472_v14, %s11133_s28  ;;  %4325 = vrot.lane.b32.xlu0 %v10217_v50, %s11132_s27  ;;  %v3108_v14 = vld [vmem:[#allocation2 + $0x178] sm:$0x3] }
 0x584   : > { %v3481_v17 = vrot.slane %v3108_v14, 2 }
 0x585   : > { %v4179_v2 = vpop.permute.xlu1 %4178  ;;  %v3524_v5 = vpop.permute.xlu0 %3523 }
 0x586   : > { %4257 = vst.msk [vmem:[#allocation3 + $0x88] sm:$0xff] %vm2310_vm13, %v4179_v2  ;;  %v4423_v60 = vld [vmem:[#allocation3 + $0x90] sm:$0xff] }
 0x587   : > { %3599 = vst.msk [vmem:[#allocation3 + $0xa0] sm:$0xff] %vm1644_vm7, %v3524_v5  ;;  %3934 = vrot.lane.b32.xlu1 %v10261_v0, %s11133_s28  ;;  %3331 = vrot.lane.b32.xlu0 %v3267_v21, %s11124_s21  ;;  %v4421_v21 = vld [vmem:[#allocation3 + $0x80] sm:$0xff]  ;;  %v10335_v5 = vld [vmem:[#allocation2 + $0x188] sm:$0xff] }
 0x589   : > { %v4183_v38 = vpop.permute.xlu1 %4182  ;;  %v3528_v19 = vpop.permute.xlu0 %3527 }
 0x58a   : > { %4259 = vst.msk [vmem:[#allocation3 + $0x98] sm:$0xff] %vm2310_vm13, %v4183_v38 }
 0x58b   : > { %3601 = vst.msk [vmem:[#allocation3 + $0xb0] sm:$0xff] %vm1644_vm7, %v3528_v19  ;;  %4060 = vrot.lane.b32.xlu1 %v10020_v24, %s11118_s25  ;;  %4329 = vrot.lane.b32.xlu0 %v10273_v4, %s11132_s27  ;;  %v3273_v24 = vrot.slane %v3108_v14, 1 }
 0x58d   : > { %v4312_v55 = vpop.permute.xlu1 %4311  ;;  %v3654_v25 = vpop.permute.xlu0 %3653  ;;  %v10294_v9 = vsel %vm1257_vm4, %v3271_v53, %v3273_v24  ;;  %v3743_v24 = vrot.slane %v10335_v5, 1 }
 0x58e   : > { %4390 = vst.msk [vmem:[#allocation3 + $0x88] sm:$0xff] %vm2444_vm14, %v4312_v55 }
 0x58f   : > { %3729 = vst.msk [vmem:[#allocation3 + $0xa0] sm:$0xff] %vm1775_vm9, %v3654_v25  ;;  %4064 = vrot.lane.b32.xlu1 %v10179_v48, %s11118_s25  ;;  %3335 = vrot.lane.b32.xlu0 %v10247_v49, %s11124_s21 }
 0x591   : > { %v3318_v15 = vpop.permute.xlu1 %3317  ;;  %v3658_v62 = vpop.permute.xlu0 %3657 }
 0x592   : > { %3392 = vst.msk [vmem:[#allocation3 + $0xa8] sm:$0xff] %vm1434_vm6, %v3318_v15 }
 0x593   : > { %3731 = vst.msk [vmem:[#allocation3 + $0xb0] sm:$0xff] %vm1775_vm9, %v3658_v62  ;;  %4194 = vrot.lane.b32.xlu1 %v10244_v37, %s11143_s1  ;;  %3539 = vrot.lane.b32.xlu0 %v10217_v50, %s11130_s0  ;;  %v10351_v62 = vsel %vm1467_vm5, %v3479_v8, %v3481_v17 }
 0x595   : > { %v4316_v42 = vpop.permute.xlu1 %4315  ;;  %v3788_v20 = vpop.permute.xlu0 %3787  ;;  %v4422_v47 = vld [vmem:[#allocation3 + $0x88] sm:$0xff] }
 0x596   : > { %4392 = vst.msk [vmem:[#allocation3 + $0x98] sm:$0xff] %vm2444_vm14, %v4316_v42  ;;  %v4445_v33 = vpack.c.bf16 %v4422_v47, %v4421_v21  ;;  %v3742_v47 = vrot.slane %v10324_v56, 1 }
 0x597   : > { %3863 = vst.msk [vmem:[#allocation3 + $0xa0] sm:$0xff] %vm1910_vm10, %v3788_v20  ;;  %4198 = vrot.lane.b32.xlu1 %v10294_v9, %s11143_s1  ;;  %3543 = vrot.lane.b32.xlu0 %v10273_v4, %s11130_s0 }
 0x598   : > { %6194 = vmatprep.mubr.msk.bf16.mxu0 %vm2545_vm15, %v4445_v33 }
 0x599   : > { %v3322_v44 = vpop.permute.xlu1 %3321  ;;  %v3792_v43 = vpop.permute.xlu0 %3791 }
 0x59a   : > { %3394 = vst.msk [vmem:[#allocation3 + $0xb8] sm:$0xff] %vm1434_vm6, %v3322_v44 }
 0x59b   : > { %3865 = vst.msk [vmem:[#allocation3 + $0xb0] sm:$0xff] %vm1910_vm10, %v3792_v43  ;;  %v6180_v50 = vpop.f32.mrb[48].mxu0  ;;  %4327 = vrot.lane.b32.xlu1 %v10261_v0, %s11132_s27  ;;  %3669 = vrot.lane.b32.xlu0 %v10171_v34, %s11127_s26  ;;  %v3744_v43 = vsel %vm1257_vm4, %v3742_v47, %v3743_v24 }
 0x59c   : > { %v4694_v36 = vmul.f32 %v6180_v50, %v10304_v18  ;;  %v4558_v26 = vpop.f32.mrb[49].mxu0 }
 0x59d   : > { %v4692_v46 = vmul.f32 %v10304_v18, %v4558_v26  ;;  %v3526_v39 = vpop.permute.xlu1 %3525  ;;  %v6181_v11 = vpop.f32.mrb[50].mxu0  ;;  %v4424_v57 = vld [vmem:[#allocation3 + $0x98] sm:$0xff]  ;;  %v3875_v26 = vrot.slane %v10324_v56, 2 }
 0x59e   : > { %v10320_v53 = vadd.f32 %v10311_v3, %v4694_v36  ;;  %3600 = vst.msk [vmem:[#allocation3 + $0xa8] sm:$0xff] %vm1644_vm7, %v3526_v39  ;;  %v4695_v6 = vmul.f32 %v6181_v11, %v10304_v18  ;;  %v3921_v58 = vpop.permute.xlu0 %3920  ;;  %v4561_v30 = vpop.f32.mrb[51].mxu0  ;;  %v4446_v34 = vpack.c.bf16 %v4424_v57, %v4423_v60  ;;  %v3876_v36 = vrot.slane %v10335_v5, 2 }
 0x59f   : > { %v10327_v10 = vadd.f32 %v10311_v3, %v4692_v46  ;;  %3996 = vst.msk [vmem:[#allocation3 + $0xa0] sm:$0xff] %vm2044_vm11, %v3921_v58  ;;  %v4693_v2 = vmul.f32 %v10304_v18, %v4561_v30  ;;  %3333 = vrot.lane.b32.xlu1 %v10244_v37, %s11124_s21  ;;  %3673 = vrot.lane.b32.xlu0 %v10324_v56, %s11127_s26 }
 0x5a0   : > { %v4765_v28 = vsub.f32 0.0, %v10320_v53  ;;  %v10339_v38 = vadd.f32 %v10311_v3, %v4695_v6  ;;  %6195 = vmatmul.mubr.msk.bf16.gmra.mrb[64].mxu0 %vm2545_vm15, %v4446_v34  ;;  %v10381_v60 = vsel %vm1467_vm5, %v3875_v26, %v3876_v36 }
 0x5a1   : > { %v4763_v19 = vsub.f32 0.0, %v10327_v10  ;;  %v10344_v55 = vadd.f32 %v10311_v3, %v4693_v2  ;;  %v3530_v25 = vpop.permute.xlu1 %3529 }
 0x5a2   : > { %v4799_v14 = vmul.f32 1.442695, %v4765_v28  ;;  %v4766_v37 = vsub.f32 0.0, %v10339_v38  ;;  %3602 = vst.msk [vmem:[#allocation3 + $0xb8] sm:$0xff] %vm1644_vm7, %v3530_v25  ;;  %v3925_v15 = vpop.permute.xlu0 %3924  ;;  %v3112_v28 = vld [vmem:[#allocation2 + $0x198] sm:$0xff]  ;;  %v10394_v25 = vld [vmem:[#allocation2 + $0x1a0] sm:$0xff] }
 0x5a3   : > { %v4795_v42 = vmul.f32 1.442695, %v4763_v19  ;;  %v4764_v20 = vsub.f32 0.0, %v10344_v55  ;;  %3998 = vst.msk [vmem:[#allocation3 + $0xb0] sm:$0xff] %vm2044_vm11, %v3925_v15  ;;  %4331 = vrot.lane.b32.xlu1 %v10351_v62, %s11132_s27  ;;  %3803 = vrot.lane.b32.xlu0 %v10247_v49, %s11131_s18  ;;  %v4140_v15 = vrot.slane %v10394_v25, 1 }
 0x5a4   : > { %6715 = vpow2.f32 %v4799_v14  ;;  %v4801_v21 = vmul.f32 1.442695, %v4766_v37  ;;  %v3111_v37 = vld [vmem:[#allocation2 + $0x190] sm:$0x3] }
 0x5a5   : > { %6717 = vpow2.f32 %v4795_v42  ;;  %v4797_v8 = vmul.f32 1.442695, %v4764_v20  ;;  %v3656_v33 = vpop.permute.xlu1 %3655  ;;  %v3745_v20 = vrot.slane %v3111_v37, 1 }
 0x5a6   : > { %6719 = vpow2.f32 %v4801_v21  ;;  %3730 = vst.msk [vmem:[#allocation3 + $0xa8] sm:$0xff] %vm1775_vm9, %v3656_v33  ;;  %v4051_v44 = vpop.permute.xlu0 %4050 }
 0x5a7   : > { %6721 = vpow2.f32 %v4797_v8  ;;  %4126 = vst.msk [vmem:[#allocation3 + $0xa0] sm:$0xff] %vm2175_vm12, %v4051_v44  ;;  %3337 = vrot.lane.b32.xlu1 %v10294_v9, %s11124_s21  ;;  %3807 = vrot.lane.b32.xlu0 %v3744_v43, %s11131_s18 }
 0x5a9   : > { %v3660_v49 = vpop.permute.xlu1 %3659 }
 0x5aa   : > { %3732 = vst.msk [vmem:[#allocation3 + $0xb8] sm:$0xff] %vm1775_vm9, %v3660_v49  ;;  %v4055_v50 = vpop.permute.xlu0 %4054 }
 0x5ab   : > { %4128 = vst.msk [vmem:[#allocation3 + $0xb0] sm:$0xff] %vm2175_vm12, %v4055_v50  ;;  %3541 = vrot.lane.b32.xlu1 %v10261_v0, %s11130_s0  ;;  %3936 = vrot.lane.b32.xlu0 %v10273_v4, %s11133_s28 }
 0x5ad   : > { %v3790_v46 = vpop.permute.xlu1 %3789 }
 0x5ae   : > { %v6716_v39 = vpop.eup %6715  ;;  %3864 = vst.msk [vmem:[#allocation3 + $0xa8] sm:$0xff] %vm1910_vm10, %v3790_v46  ;;  %v4185_v11 = vpop.permute.xlu0 %4184 }
 0x5af   : > { %v6718_v57 = vpop.eup %6717  ;;  %v4861_v6 = vadd.f32 1.0, %v6716_v39  ;;  %4260 = vst.msk [vmem:[#allocation3 + $0xa0] sm:$0xff] %vm2310_vm13, %v4185_v11  ;;  %3545 = vrot.lane.b32.xlu1 %v10351_v62, %s11130_s0  ;;  %3940 = vrot.lane.b32.xlu0 %v10381_v60, %s11133_s28  ;;  %v4273_v11 = vrot.slane %v10394_v25, 2 }
 0x5b0   : > { %v6720_v0 = vpop.eup %6719  ;;  %v4859_v4 = vadd.f32 1.0, %v6718_v57 }
 0x5b1   : > { %v6722_v58 = vpop.eup %6721  ;;  %6723 = vrcp.f32 %v4861_v6  ;;  %v4862_v30 = vadd.f32 1.0, %v6720_v0  ;;  %v3794_v34 = vpop.permute.xlu1 %3793 }
 0x5b2   : > { %6725 = vrcp.f32 %v4859_v4  ;;  %v4860_v17 = vadd.f32 1.0, %v6722_v58  ;;  %3866 = vst.msk [vmem:[#allocation3 + $0xb8] sm:$0xff] %vm1910_vm10, %v3794_v34  ;;  %v4189_v2 = vpop.permute.xlu0 %4188  ;;  %v3878_v4 = vrot.slane %v3111_v37, 2 }
 0x5b3   : > { %6727 = vrcp.f32 %v4862_v30  ;;  %4262 = vst.msk [vmem:[#allocation3 + $0xb0] sm:$0xff] %vm2310_vm13, %v4189_v2  ;;  %3671 = vrot.lane.b32.xlu1 %v10179_v48, %s11127_s26  ;;  %4066 = vrot.lane.b32.xlu0 %v10324_v56, %s11118_s25  ;;  %v4139_v48 = vrot.slane %v3112_v28, 1 }
 0x5b4   : > { %6729 = vrcp.f32 %v4860_v17  ;;  %v3879_v2 = vsel %vm1467_vm5, %v3876_v36, %v3878_v4 }
 0x5b5   : > { %v3923_v19 = vpop.permute.xlu1 %3922  ;;  %v4141_v33 = vsel %vm1257_vm4, %v4139_v48, %v4140_v15 }
 0x5b6   : > { %3997 = vst.msk [vmem:[#allocation3 + $0xa8] sm:$0xff] %vm2044_vm11, %v3923_v19  ;;  %v4318_v14 = vpop.permute.xlu0 %4317  ;;  %v5006_v19 = vpack.c.bf16 %v7460_v12, %v7437_v1 }
 0x5b7   : > { %4393 = vst.msk [vmem:[#allocation3 + $0xa0] sm:$0xff] %vm2444_vm14, %v4318_v14  ;;  %3675 = vrot.lane.b32.xlu1 %v10335_v5, %s11127_s26  ;;  %4070 = vrot.lane.b32.xlu0 %v3112_v28, %s11118_s25  ;;  %s7050_s26 = smov 124   ;;  %v3114_v14 = vld [vmem:[#allocation2 + $0x1a8] sm:$0x3] }
 0x5b9   : > { %v3927_v56 = vpop.permute.xlu1 %3926 }
 0x5ba   : > { %3999 = vst.msk [vmem:[#allocation3 + $0xb8] sm:$0xff] %vm2044_vm11, %v3927_v56  ;;  %v3324_v42 = vpop.permute.xlu0 %3323 }
 0x5bb   : > { %v6724_v21 = vpop.eup %6723  ;;  %3395 = vst.msk [vmem:[#allocation3 + $0xc0] sm:$0xff] %vm1434_vm6, %v3324_v42  ;;  %3805 = vrot.lane.b32.xlu1 %v10294_v9, %s11131_s18  ;;  %4200 = vrot.lane.b32.xlu0 %v3744_v43, %s11143_s1  ;;  %v3746_v9 = vsel %vm1257_vm4, %v3743_v24, %v3745_v20  ;;  %v4272_v43 = vrot.slane %v3112_v28, 2  ;;  %v5010_v20 = vpack.c.bf16 %v7670_v52, %v7656_v54 }
 0x5bc   : > { %v6726_v47 = vpop.eup %6725  ;;  %v4925_v8 = vmul.f32 %v6724_v21, %v10320_v53 }
 0x5bd   : > { %v6728_v44 = vpop.eup %6727  ;;  %v4923_v49 = vmul.f32 %v6726_v47, %v10327_v10  ;;  %v4053_v50 = vpop.permute.xlu1 %4052  ;;  %v4274_v30 = vsel %vm1467_vm5, %v4272_v43, %v4273_v11 }
 0x5be   : > { %v6730_v26 = vpop.eup %6729  ;;  %v4926_v46 = vmul.f32 %v6728_v44, %v10339_v38  ;;  %4127 = vst.msk [vmem:[#allocation3 + $0xa8] sm:$0xff] %vm2175_vm12, %v4053_v50  ;;  %v4322_v39 = vpop.permute.xlu0 %4321  ;;  %v10422_v10 = vadd.f32 %v4925_v8, %v7372_v13  ;;  %v4425_v21 = vld [vmem:[#allocation3 + $0xa0] sm:$0xff]  ;;  %v4275_v44 = vrot.slane %v3114_v14, 2  ;;  %v5020_v50 = vld [vmem:[%s11045_s11] sm:$0x3] }
 0x5bf   : > { %v4924_v53 = vmul.f32 %v6730_v26, %v10344_v55  ;;  %4395 = vst.msk [vmem:[#allocation3 + $0xb0] sm:$0xff] %vm2444_vm14, %v4322_v39  ;;  %3809 = vrot.lane.b32.xlu1 %v3746_v9, %s11131_s18  ;;  %4204 = vrot.lane.b32.xlu0 %v4141_v33, %s11143_s1  ;;  %v10429_v57 = vadd.f32 %v4923_v49, %v7376_v16 }
 0x5c0   : > { %v10425_v38 = vadd.f32 %v4926_v46, %v7382_v22  ;;  %v5012_v49 = vpack.c.bf16 %v7710_v63, %v7691_v23  ;;  %6320 = vmatprep.subr.msk.bf16.mxu1 %vm2594_vm8, %v5020_v50  ;;  %v5118_v46 = vsel %vm2594_vm8, %v5020_v50, 0  ;;  %v4276_v43 = vsel %vm1467_vm5, %v4273_v11, %v4275_v44  ;;  %v11148_v50 = vld [vmem:[#allocation7_spill] sm:$0xff] }
 0x5c1   : > { %v10432_v55 = vadd.f32 %v4924_v53, %v7391_v27  ;;  %v4057_v24 = vpop.permute.xlu1 %4056  ;;  %6211 = vmatpush3.bf16.msra.mxu1 %v5118_v46  ;;  %v5018_v44 = vpack.c.bf16 %v7896_v41, %v7884_v61 }
 0x5c2   : > { %v4988_v6 = vpack.c.bf16 %v10425_v38, %v10422_v10  ;;  %4129 = vst.msk [vmem:[#allocation3 + $0xb8] sm:$0xff] %vm2175_vm12, %v4057_v24  ;;  %v3328_v0 = vpop.permute.xlu0 %3327 }
 0x5c3   : > { %3397 = vst.msk [vmem:[#allocation3 + $0xd0] sm:$0xff] %vm1434_vm6, %v3328_v0  ;;  %3938 = vrot.lane.b32.xlu1 %v10351_v62, %s11133_s28  ;;  %4333 = vrot.lane.b32.xlu0 %v10381_v60, %s11132_s27  ;;  %v4987_v58 = vpack.c.bf16 %v10432_v55, %v10429_v57  ;;  %v5004_v60 = vpack.c.bf16 %v7391_v27, %v7376_v16  ;;  %v4142_v16 = vrot.slane %v3114_v14, 1 }
 0x5c5   : > { %v4187_v34 = vpop.permute.xlu1 %4186  ;;  %v4143_v56 = vsel %vm1257_vm4, %v4140_v15, %v4142_v16 }
 0x5c6   : > { %4261 = vst.msk [vmem:[#allocation3 + $0xa8] sm:$0xff] %vm2310_vm13, %v4187_v34  ;;  %v3532_v17 = vpop.permute.xlu0 %3531  ;;  %v4427_v34 = vld [vmem:[#allocation3 + $0xb0] sm:$0xff] }
 0x5c7   : > { %3603 = vst.msk [vmem:[#allocation3 + $0xc0] sm:$0xff] %vm1644_vm7, %v3532_v17  ;;  %3942 = vrot.lane.b32.xlu1 %v3879_v2, %s11133_s28  ;;  %4337 = vrot.lane.b32.xlu0 %v4274_v30, %s11132_s27  ;;  %v5014_v30 = vpack.c.bf16 %v7795_v31, %v7783_v32 }
 0x5c9   : > { %v4191_v62 = vpop.permute.xlu1 %4190 }
 0x5ca   : > { %4263 = vst.msk [vmem:[#allocation3 + $0xb8] sm:$0xff] %vm2310_vm13, %v4191_v62  ;;  %v3536_v28 = vpop.permute.xlu0 %3535 }
 0x5cb   : > { %3605 = vst.msk [vmem:[#allocation3 + $0xd0] sm:$0xff] %vm1644_vm7, %v3536_v28  ;;  %4068 = vrot.lane.b32.xlu1 %v10335_v5, %s11118_s25  ;;  %5037 = vrot.lane.b32.xlu0 %v5004_v60, %s7050_s26  ;;  %v5008_v5 = vpack.c.bf16 %v7578_v45, %v7558_v40 }
 0x5cd   : > { %v4320_v36 = vpop.permute.xlu1 %4319 }
 0x5ce   : > { %4394 = vst.msk [vmem:[#allocation3 + $0xa8] sm:$0xff] %vm2444_vm14, %v4320_v36  ;;  %v3662_v37 = vpop.permute.xlu0 %3661 }
 0x5cf   : > { %3733 = vst.msk [vmem:[#allocation3 + $0xc0] sm:$0xff] %vm1775_vm9, %v3662_v37  ;;  %4072 = vrot.lane.b32.xlu1 %v10394_v25, %s11118_s25  ;;  %5041 = vrot.lane.b32.xlu0 %v5006_v19, %s7050_s26  ;;  %s458_s25 = sand.u32 1, %s7031_s30  }
 0x5d0   : > { %s5907_s21 = sshll.u32 %s458_s25, 4  ;;  %s5830_s20 = scalar_lea.sflag [#allocation5], %s458_s25 }
 0x5d1   : > { %v3326_v27 = vpop.permute.xlu1 %3325  ;;  %s10973_s0 = scalar_lea.vmem [#allocation4], %s5907_s21 }
 0x5d2   : > { %3396 = vst.msk [vmem:[#allocation3 + $0xc8] sm:$0xff] %vm1434_vm6, %v3326_v27  ;;  %v3666_v48 = vpop.permute.xlu0 %3665  ;;  %s5844_s18 = sshll.u32 %s10973_s0, 4  ;;  %s10986_s18 = int_to_ptr.vmem [resolvable:$true] %s5844_s18 }
 0x5d3   : > { %3735 = vst.msk [vmem:[#allocation3 + $0xd0] sm:$0xff] %vm1775_vm9, %v3666_v48  ;;  %4202 = vrot.lane.b32.xlu1 %v3746_v9, %s11143_s1  ;;  %5045 = vrot.lane.b32.xlu0 %v5008_v5, %s7050_s26  ;;  %v5005_v5 = vpack.c.bf16 %v7382_v22, %v7372_v13  ;;  %v5016_v48 = vpack.c.bf16 %v7823_v29, %v7807_v51  ;;  %s6977_s2 = scalar_lea.vmem %s10986_s18, 256 }
 0x5d4   : > { %p6978_p11 = scmp.ne.s32.totalorder %s10986_s18, %s6977_s2 }
 0x5d5   : > { %v4324_v42 = vpop.permute.xlu1 %4323  ;;  %v4426_v47 = vld [vmem:[#allocation3 + $0xa8] sm:$0xff] }
 0x5d6   : > { %4396 = vst.msk [vmem:[#allocation3 + $0xb8] sm:$0xff] %vm2444_vm14, %v4324_v42  ;;  %v3796_v8 = vpop.permute.xlu0 %3795  ;;  %v4447_v33 = vpack.c.bf16 %v4426_v47, %v4425_v21  ;;  %p6979_p12 = pnand %p6978_p11, %p7165_p5 }
 0x5d7   : > { %3867 = vst.msk [vmem:[#allocation3 + $0xc0] sm:$0xff] %vm1910_vm10, %v3796_v8  ;;  %4206 = vrot.lane.b32.xlu1 %v4143_v56, %s11143_s1  ;;  %5049 = vrot.lane.b32.xlu0 %v5010_v20, %s7050_s26 }
 0x5d8   : > { %6198 = vmatprep.mubr.msk.bf16.mxu0 %vm2545_vm15, %v4447_v33  ;;  %v5007_v33 = vpack.c.bf16 %v7449_v7, %v7432_v59  ;;  %p6980_p13 = pneg %p6979_p12 }
 0x5d9   : > { %v3330_v15 = vpop.permute.xlu1 %3329 }
 0x5da   : > { %3398 = vst.msk [vmem:[#allocation3 + $0xd8] sm:$0xff] %vm1434_vm6, %v3330_v15  ;;  %v3800_v26 = vpop.permute.xlu0 %3799 }
 0x5db   : > { %3869 = vst.msk [vmem:[#allocation3 + $0xd0] sm:$0xff] %vm1910_vm10, %v3800_v26  ;;  %v6184_v39 = vpop.f32.mrb[52].mxu0  ;;  %4335 = vrot.lane.b32.xlu1 %v3879_v2, %s11132_s27  ;;  %5053 = vrot.lane.b32.xlu0 %v5012_v49, %s7050_s26  ;;  %v5009_v26 = vpack.c.bf16 %v11148_v50, %v7549_v35 }
 0x5dc   : > { %v4698_v9 = vmul.f32 %v6184_v39, %v10304_v18  ;;  %v4574_v53 = vpop.f32.mrb[53].mxu0 }
 0x5dd   : > { %v4696_v24 = vmul.f32 %v10304_v18, %v4574_v53  ;;  %v3534_v0 = vpop.permute.xlu1 %3533  ;;  %v6185_v4 = vpop.f32.mrb[54].mxu0  ;;  %v4428_v17 = vld [vmem:[#allocation3 + $0xb8] sm:$0xff]  ;;  %v11150_v53 = vld [vmem:[#allocation9_spill] sm:$0xff] }
 0x5de   : > { %v10503_v2 = vadd.f32 %v10311_v3, %v4698_v9  ;;  %3604 = vst.msk [vmem:[#allocation3 + $0xc8] sm:$0xff] %vm1644_vm7, %v3534_v0  ;;  %v4699_v62 = vmul.f32 %v6185_v4, %v10304_v18  ;;  %v3929_v25 = vpop.permute.xlu0 %3928  ;;  %v4577_v60 = vpop.f32.mrb[55].mxu0  ;;  %v4448_v11 = vpack.c.bf16 %v4428_v17, %v4427_v34  ;;  %v11149_v9 = vld [vmem:[#allocation8_spill] sm:$0xff] }
 0x5df   : > { %v10508_v28 = vadd.f32 %v10311_v3, %v4696_v24  ;;  %4000 = vst.msk [vmem:[#allocation3 + $0xc0] sm:$0xff] %vm2044_vm11, %v3929_v25  ;;  %v4697_v36 = vmul.f32 %v10304_v18, %v4577_v60  ;;  %4339 = vrot.lane.b32.xlu1 %v4276_v43, %s11132_s27  ;;  %5057 = vrot.lane.b32.xlu0 %v5014_v30, %s7050_s26  ;;  %s6010_s27 = sshll.u32 %s7148_s17, 8  ;;  %s7051_s17 = smov [#allocation4]  }
 0x5e0   : > { %v4769_v19 = vsub.f32 0.0, %v10503_v2  ;;  %v10516_v14 = vadd.f32 %v10311_v3, %v4699_v62  ;;  %6199 = vmatmul.mubr.msk.bf16.gmra.mrb[68].mxu0 %vm2545_vm15, %v4448_v11  ;;  %v5011_v43 = vpack.c.bf16 %v11150_v53, %v11149_v9  ;;  %v11151_v11 = vld [vmem:[#allocation10_spill] sm:$0xff]  ;;  %s10991_s4 = scalar_lea.hbm %s11048_s14, %s6010_s27  ;;  %s6981_s3 = sshll.u32 %s7051_s17, 4  ;;  %s6982_s3 = int_to_ptr.vmem [resolvable:$false] %s6981_s3 }
 0x5e1   : > { %v4767_v37 = vsub.f32 0.0, %v10508_v28  ;;  %v10521_v16 = vadd.f32 %v10311_v3, %v4697_v36  ;;  %v3538_v27 = vpop.permute.xlu1 %3537  ;;  %v11152_v36 = vld [vmem:[#allocation11_spill] sm:$0xff]  ;;  %p6984_p0 = scmp.lt.s32.totalorder %s10986_s18, %s6982_s3 }
 0x5e2   : > { %v4807_v56 = vmul.f32 1.442695, %v4769_v19  ;;  %v4770_v42 = vsub.f32 0.0, %v10516_v14  ;;  %3606 = vst.msk [vmem:[#allocation3 + $0xd8] sm:$0xff] %vm1644_vm7, %v3538_v27  ;;  %v3933_v20 = vpop.permute.xlu0 %3932  ;;  %v5013_v19 = vpack.c.bf16 %v11152_v36, %v11151_v11 }
 0x5e3   : > { %v4803_v21 = vmul.f32 1.442695, %v4767_v37  ;;  %v4768_v47 = vsub.f32 0.0, %v10521_v16  ;;  %4002 = vst.msk [vmem:[#allocation3 + $0xd0] sm:$0xff] %vm2044_vm11, %v3933_v20  ;;  %5039 = vrot.lane.b32.xlu1 %v5005_v5, %s7050_s26  ;;  %5061 = vrot.lane.b32.xlu0 %v5016_v48, %s7050_s26  ;;  %v11153_v48 = vld [vmem:[#allocation12_spill] sm:$0xff] }
 0x5e4   : > { %6731 = vpow2.f32 %v4807_v56  ;;  %v4809_v13 = vmul.f32 1.442695, %v4770_v42  ;;  %v11154_v56 = vld [vmem:[#allocation13_spill] sm:$0xff] }
 0x5e5   : > { %6733 = vpow2.f32 %v4803_v21  ;;  %v4805_v22 = vmul.f32 1.442695, %v4768_v47  ;;  %v3664_v8 = vpop.permute.xlu1 %3663  ;;  %v5015_v42 = vpack.c.bf16 %v11154_v56, %v11153_v48  ;;  %v11155_v47 = vld [vmem:[#allocation14_spill] sm:$0xff] }
 0x5e6   : > { %6735 = vpow2.f32 %v4809_v13  ;;  %3734 = vst.msk [vmem:[#allocation3 + $0xc8] sm:$0xff] %vm1775_vm9, %v3664_v8  ;;  %v4059_v15 = vpop.permute.xlu0 %4058  ;;  %v11156_v13 = vld [vmem:[#allocation15_spill] sm:$0xff] }
 0x5e7   : > { %6737 = vpow2.f32 %v4805_v22  ;;  %4130 = vst.msk [vmem:[#allocation3 + $0xc0] sm:$0xff] %vm2175_vm12, %v4059_v15  ;;  %5043 = vrot.lane.b32.xlu1 %v5007_v33, %s7050_s26  ;;  %5065 = vrot.lane.b32.xlu0 %v5018_v44, %s7050_s26  ;;  %v5017_v22 = vpack.c.bf16 %v11156_v13, %v11155_v47 }
 0x5e9   : > { %v3668_v49 = vpop.permute.xlu1 %3667 }
 0x5ea   : > { %3736 = vst.msk [vmem:[#allocation3 + $0xd8] sm:$0xff] %vm1775_vm9, %v3668_v49  ;;  %v4063_v46 = vpop.permute.xlu0 %4062 }
 0x5eb   : > { %4132 = vst.msk [vmem:[#allocation3 + $0xd0] sm:$0xff] %vm2175_vm12, %v4063_v46  ;;  %5047 = vrot.lane.b32.xlu1 %v5009_v26, %s7050_s26 }
 0x5ed   : > { %v3798_v39 = vpop.permute.xlu1 %3797 }
 0x5ee   : > { %v6732_v24 = vpop.eup %6731  ;;  %3868 = vst.msk [vmem:[#allocation3 + $0xc8] sm:$0xff] %vm1910_vm10, %v3798_v39  ;;  %v4193_v0 = vpop.permute.xlu0 %4192  ;;  %v11157_v39 = vld [vmem:[#allocation16_spill] sm:$0xff] }
 0x5ef   : > { %v6734_v4 = vpop.eup %6733  ;;  %v4865_v30 = vadd.f32 1.0, %v6732_v24  ;;  %4264 = vst.msk [vmem:[#allocation3 + $0xc0] sm:$0xff] %vm2310_vm13, %v4193_v0  ;;  %5051 = vrot.lane.b32.xlu1 %v5011_v43, %s7050_s26  ;;  %v11158_v43 = vld [vmem:[#allocation17_spill] sm:$0xff] }
 0x5f0   : > { %v6736_v34 = vpop.eup %6735  ;;  %v4863_v17 = vadd.f32 1.0, %v6734_v4  ;;  %v5019_v24 = vpack.c.bf16 %v11158_v43, %v11157_v39 }
 0x5f1   : > { %v6738_v62 = vpop.eup %6737  ;;  %6739 = vrcp.f32 %v4865_v30  ;;  %v4866_v25 = vadd.f32 1.0, %v6736_v34  ;;  %v3802_v60 = vpop.permute.xlu1 %3801 }
 0x5f2   : > { %6741 = vrcp.f32 %v4863_v17  ;;  %v4864_v37 = vadd.f32 1.0, %v6738_v62  ;;  %3870 = vst.msk [vmem:[#allocation3 + $0xd8] sm:$0xff] %vm1910_vm10, %v3802_v60  ;;  %v4197_v27 = vpop.permute.xlu0 %4196 }
 0x5f3   : > { %6743 = vrcp.f32 %v4866_v25  ;;  %4266 = vst.msk [vmem:[#allocation3 + $0xd0] sm:$0xff] %vm2310_vm13, %v4197_v27  ;;  %5055 = vrot.lane.b32.xlu1 %v5013_v19, %s7050_s26 }
 0x5f4   : > { %6745 = vrcp.f32 %v4864_v37 }
 0x5f5   : > { %v3931_v5 = vpop.permute.xlu1 %3930 }
 0x5f6   : > { %4001 = vst.msk [vmem:[#allocation3 + $0xc8] sm:$0xff] %vm2044_vm11, %v3931_v5  ;;  %v4326_v20 = vpop.permute.xlu0 %4325 }
 0x5f7   : > { %4397 = vst.msk [vmem:[#allocation3 + $0xc0] sm:$0xff] %vm2444_vm14, %v4326_v20  ;;  %5059 = vrot.lane.b32.xlu1 %v5015_v42, %s7050_s26 }
 0x5f9   : > { %v3935_v21 = vpop.permute.xlu1 %3934 }
 0x5fa   : > { %4003 = vst.msk [vmem:[#allocation3 + $0xd8] sm:$0xff] %vm2044_vm11, %v3935_v21  ;;  %v3332_v8 = vpop.permute.xlu0 %3331 }
 0x5fb   : > { %v6740_v33 = vpop.eup %6739  ;;  %3399 = vst.msk [vmem:[#allocation3 + $0xe0] sm:$0xff] %vm1434_vm6, %v3332_v8  ;;  %5063 = vrot.lane.b32.xlu1 %v5017_v22, %s7050_s26 }
 0x5fc   : > { %v6742_v44 = vpop.eup %6741  ;;  %v4929_v15 = vmul.f32 %v6740_v33, %v10503_v2 }
 0x5fd   : > { %v6744_v49 = vpop.eup %6743  ;;  %v4927_v26 = vmul.f32 %v6742_v44, %v10508_v28  ;;  %v4061_v46 = vpop.permute.xlu1 %4060 }
 0x5fe   : > { %v6746_v0 = vpop.eup %6745  ;;  %v4930_v4 = vmul.f32 %v6744_v49, %v10516_v14  ;;  %4131 = vst.msk [vmem:[#allocation3 + $0xc8] sm:$0xff] %vm2175_vm12, %v4061_v46  ;;  %v4330_v30 = vpop.permute.xlu0 %4329  ;;  %v10576_v2 = vadd.f32 %v4929_v15, %v7432_v59 }
 0x5ff   : > { %v4928_v34 = vmul.f32 %v6746_v0, %v10521_v16  ;;  %4399 = vst.msk [vmem:[#allocation3 + $0xd0] sm:$0xff] %vm2444_vm14, %v4330_v30  ;;  %5067 = vrot.lane.b32.xlu1 %v5019_v24, %s7050_s26  ;;  %v10582_v17 = vadd.f32 %v4927_v26, %v7437_v1  ;;  %s6983_s26 = scalar_lea.vmem %s6982_s3, 512 }
 0x600   : > { %v10579_v28 = vadd.f32 %v4930_v4, %v7449_v7  ;;  %p6985_p1 = scmp.lt.s32.totalorder %s6983_s26, %s6977_s2 }
 0x601   : > { %v10585_v14 = vadd.f32 %v4928_v34, %v7460_v12  ;;  %v4065_v62 = vpop.permute.xlu1 %4064 }
 0x602   : > { %4133 = vst.msk [vmem:[#allocation3 + $0xd8] sm:$0xff] %vm2175_vm12, %v4065_v62  ;;  %v3336_v16 = vpop.permute.xlu0 %3335  ;;  %v4990_v25 = vpack.c.bf16 %v10579_v28, %v10576_v2  ;;  %p6986_p2 = por %p6985_p1, %p6984_p0 }
 0x603   : > { %3401 = vst.msk [vmem:[#allocation3 + $0xf0] sm:$0xff] %vm1434_vm6, %v3336_v16  ;;  %v4989_v59 = vpack.c.bf16 %v10585_v14, %v10582_v17 }
 0x604   : > { %p6987_p3 = pnand %p6986_p2, %p6980_p13 }
 0x605   : > { %v4195_v7 = vpop.permute.xlu1 %4194 }
 0x606   : > { %4265 = vst.msk [vmem:[#allocation3 + $0xc8] sm:$0xff] %vm2310_vm13, %v4195_v7  ;;  %v3540_v1 = vpop.permute.xlu0 %3539 }
 0x607   : > { %3607 = vst.msk [vmem:[#allocation3 + $0xe0] sm:$0xff] %vm1644_vm7, %v3540_v1  ;;  %v6188_v12 = vpop.f32.mrb[56].mxu0 }
 0x608   : > { %v4702_v60 = vmul.f32 %v6188_v12, %v10304_v18  ;;  %v4590_v19 = vpop.f32.mrb[57].mxu0 }
 0x609   : > { %v4700_v37 = vmul.f32 %v10304_v18, %v4590_v19  ;;  %v6189_v27 = vpop.f32.mrb[58].mxu0  ;;  %v4199_v5 = vpop.permute.xlu1 %4198 }
 0x60a   : > { %v10598_v42 = vadd.f32 %v10311_v3, %v4702_v60  ;;  %v4703_v20 = vmul.f32 %v6189_v27, %v10304_v18  ;;  %4267 = vst.msk [vmem:[#allocation3 + $0xd8] sm:$0xff] %vm2310_vm13, %v4199_v5  ;;  %v3544_v21 = vpop.permute.xlu0 %3543  ;;  %v4593_v22 = vpop.f32.mrb[59].mxu0  ;;  %v4429_v60 = vld [vmem:[#allocation3 + $0xc0] sm:$0xff] }
 0x60b   : > { %v10603_v8 = vadd.f32 %v10311_v3, %v4700_v37  ;;  %3609 = vst.msk [vmem:[#allocation3 + $0xf0] sm:$0xff] %vm1644_vm7, %v3544_v21  ;;  %v4701_v33 = vmul.f32 %v10304_v18, %v4593_v22 }
 0x60c   : > { %v4773_v44 = vsub.f32 0.0, %v10598_v42  ;;  %v10609_v15 = vadd.f32 %v10311_v3, %v4703_v20  ;;  %v10627_v20 = vld [vmem:[%s11044_s10] sm:$0x3] }
 0x60d   : > { %v4771_v49 = vsub.f32 0.0, %v10603_v8  ;;  %v10613_v26 = vadd.f32 %v10311_v3, %v4701_v33  ;;  %v4328_v46 = vpop.permute.xlu1 %4327  ;;  %6321 = vmatprep.subr.msk.bf16.mxu1 %vm2594_vm8, %v10627_v20 }
 0x60e   : > { %v4815_v24 = vmul.f32 1.442695, %v4773_v44  ;;  %v4774_v0 = vsub.f32 0.0, %v10609_v15  ;;  %4398 = vst.msk [vmem:[#allocation3 + $0xc8] sm:$0xff] %vm2444_vm14, %v4328_v46  ;;  %v3670_v4 = vpop.permute.xlu0 %3669 }
 0x60f   : > { %v4811_v30 = vmul.f32 1.442695, %v4771_v49  ;;  %v4772_v34 = vsub.f32 0.0, %v10613_v26  ;;  %3737 = vst.msk [vmem:[#allocation3 + $0xe0] sm:$0xff] %vm1775_vm9, %v3670_v4 }
 0x610   : > { %6747 = vpow2.f32 %v4815_v24  ;;  %v4817_v62 = vmul.f32 1.442695, %v4774_v0 }
 0x611   : > { %6749 = vpow2.f32 %v4811_v30  ;;  %v4813_v16 = vmul.f32 1.442695, %v4772_v34  ;;  %v3334_v7 = vpop.permute.xlu1 %3333  ;;  %v4431_v30 = vld [vmem:[#allocation3 + $0xd0] sm:$0xff] }
 0x612   : > { %6751 = vpow2.f32 %v4817_v62  ;;  %3400 = vst.msk [vmem:[#allocation3 + $0xe8] sm:$0xff] %vm1434_vm6, %v3334_v7  ;;  %v3674_v1 = vpop.permute.xlu0 %3673 }
 0x613   : > { %6753 = vpow2.f32 %v4813_v16  ;;  %3739 = vst.msk [vmem:[#allocation3 + $0xf0] sm:$0xff] %vm1775_vm9, %v3674_v1 }
 0x615   : > { %v4332_v12 = vpop.permute.xlu1 %4331  ;;  %v4430_v19 = vld [vmem:[#allocation3 + $0xc8] sm:$0xff] }
 0x616   : > { %4400 = vst.msk [vmem:[#allocation3 + $0xd8] sm:$0xff] %vm2444_vm14, %v4332_v12  ;;  %v3804_v37 = vpop.permute.xlu0 %3803  ;;  %v4449_v27 = vpack.c.bf16 %v4430_v19, %v4429_v60 }
 0x617   : > { %3871 = vst.msk [vmem:[#allocation3 + $0xe0] sm:$0xff] %vm1910_vm10, %v3804_v37 }
 0x618   : > { %6202 = vmatprep.mubr.msk.bf16.mxu0 %vm2545_vm15, %v4449_v27 }
 0x619   : > { %v3338_v5 = vpop.permute.xlu1 %3337 }
 0x61a   : > { %v6748_v21 = vpop.eup %6747  ;;  %3402 = vst.msk [vmem:[#allocation3 + $0xf8] sm:$0xff] %vm1434_vm6, %v3338_v5  ;;  %v3808_v22 = vpop.permute.xlu0 %3807 }
 0x61b   : > { %v6750_v33 = vpop.eup %6749  ;;  %v4869_v44 = vadd.f32 1.0, %v6748_v21  ;;  %3873 = vst.msk [vmem:[#allocation3 + $0xf0] sm:$0xff] %vm1910_vm10, %v3808_v22 }
 0x61c   : > { %v6752_v49 = vpop.eup %6751  ;;  %v4867_v46 = vadd.f32 1.0, %v6750_v33 }
 0x61d   : > { %v6754_v24 = vpop.eup %6753  ;;  %6755 = vrcp.f32 %v4869_v44  ;;  %v4870_v0 = vadd.f32 1.0, %v6752_v49  ;;  %v3542_v4 = vpop.permute.xlu1 %3541  ;;  %v4432_v34 = vld [vmem:[#allocation3 + $0xd8] sm:$0xff] }
 0x61e   : > { %6757 = vrcp.f32 %v4867_v46  ;;  %v4868_v62 = vadd.f32 1.0, %v6754_v24  ;;  %3608 = vst.msk [vmem:[#allocation3 + $0xe8] sm:$0xff] %vm1644_vm7, %v3542_v4  ;;  %v3937_v16 = vpop.permute.xlu0 %3936  ;;  %v4450_v7 = vpack.c.bf16 %v4432_v34, %v4431_v30 }
 0x61f   : > { %6759 = vrcp.f32 %v4870_v0  ;;  %4004 = vst.msk [vmem:[#allocation3 + $0xe0] sm:$0xff] %vm2044_vm11, %v3937_v16 }
 0x620   : > { %6761 = vrcp.f32 %v4868_v62  ;;  %6203 = vmatmul.mubr.msk.bf16.gmra.mrb[72].mxu0 %vm2545_vm15, %v4450_v7 }
 0x621   : > { %v3546_v1 = vpop.permute.xlu1 %3545 }
 0x622   : > { %3610 = vst.msk [vmem:[#allocation3 + $0xf8] sm:$0xff] %vm1644_vm7, %v3546_v1  ;;  %v3941_v12 = vpop.permute.xlu0 %3940 }
 0x623   : > { %4006 = vst.msk [vmem:[#allocation3 + $0xf0] sm:$0xff] %vm2044_vm11, %v3941_v12 }
 0x625   : > { %v3672_v60 = vpop.permute.xlu1 %3671 }
 0x626   : > { %3738 = vst.msk [vmem:[#allocation3 + $0xe8] sm:$0xff] %vm1775_vm9, %v3672_v60  ;;  %v4067_v19 = vpop.permute.xlu0 %4066 }
 0x627   : > { %v6756_v37 = vpop.eup %6755  ;;  %4134 = vst.msk [vmem:[#allocation3 + $0xe0] sm:$0xff] %vm2175_vm12, %v4067_v19 }
 0x628   : > { %v6758_v27 = vpop.eup %6757  ;;  %v4933_v5 = vmul.f32 %v6756_v37, %v10598_v42 }
 0x629   : > { %v6760_v21 = vpop.eup %6759  ;;  %v4931_v22 = vmul.f32 %v6758_v27, %v10603_v8  ;;  %v3676_v33 = vpop.permute.xlu1 %3675 }
 0x62a   : > { %v6762_v44 = vpop.eup %6761  ;;  %v4934_v49 = vmul.f32 %v6760_v21, %v10609_v15  ;;  %3740 = vst.msk [vmem:[#allocation3 + $0xf8] sm:$0xff] %vm1775_vm9, %v3676_v33  ;;  %v4071_v46 = vpop.permute.xlu0 %4070  ;;  %v10647_v0 = vadd.f32 %v4933_v5, %v7549_v35 }
 0x62b   : > { %v4932_v24 = vmul.f32 %v6762_v44, %v10613_v26  ;;  %4136 = vst.msk [vmem:[#allocation3 + $0xf0] sm:$0xff] %vm2175_vm12, %v4071_v46  ;;  %v10653_v42 = vadd.f32 %v4931_v22, %v7558_v40 }
 0x62c   : > { %v10650_v4 = vadd.f32 %v4934_v49, %v11148_v50 }
 0x62d   : > { %v10656_v8 = vadd.f32 %v4932_v24, %v7578_v45  ;;  %v3806_v15 = vpop.permute.xlu1 %3805 }
 0x62e   : > { %3872 = vst.msk [vmem:[#allocation3 + $0xe8] sm:$0xff] %vm1910_vm10, %v3806_v15  ;;  %v4201_v30 = vpop.permute.xlu0 %4200  ;;  %v4992_v26 = vpack.c.bf16 %v10650_v4, %v10647_v0 }
 0x62f   : > { %4268 = vst.msk [vmem:[#allocation3 + $0xe0] sm:$0xff] %vm2310_vm13, %v4201_v30  ;;  %v4991_v35 = vpack.c.bf16 %v10656_v8, %v10653_v42 }
 0x631   : > { %v3810_v50 = vpop.permute.xlu1 %3809 }
 0x632   : > { %3874 = vst.msk [vmem:[#allocation3 + $0xf8] sm:$0xff] %vm1910_vm10, %v3810_v50  ;;  %v4205_v40 = vpop.permute.xlu0 %4204 }
 0x633   : > { %4270 = vst.msk [vmem:[#allocation3 + $0xf0] sm:$0xff] %vm2310_vm13, %v4205_v40  ;;  %v6192_v45 = vpop.f32.mrb[60].mxu0 }
 0x634   : > { %v4706_v34 = vmul.f32 %v6192_v45, %v10304_v18  ;;  %v4606_v62 = vpop.f32.mrb[61].mxu0 }
 0x635   : > { %v4704_v16 = vmul.f32 %v10304_v18, %v4606_v62  ;;  %v6193_v7 = vpop.f32.mrb[62].mxu0  ;;  %v3939_v1 = vpop.permute.xlu1 %3938 }
 0x636   : > { %v4745_v12 = vadd.f32 %v10311_v3, %v4706_v34  ;;  %v4707_v60 = vmul.f32 %v6193_v7, %v10304_v18  ;;  %4005 = vst.msk [vmem:[#allocation3 + $0xe8] sm:$0xff] %vm2044_vm11, %v3939_v1  ;;  %v4334_v19 = vpop.permute.xlu0 %4333  ;;  %v4609_v37 = vpop.f32.mrb[63].mxu0 }
 0x637   : > { %v4743_v27 = vadd.f32 %v10311_v3, %v4704_v16  ;;  %4401 = vst.msk [vmem:[#allocation3 + $0xe0] sm:$0xff] %vm2444_vm14, %v4334_v19  ;;  %v4705_v5 = vmul.f32 %v10304_v18, %v4609_v37 }
 0x638   : > { %v4777_v21 = vsub.f32 0.0, %v4745_v12  ;;  %v4746_v22 = vadd.f32 %v10311_v3, %v4707_v60 }
 0x639   : > { %v4775_v33 = vsub.f32 0.0, %v4743_v27  ;;  %v4744_v44 = vadd.f32 %v10311_v3, %v4705_v5  ;;  %v3943_v49 = vpop.permute.xlu1 %3942 }
 0x63a   : > { %v4823_v46 = vmul.f32 1.442695, %v4777_v21  ;;  %v4778_v24 = vsub.f32 0.0, %v4746_v22  ;;  %4007 = vst.msk [vmem:[#allocation3 + $0xf8] sm:$0xff] %vm2044_vm11, %v3943_v49  ;;  %v4338_v15 = vpop.permute.xlu0 %4337 }
 0x63b   : > { %v4819_v30 = vmul.f32 1.442695, %v4775_v33  ;;  %v4776_v50 = vsub.f32 0.0, %v4744_v44  ;;  %4403 = vst.msk [vmem:[#allocation3 + $0xf0] sm:$0xff] %vm2444_vm14, %v4338_v15 }
 0x63c   : > { %6763 = vpow2.f32 %v4823_v46  ;;  %v4825_v40 = vmul.f32 1.442695, %v4778_v24 }
 0x63d   : > { %6765 = vpow2.f32 %v4819_v30  ;;  %v4821_v18 = vmul.f32 1.442695, %v4776_v50  ;;  %v4069_v45 = vpop.permute.xlu1 %4068  ;;  %v5330_v50 = vsel %vm2594_vm8, %v10627_v20, 0 }
 0x63e   : > { %6767 = vpow2.f32 %v4825_v40  ;;  %4135 = vst.msk [vmem:[#allocation3 + $0xe8] sm:$0xff] %vm2175_vm12, %v4069_v45  ;;  %v5038_v34 = vpop.permute.xlu0 %5037 }
 0x63f   : > { %6769 = vpow2.f32 %v4821_v18  ;;  %6212 = vmatprep.mubr.msk.bf16.mxu1 %vm467_vm1, %v5038_v34  ;;  %v4433_v34 = vld [vmem:[#allocation3 + $0xe0] sm:$0xff] }
 0x641   : > { %v4073_v3 = vpop.permute.xlu1 %4072 }
 0x642   : > { %4137 = vst.msk [vmem:[#allocation3 + $0xf8] sm:$0xff] %vm2175_vm12, %v4073_v3 }
 0x645   : > { %v4203_v62 = vpop.permute.xlu1 %4202 }
 0x646   : > { %v6764_v16 = vpop.eup %6763  ;;  %4269 = vst.msk [vmem:[#allocation3 + $0xe8] sm:$0xff] %vm2310_vm13, %v4203_v62 }
 0x647   : > { %v6766_v7 = vpop.eup %6765  ;;  %v4873_v1 = vadd.f32 1.0, %v6764_v16 }
 0x648   : > { %v6768_v60 = vpop.eup %6767  ;;  %v4871_v19 = vadd.f32 1.0, %v6766_v7  ;;  %v5042_v7 = vpop.permute.xlu0 %5041 }
 0x649   : > { %v6770_v37 = vpop.eup %6769  ;;  %6771 = vrcp.f32 %v4873_v1  ;;  %v4874_v5 = vadd.f32 1.0, %v6768_v60  ;;  %v4207_v21 = vpop.permute.xlu1 %4206 }
 0x64a   : > { %6773 = vrcp.f32 %v4871_v19  ;;  %v4872_v33 = vadd.f32 1.0, %v6770_v37  ;;  %4271 = vst.msk [vmem:[#allocation3 + $0xf8] sm:$0xff] %vm2310_vm13, %v4207_v21  ;;  %v4435_v19 = vld [vmem:[#allocation3 + $0xf0] sm:$0xff] }
 0x64b   : > { %6775 = vrcp.f32 %v4874_v5 }
 0x64c   : > { %6777 = vrcp.f32 %v4872_v33  ;;  %v5046_v21 = vpop.permute.xlu0 %5045 }
 0x64d   : > { %v4336_v49 = vpop.permute.xlu1 %4335 }
 0x64e   : > { %4402 = vst.msk [vmem:[#allocation3 + $0xe8] sm:$0xff] %vm2444_vm14, %v4336_v49 }
 0x650   : > { %v5050_v33 = vpop.permute.xlu0 %5049 }
 0x651   : > { %v4340_v46 = vpop.permute.xlu1 %4339 }
 0x652   : > { %4404 = vst.msk [vmem:[#allocation3 + $0xf8] sm:$0xff] %vm2444_vm14, %v4340_v46 }
 0x653   : > { %v6772_v24 = vpop.eup %6771 }
 0x654   : > { %v6774_v15 = vpop.eup %6773  ;;  %v4937_v30 = vmul.f32 %v6772_v24, %v4745_v12  ;;  %v5054_v49 = vpop.permute.xlu0 %5053  ;;  %v10716_v24 = vld [vmem:[%s11042_s8] ss:$0 sm:$0xff] }
 0x655   : > { %v6776_v40 = vpop.eup %6775  ;;  %v4935_v18 = vmul.f32 %v6774_v15, %v4743_v27  ;;  %v5040_v45 = vpop.permute.xlu1 %5039  ;;  %v4434_v3 = vld [vmem:[#allocation3 + $0xe8] sm:$0xff] }
 0x656   : > { %v6778_v62 = vpop.eup %6777  ;;  %v4938_v16 = vmul.f32 %v6776_v40, %v4746_v22  ;;  %6213 = vmatmul.mubr.msk.bf16.vlgmr.msra.gmra.mrb[16].mxu1 %vm467_vm1, %v5040_v45  ;;  %v4451_v1 = vpack.c.bf16 %v4434_v3, %v4433_v34  ;;  %v10690_v12 = vadd.f32 %v4937_v30, %v11149_v9  ;;  %v10723_v34 = vld [vmem:[%s11043_s9] ss:$0 sm:$0xff] }
 0x657   : > { %v4936_v60 = vmul.f32 %v6778_v62, %v4744_v44  ;;  %6216 = vmatprep.mubr.msk.bf16.mxu1 %vm467_vm1, %v5042_v7  ;;  %6245 = vmatpush3.bf16.msra.mxu1 %v5330_v50  ;;  %v10697_v27 = vadd.f32 %v4935_v18, %v7656_v54 }
 0x658   : > { %v10693_v20 = vadd.f32 %v4938_v16, %v11150_v53  ;;  %6206 = vmatprep.mubr.msk.bf16.mxu0 %vm2545_vm15, %v4451_v1  ;;  %v5058_v45 = vpop.permute.xlu0 %5057 }
 0x659   : > { %v10700_v22 = vadd.f32 %v4936_v60, %v7670_v52  ;;  %v4436_v37 = vld [vmem:[#allocation3 + $0xf8] sm:$0xff]  ;;  %v5044_v53 = vpop.permute.xlu1 %5043 }
 0x65a   : > { %v4452_v44 = vpack.c.bf16 %v4436_v37, %v4435_v19  ;;  %v4994_v5 = vpack.c.bf16 %v10693_v20, %v10690_v12 }
 0x65b   : > { %v4993_v9 = vpack.c.bf16 %v10700_v22, %v10697_v27 }
 0x65c   : > { %6207 = vmatmul.mubr.msk.bf16.gmra.mrb[76].mxu0 %vm2545_vm15, %v4452_v44 }
 0x65d   : > { %v5048_v54 = vpop.permute.xlu1 %5047 }
 0x65e   : > { %6217 = vmatmul.mubr.msk.bf16.gmra.mrb[20].mxu1 %vm467_vm1, %v5044_v53 }
 0x65f   : > { %6220 = vmatprep.mubr.msk.bf16.mxu1 %vm467_vm1, %v5046_v21 }
 0x661   : > { %v5052_v52 = vpop.permute.xlu1 %5051 }
 0x665   : > { %v5056_v50 = vpop.permute.xlu1 %5055 }
 0x666   : > { %6221 = vmatmul.mubr.msk.bf16.gmra.mrb[24].mxu1 %vm467_vm1, %v5048_v54 }
 0x667   : > { %6224 = vmatprep.mubr.msk.bf16.mxu1 %vm467_vm1, %v5050_v33 }
 0x66e   : > { %6225 = vmatmul.mubr.msk.bf16.gmra.mrb[28].mxu1 %vm467_vm1, %v5052_v52 }
 0x66f   : > { %6228 = vmatprep.mubr.msk.bf16.mxu1 %vm467_vm1, %v5054_v49  ;;  %v5060_v49 = vpop.permute.xlu1 %5059 }
 0x673   : > { %v6196_v46 = vpop.f32.mrb[64].mxu0 }
 0x674   : > { %v4710_v15 = vmul.f32 %v10716_v24, %v6196_v46  ;;  %v4622_v30 = vpop.f32.mrb[65].mxu0 }
 0x675   : > { %v4708_v40 = vmul.f32 %v10716_v24, %v4622_v30  ;;  %v6197_v18 = vpop.f32.mrb[66].mxu0  ;;  %v5064_v30 = vpop.permute.xlu1 %5063 }
 0x676   : > { %v4749_v3 = vadd.f32 %v10723_v34, %v4710_v15  ;;  %v4711_v62 = vmul.f32 %v10716_v24, %v6197_v18  ;;  %v4625_v16 = vpop.f32.mrb[67].mxu0  ;;  %6229 = vmatmul.mubr.msk.bf16.gmra.mrb[32].mxu1 %vm467_vm1, %v5056_v50  ;;  %v5062_v15 = vpop.permute.xlu0 %5061 }
 0x677   : > { %v4747_v7 = vadd.f32 %v10723_v34, %v4708_v40  ;;  %v4709_v1 = vmul.f32 %v10716_v24, %v4625_v16  ;;  %6232 = vmatprep.mubr.msk.bf16.mxu1 %vm467_vm1, %v5058_v45 }
 0x678   : > { %v4781_v60 = vsub.f32 0.0, %v4749_v3  ;;  %v4750_v19 = vadd.f32 %v10723_v34, %v4711_v62 }
 0x679   : > { %v4779_v37 = vsub.f32 0.0, %v4747_v7  ;;  %v4748_v44 = vadd.f32 %v10723_v34, %v4709_v1 }
 0x67a   : > { %v4831_v53 = vmul.f32 1.442695, %v4781_v60  ;;  %v4782_v21 = vsub.f32 0.0, %v4750_v19  ;;  %v5066_v40 = vpop.permute.xlu0 %5065 }
 0x67b   : > { %v4827_v54 = vmul.f32 1.442695, %v4779_v37  ;;  %v4780_v33 = vsub.f32 0.0, %v4748_v44 }
 0x67c   : > { %6779 = vpow2.f32 %v4831_v53  ;;  %v4833_v52 = vmul.f32 1.442695, %v4782_v21  ;;  %v5068_v53 = vpop.permute.xlu1 %5067 }
 0x67d   : > { %6781 = vpow2.f32 %v4827_v54  ;;  %v4829_v46 = vmul.f32 1.442695, %v4780_v33 }
 0x67e   : > { %6783 = vpow2.f32 %v4833_v52  ;;  %6233 = vmatmul.mubr.msk.bf16.gmra.mrb[36].mxu1 %vm467_vm1, %v5060_v49 }
 0x67f   : > { %6785 = vpow2.f32 %v4829_v46  ;;  %6236 = vmatprep.mubr.msk.bf16.mxu1 %vm467_vm1, %v5062_v15 }
 0x686   : > { %v6780_v50 = vpop.eup %6779  ;;  %6237 = vmatmul.mubr.msk.bf16.gmra.mrb[40].mxu1 %vm467_vm1, %v5064_v30 }
 0x687   : > { %v6782_v18 = vpop.eup %6781  ;;  %v4877_v45 = vadd.f32 1.0, %v6780_v50  ;;  %6240 = vmatprep.mubr.msk.bf16.mxu1 %vm467_vm1, %v5066_v40 }
 0x688   : > { %v6784_v62 = vpop.eup %6783  ;;  %v4875_v16 = vadd.f32 1.0, %v6782_v18 }
 0x689   : > { %v6786_v1 = vpop.eup %6785  ;;  %6787 = vrcp.f32 %v4877_v45  ;;  %v4878_v60 = vadd.f32 1.0, %v6784_v62 }
 0x68a   : > { %6789 = vrcp.f32 %v4875_v16  ;;  %v4876_v37 = vadd.f32 1.0, %v6786_v1 }
 0x68b   : > { %6791 = vrcp.f32 %v4878_v60 }
 0x68c   : > { %6793 = vrcp.f32 %v4876_v37 }
 0x68e   : > { %6241 = vmatmul.mubr.msk.bf16.gmra.mrb[44].mxu1 %vm467_vm1, %v5068_v53 }
 0x68f   : > { %6246 = vmatprep.mubr.msk.bf16.mxu1 %vm467_vm1, %v4987_v58 }
 0x693   : > { %v6788_v21 = vpop.eup %6787 }
 0x694   : > { %v6790_v54 = vpop.eup %6789  ;;  %v4941_v33 = vmul.f32 %v6788_v21, %v4749_v3 }
 0x695   : > { %v6792_v52 = vpop.eup %6791  ;;  %v4939_v49 = vmul.f32 %v6790_v54, %v4747_v7 }
 0x696   : > { %v6794_v46 = vpop.eup %6793  ;;  %v4942_v15 = vmul.f32 %v6792_v52, %v4750_v19  ;;  %6247 = vmatmul.mubr.msk.bf16.vlgmr.msra.gmra.mrb[16].mxu1 %vm467_vm1, %v4988_v6  ;;  %v4973_v57 = vadd.f32 %v4941_v33, %v11151_v11 }
 0x697   : > { %v4940_v30 = vmul.f32 %v6794_v46, %v4748_v44  ;;  %6250 = vmatprep.mubr.msk.bf16.mxu1 %vm467_vm1, %v4989_v59  ;;  %v4971_v58 = vadd.f32 %v4939_v49, %v7691_v23 }
 0x698   : > { %v4974_v55 = vadd.f32 %v4942_v15, %v11152_v36 }
 0x699   : > { %v4972_v3 = vadd.f32 %v4940_v30, %v7710_v63 }
 0x69a   : > { %v4996_v7 = vpack.c.bf16 %v4974_v55, %v4973_v57 }
 0x69b   : > { %v4995_v19 = vpack.c.bf16 %v4972_v3, %v4971_v58 }
 0x69e   : > { %6251 = vmatmul.mubr.msk.bf16.gmra.mrb[20].mxu1 %vm467_vm1, %v4990_v25 }
 0x69f   : > { %6254 = vmatprep.mubr.msk.bf16.mxu1 %vm467_vm1, %v4991_v35 }
 0x6a6   : > { %6255 = vmatmul.mubr.msk.bf16.gmra.mrb[24].mxu1 %vm467_vm1, %v4992_v26 }
 0x6a7   : > { %6258 = vmatprep.mubr.msk.bf16.mxu1 %vm467_vm1, %v4993_v9 }
 0x6ae   : > { %6259 = vmatmul.mubr.msk.bf16.gmra.mrb[28].mxu1 %vm467_vm1, %v4994_v5 }
 0x6af   : > { %6262 = vmatprep.mubr.msk.bf16.mxu1 %vm467_vm1, %v4995_v19 }
 0x6b3   : > { %v6200_v23 = vpop.f32.mrb[68].mxu0 }
 0x6b4   : > { %v4714_v63 = vmul.f32 %v10716_v24, %v6200_v23  ;;  %v4638_v10 = vpop.f32.mrb[69].mxu0 }
 0x6b5   : > { %v4712_v38 = vmul.f32 %v10716_v24, %v4638_v10  ;;  %v6201_v6 = vpop.f32.mrb[70].mxu0 }
 0x6b6   : > { %v4753_v11 = vadd.f32 %v10723_v34, %v4714_v63  ;;  %v4715_v36 = vmul.f32 %v10716_v24, %v6201_v6  ;;  %v4641_v2 = vpop.f32.mrb[71].mxu0  ;;  %6263 = vmatmul.mubr.msk.bf16.gmra.mrb[32].mxu1 %vm467_vm1, %v4996_v7 }
 0x6b7   : > { %v4751_v28 = vadd.f32 %v10723_v34, %v4712_v38  ;;  %v4713_v17 = vmul.f32 %v10716_v24, %v4641_v2 }
 0x6b8   : > { %v4785_v14 = vsub.f32 0.0, %v4753_v11  ;;  %v4754_v25 = vadd.f32 %v10723_v34, %v4715_v36 }
 0x6b9   : > { %v4783_v59 = vsub.f32 0.0, %v4751_v28  ;;  %v4752_v0 = vadd.f32 %v10723_v34, %v4713_v17 }
 0x6ba   : > { %v4839_v4 = vmul.f32 1.442695, %v4785_v14  ;;  %v4786_v42 = vsub.f32 0.0, %v4754_v25 }
 0x6bb   : > { %v4835_v8 = vmul.f32 1.442695, %v4783_v59  ;;  %v4784_v26 = vsub.f32 0.0, %v4752_v0 }
 0x6bc   : > { %6795 = vpow2.f32 %v4839_v4  ;;  %v4841_v35 = vmul.f32 1.442695, %v4786_v42 }
 0x6bd   : > { %6797 = vpow2.f32 %v4835_v8  ;;  %v4837_v12 = vmul.f32 1.442695, %v4784_v26 }
 0x6be   : > { %6799 = vpow2.f32 %v4841_v35 }
 0x6bf   : > { %6801 = vpow2.f32 %v4837_v12 }
 0x6c6   : > { %v6796_v20 = vpop.eup %6795 }
 0x6c7   : > { %v6798_v27 = vpop.eup %6797  ;;  %v4881_v22 = vadd.f32 1.0, %v6796_v20 }
 0x6c8   : > { %v6800_v5 = vpop.eup %6799  ;;  %v4879_v9 = vadd.f32 1.0, %v6798_v27 }
 0x6c9   : > { %v6802_v44 = vpop.eup %6801  ;;  %6803 = vrcp.f32 %v4881_v22  ;;  %v4882_v50 = vadd.f32 1.0, %v6800_v5 }
 0x6ca   : > { %6805 = vrcp.f32 %v4879_v9  ;;  %v4880_v40 = vadd.f32 1.0, %v6802_v44 }
 0x6cb   : > { %6807 = vrcp.f32 %v4882_v50 }
 0x6cc   : > { %6809 = vrcp.f32 %v4880_v40 }
 0x6d3   : > { %v6804_v18 = vpop.eup %6803 }
 0x6d4   : > { %v6806_v45 = vpop.eup %6805  ;;  %v4945_v62 = vmul.f32 %v6804_v18, %v4753_v11 }
 0x6d5   : > { %v6808_v16 = vpop.eup %6807  ;;  %v4943_v1 = vmul.f32 %v6806_v45, %v4751_v28 }
 0x6d6   : > { %v6810_v60 = vpop.eup %6809  ;;  %v4946_v37 = vmul.f32 %v6808_v16, %v4754_v25  ;;  %v4977_v21 = vadd.f32 %v4945_v62, %v11153_v48 }
 0x6d7   : > { %v4944_v53 = vmul.f32 %v6810_v60, %v4752_v0  ;;  %v4975_v33 = vadd.f32 %v4943_v1, %v7783_v32 }
 0x6d8   : > { %v4978_v54 = vadd.f32 %v4946_v37, %v11154_v56 }
 0x6d9   : > { %v4976_v52 = vadd.f32 %v4944_v53, %v7795_v31 }
 0x6da   : > { %v4998_v49 = vpack.c.bf16 %v4978_v54, %v4977_v21 }
 0x6db   : > { %v4997_v46 = vpack.c.bf16 %v4976_v52, %v4975_v33 }
 0x6dd   : > { %6266 = vmatprep.mubr.msk.bf16.mxu1 %vm467_vm1, %v4997_v46 }
 0x6de   : > { %6267 = vmatmul.mubr.msk.bf16.gmra.mrb[36].mxu1 %vm467_vm1, %v4998_v49 }
 0x6f3   : > { %v6204_v15 = vpop.f32.mrb[72].mxu0 }
 0x6f4   : > { %v4718_v30 = vmul.f32 %v10716_v24, %v6204_v15  ;;  %v4654_v57 = vpop.f32.mrb[73].mxu0 }
 0x6f5   : > { %v4716_v55 = vmul.f32 %v10716_v24, %v4654_v57  ;;  %v6205_v58 = vpop.f32.mrb[74].mxu0 }
 0x6f6   : > { %v4757_v48 = vadd.f32 %v10723_v34, %v4718_v30  ;;  %v4719_v56 = vmul.f32 %v10716_v24, %v6205_v58  ;;  %v4657_v32 = vpop.f32.mrb[75].mxu0 }
 0x6f7   : > { %v4755_v31 = vadd.f32 %v10723_v34, %v4716_v55  ;;  %v4717_v3 = vmul.f32 %v10716_v24, %v4657_v32 }
 0x6f8   : > { %v4789_v7 = vsub.f32 0.0, %v4757_v48  ;;  %v4758_v19 = vadd.f32 %v10723_v34, %v4719_v56 }
 0x6f9   : > { %v4787_v23 = vsub.f32 0.0, %v4755_v31  ;;  %v4756_v63 = vadd.f32 %v10723_v34, %v4717_v3 }
 0x6fa   : > { %v4847_v10 = vmul.f32 1.442695, %v4789_v7  ;;  %v4790_v38 = vsub.f32 0.0, %v4758_v19 }
 0x6fb   : > { %v4843_v6 = vmul.f32 1.442695, %v4787_v23  ;;  %v4788_v11 = vsub.f32 0.0, %v4756_v63 }
 0x6fc   : > { %6811 = vpow2.f32 %v4847_v10  ;;  %v4849_v36 = vmul.f32 1.442695, %v4790_v38 }
 0x6fd   : > { %6813 = vpow2.f32 %v4843_v6  ;;  %v4845_v2 = vmul.f32 1.442695, %v4788_v11 }
 0x6fe   : > { %6815 = vpow2.f32 %v4849_v36 }
 0x6ff   : > { %6817 = vpow2.f32 %v4845_v2 }
 0x706   : > { %v6812_v28 = vpop.eup %6811 }
 0x707   : > { %v6814_v17 = vpop.eup %6813  ;;  %v4885_v14 = vadd.f32 1.0, %v6812_v28 }
 0x708   : > { %v6816_v25 = vpop.eup %6815  ;;  %v4883_v59 = vadd.f32 1.0, %v6814_v17 }
 0x709   : > { %v6818_v0 = vpop.eup %6817  ;;  %6819 = vrcp.f32 %v4885_v14  ;;  %v4886_v4 = vadd.f32 1.0, %v6816_v25 }
 0x70a   : > { %6821 = vrcp.f32 %v4883_v59  ;;  %v4884_v42 = vadd.f32 1.0, %v6818_v0  ;;  %v10821_v59 = vld [vmem:[%s11046_s12] ss:$0 sm:$0xff] }
 0x70b   : > { %6823 = vrcp.f32 %v4886_v4 }
 0x70c   : > { %6825 = vrcp.f32 %v4884_v42 }
 0x713   : > { %v6820_v8 = vpop.eup %6819 }
 0x714   : > { %v6822_v26 = vpop.eup %6821  ;;  %v4949_v35 = vmul.f32 %v6820_v8, %v4757_v48 }
 0x715   : > { %v6824_v12 = vpop.eup %6823  ;;  %v4947_v20 = vmul.f32 %v6822_v26, %v4755_v31 }
 0x716   : > { %v6826_v27 = vpop.eup %6825  ;;  %v4950_v22 = vmul.f32 %v6824_v12, %v4758_v19  ;;  %v4981_v9 = vadd.f32 %v4949_v35, %v11155_v47 }
 0x717   : > { %v4948_v5 = vmul.f32 %v6826_v27, %v4756_v63  ;;  %v4979_v50 = vadd.f32 %v4947_v20, %v7807_v51 }
 0x718   : > { %v4982_v44 = vadd.f32 %v4950_v22, %v11156_v13 }
 0x719   : > { %v4980_v40 = vadd.f32 %v4948_v5, %v7823_v29 }
 0x71a   : > { %v5000_v18 = vpack.c.bf16 %v4982_v44, %v4981_v9 }
 0x71b   : > { %v4999_v45 = vpack.c.bf16 %v4980_v40, %v4979_v50 }
 0x71d   : > { %6270 = vmatprep.mubr.msk.bf16.mxu1 %vm467_vm1, %v4999_v45 }
 0x71e   : > { %6271 = vmatmul.mubr.msk.bf16.gmra.mrb[40].mxu1 %vm467_vm1, %v5000_v18 }
 0x72f   : > { %v6208_v62 = vpop.f32.mrb[76].mxu0 }
 0x730   : > { %v4722_v16 = vmul.f32 %v10716_v24, %v6208_v62  ;;  %v4670_v1 = vpop.f32.mrb[77].mxu0 }
 0x731   : > { %v4720_v60 = vmul.f32 %v10716_v24, %v4670_v1  ;;  %v6209_v37 = vpop.f32.mrb[78].mxu0 }
 0x732   : > { %v4761_v47 = vadd.f32 %v10723_v34, %v4722_v16  ;;  %v4723_v13 = vmul.f32 %v10716_v24, %v6209_v37  ;;  %v4673_v51 = vpop.f32.mrb[79].mxu0 }
 0x733   : > { %v4759_v29 = vadd.f32 %v10723_v34, %v4720_v60  ;;  %v4721_v53 = vmul.f32 %v10716_v24, %v4673_v51 }
 0x734   : > { %v4793_v21 = vsub.f32 0.0, %v4761_v47  ;;  %v4762_v54 = vadd.f32 %v10723_v34, %v4723_v13 }
 0x735   : > { %v4791_v33 = vsub.f32 0.0, %v4759_v29  ;;  %v4760_v52 = vadd.f32 %v10723_v34, %v4721_v53 }
 0x736   : > { %v4855_v49 = vmul.f32 1.442695, %v4793_v21  ;;  %v4794_v46 = vsub.f32 0.0, %v4762_v54 }
 0x737   : > { %v4851_v15 = vmul.f32 1.442695, %v4791_v33  ;;  %v4792_v30 = vsub.f32 0.0, %v4760_v52 }
 0x738   : > { %6827 = vpow2.f32 %v4855_v49  ;;  %v4857_v57 = vmul.f32 1.442695, %v4794_v46 }
 0x739   : > { %6829 = vpow2.f32 %v4851_v15  ;;  %v4853_v55 = vmul.f32 1.442695, %v4792_v30 }
 0x73a   : > { %6831 = vpow2.f32 %v4857_v57 }
 0x73b   : > { %6833 = vpow2.f32 %v4853_v55 }
 0x742   : > { %v6828_v58 = vpop.eup %6827 }
 0x743   : > { %v6830_v48 = vpop.eup %6829  ;;  %v4889_v56 = vadd.f32 1.0, %v6828_v58 }
 0x744   : > { %v6832_v24 = vpop.eup %6831  ;;  %v4887_v32 = vadd.f32 1.0, %v6830_v48 }
 0x745   : > { %v6834_v31 = vpop.eup %6833  ;;  %6835 = vrcp.f32 %v4889_v56  ;;  %v4890_v3 = vadd.f32 1.0, %v6832_v24 }
 0x746   : > { %6837 = vrcp.f32 %v4887_v32  ;;  %v4888_v34 = vadd.f32 1.0, %v6834_v31 }
 0x747   : > { %6839 = vrcp.f32 %v4890_v3 }
 0x748   : > { %6841 = vrcp.f32 %v4888_v34 }
 0x74f   : > { %v6836_v7 = vpop.eup %6835 }
 0x750   : > { %v6838_v19 = vpop.eup %6837  ;;  %v4953_v23 = vmul.f32 %v6836_v7, %v4761_v47 }
 0x751   : > { %v6840_v63 = vpop.eup %6839  ;;  %v4951_v10 = vmul.f32 %v6838_v19, %v4759_v29 }
 0x752   : > { %v6842_v38 = vpop.eup %6841  ;;  %v4954_v6 = vmul.f32 %v6840_v63, %v4762_v54  ;;  %v4985_v36 = vadd.f32 %v4953_v23, %v11157_v39  ;;  %v10826_v39 = vld [vmem:[%s11047_s13] ss:$0 sm:$0xff] }
 0x753   : > { %v4952_v11 = vmul.f32 %v6842_v38, %v4760_v52  ;;  %v4983_v28 = vadd.f32 %v4951_v10, %v7884_v61 }
 0x754   : > { %v4986_v2 = vadd.f32 %v4954_v6, %v11158_v43 }
 0x755   : > { %v4984_v17 = vadd.f32 %v4952_v11, %v7896_v41 }
 0x756   : > { %v5002_v14 = vpack.c.bf16 %v4986_v2, %v4985_v36 }
 0x757   : > { %v5001_v25 = vpack.c.bf16 %v4984_v17, %v4983_v28 }
 0x759   : > { %6274 = vmatprep.mubr.msk.bf16.mxu1 %vm467_vm1, %v5001_v25 }
 0x75a   : > { %6275 = vmatmul.mubr.msk.bf16.gmra.mrb[44].mxu1 %vm467_vm1, %v5002_v14 }
 0x769   : > { %v6248_v0 = vpop.f32.mrb[16].mxu1 }
 0x76a   : > { %v5502_v61 = vmul.f32 %v6248_v0, %v10821_v59  ;;  %v5366_v41 = vpop.f32.mrb[17].mxu1 }
 0x76b   : > { %v5500_v43 = vmul.f32 %v10821_v59, %v5366_v41  ;;  %v6249_v4 = vpop.f32.mrb[18].mxu1 }
 0x76c   : > { %v10831_v42 = vadd.f32 %v10826_v39, %v5502_v61  ;;  %v5503_v8 = vmul.f32 %v6249_v4, %v10821_v59  ;;  %v5369_v26 = vpop.f32.mrb[19].mxu1 }
 0x76d   : > { %v10835_v35 = vadd.f32 %v10826_v39, %v5500_v43  ;;  %v5501_v12 = vmul.f32 %v10821_v59, %v5369_v26 }
 0x76e   : > { %v5573_v20 = vsub.f32 0.0, %v10831_v42  ;;  %v10840_v27 = vadd.f32 %v10826_v39, %v5503_v8 }
 0x76f   : > { %v5571_v22 = vsub.f32 0.0, %v10835_v35  ;;  %v10844_v5 = vadd.f32 %v10826_v39, %v5501_v12 }
 0x770   : > { %v5607_v9 = vmul.f32 1.442695, %v5573_v20  ;;  %v5574_v50 = vsub.f32 0.0, %v10840_v27 }
 0x771   : > { %v5603_v44 = vmul.f32 1.442695, %v5571_v22  ;;  %v5572_v40 = vsub.f32 0.0, %v10844_v5  ;;  %v6252_v18 = vpop.f32.mrb[20].mxu1 }
 0x772   : > { %v5382_v45 = vpop.f32.mrb[21].mxu1  ;;  %v5506_v16 = vmul.f32 %v6252_v18, %v10821_v59  ;;  %v5609_v47 = vmul.f32 1.442695, %v5574_v50 }
 0x773   : > { %6843 = vpow2.f32 %v5603_v44  ;;  %v5605_v62 = vmul.f32 1.442695, %v5572_v40  ;;  %v5504_v1 = vmul.f32 %v10821_v59, %v5382_v45  ;;  %v6253_v60 = vpop.f32.mrb[22].mxu1 }
 0x774   : > { %6845 = vpow2.f32 %v5607_v9  ;;  %v5385_v37 = vpop.f32.mrb[23].mxu1  ;;  %v10855_v29 = vadd.f32 %v10826_v39, %v5506_v16  ;;  %v5507_v33 = vmul.f32 %v6253_v60, %v10821_v59 }
 0x775   : > { %6847 = vpow2.f32 %v5605_v62  ;;  %v10851_v13 = vadd.f32 %v10826_v39, %v5504_v1  ;;  %v5505_v51 = vmul.f32 %v10821_v59, %v5385_v37 }
 0x776   : > { %6849 = vpow2.f32 %v5609_v47  ;;  %v5577_v15 = vsub.f32 0.0, %v10855_v29  ;;  %v10865_v58 = vadd.f32 %v10826_v39, %v5507_v33 }
 0x777   : > { %v5575_v53 = vsub.f32 0.0, %v10851_v13  ;;  %v10859_v21 = vadd.f32 %v10826_v39, %v5505_v51 }
 0x778   : > { %v5615_v3 = vmul.f32 1.442695, %v5577_v15  ;;  %v5578_v19 = vsub.f32 0.0, %v10865_v58 }
 0x779   : > { %v5611_v54 = vmul.f32 1.442695, %v5575_v53  ;;  %v5576_v52 = vsub.f32 0.0, %v10859_v21  ;;  %v6256_v49 = vpop.f32.mrb[24].mxu1 }
 0x77a   : > { %v5398_v46 = vpop.f32.mrb[25].mxu1  ;;  %v5510_v38 = vmul.f32 %v6256_v49, %v10821_v59  ;;  %v5617_v17 = vmul.f32 1.442695, %v5578_v19 }
 0x77b   : > { %v6257_v30 = vpop.f32.mrb[26].mxu1  ;;  %6851 = vpow2.f32 %v5611_v54  ;;  %v5613_v48 = vmul.f32 1.442695, %v5576_v52  ;;  %v5508_v56 = vmul.f32 %v10821_v59, %v5398_v46 }
 0x77c   : > { %v5401_v57 = vpop.f32.mrb[27].mxu1  ;;  %v10883_v0 = vadd.f32 %v10826_v39, %v5510_v38  ;;  %v5511_v41 = vmul.f32 %v6257_v30, %v10821_v59 }
 0x77d   : > { %v6844_v55 = vpop.eup %6843  ;;  %v5509_v7 = vmul.f32 %v10821_v59, %v5401_v57  ;;  %v10871_v23 = vadd.f32 %v10826_v39, %v5508_v56 }
 0x77e   : > { %v6846_v24 = vpop.eup %6845  ;;  %v5667_v32 = vadd.f32 1.0, %v6844_v55  ;;  %v5581_v20 = vsub.f32 0.0, %v10883_v0  ;;  %v10892_v62 = vadd.f32 %v10826_v39, %v5511_v41 }
 0x77f   : > { %v6848_v31 = vpop.eup %6847  ;;  %v5669_v10 = vadd.f32 1.0, %v6846_v24  ;;  %v10879_v2 = vadd.f32 %v10826_v39, %v5509_v7  ;;  %v5579_v14 = vsub.f32 0.0, %v10871_v23 }
 0x780   : > { %6853 = vrcp.f32 %v5667_v32  ;;  %v5668_v34 = vadd.f32 1.0, %v6848_v31  ;;  %v6850_v11 = vpop.eup %6849  ;;  %v5623_v33 = vmul.f32 1.442695, %v5581_v20  ;;  %v5582_v56 = vsub.f32 0.0, %v10892_v62 }
 0x781   : > { %6855 = vpow2.f32 %v5613_v48  ;;  %v10873_v63 = vpop.f32.mrb[28].mxu1  ;;  %v5670_v25 = vadd.f32 1.0, %v6850_v11  ;;  %v5580_v43 = vsub.f32 0.0, %v10879_v2  ;;  %v5619_v4 = vmul.f32 1.442695, %v5579_v14 }
 0x782   : > { %6857 = vrcp.f32 %v5668_v34  ;;  %v5414_v6 = vpop.f32.mrb[29].mxu1  ;;  %v5514_v11 = vmul.f32 %v10873_v63, %v10821_v59 }
 0x783   : > { %6859 = vpow2.f32 %v5615_v3  ;;  %v10876_v36 = vpop.f32.mrb[30].mxu1  ;;  %v5621_v16 = vmul.f32 1.442695, %v5580_v43  ;;  %v5512_v51 = vmul.f32 %v10821_v59, %v5414_v6  ;;  %v5625_v6 = vmul.f32 1.442695, %v5582_v56 }
 0x784   : > { %v5417_v28 = vpop.f32.mrb[31].mxu1  ;;  %6861 = vrcp.f32 %v5669_v10  ;;  %v10929_v43 = vadd.f32 %v10826_v39, %v5514_v11  ;;  %v5515_v63 = vmul.f32 %v10876_v36, %v10821_v59 }
 0x785   : > { %v6852_v61 = vpop.eup %6851  ;;  %6863 = vpow2.f32 %v5617_v17  ;;  %v5513_v48 = vmul.f32 %v10821_v59, %v5417_v28  ;;  %v10915_v24 = vadd.f32 %v10826_v39, %v5512_v51 }
 0x786   : > { %6865 = vrcp.f32 %v5670_v25  ;;  %v5671_v12 = vadd.f32 1.0, %v6852_v61 }
 0x787   : > { %6867 = vpow2.f32 %v5619_v4  ;;  %v10921_v38 = vadd.f32 %v10826_v39, %v5513_v48  ;;  %v5583_v28 = vsub.f32 0.0, %v10915_v24 }
 0x788   : > { %6869 = vrcp.f32 %v5671_v12 }
 0x789   : > { %v6264_v8 = vpop.f32.mrb[32].mxu1  ;;  %6871 = vpow2.f32 %v5621_v16  ;;  %v5584_v41 = vsub.f32 0.0, %v10921_v38  ;;  %v5627_v4 = vmul.f32 1.442695, %v5583_v28 }
 0x78a   : > { %v6854_v26 = vpop.eup %6853  ;;  %v5518_v22 = vmul.f32 %v6264_v8, %v10821_v59  ;;  %v5430_v9 = vpop.f32.mrb[33].mxu1 }
 0x78b   : > { %v6856_v44 = vpop.eup %6855  ;;  %v5731_v50 = vmul.f32 %v6854_v26, %v10835_v35  ;;  %v5516_v40 = vmul.f32 %v10821_v59, %v5430_v9  ;;  %v6265_v18 = vpop.f32.mrb[34].mxu1  ;;  %v5629_v20 = vmul.f32 1.442695, %v5584_v41 }
 0x78c   : > { %v6858_v45 = vpop.eup %6857  ;;  %v10895_v1 = vadd.f32 %v10826_v39, %v5518_v22  ;;  %v5519_v60 = vmul.f32 %v6265_v18, %v10821_v59  ;;  %v5433_v37 = vpop.f32.mrb[35].mxu1  ;;  %v5672_v54 = vadd.f32 1.0, %v6856_v44  ;;  %v5585_v44 = vsub.f32 0.0, %v10929_v43 }
 0x78d   : > { %v6860_v47 = vpop.eup %6859  ;;  %v10900_v35 = vadd.f32 %v10826_v39, %v5516_v40  ;;  %v5517_v53 = vmul.f32 %v10821_v59, %v5433_v37  ;;  %5763 = vxpose.xlu0.b32.start [1/16] (narrow) %v5731_v50, 8  ;;  %v5732_v49 = vmul.f32 %v6858_v45, %v10844_v5  ;;  %v10936_v50 = vadd.f32 %v10826_v39, %v5515_v63 }
 0x78e   : > { %v5589_v52 = vsub.f32 0.0, %v10895_v1  ;;  %v10907_v15 = vadd.f32 %v10826_v39, %v5519_v60  ;;  %v6862_v57 = vpop.eup %6861  ;;  %v5673_v55 = vadd.f32 1.0, %v6860_v47  ;;  %6873 = vrcp.f32 %v5672_v54 }
 0x78f   : > { %v5587_v46 = vsub.f32 0.0, %v10900_v35  ;;  %v10910_v30 = vadd.f32 %v10826_v39, %v5517_v53  ;;  %v6864_v3 = vpop.eup %6863  ;;  %v5733_v34 = vmul.f32 %v6862_v57, %v10831_v42  ;;  %6875 = vpow2.f32 %v5623_v33 }
 0x790   : > { %v5639_v31 = vmul.f32 1.442695, %v5589_v52  ;;  %v5590_v7 = vsub.f32 0.0, %v10907_v15  ;;  %v6866_v10 = vpop.eup %6865  ;;  %6877 = vrcp.f32 %v5673_v55  ;;  %v5674_v17 = vadd.f32 1.0, %v6864_v3 }
 0x791   : > { %v5635_v32 = vmul.f32 1.442695, %v5587_v46  ;;  %v5588_v5 = vsub.f32 0.0, %v10910_v30  ;;  %5764 = vxpose.xlu0.b32.cont [2/16] (narrow) %v5732_v49, 8  ;;  %v6868_v42 = vpop.eup %6867  ;;  %v5734_v14 = vmul.f32 %v6866_v10, %v10840_v27  ;;  %v5631_v60 = vmul.f32 1.442695, %v5585_v44 }
 0x792   : > { %v5641_v25 = vmul.f32 1.442695, %v5590_v7  ;;  %v6870_v61 = vpop.eup %6869  ;;  %v5675_v26 = vadd.f32 1.0, %v6868_v42  ;;  %v5586_v37 = vsub.f32 0.0, %v10936_v50 }
 0x793   : > { %v5637_v19 = vmul.f32 1.442695, %v5588_v5  ;;  %6879 = vpow2.f32 %v5635_v32  ;;  %v6872_v8 = vpop.eup %6871  ;;  %v5735_v12 = vmul.f32 %v6870_v61, %v10851_v13 }
 0x794   : > { %6881 = vpow2.f32 %v5639_v31  ;;  %v5676_v9 = vadd.f32 1.0, %v6872_v8 }
 0x795   : > { %5765 = vxpose.xlu0.b32.cont [3/16] (narrow) %v5733_v34, 8  ;;  %6883 = vpow2.f32 %v5637_v19 }
 0x796   : > { %6885 = vpow2.f32 %v5625_v6 }
 0x797   : > { %6887 = vrcp.f32 %v5674_v17 }
 0x798   : > { %6889 = vpow2.f32 %v5641_v25  ;;  %v6874_v27 = vpop.eup %6873 }
 0x799   : > { %5766 = vxpose.xlu0.b32.cont [4/16] (narrow) %v5734_v14, 8  ;;  %v6876_v22 = vpop.eup %6875  ;;  %6891 = vpow2.f32 %v5627_v4  ;;  %v5736_v18 = vmul.f32 %v6874_v27, %v10859_v21  ;;  %v5633_v21 = vmul.f32 1.442695, %v5586_v37 }
 0x79a   : > { %v6878_v40 = vpop.eup %6877  ;;  %6893 = vrcp.f32 %v5675_v26  ;;  %v5677_v47 = vadd.f32 1.0, %v6876_v22 }
 0x79b   : > { %6895 = vpow2.f32 %v5629_v20  ;;  %v5737_v54 = vmul.f32 %v6878_v40, %v10855_v29 }
 0x79c   : > { %6897 = vrcp.f32 %v5676_v9 }
 0x79d   : > { %5767 = vxpose.xlu0.b32.cont [5/16] (narrow) %v5735_v12, 8  ;;  %v6880_v36 = vpop.eup %6879 }
 0x79e   : > { %v6882_v45 = vpop.eup %6881  ;;  %v5683_v13 = vadd.f32 1.0, %v6880_v36 }
 0x79f   : > { %v6884_v16 = vpop.eup %6883  ;;  %v5685_v52 = vadd.f32 1.0, %v6882_v45 }
 0x7a0   : > { %6899 = vrcp.f32 %v5683_v13  ;;  %v5684_v51 = vadd.f32 1.0, %v6884_v16  ;;  %v6886_v53 = vpop.eup %6885 }
 0x7a1   : > { %5768 = vxpose.xlu0.b32.cont [6/16] (narrow) %v5736_v18, 8  ;;  %v6888_v33 = vpop.eup %6887  ;;  %v5678_v46 = vadd.f32 1.0, %v6886_v53 }
 0x7a2   : > { %6901 = vrcp.f32 %v5684_v51  ;;  %v6890_v49 = vpop.eup %6889  ;;  %v5738_v55 = vmul.f32 %v6888_v33, %v10865_v58 }
 0x7a3   : > { %6903 = vpow2.f32 %v5631_v60  ;;  %v6892_v57 = vpop.eup %6891  ;;  %v5686_v56 = vadd.f32 1.0, %v6890_v49 }
 0x7a4   : > { %6905 = vrcp.f32 %v5677_v47  ;;  %v6894_v48 = vpop.eup %6893  ;;  %v5679_v29 = vadd.f32 1.0, %v6892_v57 }
 0x7a5   : > { %5769 = vxpose.xlu0.b32.cont [7/16] (narrow) %v5737_v54, 8  ;;  %6907 = vrcp.f32 %v5685_v52  ;;  %v6896_v32 = vpop.eup %6895  ;;  %v5739_v31 = vmul.f32 %v6894_v48, %v10871_v23 }
 0x7a6   : > { %6909 = vpow2.f32 %v5633_v21  ;;  %v6898_v5 = vpop.eup %6897  ;;  %v5680_v19 = vadd.f32 1.0, %v6896_v32 }
 0x7a7   : > { %6911 = vrcp.f32 %v5678_v46  ;;  %v5740_v10 = vmul.f32 %v6898_v5, %v10879_v2 }
 0x7a8   : > { %6913 = vrcp.f32 %v5686_v56 }
 0x7a9   : > { %5770 = vxpose.xlu0.b32.cont [8/16] (narrow) %v5738_v55, 8  ;;  %6915 = vrcp.f32 %v5679_v29 }
 0x7aa   : > { %v6900_v3 = vpop.eup %6899  ;;  %6917 = vrcp.f32 %v5680_v19 }
 0x7ab   : > { %v5747_v34 = vmul.f32 %v6900_v3, %v10900_v35 }
 0x7ac   : > { %v6902_v7 = vpop.eup %6901 }
 0x7ad   : > { %5771 = vxpose.xlu0.b32.cont [9/16] (narrow) %v5739_v31, 8  ;;  %v6904_v58 = vpop.eup %6903  ;;  %5795 = vxpose.xlu1.b32.start [1/16] (narrow) %v5747_v34, 8  ;;  %v5748_v11 = vmul.f32 %v6902_v7, %v10910_v30 }
 0x7ae   : > { %v6906_v6 = vpop.eup %6905  ;;  %v5681_v42 = vadd.f32 1.0, %v6904_v58 }
 0x7af   : > { %v6908_v17 = vpop.eup %6907  ;;  %v5741_v35 = vmul.f32 %v6906_v6, %v10883_v0 }
 0x7b0   : > { %v6910_v25 = vpop.eup %6909  ;;  %v5749_v12 = vmul.f32 %v6908_v17, %v10895_v1  ;;  %6919 = vrcp.f32 %v5681_v42 }
 0x7b1   : > { %5772 = vxpose.xlu0.b32.cont [10/16] (narrow) %v5740_v10, 8  ;;  %v6268_v28 = vpop.f32.mrb[36].mxu1  ;;  %5796 = vxpose.xlu1.b32.cont [2/16] (narrow) %v5748_v11, 8  ;;  %v6912_v2 = vpop.eup %6911  ;;  %v5682_v0 = vadd.f32 1.0, %v6910_v25 }
 0x7b2   : > { %v5522_v23 = vmul.f32 %v6268_v28, %v10821_v59  ;;  %v5446_v14 = vpop.f32.mrb[37].mxu1  ;;  %v6914_v27 = vpop.eup %6913  ;;  %v5742_v9 = vmul.f32 %v6912_v2, %v10892_v62 }
 0x7b3   : > { %v5520_v61 = vmul.f32 %v10821_v59, %v5446_v14  ;;  %v6269_v41 = vpop.f32.mrb[38].mxu1  ;;  %v6916_v36 = vpop.eup %6915  ;;  %v5750_v1 = vmul.f32 %v6914_v27, %v10907_v15  ;;  %6921 = vrcp.f32 %v5682_v0 }
 0x7b4   : > { %v5561_v4 = vadd.f32 %v10826_v39, %v5522_v23  ;;  %v5523_v63 = vmul.f32 %v6269_v41, %v10821_v59  ;;  %v5449_v30 = vpop.f32.mrb[39].mxu1  ;;  %v5743_v60 = vmul.f32 %v6916_v36, %v10915_v24  ;;  %v6918_v47 = vpop.eup %6917 }
 0x7b5   : > { %v5559_v8 = vadd.f32 %v10826_v39, %v5520_v61  ;;  %v5521_v26 = vmul.f32 %v10821_v59, %v5449_v30  ;;  %5773 = vxpose.xlu0.b32.cont [11/16] (narrow) %v5741_v35, 8  ;;  %5797 = vxpose.xlu1.b32.cont [3/16] (narrow) %v5749_v12, 8  ;;  %v5744_v51 = vmul.f32 %v6918_v47, %v10921_v38 }
 0x7b6   : > { %v5593_v20 = vsub.f32 0.0, %v5561_v4  ;;  %v5562_v22 = vadd.f32 %v10826_v39, %v5523_v63 }
 0x7b7   : > { %v5591_v44 = vsub.f32 0.0, %v5559_v8  ;;  %v5560_v40 = vadd.f32 %v10826_v39, %v5521_v26 }
 0x7b8   : > { %v5647_v18 = vmul.f32 1.442695, %v5593_v20  ;;  %v5594_v13 = vsub.f32 0.0, %v5562_v22 }
 0x7b9   : > { %v5643_v45 = vmul.f32 1.442695, %v5591_v44  ;;  %v5592_v16 = vsub.f32 0.0, %v5560_v40  ;;  %5774 = vxpose.xlu0.b32.cont [12/16] (narrow) %v5742_v9, 8  ;;  %5798 = vxpose.xlu1.b32.cont [4/16] (narrow) %v5750_v1, 8 }
 0x7ba   : > { %v5649_v62 = vmul.f32 1.442695, %v5594_v13  ;;  %v6920_v53 = vpop.eup %6919 }
 0x7bb   : > { %6923 = vpow2.f32 %v5643_v45  ;;  %v5645_v37 = vmul.f32 1.442695, %v5592_v16  ;;  %v5745_v54 = vmul.f32 %v6920_v53, %v10929_v43 }
 0x7bc   : > { %6925 = vpow2.f32 %v5647_v18 }
 0x7bd   : > { %6927 = vpow2.f32 %v5645_v37  ;;  %5775 = vxpose.xlu0.b32.cont [13/16] (narrow) %v5743_v60, 8  ;;  %v6922_v33 = vpop.eup %6921 }
 0x7be   : > { %6929 = vpow2.f32 %v5649_v62  ;;  %v5746_v21 = vmul.f32 %v6922_v33, %v10936_v50 }
 0x7c1   : > { %5776 = vxpose.xlu0.b32.cont [14/16] (narrow) %v5744_v51, 8 }
 0x7c5   : > { %v6924_v15 = vpop.eup %6923  ;;  %5777 = vxpose.xlu0.b32.cont [15/16] (narrow) %v5745_v54, 8 }
 0x7c6   : > { %v6926_v52 = vpop.eup %6925  ;;  %v5687_v24 = vadd.f32 1.0, %v6924_v15 }
 0x7c7   : > { %v6928_v49 = vpop.eup %6927  ;;  %v5689_v57 = vadd.f32 1.0, %v6926_v52 }
 0x7c8   : > { %6931 = vrcp.f32 %v5687_v24  ;;  %v5688_v46 = vadd.f32 1.0, %v6928_v49  ;;  %v6930_v55 = vpop.eup %6929 }
 0x7c9   : > { %5778 = vxpose.xlu0.b32.end [16/16] (narrow) %v5746_v21, 8  ;;  %v5690_v38 = vadd.f32 1.0, %v6930_v55 }
 0x7ca   : > { %6933 = vrcp.f32 %v5688_v46 }
 0x7cb   : > { %6935 = vrcp.f32 %v5689_v57 }
 0x7cc   : > { %6937 = vrcp.f32 %v5690_v38 }
 0x7d2   : > { %v6932_v48 = vpop.eup %6931 }
 0x7d3   : > { %v5751_v56 = vmul.f32 %v6932_v48, %v5559_v8 }
 0x7d4   : > { %v6934_v43 = vpop.eup %6933 }
 0x7d5   : > { %5799 = vxpose.xlu1.b32.cont [5/16] (narrow) %v5751_v56, 8  ;;  %v5752_v32 = vmul.f32 %v6934_v43, %v5560_v40  ;;  %v6936_v29 = vpop.eup %6935 }
 0x7d6   : > { %v5753_v5 = vmul.f32 %v6936_v29, %v5561_v4  ;;  %v6938_v31 = vpop.eup %6937 }
 0x7d7   : > { %v5754_v50 = vmul.f32 %v6938_v31, %v5562_v22 }
 0x7d9   : > { %5800 = vxpose.xlu1.b32.cont [6/16] (narrow) %v5752_v32, 8 }
 0x7dd   : > { %5801 = vxpose.xlu1.b32.cont [7/16] (narrow) %v5753_v5, 8 }
 0x7e1   : > { %5802 = vxpose.xlu1.b32.cont [8/16] (narrow) %v5754_v50, 8 }
 0x7f1   : > { %v6272_v3 = vpop.f32.mrb[40].mxu1 }
 0x7f2   : > { %v5526_v34 = vmul.f32 %v6272_v3, %v10821_v59  ;;  %v5462_v7 = vpop.f32.mrb[41].mxu1 }
 0x7f3   : > { %v5524_v19 = vmul.f32 %v10821_v59, %v5462_v7  ;;  %v6273_v58 = vpop.f32.mrb[42].mxu1 }
 0x7f4   : > { %v5565_v10 = vadd.f32 %v10826_v39, %v5526_v34  ;;  %v5527_v6 = vmul.f32 %v6273_v58, %v10821_v59  ;;  %v5465_v11 = vpop.f32.mrb[43].mxu1 }
 0x7f5   : > { %v5563_v28 = vadd.f32 %v10826_v39, %v5524_v19  ;;  %v5525_v17 = vmul.f32 %v10821_v59, %v5465_v11 }
 0x7f6   : > { %v5597_v42 = vsub.f32 0.0, %v5565_v10  ;;  %v5566_v23 = vadd.f32 %v10826_v39, %v5527_v6 }
 0x7f7   : > { %v5595_v14 = vsub.f32 0.0, %v5563_v28  ;;  %v5564_v25 = vadd.f32 %v10826_v39, %v5525_v17 }
 0x7f8   : > { %v5655_v35 = vmul.f32 1.442695, %v5597_v42  ;;  %v5598_v41 = vsub.f32 0.0, %v5566_v23 }
 0x7f9   : > { %v5651_v61 = vmul.f32 1.442695, %v5595_v14  ;;  %v5596_v2 = vsub.f32 0.0, %v5564_v25 }
 0x7fa   : > { %v5657_v63 = vmul.f32 1.442695, %v5598_v41 }
 0x7fb   : > { %6939 = vpow2.f32 %v5651_v61  ;;  %v5653_v4 = vmul.f32 1.442695, %v5596_v2 }
 0x7fc   : > { %6941 = vpow2.f32 %v5655_v35 }
 0x7fd   : > { %6943 = vpow2.f32 %v5653_v4 }
 0x7fe   : > { %6945 = vpow2.f32 %v5657_v63 }
 0x805   : > { %v6940_v30 = vpop.eup %6939 }
 0x806   : > { %v6942_v8 = vpop.eup %6941  ;;  %v5691_v26 = vadd.f32 1.0, %v6940_v30 }
 0x807   : > { %v6944_v12 = vpop.eup %6943  ;;  %v5693_v0 = vadd.f32 1.0, %v6942_v8 }
 0x808   : > { %6947 = vrcp.f32 %v5691_v26  ;;  %v5692_v27 = vadd.f32 1.0, %v6944_v12  ;;  %v6946_v20 = vpop.eup %6945 }
 0x809   : > { %v5694_v9 = vadd.f32 1.0, %v6946_v20 }
 0x80a   : > { %6949 = vrcp.f32 %v5692_v27 }
 0x80b   : > { %6951 = vrcp.f32 %v5693_v0 }
 0x80c   : > { %6953 = vrcp.f32 %v5694_v9 }
 0x80d   : > { %v5779_v22 = vpop.trf.xlu0 }
 0x80e   : > { %5827 = vst [vmem:[%s10973_s0] sm:$0xff] %v5779_v22 }
 0x812   : > { %v6948_v44 = vpop.eup %6947 }
 0x813   : > { %v5755_v40 = vmul.f32 %v6948_v44, %v5563_v28 }
 0x814   : > { %v6950_v36 = vpop.eup %6949 }
 0x815   : > { %5803 = vxpose.xlu1.b32.cont [9/16] (narrow) %v5755_v40, 8  ;;  %v5756_v18 = vmul.f32 %v6950_v36, %v5564_v25  ;;  %v6952_v45 = vpop.eup %6951 }
 0x816   : > { %v5757_v13 = vmul.f32 %v6952_v45, %v5565_v10  ;;  %v6954_v16 = vpop.eup %6953 }
 0x817   : > { %v5758_v1 = vmul.f32 %v6954_v16, %v5566_v23 }
 0x819   : > { %5804 = vxpose.xlu1.b32.cont [10/16] (narrow) %v5756_v18, 8 }
 0x81d   : > { %5805 = vxpose.xlu1.b32.cont [11/16] (narrow) %v5757_v13, 8 }
 0x821   : > { %5806 = vxpose.xlu1.b32.cont [12/16] (narrow) %v5758_v1, 8 }
 0x82d   : > { %v6276_v60 = vpop.f32.mrb[44].mxu1 }
 0x82e   : > { %v5530_v37 = vmul.f32 %v6276_v60, %v10821_v59  ;;  %v5478_v47 = vpop.f32.mrb[45].mxu1 }
 0x82f   : > { %v5528_v62 = vmul.f32 %v10821_v59, %v5478_v47  ;;  %v6277_v51 = vpop.f32.mrb[46].mxu1 }
 0x830   : > { %v5569_v53 = vadd.f32 %v10826_v39, %v5530_v37  ;;  %v5531_v54 = vmul.f32 %v6277_v51, %v10821_v59  ;;  %v5481_v33 = vpop.f32.mrb[47].mxu1 }
 0x831   : > { %v5567_v15 = vadd.f32 %v10826_v39, %v5528_v62  ;;  %v5529_v52 = vmul.f32 %v10821_v59, %v5481_v33 }
 0x832   : > { %v5601_v24 = vsub.f32 0.0, %v5569_v53  ;;  %v5570_v49 = vadd.f32 %v10826_v39, %v5531_v54 }
 0x833   : > { %v5599_v21 = vsub.f32 0.0, %v5567_v15  ;;  %v5568_v46 = vadd.f32 %v10826_v39, %v5529_v52 }
 0x834   : > { %v5663_v57 = vmul.f32 1.442695, %v5601_v24  ;;  %v5602_v38 = vsub.f32 0.0, %v5570_v49 }
 0x835   : > { %v5659_v55 = vmul.f32 1.442695, %v5599_v21  ;;  %v5600_v48 = vsub.f32 0.0, %v5568_v46 }
 0x836   : > { %v5665_v43 = vmul.f32 1.442695, %v5602_v38 }
 0x837   : > { %6955 = vpow2.f32 %v5659_v55  ;;  %v5661_v56 = vmul.f32 1.442695, %v5600_v48 }
 0x838   : > { %6957 = vpow2.f32 %v5663_v57 }
 0x839   : > { %6959 = vpow2.f32 %v5661_v56 }
 0x83a   : > { %6961 = vpow2.f32 %v5665_v43 }
 0x841   : > { %v6956_v32 = vpop.eup %6955 }
 0x842   : > { %v6958_v29 = vpop.eup %6957  ;;  %v5695_v5 = vadd.f32 1.0, %v6956_v32 }
 0x843   : > { %v6960_v59 = vpop.eup %6959  ;;  %v5697_v50 = vadd.f32 1.0, %v6958_v29 }
 0x844   : > { %6963 = vrcp.f32 %v5695_v5  ;;  %v5696_v31 = vadd.f32 1.0, %v6960_v59  ;;  %v6962_v3 = vpop.eup %6961 }
 0x845   : > { %v5698_v39 = vadd.f32 1.0, %v6962_v3 }
 0x846   : > { %6965 = vrcp.f32 %v5696_v31 }
 0x847   : > { %6967 = vrcp.f32 %v5697_v50 }
 0x848   : > { %6969 = vrcp.f32 %v5698_v39 }
 0x84e   : > { %v6964_v34 = vpop.eup %6963 }
 0x84f   : > { %v5759_v7 = vmul.f32 %v6964_v34, %v5567_v15 }
 0x850   : > { %v6966_v19 = vpop.eup %6965 }
 0x851   : > { %5807 = vxpose.xlu1.b32.cont [13/16] (narrow) %v5759_v7, 8  ;;  %v5760_v58 = vmul.f32 %v6966_v19, %v5568_v46  ;;  %v6968_v10 = vpop.eup %6967 }
 0x852   : > { %v5761_v6 = vmul.f32 %v6968_v10, %v5569_v53  ;;  %v6970_v11 = vpop.eup %6969 }
 0x853   : > { %v5762_v28 = vmul.f32 %v6970_v11, %v5570_v49 }
 0x855   : > { %5808 = vxpose.xlu1.b32.cont [14/16] (narrow) %v5760_v58, 8 }
 0x859   : > { %5809 = vxpose.xlu1.b32.cont [15/16] (narrow) %v5761_v6, 8 }
 0x85d   : > { %5810 = vxpose.xlu1.b32.end [16/16] (narrow) %v5762_v28, 8 }
 0x8a1   : > { %v5811_v17 = vpop.trf.xlu1 }
 0x8a2   : > { %5828 = vst [vmem:[%s10973_s0 + $0x8] sm:$0xff] %v5811_v17 }
 0x8a3   : > { %6990 = shalt.err (!%p6987_p3)
}
 0x8a4   : > { %s6991_s25 = scalar_lea.hbm %s10991_s4, 256  ;;  %s6995_s27 = scalar_lea.hbm %s11048_s14, 512 }
 0x8a5   : > { %p6992_p4 = scmp.ne.s32.totalorder %s10991_s4, %s6991_s25  ;;  %p6996_p9 = scmp.lt.u32.totalorder %s10991_s4, %s11048_s14 }
 0x8a6   : > { %p6997_p10 = scmp.lt.u32.totalorder %s6995_s27, %s6991_s25  ;;  %p6999_p12 = scmp.lt.u32.totalorder %s6991_s25, %s10991_s4 }
 0x8a7   : > { %p6993_p7 = pnand %p6992_p4, %p7165_p5 }
 0x8a8   : > { %p6998_p11 = por %p6997_p10, %p6996_p9 }
 0x8a9   : > { %p6994_p8 = pneg %p6993_p7 }
 0x8aa   : > { %p7000_p13 = por %p6999_p12, %p6998_p11 }
 0x8ac   : > { %p7001_p0 = pnand %p7000_p13, %p6994_p8 }
 0x8ae   : > { %7004 = shalt.err (!%p7001_p0)
}
 0x8af   : > { %6322 = dma.vmem_to_hbm [thread:$0]  (%p7165_p5), %s10986_s18, 256, %s10991_s4, %s5830_s20  }
 0x8b0 PF: > { %p6328_p1 = scmp.ge.s32.totalorder %s7039_s16, 2  ;;  %s5856_s2 = sand.u32 1, %s7027_s29  }
 0x8b1   : > { %s5857_s17 = scalar_lea.sflag [#allocation5], %s5856_s2 }
 0x8b2   : > { %p6325_p2 = pnand %p6328_p1, %p7169_p6 }
 0x8b4   : > { %7022 = dma.done.wait (!%p6325_p2), %s5857_s17, 256  }
 0x8b5   : > { %7024 = vsyncadd (!%p6325_p2), %s5857_s17, 4294967040  ;;  %p24_p3 = scmp.ge.s32.totalorder %s7152_s19, 4   ;;  %s11159_s29 = smov %s7031_s30 }
 0x8b6   : > { %s11160_s30 = smov %s7035_s15  ;;  %s11161_s15 = smov %s7163_s22 }
 0x8b7   : > { %s11162_s16 = smov %s7152_s19  ;;  %26 = sbr.rel (!%p24_p3) target bundleno = 9 (0x9), region = 112 }
 0x8be   :  { %5862 = vsyncpa [#allocation5], 1 }
 0x8bf   :  { %5864 = vsyncpa [#allocation5 + $0x1], 1 }

</bundles_post_ra>
